<compile_context>
chip_gen: v5e
topology: v5e:2x2
jax: 0.10.0
libtpu: 0.0.40
codegen_flags: <defaults>
</compile_context>

<pallas_src>
import jax
import jax.numpy as jnp
import numpy as np
from jax.experimental import pallas as pl
from jax.experimental.pallas import tpu as pltpu

EPS = 1e-5
LANES = 128
MXU_DTYPE = jnp.bfloat16      # MXU operand dtype (f32 accumulation);
                              # set to jnp.float32 for exact f32 semantics.


def _round_up(n, m):
    return ((n + m - 1) // m) * m


# ---------------------------------------------------------------------------
# fused Pallas kernel (whole problem VMEM-resident, no grid)
# ---------------------------------------------------------------------------
def residual_block_kernel(x_ref, w1_ref, g1_ref, b1_ref,
                          w2_ref, g2_ref, b2_ref,
                          w3_ref, g3_ref, b3_ref, o_ref):
    N, Hp, W, Cin = x_ref.shape            # x is H-halo padded: Hp = H + 2
    H = Hp - 2
    Cp = o_ref.shape[-1]                   # lane-padded channel count
    M = N * H * W
    inv_count = 1.0 / float(M)

    def bn_scale_shift(y, gamma, beta):
        # Train-mode batch statistics over all N*H*W rows, per channel.
        # Single traversal: sum + sum-of-squares, biased variance.
        s = jnp.sum(y, axis=0, keepdims=True)
        sq = jnp.sum(y * y, axis=0, keepdims=True)
        mean = s * inv_count
        var = sq * inv_count - mean * mean
        scale = jax.lax.rsqrt(var + EPS) * gamma
        shift = beta - mean * scale        # fused apply: y * scale + shift
        return scale, shift

    def conv3x3(vh, w_flat):
        # vh: (N, H+2, W, C) bf16 with zero halo rows 0 and H+1.
        # 3x3 'same' conv as ONE im2col matmul: the two W-neighbour shifts are
        # built once; the 9 taps are then aligned H-slices of the 3 variants.
        Hv, C = vh.shape[1], vh.shape[-1]
        zcol = jnp.zeros((N, Hv, 1, C), vh.dtype)
        var_w = (jnp.concatenate([zcol, vh[:, :, :W - 1, :]], axis=2),  # kx=0
                 vh,                                                    # kx=1
                 jnp.concatenate([vh[:, :, 1:, :], zcol], axis=2))      # kx=2
        taps = [var_w[kx][:, ky:ky + H, :, :]
                for ky in range(3) for kx in range(3)]
        slab = jnp.concatenate(taps, axis=-1).reshape(M, 9 * C)
        return jnp.dot(slab, w_flat, preferred_element_type=jnp.float32)

    x = x_ref[...]                                          # (N, H+2, W, Cin)

    # ---- cv1 stage 1: a = relu(BN1(conv3x3(x))) ----------------------------
    y1 = conv3x3(x, w1_ref[...])                            # (M, Cp) f32
    sc1, sh1 = bn_scale_shift(y1, g1_ref[...], b1_ref[...])
    a = jnp.maximum(y1 * sc1 + sh1, 0.0).astype(MXU_DTYPE).reshape(N, H, W, Cp)
    zrow = jnp.zeros((N, 1, W, Cp), MXU_DTYPE)
    ah = jnp.concatenate([zrow, a, zrow], axis=1)           # (N, H+2, W, Cp)

    # ---- cv1 stage 2: BN2(conv3x3(a)); `a` never leaves VMEM ---------------
    y2 = conv3x3(ah, w2_ref[...])
    sc2, sh2 = bn_scale_shift(y2, g2_ref[...], b2_ref[...])

    # ---- cv2: BN3(conv1x1(x)) — computed just before the residual add so it
    # does not pin an extra (M, Cp) live range across both 3x3 stages. --------
    y3 = jnp.dot(x[:, 1:H + 1, :, :].reshape(M, Cin), w3_ref[...],
                 preferred_element_type=jnp.float32)
    sc3, sh3 = bn_scale_shift(y3, g3_ref[...], b3_ref[...])

    # ---- residual add + ReLU: lane-dense (M, Cp) store ----------------------
    o_ref[...] = jnp.maximum((y2 * sc2 + sh2) + (y3 * sc3 + sh3), 0.0)


# ---------------------------------------------------------------------------
# wrapper (layout glue: NCHW <-> NHWC, im2col weight reshape, channel unpad)
# ---------------------------------------------------------------------------
def residual_block_forward(x_nchw, params):
    N, Cin, H, W = x_nchw.shape
    Ch = params["w1"].shape[-1]
    # 128 fills the v5e MXU exactly; for Ch > 128 pad to 256 so a v6e/v7x
    # 256-wide MXU tile is fully used.
    Cp = _round_up(Ch, 256 if Ch > LANES else LANES)
    M = N * H * W
    # TODO(synk): general W needs relayout-tolerant reshapes; the im2col
    #             reshape is only guaranteed copy-free for W % 8 == 0.
    assert W % 8 == 0, "W must be a multiple of 8"

    # NCHW -> NHWC, bf16, H-halo rows only (W shifts are built in-kernel).
    x = jnp.transpose(x_nchw, (0, 2, 3, 1)).astype(MXU_DTYPE)
    x = jnp.pad(x, ((0, 0), (1, 1), (0, 0), (0, 0)))

    co = Cp - Ch
    # weights -> im2col layout (tap-major rows), zero-padded out-channels.
    w1 = jnp.pad(params["w1"].reshape(9 * Cin, Ch),
                 ((0, 0), (0, co))).astype(MXU_DTYPE)
    w2 = jnp.pad(params["w2"], ((0, 0), (0, 0), (0, co), (0, co))
                 ).reshape(9 * Cp, Cp).astype(MXU_DTYPE)
    w3 = jnp.pad(params["w3"].reshape(Cin, Ch),
                 ((0, 0), (0, co))).astype(MXU_DTYPE)
    # BN affine params zero-padded (padded channels stay identically 0).
    pad_c = lambda a: jnp.pad(a.reshape(1, Ch),
                              ((0, 0), (0, co))).astype(jnp.float32)
    g1, b1 = pad_c(params["g1"]), pad_c(params["b1"])
    g2, b2 = pad_c(params["g2"]), pad_c(params["b2"])
    g3, b3 = pad_c(params["g3"]), pad_c(params["b3"])

    # VMEM working-set estimate -> vmem limit (32..100 MiB; see v7x TODO).
    est = int(x.size * 2 + (w1.size + w2.size + w3.size) * 2 + 6 * Cp * 4
              + M * (9 * Cin + 9 * Cp) * 2      # im2col slabs (bf16)
              + 3 * M * Cp * 2                  # bf16 intermediates
              + 4 * M * Cp * 4)                 # f32 conv outputs + result
    vmem_limit = int(min(100 * 2 ** 20, max(32 * 2 ** 20, 2 * est)))

    flops = 2 * M * Cp * (9 * Cin + 9 * Cp + Cin) + 16 * M * Cp
    bytes_accessed = int(x.size * 2 + (w1.size + w2.size + w3.size) * 2
                         + 6 * Cp * 4 + M * Cp * 4)

    vmem = lambda: pl.BlockSpec(memory_space=pltpu.MemorySpace.VMEM)
    out = pl.pallas_call(
        residual_block_kernel,
        out_shape=jax.ShapeDtypeStruct((M, Cp), jnp.float32),
        in_specs=[vmem() for _ in range(10)],
        out_specs=vmem(),
        compiler_params=pltpu.CompilerParams(vmem_limit_bytes=vmem_limit),
        cost_estimate=pl.CostEstimate(flops=flops, transcendentals=3 * Cp,
                                      bytes_accessed=bytes_accessed),
    )(x, w1, g1, b1, w2, g2, b2, w3, g3, b3)

    out = out.reshape(N, H, W, Cp)[:, :, :, :Ch]              # drop lane pad
    return jnp.transpose(out, (0, 3, 1, 2))                   # NHWC -> NCHW


# ---------------------------------------------------------------------------
# deterministic parameter init (synthetic; shapes from the module __init__)
# ---------------------------------------------------------------------------
def init_params(key, d, h):
    ks = jax.random.split(key, 9)
    p = {}
    p["w1"] = 0.1 * jax.random.normal(ks[0], (3, 3, d, h), jnp.float32)   # Conv(d,h,3)
    p["g1"] = 1.0 + 0.1 * jax.random.normal(ks[1], (1, 1, 1, h), jnp.float32)
    p["b1"] = 0.1 * jax.random.normal(ks[2], (1, 1, 1, h), jnp.float32)
    p["w2"] = 0.1 * jax.random.normal(ks[3], (3, 3, h, h), jnp.float32)   # Conv(h,h,3)
    p["g2"] = 1.0 + 0.1 * jax.random.normal(ks[4], (1, 1, 1, h), jnp.float32)
    p["b2"] = 0.1 * jax.random.normal(ks[5], (1, 1, 1, h), jnp.float32)
    p["w3"] = 0.1 * jax.random.normal(ks[6], (1, 1, d, h), jnp.float32)   # Conv(d,h,1)
    p["g3"] = 1.0 + 0.1 * jax.random.normal(ks[7], (1, 1, 1, h), jnp.float32)
    p["b3"] = 0.1 * jax.random.normal(ks[8], (1, 1, 1, h), jnp.float32)
    return p


# ---------------------------------------------------------------------------
# pure-JAX reference (same math incl. bf16 conv operands; correctness check)
# ---------------------------------------------------------------------------
def ref_forward(x_nchw, p):
    x = jnp.transpose(x_nchw, (0, 2, 3, 1)).astype(jnp.float32)

    def conv(v, w, pad):
        return jax.lax.conv_general_dilated(
            v.astype(MXU_DTYPE), w.astype(MXU_DTYPE), (1, 1),
            [(pad, pad), (pad, pad)],
            dimension_numbers=("NHWC", "HWIO", "NHWC"),
            preferred_element_type=jnp.float32)

    def bn(y, g, b):
        mean = jnp.mean(y, axis=(0, 1, 2), keepdims=True)
        var = jnp.mean(y * y, axis=(0, 1, 2), keepdims=True) - mean * mean
        return (y - mean) * jax.lax.rsqrt(var + EPS) * g + b

    a = jax.nn.relu(bn(conv(x, p["w1"], 1), p["g1"], p["b1"]))
    branch_a = bn(conv(a, p["w2"], 1), p["g2"], p["b2"])
    branch_b = bn(conv(x, p["w3"], 0), p["g3"], p["b3"])
    return jnp.transpose(jax.nn.relu(branch_a + branch_b), (0, 3, 1, 2))


if __name__ == "__main__":
    d, h = 4, 8                       # d != h -> cv2 is ConvBn(d, h, 1)
    key = jax.random.PRNGKey(0)
    kx, kp = jax.random.split(key)
    x = jax.random.normal(kx, (2, d, 16, 16), jnp.float32)   # NCHW, like PyTorch
    params = init_params(kp, d, h)

    out = jax.jit(residual_block_forward)(x, params)
    out = jax.block_until_ready(out)

    assert out.shape == (2, h, 16, 16), out.shape
    ref = ref_forward(x, params)
    # Tolerance sized for bf16 MXU operands (kernel and reference use the same
    # bf16-rounded inputs, so observed deltas are ~1e-5..1e-4).
    np.testing.assert_allclose(np.asarray(out), np.asarray(ref),
                               atol=1e-2, rtol=1e-2)
    print("KERNEL_OK")
</pallas_src>

<mosaic_0001>
module attributes {stable_mosaic.version = 11 : i64} {
  func.func @residual_block_kernel(%arg0: memref<2x18x16x4xbf16, #tpu.memory_space<vmem>>, %arg1: memref<36x128xbf16, #tpu.memory_space<vmem>>, %arg2: memref<1x128xf32, #tpu.memory_space<vmem>>, %arg3: memref<1x128xf32, #tpu.memory_space<vmem>>, %arg4: memref<1152x128xbf16, #tpu.memory_space<vmem>>, %arg5: memref<1x128xf32, #tpu.memory_space<vmem>>, %arg6: memref<1x128xf32, #tpu.memory_space<vmem>>, %arg7: memref<4x128xbf16, #tpu.memory_space<vmem>>, %arg8: memref<1x128xf32, #tpu.memory_space<vmem>>, %arg9: memref<1x128xf32, #tpu.memory_space<vmem>>, %arg10: memref<512x128xf32, #tpu.memory_space<vmem>>) attributes {dimension_semantics = [], scalar_prefetch = 0 : i64, scratch_operands = 0 : i64, tpu.core_type = #tpu.core_type<tc>} {
    %c0 = arith.constant 0 : index
    %c0_0 = arith.constant 0 : index
    %c0_1 = arith.constant 0 : index
    %c0_2 = arith.constant 0 : index
    %0 = vector.load %arg0[%c0, %c0_0, %c0_1, %c0_2] : memref<2x18x16x4xbf16, #tpu.memory_space<vmem>>, vector<2x18x16x4xbf16>
    %c0_3 = arith.constant 0 : index
    %c0_4 = arith.constant 0 : index
    %1 = vector.load %arg1[%c0_3, %c0_4] : memref<36x128xbf16, #tpu.memory_space<vmem>>, vector<36x128xbf16>
    %cst = arith.constant 0.000000e+00 : bf16
    %2 = vector.broadcast %cst : bf16 to vector<2x18x1x4xbf16>
    %3 = vector.extract_strided_slice %0 {offsets = [0, 0, 0, 0], sizes = [2, 18, 15, 4], strides = [1, 1, 1, 1]} : vector<2x18x16x4xbf16> to vector<2x18x15x4xbf16>
    %4 = tpu.concatenate %2, %3 in 2 : vector<2x18x1x4xbf16>, vector<2x18x15x4xbf16> -> vector<2x18x16x4xbf16>
    %5 = vector.extract_strided_slice %0 {offsets = [0, 0, 1, 0], sizes = [2, 18, 15, 4], strides = [1, 1, 1, 1]} : vector<2x18x16x4xbf16> to vector<2x18x15x4xbf16>
    %6 = tpu.concatenate %5, %2 in 2 : vector<2x18x15x4xbf16>, vector<2x18x1x4xbf16> -> vector<2x18x16x4xbf16>
    %7 = vector.extract_strided_slice %4 {offsets = [0, 0, 0, 0], sizes = [2, 16, 16, 4], strides = [1, 1, 1, 1]} : vector<2x18x16x4xbf16> to vector<2x16x16x4xbf16>
    %8 = vector.extract_strided_slice %0 {offsets = [0, 0, 0, 0], sizes = [2, 16, 16, 4], strides = [1, 1, 1, 1]} : vector<2x18x16x4xbf16> to vector<2x16x16x4xbf16>
    %9 = vector.extract_strided_slice %6 {offsets = [0, 0, 0, 0], sizes = [2, 16, 16, 4], strides = [1, 1, 1, 1]} : vector<2x18x16x4xbf16> to vector<2x16x16x4xbf16>
    %10 = vector.extract_strided_slice %4 {offsets = [0, 1, 0, 0], sizes = [2, 16, 16, 4], strides = [1, 1, 1, 1]} : vector<2x18x16x4xbf16> to vector<2x16x16x4xbf16>
    %11 = vector.extract_strided_slice %0 {offsets = [0, 1, 0, 0], sizes = [2, 16, 16, 4], strides = [1, 1, 1, 1]} : vector<2x18x16x4xbf16> to vector<2x16x16x4xbf16>
    %12 = vector.extract_strided_slice %6 {offsets = [0, 1, 0, 0], sizes = [2, 16, 16, 4], strides = [1, 1, 1, 1]} : vector<2x18x16x4xbf16> to vector<2x16x16x4xbf16>
    %13 = vector.extract_strided_slice %4 {offsets = [0, 2, 0, 0], sizes = [2, 16, 16, 4], strides = [1, 1, 1, 1]} : vector<2x18x16x4xbf16> to vector<2x16x16x4xbf16>
    %14 = vector.extract_strided_slice %0 {offsets = [0, 2, 0, 0], sizes = [2, 16, 16, 4], strides = [1, 1, 1, 1]} : vector<2x18x16x4xbf16> to vector<2x16x16x4xbf16>
    %15 = vector.extract_strided_slice %6 {offsets = [0, 2, 0, 0], sizes = [2, 16, 16, 4], strides = [1, 1, 1, 1]} : vector<2x18x16x4xbf16> to vector<2x16x16x4xbf16>
    %16 = tpu.concatenate %7, %8, %9, %10, %11, %12, %13, %14, %15 in 3 : vector<2x16x16x4xbf16>, vector<2x16x16x4xbf16>, vector<2x16x16x4xbf16>, vector<2x16x16x4xbf16>, vector<2x16x16x4xbf16>, vector<2x16x16x4xbf16>, vector<2x16x16x4xbf16>, vector<2x16x16x4xbf16>, vector<2x16x16x4xbf16> -> vector<2x16x16x36xbf16>
    %17 = vector.shape_cast %16 : vector<2x16x16x36xbf16> to vector<512x36xbf16>
    %cst_5 = arith.constant dense<0.000000e+00> : vector<512x128xf32>
    %18 = tpu.matmul %17, %1, %cst_5 {dimension_numbers = #tpu.dot_dimension_numbers<[1], [0], [0], [1], [0, 0, 1, 1], [], []>} : vector<512x36xbf16>, vector<36x128xbf16>, vector<512x128xf32> -> vector<512x128xf32>
    %c0_6 = arith.constant 0 : index
    %c0_7 = arith.constant 0 : index
    %19 = vector.load %arg2[%c0_6, %c0_7] : memref<1x128xf32, #tpu.memory_space<vmem>>, vector<1x128xf32>
    %c0_8 = arith.constant 0 : index
    %c0_9 = arith.constant 0 : index
    %20 = vector.load %arg3[%c0_8, %c0_9] : memref<1x128xf32, #tpu.memory_space<vmem>>, vector<1x128xf32>
    %cst_10 = arith.constant dense<0.000000e+00> : vector<128xf32>
    %21 = vector.multi_reduction <add>, %18, %cst_10 [0] : vector<512x128xf32> to vector<128xf32>
    %22 = vector.shape_cast %21 : vector<128xf32> to vector<1x128xf32>
    %23 = arith.mulf %18, %18 : vector<512x128xf32>
    %cst_11 = arith.constant dense<0.000000e+00> : vector<128xf32>
    %24 = vector.multi_reduction <add>, %23, %cst_11 [0] : vector<512x128xf32> to vector<128xf32>
    %25 = vector.shape_cast %24 : vector<128xf32> to vector<1x128xf32>
    %cst_12 = arith.constant 0.001953125 : f32
    %26 = vector.broadcast %cst_12 : f32 to vector<1x128xf32>
    %27 = arith.mulf %22, %26 : vector<1x128xf32>
    %cst_13 = arith.constant 0.001953125 : f32
    %28 = vector.broadcast %cst_13 : f32 to vector<1x128xf32>
    %29 = arith.mulf %25, %28 : vector<1x128xf32>
    %30 = arith.mulf %27, %27 : vector<1x128xf32>
    %31 = arith.subf %29, %30 : vector<1x128xf32>
    %cst_14 = arith.constant 9.99999974E-6 : f32
    %32 = vector.broadcast %cst_14 : f32 to vector<1x128xf32>
    %33 = arith.addf %31, %32 : vector<1x128xf32>
    %34 = math.rsqrt %33 : vector<1x128xf32>
    %35 = arith.mulf %34, %19 : vector<1x128xf32>
    %36 = arith.mulf %27, %35 : vector<1x128xf32>
    %37 = arith.subf %20, %36 : vector<1x128xf32>
    %38 = vector.broadcast %35 : vector<1x128xf32> to vector<512x128xf32>
    %39 = arith.mulf %18, %38 : vector<512x128xf32>
    %40 = vector.broadcast %37 : vector<1x128xf32> to vector<512x128xf32>
    %41 = arith.addf %39, %40 : vector<512x128xf32>
    %cst_15 = arith.constant 0.000000e+00 : f32
    %42 = vector.broadcast %cst_15 : f32 to vector<512x128xf32>
    %43 = arith.maximumf %41, %42 : vector<512x128xf32>
    %44 = arith.truncf %43 : vector<512x128xf32> to vector<512x128xbf16>
    %45 = vector.shape_cast %44 : vector<512x128xbf16> to vector<2x16x16x128xbf16>
    %cst_16 = arith.constant 0.000000e+00 : bf16
    %46 = vector.broadcast %cst_16 : bf16 to vector<2x1x16x128xbf16>
    %47 = tpu.concatenate %46, %45, %46 in 1 : vector<2x1x16x128xbf16>, vector<2x16x16x128xbf16>, vector<2x1x16x128xbf16> -> vector<2x18x16x128xbf16>
    %c0_17 = arith.constant 0 : index
    %c0_18 = arith.constant 0 : index
    %48 = vector.load %arg4[%c0_17, %c0_18] : memref<1152x128xbf16, #tpu.memory_space<vmem>>, vector<1152x128xbf16>
    %cst_19 = arith.constant 0.000000e+00 : bf16
    %49 = vector.broadcast %cst_19 : bf16 to vector<2x18x1x128xbf16>
    %50 = vector.extract_strided_slice %47 {offsets = [0, 0, 0, 0], sizes = [2, 18, 15, 128], strides = [1, 1, 1, 1]} : vector<2x18x16x128xbf16> to vector<2x18x15x128xbf16>
    %51 = tpu.concatenate %49, %50 in 2 : vector<2x18x1x128xbf16>, vector<2x18x15x128xbf16> -> vector<2x18x16x128xbf16>
    %52 = vector.extract_strided_slice %47 {offsets = [0, 0, 1, 0], sizes = [2, 18, 15, 128], strides = [1, 1, 1, 1]} : vector<2x18x16x128xbf16> to vector<2x18x15x128xbf16>
    %53 = tpu.concatenate %52, %49 in 2 : vector<2x18x15x128xbf16>, vector<2x18x1x128xbf16> -> vector<2x18x16x128xbf16>
    %54 = vector.extract_strided_slice %51 {offsets = [0, 0, 0, 0], sizes = [2, 16, 16, 128], strides = [1, 1, 1, 1]} : vector<2x18x16x128xbf16> to vector<2x16x16x128xbf16>
    %55 = vector.extract_strided_slice %47 {offsets = [0, 0, 0, 0], sizes = [2, 16, 16, 128], strides = [1, 1, 1, 1]} : vector<2x18x16x128xbf16> to vector<2x16x16x128xbf16>
    %56 = vector.extract_strided_slice %53 {offsets = [0, 0, 0, 0], sizes = [2, 16, 16, 128], strides = [1, 1, 1, 1]} : vector<2x18x16x128xbf16> to vector<2x16x16x128xbf16>
    %57 = vector.extract_strided_slice %51 {offsets = [0, 1, 0, 0], sizes = [2, 16, 16, 128], strides = [1, 1, 1, 1]} : vector<2x18x16x128xbf16> to vector<2x16x16x128xbf16>
    %58 = vector.extract_strided_slice %47 {offsets = [0, 1, 0, 0], sizes = [2, 16, 16, 128], strides = [1, 1, 1, 1]} : vector<2x18x16x128xbf16> to vector<2x16x16x128xbf16>
    %59 = vector.extract_strided_slice %53 {offsets = [0, 1, 0, 0], sizes = [2, 16, 16, 128], strides = [1, 1, 1, 1]} : vector<2x18x16x128xbf16> to vector<2x16x16x128xbf16>
    %60 = vector.extract_strided_slice %51 {offsets = [0, 2, 0, 0], sizes = [2, 16, 16, 128], strides = [1, 1, 1, 1]} : vector<2x18x16x128xbf16> to vector<2x16x16x128xbf16>
    %61 = vector.extract_strided_slice %47 {offsets = [0, 2, 0, 0], sizes = [2, 16, 16, 128], strides = [1, 1, 1, 1]} : vector<2x18x16x128xbf16> to vector<2x16x16x128xbf16>
    %62 = vector.extract_strided_slice %53 {offsets = [0, 2, 0, 0], sizes = [2, 16, 16, 128], strides = [1, 1, 1, 1]} : vector<2x18x16x128xbf16> to vector<2x16x16x128xbf16>
    %63 = tpu.concatenate %54, %55, %56, %57, %58, %59, %60, %61, %62 in 3 : vector<2x16x16x128xbf16>, vector<2x16x16x128xbf16>, vector<2x16x16x128xbf16>, vector<2x16x16x128xbf16>, vector<2x16x16x128xbf16>, vector<2x16x16x128xbf16>, vector<2x16x16x128xbf16>, vector<2x16x16x128xbf16>, vector<2x16x16x128xbf16> -> vector<2x16x16x1152xbf16>
    %64 = vector.shape_cast %63 : vector<2x16x16x1152xbf16> to vector<512x1152xbf16>
    %cst_20 = arith.constant dense<0.000000e+00> : vector<512x128xf32>
    %65 = tpu.matmul %64, %48, %cst_20 {dimension_numbers = #tpu.dot_dimension_numbers<[1], [0], [0], [1], [0, 0, 1, 1], [], []>} : vector<512x1152xbf16>, vector<1152x128xbf16>, vector<512x128xf32> -> vector<512x128xf32>
    %c0_21 = arith.constant 0 : index
    %c0_22 = arith.constant 0 : index
    %66 = vector.load %arg5[%c0_21, %c0_22] : memref<1x128xf32, #tpu.memory_space<vmem>>, vector<1x128xf32>
    %c0_23 = arith.constant 0 : index
    %c0_24 = arith.constant 0 : index
    %67 = vector.load %arg6[%c0_23, %c0_24] : memref<1x128xf32, #tpu.memory_space<vmem>>, vector<1x128xf32>
    %cst_25 = arith.constant dense<0.000000e+00> : vector<128xf32>
    %68 = vector.multi_reduction <add>, %65, %cst_25 [0] : vector<512x128xf32> to vector<128xf32>
    %69 = vector.shape_cast %68 : vector<128xf32> to vector<1x128xf32>
    %70 = arith.mulf %65, %65 : vector<512x128xf32>
    %cst_26 = arith.constant dense<0.000000e+00> : vector<128xf32>
    %71 = vector.multi_reduction <add>, %70, %cst_26 [0] : vector<512x128xf32> to vector<128xf32>
    %72 = vector.shape_cast %71 : vector<128xf32> to vector<1x128xf32>
    %cst_27 = arith.constant 0.001953125 : f32
    %73 = vector.broadcast %cst_27 : f32 to vector<1x128xf32>
    %74 = arith.mulf %69, %73 : vector<1x128xf32>
    %cst_28 = arith.constant 0.001953125 : f32
    %75 = vector.broadcast %cst_28 : f32 to vector<1x128xf32>
    %76 = arith.mulf %72, %75 : vector<1x128xf32>
    %77 = arith.mulf %74, %74 : vector<1x128xf32>
    %78 = arith.subf %76, %77 : vector<1x128xf32>
    %cst_29 = arith.constant 9.99999974E-6 : f32
    %79 = vector.broadcast %cst_29 : f32 to vector<1x128xf32>
    %80 = arith.addf %78, %79 : vector<1x128xf32>
    %81 = math.rsqrt %80 : vector<1x128xf32>
    %82 = arith.mulf %81, %66 : vector<1x128xf32>
    %83 = arith.mulf %74, %82 : vector<1x128xf32>
    %84 = arith.subf %67, %83 : vector<1x128xf32>
    %85 = vector.extract_strided_slice %0 {offsets = [0, 1, 0, 0], sizes = [2, 16, 16, 4], strides = [1, 1, 1, 1]} : vector<2x18x16x4xbf16> to vector<2x16x16x4xbf16>
    %86 = vector.shape_cast %85 : vector<2x16x16x4xbf16> to vector<512x4xbf16>
    %c0_30 = arith.constant 0 : index
    %c0_31 = arith.constant 0 : index
    %87 = vector.load %arg7[%c0_30, %c0_31] : memref<4x128xbf16, #tpu.memory_space<vmem>>, vector<4x128xbf16>
    %cst_32 = arith.constant dense<0.000000e+00> : vector<512x128xf32>
    %88 = tpu.matmul %86, %87, %cst_32 {dimension_numbers = #tpu.dot_dimension_numbers<[1], [0], [0], [1], [0, 0, 1, 1], [], []>} : vector<512x4xbf16>, vector<4x128xbf16>, vector<512x128xf32> -> vector<512x128xf32>
    %c0_33 = arith.constant 0 : index
    %c0_34 = arith.constant 0 : index
    %89 = vector.load %arg8[%c0_33, %c0_34] : memref<1x128xf32, #tpu.memory_space<vmem>>, vector<1x128xf32>
    %c0_35 = arith.constant 0 : index
    %c0_36 = arith.constant 0 : index
    %90 = vector.load %arg9[%c0_35, %c0_36] : memref<1x128xf32, #tpu.memory_space<vmem>>, vector<1x128xf32>
    %cst_37 = arith.constant dense<0.000000e+00> : vector<128xf32>
    %91 = vector.multi_reduction <add>, %88, %cst_37 [0] : vector<512x128xf32> to vector<128xf32>
    %92 = vector.shape_cast %91 : vector<128xf32> to vector<1x128xf32>
    %93 = arith.mulf %88, %88 : vector<512x128xf32>
    %cst_38 = arith.constant dense<0.000000e+00> : vector<128xf32>
    %94 = vector.multi_reduction <add>, %93, %cst_38 [0] : vector<512x128xf32> to vector<128xf32>
    %95 = vector.shape_cast %94 : vector<128xf32> to vector<1x128xf32>
    %cst_39 = arith.constant 0.001953125 : f32
    %96 = vector.broadcast %cst_39 : f32 to vector<1x128xf32>
    %97 = arith.mulf %92, %96 : vector<1x128xf32>
    %cst_40 = arith.constant 0.001953125 : f32
    %98 = vector.broadcast %cst_40 : f32 to vector<1x128xf32>
    %99 = arith.mulf %95, %98 : vector<1x128xf32>
    %100 = arith.mulf %97, %97 : vector<1x128xf32>
    %101 = arith.subf %99, %100 : vector<1x128xf32>
    %cst_41 = arith.constant 9.99999974E-6 : f32
    %102 = vector.broadcast %cst_41 : f32 to vector<1x128xf32>
    %103 = arith.addf %101, %102 : vector<1x128xf32>
    %104 = math.rsqrt %103 : vector<1x128xf32>
    %105 = arith.mulf %104, %89 : vector<1x128xf32>
    %106 = arith.mulf %97, %105 : vector<1x128xf32>
    %107 = arith.subf %90, %106 : vector<1x128xf32>
    %108 = vector.broadcast %82 : vector<1x128xf32> to vector<512x128xf32>
    %109 = arith.mulf %65, %108 : vector<512x128xf32>
    %110 = vector.broadcast %84 : vector<1x128xf32> to vector<512x128xf32>
    %111 = arith.addf %109, %110 : vector<512x128xf32>
    %112 = vector.broadcast %105 : vector<1x128xf32> to vector<512x128xf32>
    %113 = arith.mulf %88, %112 : vector<512x128xf32>
    %114 = vector.broadcast %107 : vector<1x128xf32> to vector<512x128xf32>
    %115 = arith.addf %113, %114 : vector<512x128xf32>
    %116 = arith.addf %111, %115 : vector<512x128xf32>
    %cst_42 = arith.constant 0.000000e+00 : f32
    %117 = vector.broadcast %cst_42 : f32 to vector<512x128xf32>
    %118 = arith.maximumf %116, %117 : vector<512x128xf32>
    %c0_43 = arith.constant 0 : index
    %c0_44 = arith.constant 0 : index
    %119 = vector.load %arg10[%c0_43, %c0_44] : memref<512x128xf32, #tpu.memory_space<vmem>>, vector<512x128xf32>
    tpu.vector_store %arg10[%c0_43, %c0_44], %118 {strides = array<i32>} : memref<512x128xf32, #tpu.memory_space<vmem>>, vector<512x128xf32>,
    return
  }
}

</mosaic_0001>

<bundles_post_ra>
// kernel: residual_block_forward.1
= control target key start
LH: loop header
LB: loop body
LE: loop exit
PB: predicated region body
PF: predicated region fallthrough
CT: control target
= control target key end

     0   :  { %vm581_vm0 = vcmask 1040384   ;;  %vm582_vm1 = vsmask.f32 256  ;;  %vm728_vm2 = vcmask 1047552   ;;  %vm729_vm3 = vsmask.f32 7424  ;;  %s13525_s0 = inlined_call_operand.vmem [shape: bf16[2,18,16,4], index: 0, kind: input, shape index: {}]   ;;  %s13526_s1 = inlined_call_operand.vmem [shape: bf16[36,128], index: 1, kind: input, shape index: {}]   ;;  %s13527_s4 = inlined_call_operand.vmem [shape: bf16[1152,128], index: 4, kind: input, shape index: {}]   ;;  %s13528_s2 = inlined_call_operand.vmem [shape: f32[1,128], index: 2, kind: input, shape index: {}]   ;;  %s13529_s3 = inlined_call_operand.vmem [shape: f32[1,128], index: 3, kind: input, shape index: {}]   ;;  %s13530_s7 = inlined_call_operand.vmem [shape: bf16[4,128], index: 7, kind: input, shape index: {}]   ;;  %s13531_s8 = inlined_call_operand.vmem [shape: f32[1,128], index: 8, kind: input, shape index: {}]   ;;  %s13532_s9 = inlined_call_operand.vmem [shape: f32[1,128], index: 9, kind: input, shape index: {}]   ;;  %s13533_s5 = inlined_call_operand.vmem [shape: f32[1,128], index: 5, kind: input, shape index: {}]   ;;  %s13534_s6 = inlined_call_operand.vmem [shape: f32[1,128], index: 6, kind: input, shape index: {}]   ;;  %s13535_s10 = inlined_call_operand.vmem [shape: f32[512,128], index: 10, kind: output, shape index: {}]  }
   0x1   :  { %v7000_v0 = vld [vmem:[%s13525_s0 + $0x8] sm:$0xff]  ;;  %v7245_v1 = vld [vmem:[%s13525_s0] sm:$0xff]  ;;  %v7001_v2 = vld [vmem:[%s13525_s0 + $0x10] sm:$0xff]  ;;  %s7175_s19 = smov 16   ;;  %s7176_s20 = smov 4   ;;  %v13886_v9 = vmov 0 }
   0x2   :  { %1023 = vrot.lane.b32.xlu1 %v7000_v0, %s7175_s19  ;;  %767 = vrot.lane.b32.xlu0 %v7245_v1, %s7176_s20  ;;  %v301_v3 = vshrl.u32 %v7000_v0, 16  ;;  %v304_v4 = vshll.u32 %v7000_v0, 16  ;;  %v294_v5 = vshrl.u32 %v7245_v1, 16  ;;  %v297_v6 = vshll.u32 %v7245_v1, 16  ;;  %vm7256_vm4 = vmand %vm581_vm0, %vm582_vm1  ;;  %s7177_s21 = smov 20   ;;  %s7178_s22 = smov 12  }
   0x3   :  { %v311_v7 = vshll.u32 %v7001_v2, 16  ;;  %v13887_v9 = vsel %vm7256_vm4, 4294967295, %v13886_v9  ;;  %vm7264_vm5 = vmand %vm728_vm2, %vm729_vm3  ;;  %v13889_v12 = vmov 0  ;;  %v308_v15 = vshrl.u32 %v7001_v2, 16  ;;  %s7179_s23 = smov 8   ;;  %v7002_v25 = vld [vmem:[%s13525_s0 + $0x18] sm:$0xff] }
   0x4   :  { %v303_v8 = vrot.slane %v301_v3, 7  ;;  %13888 = vst [vmem:[#allocation2_spill] sm:$0xff] %v13887_v9  ;;  %v620_v10 = vrot.slane %v297_v6, 1  ;;  %v622_v11 = vrot.slane %v304_v4, 1  ;;  %v13890_v12 = vsel %vm7264_vm5, 4294967295, %v13889_v12  ;;  %s7180_s26 = smov 24  }
   0x5   :  { %13891 = vst [vmem:[#allocation3_spill] sm:$0xff] %v13890_v12  ;;  %v624_v17 = vrot.slane %v311_v7, 1  ;;  %v310_v20 = vrot.slane %v308_v15, 7  ;;  %s7181_s27 = smov 32   ;;  %s7182_s28 = smov 28   ;;  %v315_v27 = vshrl.u32 %v7002_v25, 16 }
   0x6   :  { %v306_v13 = vor.u32 %v304_v4, %v303_v8  ;;  %v621_v14 = vor.u32 %v620_v10, %v294_v5  ;;  %v623_v16 = vor.u32 %v622_v11, %v301_v3  ;;  %v318_v29 = vshll.u32 %v7002_v25, 16  ;;  %v7003_v35 = vld [vmem:[%s13525_s0 + $0x20] sm:$0xff]  ;;  %v7004_v43 = vld [vmem:[%s13525_s0 + $0x28] sm:$0xff]  ;;  %v7344_v52 = vld [vmem:[%s13525_s0 + $0x30] sm:$0xff] }
   0x7   :  { %v625_v22 = vor.u32 %v624_v17, %v308_v15  ;;  %v313_v23 = vor.u32 %v311_v7, %v310_v20  ;;  %v317_v28 = vrot.slane %v315_v27, 7  ;;  %v322_v36 = vshrl.u32 %v7003_v35, 16  ;;  %v112_v55 = vld [vmem:[%s13526_s1 + $0x10] sm:$0x3]  ;;  %v7036_v62 = vld [vmem:[%s13526_s1 + $0x8] sm:$0xff]  ;;  %v7383_v8 = vld [vmem:[%s13525_s0 + $0x38] sm:$0xff] }
   0x8   :  { %v7272_v18 = vsel %vm7256_vm4, 0, %v306_v13  ;;  %v731_v19 = vsel %vm7264_vm5, %v621_v14, 0  ;;  %v732_v21 = vsel %vm7264_vm5, %v623_v16, 0  ;;  %v626_v32 = vrot.slane %v318_v29, 1 }
   0x9   :  { %1089 = vrot.lane.b32.xlu2 %v732_v21, %s7177_s21  ;;  %v733_v24 = vsel %vm7264_vm5, %v625_v22, 0  ;;  %v7289_v26 = vsel %vm7256_vm4, 0, %v313_v23  ;;  %v320_v30 = vor.u32 %v318_v29, %v317_v28  ;;  %v324_v37 = vrot.slane %v322_v36, 7 }
   0xa   :  { %959 = vrot.lane.b32.xlu1 %v7272_v18, %s7178_s22  ;;  %863 = vrot.lane.b32.xlu0 %v731_v19, %s7179_s23  ;;  %v627_v33 = vor.u32 %v626_v32, %v315_v27  ;;  %v325_v38 = vshll.u32 %v7003_v35, 16  ;;  %v332_v45 = vshll.u32 %v7004_v43, 16  ;;  %v329_v46 = vshrl.u32 %v7004_v43, 16  ;;  %v7418_v32 = vld [vmem:[%s13525_s0 + $0x40] sm:$0xff] }
   0xb   :  { %v7301_v31 = vsel %vm7256_vm4, 0, %v320_v30  ;;  %v336_v54 = vshrl.u32 %v7344_v52, 16  ;;  %v339_v57 = vshll.u32 %v7344_v52, 16  ;;  %v1910_v58 = vunpack.c.l.b16 %v112_v55  ;;  %v7446_v55 = vld [vmem:[%s13525_s0 + $0x48] sm:$0xff] }
   0xc   :  { %v734_v34 = vsel %vm7264_vm5, %v627_v33, 0  ;;  %v327_v39 = vor.u32 %v325_v38, %v324_v37  ;;  %v628_v41 = vrot.slane %v325_v38, 1  ;;  %v630_v47 = vrot.slane %v332_v45, 1 }
   0xd   :  { %v331_v48 = vrot.slane %v329_v46, 7  ;;  %v338_v56 = vrot.slane %v336_v54, 7  ;;  %v1913_v59 = vpack.c.b16 %v1910_v58, %v1910_v58  ;;  %vm1981_vm6 = vcmask 1041408  }
   0xe   :  { %v7321_v40 = vsel %vm7256_vm4, 0, %v327_v39  ;;  %v629_v42 = vor.u32 %v628_v41, %v322_v36  ;;  %v631_v49 = vor.u32 %v630_v47, %v329_v46  ;;  %v343_v10 = vshrl.u32 %v7383_v8, 16 }
   0xf   :  { %v334_v50 = vor.u32 %v332_v45, %v331_v48  ;;  %v341_v60 = vor.u32 %v339_v57, %v338_v56  ;;  %v1983_v61 = vsel %vm1981_vm6, %v1913_v59, 0  ;;  %v346_v14 = vshll.u32 %v7383_v8, 16 }
  0x10   :  { %v735_v44 = vsel %vm7264_vm5, %v629_v42, 0  ;;  %v736_v51 = vsel %vm7264_vm5, %v631_v49, 0  ;;  %1990 = vmatpush.bf16.msra.mxu0 %v1983_v61  ;;  %7109 = vmatpush.bf16.msra.mxu3 %v1983_v61  ;;  %v345_v13 = vrot.slane %v343_v10, 7  ;;  %v296_v15 = vrot.slane %v294_v5, 7 }
  0x11   :  { %1155 = vrot.lane.b32.xlu2 %v7289_v26, %s7180_s26  ;;  %v7348_v53 = vsel %vm7256_vm4, 0, %v334_v50  ;;  %v7369_v63 = vsel %vm7256_vm4, 0, %v341_v60  ;;  %v634_v5 = vrot.slane %v346_v14, 1  ;;  %vm1349_vm7 = vcmask 31744  }
  0x12   :  { %1285 = vrot.lane.b32.xlu1 %v733_v24, %s7181_s27  ;;  %1219 = vrot.lane.b32.xlu0 %v7001_v2, %s7182_s28  ;;  %v348_v16 = vor.u32 %v346_v14, %v345_v13  ;;  %vm1446_vm8 = vcmask 64512   ;;  %vm1511_vm9 = vcmask 97280   ;;  %vm1576_vm10 = vcmask 130048  }
  0x13   :  { %v635_v27 = vor.u32 %v634_v5, %v343_v10  ;;  %vm1641_vm11 = vcmask 162816   ;;  %vm1706_vm12 = vcmask 195584   ;;  %vm1771_vm13 = vcmask 228352  }
  0x14   :  { %1991 = vmatpush.bf16.msra.mxu0 %v7036_v62  ;;  %7110 = vmatpush.bf16.msra.mxu3 %v7036_v62  ;;  %v7402_v22 = vsel %vm7256_vm4, 0, %v348_v16  ;;  %vm1836_vm14 = vcmask 261120   ;;  %vm1916_vm15 = vcmask 293888  }
  0x15   :  { %v738_v33 = vsel %vm7264_vm5, %v635_v27, 0 }
  0x19   :  { %769 = vrot.lane.b32.xlu2 %v7000_v0, %s7176_s20  ;;  %v632_v0 = vrot.slane %v339_v57, 1  ;;  %v357_v57 = vshrl.u32 %v7446_v55, 16 }
  0x1a   :  { %961 = vrot.lane.b32.xlu1 %v7289_v26, %s7178_s22  ;;  %865 = vrot.lane.b32.xlu0 %v732_v21, %s7179_s23  ;;  %v299_v21 = vor.u32 %v297_v6, %v296_v15 }
  0x1b   :  { %v633_v3 = vor.u32 %v632_v0, %v336_v54  ;;  %v359_v0 = vrot.slane %v357_v57, 7 }
  0x1c   :  { %v584_v23 = vsel %vm7256_vm4, 0, %v299_v21 }
  0x1d   :  { %v737_v7 = vsel %vm7264_vm5, %v633_v3, 0 }
  0x21   :  { %1025 = vrot.lane.b32.xlu2 %v7001_v2, %s7175_s19 }
  0x22   :  { %1157 = vrot.lane.b32.xlu1 %v7301_v31, %s7180_s26  ;;  %1091 = vrot.lane.b32.xlu0 %v733_v24, %s7177_s21 }
  0x29   :  { %1221 = vrot.lane.b32.xlu2 %v7002_v25, %s7182_s28 }
  0x2a   :  { %771 = vrot.lane.b32.xlu1 %v7001_v2, %s7176_s20  ;;  %1287 = vrot.lane.b32.xlu0 %v734_v34, %s7181_s27  ;;  %v7035_v2 = vld [vmem:[%s13526_s1] sm:$0xff] }
  0x2b   :  { %1992 = vmatpush.bf16.msra.mxu0 %v7035_v2  ;;  %7111 = vmatpush.bf16.msra.mxu3 %v7035_v2  ;;  %v360_v2 = vshll.u32 %v7446_v55, 16 }
  0x31   :  { %867 = vrot.lane.b32.xlu2 %v733_v24, %s7179_s23 }
  0x32   :  { %1027 = vrot.lane.b32.xlu1 %v7002_v25, %s7175_s19  ;;  %963 = vrot.lane.b32.xlu0 %v7301_v31, %s7178_s22 }
  0x39   :  { %1093 = vrot.lane.b32.xlu2 %v734_v34, %s7177_s21 }
  0x3a   :  { %1223 = vrot.lane.b32.xlu1 %v7003_v35, %s7182_s28  ;;  %1159 = vrot.lane.b32.xlu0 %v7321_v40, %s7180_s26 }
  0x41   :  { %1289 = vrot.lane.b32.xlu2 %v735_v44, %s7181_s27 }
  0x42   :  { %869 = vrot.lane.b32.xlu1 %v734_v34, %s7179_s23  ;;  %773 = vrot.lane.b32.xlu0 %v7002_v25, %s7176_s20 }
  0x49   :  { %965 = vrot.lane.b32.xlu2 %v7321_v40, %s7178_s22 }
  0x4a   :  { %1095 = vrot.lane.b32.xlu1 %v735_v44, %s7177_s21  ;;  %1029 = vrot.lane.b32.xlu0 %v7003_v35, %s7175_s19 }
  0x51   :  { %1161 = vrot.lane.b32.xlu2 %v7348_v53, %s7180_s26 }
  0x52   :  { %1291 = vrot.lane.b32.xlu1 %v736_v51, %s7181_s27  ;;  %1225 = vrot.lane.b32.xlu0 %v7004_v43, %s7182_s28 }
  0x59   :  { %775 = vrot.lane.b32.xlu2 %v7003_v35, %s7176_s20  ;;  %v353_v35 = vshll.u32 %v7418_v32, 16 }
  0x5a   :  { %967 = vrot.lane.b32.xlu1 %v7348_v53, %s7178_s22  ;;  %871 = vrot.lane.b32.xlu0 %v735_v44, %s7179_s23 }
  0x5b   :  { %v636_v44 = vrot.slane %v353_v35, 1 }
  0x61   :  { %1031 = vrot.lane.b32.xlu2 %v7004_v43, %s7175_s19 }
  0x62   :  { %1163 = vrot.lane.b32.xlu1 %v7369_v63, %s7180_s26  ;;  %1097 = vrot.lane.b32.xlu0 %v736_v51, %s7177_s21 }
  0x63   :  { %v1090_v4 = vpop.permute.xlu2 %1089 }
  0x69   :  { %1227 = vrot.lane.b32.xlu2 %v7344_v52, %s7182_s28 }
  0x6a   :  { %777 = vrot.lane.b32.xlu1 %v7004_v43, %s7176_s20  ;;  %1293 = vrot.lane.b32.xlu0 %v737_v7, %s7181_s27  ;;  %v350_v43 = vshrl.u32 %v7418_v32, 16 }
  0x6b   :  { %v1156_v11 = vpop.permute.xlu2 %1155 }
  0x6c   :  { %v352_v45 = vrot.slane %v350_v43, 7  ;;  %v637_v46 = vor.u32 %v636_v44, %v350_v43 }
  0x6e   :  { %v739_v54 = vsel %vm7264_vm5, %v637_v46, 0 }
  0x71   :  { %873 = vrot.lane.b32.xlu2 %v736_v51, %s7179_s23  ;;  %v355_v51 = vor.u32 %v353_v35, %v352_v45 }
  0x72   :  { %1033 = vrot.lane.b32.xlu1 %v7344_v52, %s7175_s19  ;;  %969 = vrot.lane.b32.xlu0 %v7369_v63, %s7178_s22 }
  0x73   :  { %v770_v17 = vpop.permute.xlu2 %769  ;;  %v7450_v56 = vsel %vm7256_vm4, 0, %v355_v51 }
  0x74   :  { %v1024_v19 = vpop.permute.xlu1 %1023  ;;  %v768_v20 = vpop.permute.xlu0 %767  ;;  %v1355_v48 = vsel %vm1349_vm7, %v7272_v18, %v770_v17 }
  0x75   :  { %v1352_v6 = vsel %vm1349_vm7, %v584_v23, %v768_v20 }
  0x79   :  { %1099 = vrot.lane.b32.xlu2 %v737_v7, %s7177_s21 }
  0x7a   :  { %1229 = vrot.lane.b32.xlu1 %v7383_v8, %s7182_s28  ;;  %1165 = vrot.lane.b32.xlu0 %v7402_v22, %s7180_s26 }
  0x7b   :  { %v1026_v1 = vpop.permute.xlu2 %1025 }
  0x7c   :  { %v960_v24 = vpop.permute.xlu1 %959  ;;  %v864_v25 = vpop.permute.xlu0 %863 }
  0x7d   :  { %v1448_v28 = vsel %vm1446_vm8, %v1352_v6, %v864_v25 }
  0x7e   :  { %v1513_v29 = vsel %vm1511_vm9, %v1448_v28, %v960_v24 }
  0x7f   :  { %v1578_v30 = vsel %vm1576_vm10, %v1513_v29, %v1024_v19 }
  0x80   :  { %v1643_v34 = vsel %vm1641_vm11, %v1578_v30, %v1090_v4  ;;  %v362_v4 = vor.u32 %v360_v2, %v359_v0 }
  0x81   :  { %1295 = vrot.lane.b32.xlu2 %v738_v33, %s7181_s27  ;;  %v1708_v37 = vsel %vm1706_vm12, %v1643_v34, %v1156_v11 }
  0x82   :  { %875 = vrot.lane.b32.xlu1 %v737_v7, %s7179_s23  ;;  %779 = vrot.lane.b32.xlu0 %v7344_v52, %s7176_s20  ;;  %v7473_v15 = vsel %vm7256_vm4, 0, %v362_v4 }
  0x83   :  { %v1222_v36 = vpop.permute.xlu2 %1221 }
  0x84   :  { %v1286_v38 = vpop.permute.xlu1 %1285  ;;  %v1220_v39 = vpop.permute.xlu0 %1219 }
  0x85   :  { %v1773_v41 = vsel %vm1771_vm13, %v1708_v37, %v1220_v39 }
  0x86   :  { %v1838_v42 = vsel %vm1836_vm14, %v1773_v41, %v1286_v38 }
  0x87   :  { %6647 = vmatmul.msk.bf16.vlgmr.msra.gmra.mxu0 %vm1916_vm15, %v1838_v42 }
  0x89   :  { %971 = vrot.lane.b32.xlu2 %v7402_v22, %s7178_s22 }
  0x8a   :  { %1101 = vrot.lane.b32.xlu1 %v738_v33, %s7177_s21  ;;  %1035 = vrot.lane.b32.xlu0 %v7383_v8, %s7175_s19 }
  0x8b   :  { %v868_v47 = vpop.permute.xlu2 %867 }
  0x8c   :  { %v962_v49 = vpop.permute.xlu1 %961  ;;  %v866_v50 = vpop.permute.xlu0 %865 }
  0x8d   :  { %v1450_v52 = vsel %vm1446_vm8, %v1355_v48, %v866_v50  ;;  %v7526_v50 = vld [vmem:[%s13525_s0 + $0x58] sm:$0xff] }
  0x8e   :  { %v1515_v18 = vsel %vm1511_vm9, %v1450_v52, %v962_v49 }
  0x8f   :  { %v1580_v61 = vsel %vm1576_vm10, %v1515_v18, %v1026_v1 }
  0x91   :  { %1167 = vrot.lane.b32.xlu2 %v7450_v56, %s7180_s26 }
  0x92   :  { %1297 = vrot.lane.b32.xlu1 %v739_v54, %s7181_s27  ;;  %1231 = vrot.lane.b32.xlu0 %v7418_v32, %s7182_s28 }
  0x93   :  { %v1094_v58 = vpop.permute.xlu2 %1093 }
  0x94   :  { %v1158_v59 = vpop.permute.xlu1 %1157  ;;  %v1092_v60 = vpop.permute.xlu0 %1091 }
  0x95   :  { %v1645_v62 = vsel %vm1641_vm11, %v1580_v61, %v1092_v60 }
  0x96   :  { %v1710_v3 = vsel %vm1706_vm12, %v1645_v62, %v1158_v59  ;;  %v371_v62 = vshrl.u32 %v7526_v50, 16 }
  0x97   :  { %v1775_v10 = vsel %vm1771_vm13, %v1710_v3, %v1222_v36 }
  0x99   :  { %781 = vrot.lane.b32.xlu2 %v7383_v8, %s7176_s20  ;;  %v638_v8 = vrot.slane %v360_v2, 1  ;;  %v373_v2 = vrot.slane %v371_v62, 7 }
  0x9a   :  { %973 = vrot.lane.b32.xlu1 %v7450_v56, %s7178_s22  ;;  %877 = vrot.lane.b32.xlu0 %v738_v33, %s7179_s23 }
  0x9b   :  { %v1290_v7 = vpop.permute.xlu2 %1289  ;;  %v639_v19 = vor.u32 %v638_v8, %v357_v57  ;;  %v7554_v8 = vld [vmem:[%s13525_s0 + $0x60] sm:$0xff] }
  0x9c   :  { %v772_v11 = vpop.permute.xlu1 %771  ;;  %v1288_v13 = vpop.permute.xlu0 %1287 }
  0x9d   :  { %v1840_v14 = vsel %vm1836_vm14, %v1775_v10, %v1288_v13  ;;  %v1358_v16 = vsel %vm1349_vm7, %v7289_v26, %v772_v11  ;;  %v740_v1 = vsel %vm7264_vm5, %v639_v19, 0  ;;  %v7489_v26 = vld [vmem:[%s13525_s0 + $0x50] sm:$0xff] }
  0x9e   :  { %6648 = vmatmul.msk.bf16.gmra.mxu0 %vm1916_vm15, %v1840_v14  ;;  %v1452_v17 = vsel %vm1446_vm8, %v1358_v16, %v868_v47  ;;  %v364_v24 = vshrl.u32 %v7489_v26, 16  ;;  %v367_v36 = vshll.u32 %v7489_v26, 16 }
  0xa0   :  { %v366_v35 = vrot.slane %v364_v24, 7  ;;  %v640_v43 = vrot.slane %v367_v36, 1 }
  0xa1   :  { %1037 = vrot.lane.b32.xlu2 %v7418_v32, %s7175_s19 }
  0xa2   :  { %1169 = vrot.lane.b32.xlu1 %v7473_v15, %s7180_s26  ;;  %1103 = vrot.lane.b32.xlu0 %v739_v54, %s7177_s21  ;;  %v641_v48 = vor.u32 %v640_v43, %v364_v24 }
  0xa3   :  { %v966_v20 = vpop.permute.xlu2 %965 }
  0xa4   :  { %v1028_v21 = vpop.permute.xlu1 %1027  ;;  %v964_v5 = vpop.permute.xlu0 %963  ;;  %v741_v51 = vsel %vm7264_vm5, %v641_v48, 0 }
  0xa5   :  { %v1517_v23 = vsel %vm1511_vm9, %v1452_v17, %v964_v5  ;;  %v378_v17 = vshrl.u32 %v7554_v8, 16 }
  0xa6   :  { %v1582_v6 = vsel %vm1576_vm10, %v1517_v23, %v1028_v21 }
  0xa7   :  { %v1647_v27 = vsel %vm1641_vm11, %v1582_v6, %v1094_v58  ;;  %v381_v6 = vshll.u32 %v7554_v8, 16 }
  0xa9   :  { %1233 = vrot.lane.b32.xlu2 %v7446_v55, %s7182_s28 }
  0xaa   :  { %783 = vrot.lane.b32.xlu1 %v7418_v32, %s7176_s20  ;;  %1299 = vrot.lane.b32.xlu0 %v740_v1, %s7181_s27  ;;  %v369_v32 = vor.u32 %v367_v36, %v366_v35 }
  0xab   :  { %v1162_v25 = vpop.permute.xlu2 %1161 }
  0xac   :  { %v1224_v28 = vpop.permute.xlu1 %1223  ;;  %v1160_v29 = vpop.permute.xlu0 %1159  ;;  %v7513_v42 = vsel %vm7256_vm4, 0, %v369_v32 }
  0xad   :  { %v1712_v30 = vsel %vm1706_vm12, %v1647_v27, %v1160_v29 }
  0xae   :  { %v1777_v33 = vsel %vm1771_vm13, %v1712_v30, %v1224_v28 }
  0xaf   :  { %v1842_v34 = vsel %vm1836_vm14, %v1777_v33, %v1290_v7 }
  0xb0   :  { %6649 = vmatmul.msk.bf16.gmra.mxu0 %vm1916_vm15, %v1842_v34 }
  0xb1   :  { %879 = vrot.lane.b32.xlu2 %v739_v54, %s7179_s23  ;;  %v374_v54 = vshll.u32 %v7526_v50, 16 }
  0xb2   :  { %1039 = vrot.lane.b32.xlu1 %v7446_v55, %s7175_s19  ;;  %975 = vrot.lane.b32.xlu0 %v7473_v15, %s7178_s22 }
  0xb3   :  { %v776_v37 = vpop.permute.xlu2 %775  ;;  %v642_v0 = vrot.slane %v374_v54, 1  ;;  %v376_v11 = vor.u32 %v374_v54, %v373_v2 }
  0xb4   :  { %v870_v38 = vpop.permute.xlu1 %869  ;;  %v774_v39 = vpop.permute.xlu0 %773  ;;  %v1364_v4 = vsel %vm1349_vm7, %v7321_v40, %v776_v37 }
  0xb5   :  { %v1361_v41 = vsel %vm1349_vm7, %v7301_v31, %v774_v39  ;;  %v7558_v16 = vsel %vm7256_vm4, 0, %v376_v11 }
  0xb6   :  { %v1454_v44 = vsel %vm1446_vm8, %v1361_v41, %v870_v38 }
  0xb7   :  { %v1519_v31 = vsel %vm1511_vm9, %v1454_v44, %v966_v20 }
  0xb9   :  { %1105 = vrot.lane.b32.xlu2 %v740_v1, %s7177_s21 }
  0xba   :  { %1235 = vrot.lane.b32.xlu1 %v7489_v26, %s7182_s28  ;;  %1171 = vrot.lane.b32.xlu0 %v7513_v42, %s7180_s26 }
  0xbb   :  { %v1032_v45 = vpop.permute.xlu2 %1031 }
  0xbc   :  { %v1096_v46 = vpop.permute.xlu1 %1095  ;;  %v1030_v47 = vpop.permute.xlu0 %1029 }
  0xbd   :  { %v1584_v49 = vsel %vm1576_vm10, %v1519_v31, %v1030_v47 }
  0xbe   :  { %v1649_v52 = vsel %vm1641_vm11, %v1584_v49, %v1096_v46 }
  0xbf   :  { %v1714_v57 = vsel %vm1706_vm12, %v1649_v52, %v1162_v25 }
  0xc1   :  { %1301 = vrot.lane.b32.xlu2 %v741_v51, %s7181_s27 }
  0xc2   :  { %881 = vrot.lane.b32.xlu1 %v740_v1, %s7179_s23  ;;  %785 = vrot.lane.b32.xlu0 %v7446_v55, %s7176_s20  ;;  %v643_v55 = vor.u32 %v642_v0, %v371_v62  ;;  %v380_v1 = vrot.slane %v378_v17, 7 }
  0xc3   :  { %v1228_v18 = vpop.permute.xlu2 %1227 }
  0xc4   :  { %v1292_v58 = vpop.permute.xlu1 %1291  ;;  %v1226_v59 = vpop.permute.xlu0 %1225  ;;  %v742_v14 = vsel %vm7264_vm5, %v643_v55, 0  ;;  %v383_v25 = vor.u32 %v381_v6, %v380_v1 }
  0xc5   :  { %v1779_v60 = vsel %vm1771_vm13, %v1714_v57, %v1226_v59 }
  0xc6   :  { %v1844_v61 = vsel %vm1836_vm14, %v1779_v60, %v1292_v58  ;;  %v7581_v34 = vsel %vm7256_vm4, 0, %v383_v25 }
  0xc7   :  { %6650 = vmatmul.msk.bf16.gmra.mxu0 %vm1916_vm15, %v1844_v61 }
  0xc9   :  { %977 = vrot.lane.b32.xlu2 %v7513_v42, %s7178_s22 }
  0xca   :  { %1107 = vrot.lane.b32.xlu1 %v741_v51, %s7177_s21  ;;  %1041 = vrot.lane.b32.xlu0 %v7489_v26, %s7175_s19 }
  0xcb   :  { %v874_v3 = vpop.permute.xlu2 %873 }
  0xcc   :  { %v968_v7 = vpop.permute.xlu1 %967  ;;  %v872_v10 = vpop.permute.xlu0 %871 }
  0xcd   :  { %v1456_v13 = vsel %vm1446_vm8, %v1364_v4, %v872_v10  ;;  %v7634_v10 = vld [vmem:[%s13525_s0 + $0x70] sm:$0xff] }
  0xce   :  { %v1521_v40 = vsel %vm1511_vm9, %v1456_v13, %v968_v7 }
  0xcf   :  { %v1586_v5 = vsel %vm1576_vm10, %v1521_v40, %v1032_v45 }
  0xd1   :  { %1173 = vrot.lane.b32.xlu2 %v7558_v16, %s7180_s26 }
  0xd2   :  { %1303 = vrot.lane.b32.xlu1 %v742_v14, %s7181_s27  ;;  %1237 = vrot.lane.b32.xlu0 %v7526_v50, %s7182_s28 }
  0xd3   :  { %v1100_v19 = vpop.permute.xlu2 %1099 }
  0xd4   :  { %v1164_v20 = vpop.permute.xlu1 %1163  ;;  %v1098_v21 = vpop.permute.xlu0 %1097 }
  0xd5   :  { %v1651_v23 = vsel %vm1641_vm11, %v1586_v5, %v1098_v21 }
  0xd6   :  { %v1716_v24 = vsel %vm1706_vm12, %v1651_v23, %v1164_v20  ;;  %v392_v23 = vshrl.u32 %v7634_v10, 16 }
  0xd7   :  { %v1781_v28 = vsel %vm1771_vm13, %v1716_v24, %v1228_v18 }
  0xd9   :  { %787 = vrot.lane.b32.xlu2 %v7489_v26, %s7176_s20  ;;  %v644_v26 = vrot.slane %v381_v6, 1  ;;  %v394_v6 = vrot.slane %v392_v23, 7 }
  0xda   :  { %979 = vrot.lane.b32.xlu1 %v7558_v16, %s7178_s22  ;;  %883 = vrot.lane.b32.xlu0 %v741_v51, %s7179_s23 }
  0xdb   :  { %v1296_v27 = vpop.permute.xlu2 %1295  ;;  %v645_v32 = vor.u32 %v644_v26, %v378_v17  ;;  %v7662_v26 = vld [vmem:[%s13525_s0 + $0x78] sm:$0xff] }
  0xdc   :  { %v778_v29 = vpop.permute.xlu1 %777  ;;  %v1294_v30 = vpop.permute.xlu0 %1293 }
  0xdd   :  { %v1846_v33 = vsel %vm1836_vm14, %v1781_v28, %v1294_v30  ;;  %v1367_v35 = vsel %vm1349_vm7, %v7348_v53, %v778_v29  ;;  %v743_v43 = vsel %vm7264_vm5, %v645_v32, 0  ;;  %v7597_v53 = vld [vmem:[%s13525_s0 + $0x68] sm:$0xff] }
  0xde   :  { %6651 = vmatmul.msk.bf16.gmra.mxu0 %vm1916_vm15, %v1846_v33  ;;  %v1458_v36 = vsel %vm1446_vm8, %v1367_v35, %v874_v3  ;;  %v385_v45 = vshrl.u32 %v7597_v53, 16  ;;  %v388_v18 = vshll.u32 %v7597_v53, 16 }
  0xe0   :  { %v387_v54 = vrot.slane %v385_v45, 7  ;;  %v646_v62 = vrot.slane %v388_v18, 1 }
  0xe1   :  { %1043 = vrot.lane.b32.xlu2 %v7526_v50, %s7175_s19 }
  0xe2   :  { %1175 = vrot.lane.b32.xlu1 %v7581_v34, %s7180_s26  ;;  %1109 = vrot.lane.b32.xlu0 %v742_v14, %s7177_s21  ;;  %v647_v4 = vor.u32 %v646_v62, %v385_v45 }
  0xe3   :  { %v972_v37 = vpop.permute.xlu2 %971 }
  0xe4   :  { %v1034_v38 = vpop.permute.xlu1 %1033  ;;  %v970_v39 = vpop.permute.xlu0 %969  ;;  %v744_v11 = vsel %vm7264_vm5, %v647_v4, 0 }
  0xe5   :  { %v1523_v41 = vsel %vm1511_vm9, %v1458_v36, %v970_v39  ;;  %v399_v36 = vshrl.u32 %v7662_v26, 16 }
  0xe6   :  { %v1588_v44 = vsel %vm1576_vm10, %v1523_v41, %v1034_v38 }
  0xe7   :  { %v1653_v47 = vsel %vm1641_vm11, %v1588_v44, %v1100_v19  ;;  %v402_v44 = vshll.u32 %v7662_v26, 16 }
  0xe9   :  { %1239 = vrot.lane.b32.xlu2 %v7554_v8, %s7182_s28 }
  0xea   :  { %789 = vrot.lane.b32.xlu1 %v7526_v50, %s7176_s20  ;;  %1305 = vrot.lane.b32.xlu0 %v743_v43, %s7181_s27  ;;  %v390_v50 = vor.u32 %v388_v18, %v387_v54 }
  0xeb   :  { %v1168_v46 = vpop.permute.xlu2 %1167 }
  0xec   :  { %v1230_v48 = vpop.permute.xlu1 %1229  ;;  %v1166_v31 = vpop.permute.xlu0 %1165  ;;  %v7621_v61 = vsel %vm7256_vm4, 0, %v390_v50 }
  0xed   :  { %v1718_v49 = vsel %vm1706_vm12, %v1653_v47, %v1166_v31 }
  0xee   :  { %v1783_v51 = vsel %vm1771_vm13, %v1718_v49, %v1230_v48 }
  0xef   :  { %v1848_v52 = vsel %vm1836_vm14, %v1783_v51, %v1296_v27 }
  0xf0   :  { %6652 = vmatmul.msk.bf16.gmra.mxu0 %vm1916_vm15, %v1848_v52 }
  0xf1   :  { %885 = vrot.lane.b32.xlu2 %v742_v14, %s7179_s23  ;;  %v395_v14 = vshll.u32 %v7634_v10, 16 }
  0xf2   :  { %1045 = vrot.lane.b32.xlu1 %v7554_v8, %s7175_s19  ;;  %981 = vrot.lane.b32.xlu0 %v7581_v34, %s7178_s22 }
  0xf3   :  { %v782_v57 = vpop.permute.xlu2 %781  ;;  %v648_v1 = vrot.slane %v395_v14, 1  ;;  %v397_v29 = vor.u32 %v395_v14, %v394_v6 }
  0xf4   :  { %v876_v58 = vpop.permute.xlu1 %875  ;;  %v780_v59 = vpop.permute.xlu0 %779  ;;  %v1373_v25 = vsel %vm1349_vm7, %v7402_v22, %v782_v57 }
  0xf5   :  { %v1370_v60 = vsel %vm1349_vm7, %v7369_v63, %v780_v59  ;;  %v7666_v35 = vsel %vm7256_vm4, 0, %v397_v29 }
  0xf6   :  { %v1460_v0 = vsel %vm1446_vm8, %v1370_v60, %v876_v58 }
  0xf7   :  { %v1525_v63 = vsel %vm1511_vm9, %v1460_v0, %v972_v37 }
  0xf9   :  { %1111 = vrot.lane.b32.xlu2 %v743_v43, %s7177_s21 }
  0xfa   :  { %1241 = vrot.lane.b32.xlu1 %v7597_v53, %s7182_s28  ;;  %1177 = vrot.lane.b32.xlu0 %v7621_v61, %s7180_s26 }
  0xfb   :  { %v1038_v2 = vpop.permute.xlu2 %1037 }
  0xfc   :  { %v1102_v55 = vpop.permute.xlu1 %1101  ;;  %v1036_v3 = vpop.permute.xlu0 %1035 }
  0xfd   :  { %v1590_v7 = vsel %vm1576_vm10, %v1525_v63, %v1036_v3 }
  0xfe   :  { %v1655_v13 = vsel %vm1641_vm11, %v1590_v7, %v1102_v55 }
  0xff   :  { %v1720_v17 = vsel %vm1706_vm12, %v1655_v13, %v1168_v46 }
 0x101   :  { %1307 = vrot.lane.b32.xlu2 %v744_v11, %s7181_s27 }
 0x102   :  { %887 = vrot.lane.b32.xlu1 %v743_v43, %s7179_s23  ;;  %791 = vrot.lane.b32.xlu0 %v7554_v8, %s7176_s20  ;;  %v649_v8 = vor.u32 %v648_v1, %v392_v23  ;;  %v401_v43 = vrot.slane %v399_v36, 7 }
 0x103   :  { %v1234_v40 = vpop.permute.xlu2 %1233 }
 0x104   :  { %v1298_v19 = vpop.permute.xlu1 %1297  ;;  %v1232_v20 = vpop.permute.xlu0 %1231  ;;  %v745_v33 = vsel %vm7264_vm5, %v649_v8, 0  ;;  %v404_v46 = vor.u32 %v402_v44, %v401_v43  ;;  %v7747_v43 = vld [vmem:[%s13525_s0 + $0x98] sm:$0xff] }
 0x105   :  { %v1785_v21 = vsel %vm1771_vm13, %v1720_v17, %v1232_v20 }
 0x106   :  { %v1850_v5 = vsel %vm1836_vm14, %v1785_v21, %v1298_v19  ;;  %v7689_v52 = vsel %vm7256_vm4, 0, %v404_v46  ;;  %v427_v46 = vshrl.u32 %v7747_v43, 16 }
 0x107   :  { %6653 = vmatmul.msk.bf16.gmra.mxu0 %vm1916_vm15, %v1850_v5 }
 0x109   :  { %983 = vrot.lane.b32.xlu2 %v7621_v61, %s7178_s22 }
 0x10a   :  { %1113 = vrot.lane.b32.xlu1 %v744_v11, %s7177_s21  ;;  %1047 = vrot.lane.b32.xlu0 %v7597_v53, %s7175_s19 }
 0x10b   :  { %v880_v24 = vpop.permute.xlu2 %879 }
 0x10c   :  { %v974_v27 = vpop.permute.xlu1 %973  ;;  %v878_v28 = vpop.permute.xlu0 %877 }
 0x10d   :  { %v1462_v30 = vsel %vm1446_vm8, %v1373_v25, %v878_v28  ;;  %v7016_v28 = vld [vmem:[%s13525_s0 + $0x88] sm:$0xff] }
 0x10e   :  { %v1527_v22 = vsel %vm1511_vm9, %v1462_v30, %v974_v27 }
 0x10f   :  { %v1592_v39 = vsel %vm1576_vm10, %v1527_v22, %v1038_v2 }
 0x111   :  { %1179 = vrot.lane.b32.xlu2 %v7666_v35, %s7180_s26 }
 0x112   :  { %1309 = vrot.lane.b32.xlu1 %v745_v33, %s7181_s27  ;;  %1243 = vrot.lane.b32.xlu0 %v7634_v10, %s7182_s28 }
 0x113   :  { %v1106_v32 = vpop.permute.xlu2 %1105 }
 0x114   :  { %v1170_v37 = vpop.permute.xlu1 %1169  ;;  %v1104_v38 = vpop.permute.xlu0 %1103 }
 0x115   :  { %v1657_v41 = vsel %vm1641_vm11, %v1592_v39, %v1104_v38  ;;  %v413_v38 = vshrl.u32 %v7016_v28, 16 }
 0x116   :  { %v1722_v45 = vsel %vm1706_vm12, %v1657_v41, %v1170_v37 }
 0x117   :  { %v1787_v48 = vsel %vm1771_vm13, %v1722_v45, %v1234_v40  ;;  %v7753_v45 = vld [vmem:[%s13525_s0 + $0x90] sm:$0xff] }
 0x119   :  { %793 = vrot.lane.b32.xlu2 %v7597_v53, %s7176_s20  ;;  %v650_v53 = vrot.slane %v402_v44, 1  ;;  %v415_v44 = vrot.slane %v413_v38, 7 }
 0x11a   :  { %985 = vrot.lane.b32.xlu1 %v7666_v35, %s7178_s22  ;;  %889 = vrot.lane.b32.xlu0 %v744_v11, %s7179_s23 }
 0x11b   :  { %v1302_v47 = vpop.permute.xlu2 %1301  ;;  %v651_v50 = vor.u32 %v650_v53, %v399_v36 }
 0x11c   :  { %v784_v31 = vpop.permute.xlu1 %783  ;;  %v1300_v49 = vpop.permute.xlu0 %1299 }
 0x11d   :  { %v1852_v51 = vsel %vm1836_vm14, %v1787_v48, %v1300_v49  ;;  %v1376_v54 = vsel %vm1349_vm7, %v7450_v56, %v784_v31  ;;  %v746_v62 = vsel %vm7264_vm5, %v651_v50, 0  ;;  %v7015_v56 = vld [vmem:[%s13525_s0 + $0x80] sm:$0xff]  ;;  %v423_v31 = vshll.u32 %v7753_v45, 16 }
 0x11e   :  { %6654 = vmatmul.msk.bf16.gmra.mxu0 %vm1916_vm15, %v1852_v51  ;;  %v1464_v18 = vsel %vm1446_vm8, %v1376_v54, %v880_v24  ;;  %v406_v2 = vshrl.u32 %v7015_v56, 16  ;;  %v409_v40 = vshll.u32 %v7015_v56, 16  ;;  %v430_v50 = vshll.u32 %v7747_v43, 16 }
 0x120   :  { %v408_v14 = vrot.slane %v406_v2, 7  ;;  %v652_v23 = vrot.slane %v409_v40, 1 }
 0x121   :  { %1049 = vrot.lane.b32.xlu2 %v7634_v10, %s7175_s19 }
 0x122   :  { %1181 = vrot.lane.b32.xlu1 %v7689_v52, %s7180_s26  ;;  %1115 = vrot.lane.b32.xlu0 %v745_v33, %s7177_s21  ;;  %v653_v25 = vor.u32 %v652_v23, %v406_v2 }
 0x123   :  { %v978_v57 = vpop.permute.xlu2 %977 }
 0x124   :  { %v1040_v58 = vpop.permute.xlu1 %1039  ;;  %v976_v59 = vpop.permute.xlu0 %975  ;;  %v747_v29 = vsel %vm7264_vm5, %v653_v25, 0 }
 0x125   :  { %v1529_v60 = vsel %vm1511_vm9, %v1464_v18, %v976_v59  ;;  %v429_v18 = vrot.slane %v427_v46, 7 }
 0x126   :  { %v1594_v0 = vsel %vm1576_vm10, %v1529_v60, %v1040_v58  ;;  %v420_v60 = vshrl.u32 %v7753_v45, 16 }
 0x127   :  { %v1659_v3 = vsel %vm1641_vm11, %v1594_v0, %v1106_v32  ;;  %v432_v0 = vor.u32 %v430_v50, %v429_v18 }
 0x129   :  { %1245 = vrot.lane.b32.xlu2 %v7662_v26, %s7182_s28 }
 0x12a   :  { %795 = vrot.lane.b32.xlu1 %v7634_v10, %s7176_s20  ;;  %1311 = vrot.lane.b32.xlu0 %v746_v62, %s7181_s27  ;;  %v411_v10 = vor.u32 %v409_v40, %v408_v14 }
 0x12b   :  { %v1174_v55 = vpop.permute.xlu2 %1173 }
 0x12c   :  { %v1236_v4 = vpop.permute.xlu1 %1235  ;;  %v1172_v63 = vpop.permute.xlu0 %1171  ;;  %v600_v5 = vsel %vm7256_vm4, 0, %v411_v10 }
 0x12d   :  { %v1724_v7 = vsel %vm1706_vm12, %v1659_v3, %v1172_v63 }
 0x12e   :  { %v1789_v11 = vsel %vm1771_vm13, %v1724_v7, %v1236_v4 }
 0x12f   :  { %v1854_v13 = vsel %vm1836_vm14, %v1789_v11, %v1302_v47 }
 0x130   :  { %6655 = vmatmul.msk.bf16.gmra.mxu0 %vm1916_vm15, %v1854_v13  ;;  %v7787_v13 = vsel %vm7256_vm4, 0, %v432_v0 }
 0x131   :  { %891 = vrot.lane.b32.xlu2 %v745_v33, %s7179_s23  ;;  %v416_v33 = vshll.u32 %v7016_v28, 16 }
 0x132   :  { %1051 = vrot.lane.b32.xlu1 %v7662_v26, %s7175_s19  ;;  %987 = vrot.lane.b32.xlu0 %v7689_v52, %s7178_s22 }
 0x133   :  { %v788_v17 = vpop.permute.xlu2 %787  ;;  %v418_v47 = vor.u32 %v416_v33, %v415_v44 }
 0x134   :  { %v882_v19 = vpop.permute.xlu1 %881  ;;  %v786_v20 = vpop.permute.xlu0 %785  ;;  %v1382_v51 = vsel %vm1349_vm7, %v7513_v42, %v788_v17  ;;  %v7774_v42 = vld [vmem:[%s13525_s0 + $0xa0] sm:$0xff]  ;;  %v658_v17 = vrot.slane %v430_v50, 1 }
 0x135   :  { %v1379_v21 = vsel %vm1349_vm7, %v7473_v15, %v786_v20  ;;  %v437_v10 = vshll.u32 %v7774_v42, 16 }
 0x136   :  { %v1466_v1 = vsel %vm1446_vm8, %v1379_v21, %v882_v19  ;;  %v659_v21 = vor.u32 %v658_v17, %v427_v46 }
 0x137   :  { %v1531_v27 = vsel %vm1511_vm9, %v1466_v1, %v978_v57  ;;  %v601_v57 = vsel %vm7256_vm4, 0, %v418_v47 }
 0x138   :  { %v750_v25 = vsel %vm7264_vm5, %v659_v21, 0 }
 0x139   :  { %1117 = vrot.lane.b32.xlu2 %v746_v62, %s7177_s21 }
 0x13a   :  { %1247 = vrot.lane.b32.xlu1 %v7015_v56, %s7182_s28  ;;  %1183 = vrot.lane.b32.xlu0 %v600_v5, %s7180_s26 }
 0x13b   :  { %v1044_v6 = vpop.permute.xlu2 %1043 }
 0x13c   :  { %v1108_v8 = vpop.permute.xlu1 %1107  ;;  %v1042_v24 = vpop.permute.xlu0 %1041 }
 0x13d   :  { %v1596_v15 = vsel %vm1576_vm10, %v1531_v27, %v1042_v24  ;;  %v660_v27 = vrot.slane %v437_v10, 1 }
 0x13e   :  { %v1661_v30 = vsel %vm1641_vm11, %v1596_v15, %v1108_v8 }
 0x13f   :  { %v1726_v36 = vsel %vm1706_vm12, %v1661_v30, %v1174_v55  ;;  %v434_v55 = vshrl.u32 %v7774_v42, 16 }
 0x141   :  { %1313 = vrot.lane.b32.xlu2 %v747_v29, %s7181_s27  ;;  %v436_v40 = vrot.slane %v434_v55, 7 }
 0x142   :  { %893 = vrot.lane.b32.xlu1 %v746_v62, %s7179_s23  ;;  %797 = vrot.lane.b32.xlu0 %v7662_v26, %s7176_s20  ;;  %v654_v26 = vrot.slane %v416_v33, 1  ;;  %v656_v62 = vrot.slane %v423_v31, 1 }
 0x143   :  { %v1240_v22 = vpop.permute.xlu2 %1239  ;;  %v439_v20 = vor.u32 %v437_v10, %v436_v40 }
 0x144   :  { %v1304_v32 = vpop.permute.xlu1 %1303  ;;  %v1238_v37 = vpop.permute.xlu0 %1237  ;;  %v655_v48 = vor.u32 %v654_v26, %v413_v38  ;;  %v657_v2 = vor.u32 %v656_v62, %v420_v60 }
 0x145   :  { %v1791_v39 = vsel %vm1771_vm13, %v1726_v36, %v1238_v37  ;;  %v7803_v24 = vsel %vm7256_vm4, 0, %v439_v20 }
 0x146   :  { %v1856_v41 = vsel %vm1836_vm14, %v1791_v39, %v1304_v32  ;;  %v748_v59 = vsel %vm7264_vm5, %v655_v48, 0  ;;  %v749_v14 = vsel %vm7264_vm5, %v657_v2, 0 }
 0x147   :  { %6656 = vmatmul.msk.bf16.gmra.mxu0 %vm1916_vm15, %v1856_v41 }
 0x149   :  { %989 = vrot.lane.b32.xlu2 %v600_v5, %s7178_s22 }
 0x14a   :  { %1119 = vrot.lane.b32.xlu1 %v747_v29, %s7177_s21  ;;  %1053 = vrot.lane.b32.xlu0 %v7015_v56, %s7175_s19  ;;  %v661_v29 = vor.u32 %v660_v27, %v434_v55 }
 0x14b   :  { %v886_v49 = vpop.permute.xlu2 %885 }
 0x14c   :  { %v980_v53 = vpop.permute.xlu1 %979  ;;  %v884_v54 = vpop.permute.xlu0 %883  ;;  %v751_v32 = vsel %vm7264_vm5, %v661_v29, 0 }
 0x14d   :  { %v1468_v58 = vsel %vm1446_vm8, %v1382_v51, %v884_v54 }
 0x14e   :  { %v1533_v56 = vsel %vm1511_vm9, %v1468_v58, %v980_v53 }
 0x14f   :  { %v1598_v7 = vsel %vm1576_vm10, %v1533_v56, %v1044_v6 }
 0x151   :  { %1185 = vrot.lane.b32.xlu2 %v601_v57, %s7180_s26 }
 0x152   :  { %1315 = vrot.lane.b32.xlu1 %v748_v59, %s7181_s27  ;;  %1249 = vrot.lane.b32.xlu0 %v7016_v28, %s7182_s28 }
 0x153   :  { %v1112_v3 = vpop.permute.xlu2 %1111 }
 0x154   :  { %v1176_v4 = vpop.permute.xlu1 %1175  ;;  %v1110_v63 = vpop.permute.xlu0 %1109 }
 0x155   :  { %v1663_v11 = vsel %vm1641_vm11, %v1598_v7, %v1110_v63 }
 0x156   :  { %v1728_v19 = vsel %vm1706_vm12, %v1663_v11, %v1176_v4  ;;  %v7860_v4 = vld [vmem:[%s13525_s0 + $0xb0] sm:$0xff] }
 0x157   :  { %v1793_v23 = vsel %vm1771_vm13, %v1728_v19, %v1240_v22  ;;  %v451_v11 = vshll.u32 %v7860_v4, 16  ;;  %v448_v21 = vshrl.u32 %v7860_v4, 16 }
 0x159   :  { %799 = vrot.lane.b32.xlu2 %v7753_v45, %s7176_s20 }
 0x15a   :  { %991 = vrot.lane.b32.xlu1 %v7787_v13, %s7178_s22  ;;  %895 = vrot.lane.b32.xlu0 %v749_v14, %s7179_s23 }
 0x15b   :  { %v1308_v5 = vpop.permute.xlu2 %1307 }
 0x15c   :  { %v790_v1 = vpop.permute.xlu1 %789  ;;  %v1306_v6 = vpop.permute.xlu0 %1305 }
 0x15d   :  { %v1858_v8 = vsel %vm1836_vm14, %v1793_v23, %v1306_v6  ;;  %v1385_v15 = vsel %vm1349_vm7, %v7558_v16, %v790_v1  ;;  %v7821_v16 = vld [vmem:[%s13525_s0 + $0xa8] sm:$0xff]  ;;  %v664_v23 = vrot.slane %v451_v11, 1  ;;  %v450_v1 = vrot.slane %v448_v21, 7 }
 0x15e   :  { %6657 = vmatmul.msk.bf16.gmra.mxu0 %vm1916_vm15, %v1858_v8  ;;  %v1470_v28 = vsel %vm1446_vm8, %v1385_v15, %v886_v49  ;;  %v441_v38 = vshrl.u32 %v7821_v16, 16  ;;  %v444_v51 = vshll.u32 %v7821_v16, 16 }
 0x15f   :  { %v453_v15 = vor.u32 %v451_v11, %v450_v1 }
 0x160   :  { %v443_v49 = vrot.slane %v441_v38, 7  ;;  %v662_v58 = vrot.slane %v444_v51, 1 }
 0x161   :  { %1055 = vrot.lane.b32.xlu2 %v7747_v43, %s7175_s19 }
 0x162   :  { %1187 = vrot.lane.b32.xlu1 %v7803_v24, %s7180_s26  ;;  %1121 = vrot.lane.b32.xlu0 %v750_v25, %s7177_s21  ;;  %v663_v2 = vor.u32 %v662_v58, %v441_v38 }
 0x163   :  { %v984_v30 = vpop.permute.xlu2 %983 }
 0x164   :  { %v1046_v33 = vpop.permute.xlu1 %1045  ;;  %v982_v22 = vpop.permute.xlu0 %981  ;;  %v752_v63 = vsel %vm7264_vm5, %v663_v2, 0 }
 0x165   :  { %v1535_v36 = vsel %vm1511_vm9, %v1470_v28, %v982_v22 }
 0x166   :  { %v1600_v37 = vsel %vm1576_vm10, %v1535_v36, %v1046_v33  ;;  %v7896_v33 = vsel %vm7256_vm4, 0, %v453_v15 }
 0x167   :  { %v1665_v41 = vsel %vm1641_vm11, %v1600_v37, %v1112_v3 }
 0x169   :  { %1251 = vrot.lane.b32.xlu2 %v7774_v42, %s7182_s28 }
 0x16a   :  { %801 = vrot.lane.b32.xlu1 %v7747_v43, %s7176_s20  ;;  %1317 = vrot.lane.b32.xlu0 %v751_v32, %s7181_s27  ;;  %v446_v43 = vor.u32 %v444_v51, %v443_v49 }
 0x16b   :  { %v1180_v39 = vpop.permute.xlu2 %1179 }
 0x16c   :  { %v1242_v44 = vpop.permute.xlu1 %1241  ;;  %v1178_v26 = vpop.permute.xlu0 %1177  ;;  %v7845_v57 = vsel %vm7256_vm4, 0, %v446_v43 }
 0x16d   :  { %v1730_v46 = vsel %vm1706_vm12, %v1665_v41, %v1178_v26 }
 0x16e   :  { %v1795_v47 = vsel %vm1771_vm13, %v1730_v46, %v1242_v44  ;;  %v7914_v46 = vld [vmem:[%s13525_s0 + $0xd8] sm:$0xff] }
 0x16f   :  { %v1860_v48 = vsel %vm1836_vm14, %v1795_v47, %v1308_v5  ;;  %v486_v49 = vshll.u32 %v7914_v46, 16  ;;  %v483_v58 = vshrl.u32 %v7914_v46, 16 }
 0x170   :  { %6658 = vmatmul.msk.bf16.gmra.mxu0 %vm1916_vm15, %v1860_v48 }
 0x171   :  { %897 = vrot.lane.b32.xlu2 %v750_v25, %s7179_s23 }
 0x172   :  { %1057 = vrot.lane.b32.xlu1 %v7774_v42, %s7175_s19  ;;  %993 = vrot.lane.b32.xlu0 %v7803_v24, %s7178_s22 }
 0x173   :  { %v794_v53 = vpop.permute.xlu2 %793 }
 0x174   :  { %v888_v54 = vpop.permute.xlu1 %887  ;;  %v792_v18 = vpop.permute.xlu0 %791  ;;  %v1391_v8 = vsel %vm1349_vm7, %v7621_v61, %v794_v53 }
 0x175   :  { %v1388_v50 = vsel %vm1349_vm7, %v7581_v34, %v792_v18  ;;  %v7853_v34 = vpop.f32.mrf.mxu0 }
 0x176   :  { %v1472_v59 = vsel %vm1446_vm8, %v1388_v50, %v888_v54  ;;  %13892 = vst [vmem:[#allocation4_spill] sm:$0xff] %v7853_v34 }
 0x177   :  { %v1537_v55 = vsel %vm1511_vm9, %v1472_v59, %v984_v30  ;;  %v7892_v30 = vld [vmem:[%s13525_s0 + $0xb8] sm:$0xff]  ;;  %v674_v59 = vrot.slane %v486_v49, 1 }
 0x178   :  { %v455_v36 = vshrl.u32 %v7892_v30, 16  ;;  %v458_v26 = vshll.u32 %v7892_v30, 16 }
 0x179   :  { %1123 = vrot.lane.b32.xlu2 %v751_v32, %s7177_s21  ;;  %v675_v2 = vor.u32 %v674_v59, %v483_v58 }
 0x17a   :  { %1253 = vrot.lane.b32.xlu1 %v7821_v16, %s7182_s28  ;;  %1189 = vrot.lane.b32.xlu0 %v7845_v57, %s7180_s26  ;;  %v457_v44 = vrot.slane %v455_v36, 7 }
 0x17b   :  { %v1050_v62 = vpop.permute.xlu2 %1049 }
 0x17c   :  { %v1114_v56 = vpop.permute.xlu1 %1113  ;;  %v1048_v0 = vpop.permute.xlu0 %1047  ;;  %v460_v48 = vor.u32 %v458_v26, %v457_v44 }
 0x17d   :  { %v1602_v3 = vsel %vm1576_vm10, %v1537_v55, %v1048_v0  ;;  %v7874_v5 = vpop.f32.mrf.mxu0 }
 0x17e   :  { %v1667_v7 = vsel %vm1641_vm11, %v1602_v3, %v1114_v56  ;;  %13893 = vst [vmem:[#allocation5_spill] sm:$0xff] %v7874_v5 }
 0x17f   :  { %v1732_v40 = vsel %vm1706_vm12, %v1667_v7, %v1180_v39 }
 0x181   :  { %1319 = vrot.lane.b32.xlu2 %v752_v63, %s7181_s27 }
 0x182   :  { %899 = vrot.lane.b32.xlu1 %v751_v32, %s7179_s23  ;;  %803 = vrot.lane.b32.xlu0 %v7774_v42, %s7176_s20  ;;  %v665_v42 = vor.u32 %v664_v23, %v448_v21 }
 0x183   :  { %v1246_v14 = vpop.permute.xlu2 %1245 }
 0x184   :  { %v1310_v10 = vpop.permute.xlu1 %1309  ;;  %v1244_v17 = vpop.permute.xlu0 %1243  ;;  %v7887_v29 = vsel %vm7264_vm5, %v665_v42, 0 }
 0x185   :  { %v1797_v19 = vsel %vm1771_vm13, %v1732_v40, %v1244_v17  ;;  %v7905_v22 = vpop.f32.mrf.mxu0  ;;  %v7957_v40 = vsel %vm7264_vm5, %v675_v2, 0 }
 0x186   :  { %v1862_v20 = vsel %vm1836_vm14, %v1797_v19, %v1310_v10  ;;  %13894 = vst [vmem:[#allocation6_spill] sm:$0xff] %v7905_v22  ;;  %v7963_v19 = vld [vmem:[%s13525_s0 + $0xe8] sm:$0xff] }
 0x187   :  { %6659 = vmatmul.msk.bf16.gmra.mxu0 %vm1916_vm15, %v1862_v20  ;;  %v497_v1 = vshrl.u32 %v7963_v19, 16 }
 0x189   :  { %995 = vrot.lane.b32.xlu2 %v7845_v57, %s7178_s22 }
 0x18a   :  { %1125 = vrot.lane.b32.xlu1 %v752_v63, %s7177_s21  ;;  %1059 = vrot.lane.b32.xlu0 %v7821_v16, %s7175_s19 }
 0x18b   :  { %v892_v6 = vpop.permute.xlu2 %891 }
 0x18c   :  { %v986_v25 = vpop.permute.xlu1 %985  ;;  %v890_v27 = vpop.permute.xlu0 %889 }
 0x18d   :  { %v1474_v28 = vsel %vm1446_vm8, %v1391_v8, %v890_v27  ;;  %v7925_v50 = vpop.f32.mrf.mxu0 }
 0x18e   :  { %v1539_v61 = vsel %vm1511_vm9, %v1474_v28, %v986_v25  ;;  %13895 = vst [vmem:[#allocation7_spill] sm:$0xff] %v7925_v50 }
 0x18f   :  { %v1604_v39 = vsel %vm1576_vm10, %v1539_v61, %v1050_v62  ;;  %v7938_v62 = vld [vmem:[%s13525_s0 + $0xe0] sm:$0xff] }
 0x190   :  { %v490_v55 = vshrl.u32 %v7938_v62, 16  ;;  %v493_v17 = vshll.u32 %v7938_v62, 16 }
 0x191   :  { %1191 = vrot.lane.b32.xlu2 %v7896_v33, %s7180_s26 }
 0x192   :  { %1321 = vrot.lane.b32.xlu1 %v7887_v29, %s7181_s27  ;;  %1255 = vrot.lane.b32.xlu0 %v7860_v4, %s7182_s28  ;;  %v492_v10 = vrot.slane %v490_v55, 7  ;;  %v676_v61 = vrot.slane %v493_v17, 1 }
 0x193   :  { %v1118_v32 = vpop.permute.xlu2 %1117 }
 0x194   :  { %v1182_v37 = vpop.permute.xlu1 %1181  ;;  %v1116_v38 = vpop.permute.xlu0 %1115  ;;  %v495_v23 = vor.u32 %v493_v17, %v492_v10 }
 0x195   :  { %v1669_v41 = vsel %vm1641_vm11, %v1604_v39, %v1116_v38  ;;  %v499_v38 = vrot.slane %v497_v1, 7 }
 0x196   :  { %v1734_v47 = vsel %vm1706_vm12, %v1669_v41, %v1182_v37  ;;  %v677_v41 = vor.u32 %v676_v61, %v490_v55 }
 0x197   :  { %v1799_v43 = vsel %vm1771_vm13, %v1734_v47, %v1246_v14  ;;  %v666_v14 = vrot.slane %v458_v26, 1 }
 0x199   :  { %805 = vrot.lane.b32.xlu2 %v7821_v16, %s7176_s20  ;;  %v7930_v16 = vsel %vm7256_vm4, 0, %v460_v48  ;;  %v667_v21 = vor.u32 %v666_v14, %v455_v36  ;;  %v7983_v36 = vsel %vm7256_vm4, 0, %v495_v23 }
 0x19a   :  { %997 = vrot.lane.b32.xlu1 %v7896_v33, %s7178_s22  ;;  %901 = vrot.lane.b32.xlu0 %v752_v63, %s7179_s23 }
 0x19b   :  { %v1314_v51 = vpop.permute.xlu2 %1313  ;;  %v7978_v28 = vsel %vm7264_vm5, %v667_v21, 0 }
 0x19c   :  { %v796_v53 = vpop.permute.xlu1 %795  ;;  %v1312_v54 = vpop.permute.xlu0 %1311 }
 0x19d   :  { %v1864_v18 = vsel %vm1836_vm14, %v1799_v43, %v1312_v54  ;;  %v1394_v56 = vsel %vm1349_vm7, %v7666_v35, %v796_v53  ;;  %v7952_v35 = vpop.f32.mrf.mxu0 }
 0x19e   :  { %6660 = vmatmul.msk.bf16.gmra.mxu0 %vm1916_vm15, %v1864_v18  ;;  %v1476_v0 = vsel %vm1446_vm8, %v1394_v56, %v892_v6  ;;  %13896 = vst [vmem:[#allocation8_spill] sm:$0xff] %v7952_v35 }
 0x1a1   :  { %1061 = vrot.lane.b32.xlu2 %v7860_v4, %s7175_s19 }
 0x1a2   :  { %1193 = vrot.lane.b32.xlu1 %v7930_v16, %s7180_s26  ;;  %1127 = vrot.lane.b32.xlu0 %v7887_v29, %s7177_s21 }
 0x1a3   :  { %v990_v3 = vpop.permute.xlu2 %989 }
 0x1a4   :  { %v1052_v63 = vpop.permute.xlu1 %1051  ;;  %v988_v7 = vpop.permute.xlu0 %987 }
 0x1a5   :  { %v1541_v11 = vsel %vm1511_vm9, %v1476_v0, %v988_v7  ;;  %v7986_v39 = vpop.f32.mrf.mxu0 }
 0x1a6   :  { %v1606_v20 = vsel %vm1576_vm10, %v1541_v11, %v1052_v63  ;;  %13897 = vst [vmem:[#allocation9_spill] sm:$0xff] %v7986_v39  ;;  %v422_v11 = vrot.slane %v420_v60, 7 }
 0x1a7   :  { %v1671_v6 = vsel %vm1641_vm11, %v1606_v20, %v1118_v32  ;;  %v500_v32 = vshll.u32 %v7963_v19, 16 }
 0x1a9   :  { %817 = vrot.lane.b32.xlu2 %v7914_v46, %s7176_s20  ;;  %v502_v44 = vor.u32 %v500_v32, %v499_v38  ;;  %v678_v43 = vrot.slane %v500_v32, 1  ;;  %v8061_v32 = vld [vmem:[%s13525_s0 + $0xf0] sm:$0xff] }
 0x1aa   :  { %913 = vrot.lane.b32.xlu1 %v7957_v40, %s7179_s23  ;;  %1257 = vrot.lane.b32.xlu0 %v7892_v30, %s7182_s28 }
 0x1ab   :  { %v1186_v42 = vpop.permute.xlu2 %1185  ;;  %v8003_v54 = vsel %vm7256_vm4, 0, %v502_v44  ;;  %v679_v59 = vor.u32 %v678_v43, %v497_v1 }
 0x1ac   :  { %v1248_v8 = vpop.permute.xlu1 %1247  ;;  %v1184_v25 = vpop.permute.xlu0 %1183 }
 0x1ad   :  { %v1736_v27 = vsel %vm1706_vm12, %v1671_v6, %v1184_v25  ;;  %v8018_v7 = vsel %vm7264_vm5, %v679_v59, 0 }
 0x1ae   :  { %v1801_v15 = vsel %vm1771_vm13, %v1736_v27, %v1248_v8 }
 0x1af   :  { %v1866_v37 = vsel %vm1836_vm14, %v1801_v15, %v1314_v51  ;;  %v7997_v51 = vsel %vm7264_vm5, %v677_v41, 0 }
 0x1b0   :  { %6661 = vmatmul.msk.bf16.gmra.mxu0 %vm1916_vm15, %v1866_v37 }
 0x1b1   :  { %1323 = vrot.lane.b32.xlu2 %v7978_v28, %s7181_s27 }
 0x1b2   :  { %1073 = vrot.lane.b32.xlu1 %v7938_v62, %s7175_s19  ;;  %1009 = vrot.lane.b32.xlu0 %v7983_v36, %s7178_s22 }
 0x1b3   :  { %v800_v26 = vpop.permute.xlu2 %799 }
 0x1b4   :  { %v894_v47 = vpop.permute.xlu1 %893  ;;  %v798_v48 = vpop.permute.xlu0 %797 }
 0x1b5   :  { %v1397_v53 = vsel %vm1349_vm7, %v7689_v52, %v798_v48  ;;  %v8012_v52 = vpop.f32.mrf.mxu0 }
 0x1b6   :  { %v1478_v18 = vsel %vm1446_vm8, %v1397_v53, %v894_v47  ;;  %13898 = vst [vmem:[#allocation10_spill] sm:$0xff] %v8012_v52  ;;  %v504_v47 = vshrl.u32 %v8061_v32, 16 }
 0x1b7   :  { %v1543_v55 = vsel %vm1511_vm9, %v1478_v18, %v990_v3  ;;  %v8032_v3 = vld [vmem:[%s13525_s0 + $0xc0] sm:$0xff] }
 0x1b8   :  { %v462_v21 = vshrl.u32 %v8032_v3, 16  ;;  %v465_v8 = vshll.u32 %v8032_v3, 16 }
 0x1b9   :  { %1139 = vrot.lane.b32.xlu2 %v7997_v51, %s7177_s21 }
 0x1ba   :  { %1269 = vrot.lane.b32.xlu1 %v7963_v19, %s7182_s28  ;;  %1205 = vrot.lane.b32.xlu0 %v8003_v54, %s7180_s26  ;;  %v668_v38 = vrot.slane %v465_v8, 1 }
 0x1bb   :  { %v1056_v56 = vpop.permute.xlu2 %1055 }
 0x1bc   :  { %v1120_v0 = vpop.permute.xlu1 %1119  ;;  %v1054_v2 = vpop.permute.xlu0 %1053 }
 0x1bd   :  { %v1608_v63 = vsel %vm1576_vm10, %v1543_v55, %v1054_v2  ;;  %v8040_v6 = vpop.f32.mrf.mxu0  ;;  %v506_v2 = vrot.slane %v504_v47, 7  ;;  %v507_v55 = vshll.u32 %v8061_v32, 16 }
 0x1be   :  { %v1673_v14 = vsel %vm1641_vm11, %v1608_v63, %v1120_v0  ;;  %13899 = vst [vmem:[#allocation11_spill] sm:$0xff] %v8040_v6 }
 0x1bf   :  { %v1738_v17 = vsel %vm1706_vm12, %v1673_v14, %v1186_v42 }
 0x1c1   :  { %1335 = vrot.lane.b32.xlu2 %v8018_v7, %s7181_s27 }
 0x1c2   :  { %903 = vrot.lane.b32.xlu1 %v7887_v29, %s7179_s23  ;;  %807 = vrot.lane.b32.xlu0 %v7860_v4, %s7176_s20  ;;  %v425_v29 = vor.u32 %v423_v31, %v422_v11  ;;  %v464_v4 = vrot.slane %v462_v21, 7 }
 0x1c3   :  { %v1252_v10 = vpop.permute.xlu2 %1251 }
 0x1c4   :  { %v1316_v60 = vpop.permute.xlu1 %1315  ;;  %v1250_v20 = vpop.permute.xlu0 %1249  ;;  %v602_v42 = vsel %vm7256_vm4, 0, %v425_v29  ;;  %v467_v45 = vor.u32 %v465_v8, %v464_v4  ;;  %v680_v29 = vrot.slane %v507_v55, 1 }
 0x1c5   :  { %v1803_v23 = vsel %vm1771_vm13, %v1738_v17, %v1250_v20  ;;  %v1400_v25 = vsel %vm1349_vm7, %v602_v42, %v800_v26  ;;  %v8070_v44 = vpop.f32.mrf.mxu0  ;;  %v669_v26 = vor.u32 %v668_v38, %v462_v21 }
 0x1c6   :  { %v1868_v1 = vsel %vm1836_vm14, %v1803_v23, %v1316_v60  ;;  %v8055_v61 = vsel %vm7256_vm4, 0, %v467_v45  ;;  %v681_v4 = vor.u32 %v680_v29, %v504_v47 }
 0x1c7   :  { %6662 = vmatmul.msk.bf16.gmra.mxu0 %vm1916_vm15, %v1868_v1  ;;  %v8077_v0 = vsel %vm7264_vm5, %v669_v26, 0 }
 0x1c9   :  { %999 = vrot.lane.b32.xlu2 %v7930_v16, %s7178_s22 }
 0x1ca   :  { %1129 = vrot.lane.b32.xlu1 %v7978_v28, %s7177_s21  ;;  %1063 = vrot.lane.b32.xlu0 %v7892_v30, %s7175_s19 }
 0x1cb   :  { %v898_v31 = vpop.permute.xlu2 %897 }
 0x1cc   :  { %v992_v27 = vpop.permute.xlu1 %991  ;;  %v896_v15 = vpop.permute.xlu0 %895 }
 0x1cd   :  { %v1480_v37 = vsel %vm1446_vm8, %v1400_v25, %v896_v15  ;;  %v8089_v21 = vpop.f32.mrf.mxu0  ;;  %v8115_v15 = vld [vmem:[%s13525_s0 + $0xc8] sm:$0xff] }
 0x1ce   :  { %v1545_v41 = vsel %vm1511_vm9, %v1480_v37, %v992_v27 }
 0x1cf   :  { %v1610_v18 = vsel %vm1576_vm10, %v1545_v41, %v1056_v56  ;;  %v509_v56 = vor.u32 %v507_v55, %v506_v2  ;;  %v472_v2 = vshll.u32 %v8115_v15, 16 }
 0x1d1   :  { %1195 = vrot.lane.b32.xlu2 %v8055_v61, %s7180_s26  ;;  %v8094_v23 = vsel %vm7256_vm4, 0, %v509_v56 }
 0x1d2   :  { %1259 = vrot.lane.b32.xlu1 %v8032_v3, %s7182_s28  ;;  %819 = vrot.lane.b32.xlu0 %v7938_v62, %s7176_s20 }
 0x1d3   :  { %v1124_v48 = vpop.permute.xlu2 %1123 }
 0x1d4   :  { %v1188_v43 = vpop.permute.xlu1 %1187  ;;  %v1122_v53 = vpop.permute.xlu0 %1121 }
 0x1d5   :  { %v1675_v59 = vsel %vm1641_vm11, %v1610_v18, %v1122_v53  ;;  %v8105_v25 = vpop.f32.mrf.mxu0 }
 0x1d6   :  { %v1740_v63 = vsel %vm1706_vm12, %v1675_v59, %v1188_v43 }
 0x1d7   :  { %v1805_v14 = vsel %vm1771_vm13, %v1740_v63, %v1252_v10 }
 0x1d9   :  { %915 = vrot.lane.b32.xlu2 %v7997_v51, %s7179_s23 }
 0x1da   :  { %1011 = vrot.lane.b32.xlu1 %v8003_v54, %s7178_s22  ;;  %1325 = vrot.lane.b32.xlu0 %v8077_v0, %s7181_s27 }
 0x1db   :  { %v1320_v11 = vpop.permute.xlu2 %1319 }
 0x1dc   :  { %v802_v17 = vpop.permute.xlu1 %801  ;;  %v1318_v60 = vpop.permute.xlu0 %1317 }
 0x1dd   :  { %v1870_v20 = vsel %vm1836_vm14, %v1805_v14, %v1318_v60  ;;  %v1403_v1 = vsel %vm1349_vm7, %v7787_v13, %v802_v17  ;;  %v8110_v13 = vsel %vm7264_vm5, %v681_v4, 0  ;;  %v670_v17 = vrot.slane %v472_v2, 1 }
 0x1de   :  { %6663 = vmatmul.msk.bf16.gmra.mxu0 %vm1916_vm15, %v1870_v20  ;;  %v1482_v10 = vsel %vm1446_vm8, %v1403_v1, %v898_v31  ;;  %v469_v31 = vshrl.u32 %v8115_v15, 16 }
 0x1e0   :  { %v471_v59 = vrot.slane %v469_v31, 7  ;;  %v671_v60 = vor.u32 %v670_v17, %v469_v31 }
 0x1e1   :  { %1075 = vrot.lane.b32.xlu2 %v7963_v19, %s7175_s19 }
 0x1e2   :  { %1207 = vrot.lane.b32.xlu1 %v8094_v23, %s7180_s26  ;;  %1141 = vrot.lane.b32.xlu0 %v8018_v7, %s7177_s21 }
 0x1e3   :  { %v996_v8 = vpop.permute.xlu2 %995 }
 0x1e4   :  { %v1058_v42 = vpop.permute.xlu1 %1057  ;;  %v994_v45 = vpop.permute.xlu0 %993 }
 0x1e5   :  { %v1547_v27 = vsel %vm1511_vm9, %v1482_v10, %v994_v45 }
 0x1e6   :  { %v1612_v37 = vsel %vm1576_vm10, %v1547_v27, %v1058_v42  ;;  %v8158_v42 = vsel %vm7264_vm5, %v671_v60, 0 }
 0x1e7   :  { %v1677_v41 = vsel %vm1641_vm11, %v1612_v37, %v1124_v48  ;;  %v474_v48 = vor.u32 %v472_v2, %v471_v59 }
 0x1e9   :  { %1271 = vrot.lane.b32.xlu2 %v8061_v32, %s7182_s28  ;;  %v8143_v14 = vsel %vm7256_vm4, 0, %v474_v48 }
 0x1ea   :  { %809 = vrot.lane.b32.xlu1 %v7892_v30, %s7176_s20  ;;  %1337 = vrot.lane.b32.xlu0 %v8110_v13, %s7181_s27  ;;  %v8130_v30 = vpop.f32.mrf.mxu0 }
 0x1eb   :  { %v1192_v38 = vpop.permute.xlu2 %1191 }
 0x1ec   :  { %v1254_v26 = vpop.permute.xlu1 %1253  ;;  %v1190_v47 = vpop.permute.xlu0 %1189 }
 0x1ed   :  { %v1742_v43 = vsel %vm1706_vm12, %v1677_v41, %v1190_v47 }
 0x1ee   :  { %v1807_v53 = vsel %vm1771_vm13, %v1742_v43, %v1254_v26 }
 0x1ef   :  { %v1872_v18 = vsel %vm1836_vm14, %v1807_v53, %v1320_v11 }
 0x1f0   :  { %6664 = vmatmul.msk.bf16.gmra.mxu0 %vm1916_vm15, %v1872_v18 }
 0x1f1   :  { %905 = vrot.lane.b32.xlu2 %v7978_v28, %s7179_s23 }
 0x1f2   :  { %1065 = vrot.lane.b32.xlu1 %v8032_v3, %s7175_s19  ;;  %1001 = vrot.lane.b32.xlu0 %v8055_v61, %s7178_s22  ;;  %v8152_v1 = vpop.f32.mrf.mxu0 }
 0x1f3   :  { %v806_v55 = vpop.permute.xlu2 %805 }
 0x1f4   :  { %v900_v63 = vpop.permute.xlu1 %899  ;;  %v804_v56 = vpop.permute.xlu0 %803 }
 0x1f5   :  { %v1406_v11 = vsel %vm1349_vm7, %v7803_v24, %v804_v56 }
 0x1f6   :  { %v1484_v28 = vsel %vm1446_vm8, %v1406_v11, %v900_v63  ;;  %v1409_v11 = vsel %vm1349_vm7, %v7845_v57, %v806_v55 }
 0x1f7   :  { %v1549_v10 = vsel %vm1511_vm9, %v1484_v28, %v996_v8  ;;  %v8199_v28 = vld [vmem:[%s13525_s0 + $0xd0] sm:$0xff] }
 0x1f8   :  { %v476_v57 = vshrl.u32 %v8199_v28, 16 }
 0x1f9   :  { %1131 = vrot.lane.b32.xlu2 %v8077_v0, %s7177_s21 }
 0x1fa   :  { %821 = vrot.lane.b32.xlu1 %v7963_v19, %s7176_s20  ;;  %1197 = vrot.lane.b32.xlu0 %v8143_v14, %s7180_s26  ;;  %v8163_v19 = vld [vmem:[%s13525_s0 + $0xf8] sm:$0xff]  ;;  %v8177_v18 = vpop.f32.mrf.mxu0 }
 0x1fb   :  { %v1062_v20 = vpop.permute.xlu2 %1061  ;;  %v514_v8 = vshll.u32 %v8163_v19, 16  ;;  %v511_v26 = vshrl.u32 %v8163_v19, 16 }
 0x1fc   :  { %v1126_v29 = vpop.permute.xlu1 %1125  ;;  %v1060_v24 = vpop.permute.xlu0 %1059 }
 0x1fd   :  { %v1614_v4 = vsel %vm1576_vm10, %v1549_v10, %v1060_v24  ;;  %v513_v53 = vrot.slane %v511_v26, 7  ;;  %v682_v59 = vrot.slane %v514_v8, 1 }
 0x1fe   :  { %v1679_v45 = vsel %vm1641_vm11, %v1614_v4, %v1126_v29 }
 0x1ff   :  { %v1744_v37 = vsel %vm1706_vm12, %v1679_v45, %v1192_v38  ;;  %v683_v38 = vor.u32 %v682_v59, %v511_v26  ;;  %v485_v45 = vrot.slane %v483_v58, 7 }
 0x201   :  { %1261 = vrot.lane.b32.xlu2 %v8115_v15, %s7182_s28  ;;  %v8194_v17 = vsel %vm7264_vm5, %v683_v38, 0  ;;  %v488_v26 = vor.u32 %v486_v49, %v485_v45 }
 0x202   :  { %1327 = vrot.lane.b32.xlu1 %v8158_v42, %s7181_s27  ;;  %917 = vrot.lane.b32.xlu0 %v8018_v7, %s7179_s23  ;;  %v516_v7 = vor.u32 %v514_v8, %v513_v53  ;;  %v8209_v10 = vpop.f32.mrf.mxu0  ;;  %v478_v8 = vrot.slane %v476_v57, 7 }
 0x203   :  { %v818_v27 = vpop.permute.xlu2 %817  ;;  %v8232_v38 = vsel %vm7256_vm4, 0, %v488_v26 }
 0x204   :  { %v1322_v31 = vpop.permute.xlu1 %1321  ;;  %v1256_v41 = vpop.permute.xlu0 %1255  ;;  %v8188_v56 = vsel %vm7256_vm4, 0, %v516_v7 }
 0x205   :  { %v1809_v47 = vsel %vm1771_vm13, %v1744_v37, %v1256_v41  ;;  %v479_v37 = vshll.u32 %v8199_v28, 16 }
 0x206   :  { %v1874_v43 = vsel %vm1836_vm14, %v1809_v47, %v1322_v31 }
 0x207   :  { %6665 = vmatmul.msk.bf16.gmra.mxu0 %vm1916_vm15, %v1874_v43  ;;  %v481_v58 = vor.u32 %v479_v37, %v478_v8 }
 0x209   :  { %1013 = vrot.lane.b32.xlu2 %v8094_v23, %s7178_s22  ;;  %v8237_v49 = vsel %vm7256_vm4, 0, %v481_v58 }
 0x20a   :  { %1143 = vrot.lane.b32.xlu1 %v8110_v13, %s7177_s21  ;;  %1077 = vrot.lane.b32.xlu0 %v8061_v32, %s7175_s19 }
 0x20b   :  { %v1324_v2 = vpop.permute.xlu2 %1323 }
 0x20c   :  { %v998_v48 = vpop.permute.xlu1 %997  ;;  %v902_v63 = vpop.permute.xlu0 %901 }
 0x20d   :  { %v1486_v60 = vsel %vm1446_vm8, %v1409_v11, %v902_v63 }
 0x20e   :  { %v1551_v4 = vsel %vm1511_vm9, %v1486_v60, %v998_v48 }
 0x20f   :  { %v1616_v31 = vsel %vm1576_vm10, %v1551_v4, %v1062_v20 }
 0x211   :  { %1209 = vrot.lane.b32.xlu2 %v8188_v56, %s7180_s26 }
 0x212   :  { %1339 = vrot.lane.b32.xlu1 %v8194_v17, %s7181_s27  ;;  %1273 = vrot.lane.b32.xlu0 %v8163_v19, %s7182_s28 }
 0x213   :  { %v1140_v55 = vpop.permute.xlu2 %1139 }
 0x214   :  { %v1194_v29 = vpop.permute.xlu1 %1193  ;;  %v1128_v24 = vpop.permute.xlu0 %1127 }
 0x215   :  { %v1681_v41 = vsel %vm1641_vm11, %v1616_v31, %v1128_v24  ;;  %v8252_v24 = vld [vmem:[%s13525_s0 + $0x100] sm:$0xff] }
 0x216   :  { %v1746_v53 = vsel %vm1706_vm12, %v1681_v41, %v1194_v29  ;;  %v672_v29 = vrot.slane %v479_v37, 1  ;;  %v518_v45 = vshrl.u32 %v8252_v24, 16 }
 0x218   :  { %v673_v4 = vor.u32 %v672_v29, %v476_v57  ;;  %v521_v57 = vshll.u32 %v8252_v24, 16 }
 0x219   :  { %811 = vrot.lane.b32.xlu2 %v8032_v3, %s7176_s20  ;;  %v8228_v3 = vpop.f32.mrf.mxu0 }
 0x21a   :  { %1003 = vrot.lane.b32.xlu1 %v8143_v14, %s7178_s22  ;;  %907 = vrot.lane.b32.xlu0 %v8077_v0, %s7179_s23  ;;  %v1427_v0 = vsel %vm1349_vm7, %v8232_v38, %v818_v27 }
 0x21b   :  { %v1336_v47 = vpop.permute.xlu2 %1335 }
 0x21c   :  { %v914_v43 = vpop.permute.xlu1 %913  ;;  %v1258_v20 = vpop.permute.xlu0 %1257 }
 0x21d   :  { %v1811_v59 = vsel %vm1771_vm13, %v1746_v53, %v1258_v20  ;;  %v1498_v11 = vsel %vm1446_vm8, %v1427_v0, %v914_v43  ;;  %v520_v43 = vrot.slane %v518_v45, 7 }
 0x21e   :  { %v1876_v7 = vsel %vm1836_vm14, %v1811_v59, %v1324_v2 }
 0x21f   :  { %6666 = vmatmul.msk.bf16.gmra.mxu0 %vm1916_vm15, %v1876_v7  ;;  %v684_v7 = vrot.slane %v521_v57, 1 }
 0x221   :  { %1067 = vrot.lane.b32.xlu2 %v8115_v15, %s7175_s19  ;;  %v685_v0 = vor.u32 %v684_v7, %v518_v45 }
 0x222   :  { %1199 = vrot.lane.b32.xlu1 %v8237_v49, %s7180_s26  ;;  %1133 = vrot.lane.b32.xlu0 %v8158_v42, %s7177_s21 }
 0x223   :  { %v1000_v2 = vpop.permute.xlu2 %999  ;;  %v8292_v29 = vsel %vm7264_vm5, %v685_v0, 0 }
 0x224   :  { %v1074_v48 = vpop.permute.xlu1 %1073  ;;  %v1010_v63 = vpop.permute.xlu0 %1009 }
 0x225   :  { %v1563_v60 = vsel %vm1511_vm9, %v1498_v11, %v1010_v63 }
 0x226   :  { %v1628_v27 = vsel %vm1576_vm10, %v1563_v60, %v1074_v48 }
 0x227   :  { %v1693_v37 = vsel %vm1641_vm11, %v1628_v27, %v1140_v55  ;;  %v523_v55 = vor.u32 %v521_v57, %v520_v43 }
 0x229   :  { %823 = vrot.lane.b32.xlu2 %v8061_v32, %s7176_s20  ;;  %v8267_v32 = vsel %vm7264_vm5, %v673_v4, 0  ;;  %v8301_v4 = vpop.f32.mrf.mxu0 }
 0x22a   :  { %919 = vrot.lane.b32.xlu1 %v8110_v13, %s7179_s23  ;;  %1263 = vrot.lane.b32.xlu0 %v8199_v28, %s7182_s28 }
 0x22b   :  { %v1196_v8 = vpop.permute.xlu2 %1195 }
 0x22c   :  { %v1270_v31 = vpop.permute.xlu1 %1269  ;;  %v1206_v41 = vpop.permute.xlu0 %1205 }
 0x22d   :  { %v1758_v26 = vsel %vm1706_vm12, %v1693_v37, %v1206_v41 }
 0x22e   :  { %v1823_v58 = vsel %vm1771_vm13, %v1758_v26, %v1270_v31 }
 0x22f   :  { %v1888_v13 = vsel %vm1836_vm14, %v1823_v58, %v1336_v47  ;;  %v8280_v47 = vsel %vm7256_vm4, 0, %v523_v55 }
 0x230   :  { %6672 = vmatmul.msk.bf16.vlgmr.msra.gmra.mxu3 %vm1916_vm15, %v1888_v13 }
 0x231   :  { %1329 = vrot.lane.b32.xlu2 %v8267_v32, %s7181_s27  ;;  %v8315_v57 = vpop.f32.mrf.mxu0 }
 0x232   :  { %1079 = vrot.lane.b32.xlu1 %v8163_v19, %s7175_s19  ;;  %1015 = vrot.lane.b32.xlu0 %v8188_v56, %s7178_s22 }
 0x233   :  { %v916_v53 = vpop.permute.xlu2 %915 }
 0x234   :  { %v904_v20 = vpop.permute.xlu1 %903  ;;  %v808_v59 = vpop.permute.xlu0 %807 }
 0x235   :  { %v1412_v60 = vsel %vm1349_vm7, %v7896_v33, %v808_v59 }
 0x236   :  { %v1488_v27 = vsel %vm1446_vm8, %v1412_v60, %v904_v20  ;;  %v8323_v20 = vld [vmem:[%s13525_s0 + $0x108] sm:$0xff] }
 0x237   :  { %v1553_v33 = vsel %vm1511_vm9, %v1488_v27, %v1000_v2  ;;  %v525_v7 = vshrl.u32 %v8323_v20, 16 }
 0x239   :  { %1145 = vrot.lane.b32.xlu2 %v8194_v17, %s7177_s21  ;;  %v527_v27 = vrot.slane %v525_v7, 7 }
 0x23a   :  { %1275 = vrot.lane.b32.xlu1 %v8252_v24, %s7182_s28  ;;  %1211 = vrot.lane.b32.xlu0 %v8280_v47, %s7180_s26 }
 0x23b   :  { %v1076_v48 = vpop.permute.xlu2 %1075 }
 0x23c   :  { %v1130_v63 = vpop.permute.xlu1 %1129  ;;  %v1064_v11 = vpop.permute.xlu0 %1063 }
 0x23d   :  { %v1618_v41 = vsel %vm1576_vm10, %v1553_v33, %v1064_v11  ;;  %v528_v33 = vshll.u32 %v8323_v20, 16 }
 0x23e   :  { %v1683_v26 = vsel %vm1641_vm11, %v1618_v41, %v1130_v63 }
 0x241   :  { %1341 = vrot.lane.b32.xlu2 %v8292_v29, %s7181_s27 }
 0x242   :  { %909 = vrot.lane.b32.xlu1 %v8158_v42, %s7179_s23  ;;  %813 = vrot.lane.b32.xlu0 %v8115_v15, %s7176_s20  ;;  %v1748_v15 = vsel %vm1706_vm12, %v1683_v26, %v1196_v8 }
 0x243   :  { %v1272_v45 = vpop.permute.xlu2 %1271 }
 0x244   :  { %v1260_v37 = vpop.permute.xlu1 %1259  ;;  %v820_v31 = vpop.permute.xlu0 %819 }
 0x245   :  { %v1813_v2 = vsel %vm1771_vm13, %v1748_v15, %v1260_v37  ;;  %v1430_v55 = vsel %vm1349_vm7, %v7983_v36, %v820_v31 }
 0x246   :  { %v1500_v8 = vsel %vm1446_vm8, %v1430_v55, %v916_v53 }
 0x249   :  { %1005 = vrot.lane.b32.xlu2 %v8237_v49, %s7178_s22 }
 0x24a   :  { %1135 = vrot.lane.b32.xlu1 %v8267_v32, %s7177_s21  ;;  %1069 = vrot.lane.b32.xlu0 %v8199_v28, %s7175_s19 }
 0x24b   :  { %v906_v42 = vpop.permute.xlu2 %905 }
 0x24c   :  { %v1012_v58 = vpop.permute.xlu1 %1011  ;;  %v1326_v13 = vpop.permute.xlu0 %1325 }
 0x24d   :  { %v1878_v43 = vsel %vm1836_vm14, %v1813_v2, %v1326_v13  ;;  %v1565_v59 = vsel %vm1511_vm9, %v1500_v8, %v1012_v58  ;;  %v8359_v8 = vpop.f32.mrf.mxu0 }
 0x24e   :  { %6667 = vmatmul.msk.bf16.gmra.mxu0 %vm1916_vm15, %v1878_v43  ;;  %v1630_v60 = vsel %vm1576_vm10, %v1565_v59, %v1076_v48 }
 0x251   :  { %1201 = vrot.lane.b32.xlu2 %v8232_v38, %s7180_s26 }
 0x252   :  { %1265 = vrot.lane.b32.xlu1 %v7914_v46, %s7182_s28  ;;  %825 = vrot.lane.b32.xlu0 %v8163_v19, %s7176_s20  ;;  %v530_v19 = vor.u32 %v528_v33, %v527_v27 }
 0x253   :  { %v1132_v0 = vpop.permute.xlu2 %1131 }
 0x254   :  { %v1208_v63 = vpop.permute.xlu1 %1207  ;;  %v1142_v11 = vpop.permute.xlu0 %1141  ;;  %v8349_v2 = vsel %vm7256_vm4, 0, %v530_v19 }
 0x255   :  { %v1695_v53 = vsel %vm1641_vm11, %v1630_v60, %v1142_v11 }
 0x256   :  { %v1760_v37 = vsel %vm1706_vm12, %v1695_v53, %v1208_v63  ;;  %v8374_v53 = vpop.f32.mrf.mxu0 }
 0x257   :  { %v1825_v48 = vsel %vm1771_vm13, %v1760_v37, %v1272_v45 }
 0x259   :  { %921 = vrot.lane.b32.xlu2 %v8194_v17, %s7179_s23  ;;  %v686_v17 = vrot.slane %v528_v33, 1 }
 0x25a   :  { %1017 = vrot.lane.b32.xlu1 %v8280_v47, %s7178_s22  ;;  %1331 = vrot.lane.b32.xlu0 %v7957_v40, %s7181_s27 }
 0x25b   :  { %v1262_v31 = vpop.permute.xlu2 %1261  ;;  %v687_v45 = vor.u32 %v686_v17, %v525_v7 }
 0x25c   :  { %v810_v41 = vpop.permute.xlu1 %809  ;;  %v1338_v26 = vpop.permute.xlu0 %1337 }
 0x25d   :  { %v1890_v15 = vsel %vm1836_vm14, %v1825_v48, %v1338_v26  ;;  %v1415_v13 = vsel %vm1349_vm7, %v7930_v16, %v810_v41  ;;  %v8364_v63 = vsel %vm7264_vm5, %v687_v45, 0 }
 0x25e   :  { %6673 = vmatmul.msk.bf16.gmra.mxu3 %vm1916_vm15, %v1890_v15  ;;  %v1490_v59 = vsel %vm1446_vm8, %v1415_v13, %v906_v42 }
 0x261   :  { %1081 = vrot.lane.b32.xlu2 %v8252_v24, %s7175_s19 }
 0x262   :  { %1213 = vrot.lane.b32.xlu1 %v8349_v2, %s7180_s26  ;;  %1147 = vrot.lane.b32.xlu0 %v8292_v29, %s7177_s21 }
 0x263   :  { %v1014_v58 = vpop.permute.xlu2 %1013 }
 0x264   :  { %v1066_v43 = vpop.permute.xlu1 %1065  ;;  %v1002_v55 = vpop.permute.xlu0 %1001 }
 0x265   :  { %v1555_v11 = vsel %vm1511_vm9, %v1490_v59, %v1002_v55 }
 0x266   :  { %v1620_v42 = vsel %vm1576_vm10, %v1555_v11, %v1066_v43 }
 0x267   :  { %v1685_v27 = vsel %vm1641_vm11, %v1620_v42, %v1132_v0  ;;  %v8387_v0 = vpop.f32.mrf.mxu0 }
 0x269   :  { %1277 = vrot.lane.b32.xlu2 %v8323_v20, %s7182_s28 }
 0x26a   :  { %815 = vrot.lane.b32.xlu1 %v8199_v28, %s7176_s20  ;;  %1343 = vrot.lane.b32.xlu0 %v8364_v63, %s7181_s27 }
 0x26b   :  { %v1210_v16 = vpop.permute.xlu2 %1209 }
 0x26c   :  { %v822_v7 = vpop.permute.xlu1 %821  ;;  %v1198_v60 = vpop.permute.xlu0 %1197 }
 0x26d   :  { %v1750_v33 = vsel %vm1706_vm12, %v1685_v27, %v1198_v60 }
 0x26e   :  { %v1815_v37 = vsel %vm1771_vm13, %v1750_v33, %v1262_v31 }
 0x271   :  { %911 = vrot.lane.b32.xlu2 %v8267_v32, %s7179_s23  ;;  %v1433_v32 = vsel %vm1349_vm7, %v8003_v54, %v822_v7  ;;  %v7033_v54 = vld [vmem:[%s13525_s0 + $0x110] sm:$0xff] }
 0x272   :  { %1071 = vrot.lane.b32.xlu1 %v7914_v46, %s7175_s19  ;;  %1007 = vrot.lane.b32.xlu0 %v8232_v38, %s7178_s22  ;;  %v532_v11 = vshrl.u32 %v7033_v54, 16 }
 0x273   :  { %v812_v28 = vpop.permute.xlu2 %811 }
 0x274   :  { %v1328_v19 = vpop.permute.xlu1 %1327  ;;  %v918_v48 = vpop.permute.xlu0 %917  ;;  %v534_v7 = vrot.slane %v532_v11, 7  ;;  %v1418_v33 = vsel %vm1349_vm7, %v8055_v61, %v812_v28 }
 0x275   :  { %v1880_v41 = vsel %vm1836_vm14, %v1815_v37, %v1328_v19  ;;  %v1502_v46 = vsel %vm1446_vm8, %v1433_v32, %v918_v48  ;;  %v7034_v19 = vld [vmem:[%s13525_s0 + $0x118] sm:$0xff] }
 0x276   :  { %6668 = vmatmul.msk.bf16.gmra.mxu0 %vm1916_vm15, %v1880_v41  ;;  %v1567_v15 = vsel %vm1511_vm9, %v1502_v46, %v1014_v58  ;;  %v539_v61 = vshrl.u32 %v7034_v19, 16 }
 0x279   :  { %1137 = vrot.lane.b32.xlu2 %v7957_v40, %s7177_s21  ;;  %v8403_v40 = vpop.f32.mrf.mxu0 }
 0x27a   :  { %827 = vrot.lane.b32.xlu1 %v8252_v24, %s7176_s20  ;;  %1203 = vrot.lane.b32.xlu0 %v7983_v36, %s7180_s26  ;;  %v535_v36 = vshll.u32 %v7033_v54, 16 }
 0x27b   :  { %v1068_v38 = vpop.permute.xlu2 %1067 }
 0x27c   :  { %v1144_v31 = vpop.permute.xlu1 %1143  ;;  %v1078_v26 = vpop.permute.xlu0 %1077  ;;  %v537_v27 = vor.u32 %v535_v36, %v534_v7 }
 0x27d   :  { %v1632_v17 = vsel %vm1576_vm10, %v1567_v15, %v1078_v26  ;;  %v541_v15 = vrot.slane %v539_v61, 7 }
 0x27e   :  { %v1697_v45 = vsel %vm1641_vm11, %v1632_v17, %v1144_v31  ;;  %v618_v48 = vsel %vm7256_vm4, 0, %v537_v27  ;;  %v542_v17 = vshll.u32 %v7034_v19, 16 }
 0x27f   :  { %v1762_v58 = vsel %vm1706_vm12, %v1697_v45, %v1210_v16 }
 0x281   :  { %1267 = vrot.lane.b32.xlu2 %v7938_v62, %s7182_s28  ;;  %v688_v62 = vrot.slane %v535_v36, 1  ;;  %v8416_v60 = vpop.f32.mrf.mxu0 }
 0x282   :  { %1333 = vrot.lane.b32.xlu1 %v7997_v51, %s7181_s27  ;;  %923 = vrot.lane.b32.xlu0 %v8292_v29, %s7179_s23 }
 0x283   :  { %v824_v24 = vpop.permute.xlu2 %823  ;;  %v689_v51 = vor.u32 %v688_v62, %v532_v11 }
 0x284   :  { %v1340_v13 = vpop.permute.xlu1 %1339  ;;  %v1274_v43 = vpop.permute.xlu0 %1273  ;;  %v1436_v7 = vsel %vm1349_vm7, %v8094_v23, %v824_v24 }
 0x285   :  { %v1827_v55 = vsel %vm1771_vm13, %v1762_v58, %v1274_v43  ;;  %v765_v37 = vsel %vm7264_vm5, %v689_v51, 0 }
 0x286   :  { %v1892_v59 = vsel %vm1836_vm14, %v1827_v55, %v1340_v13  ;;  %v544_v13 = vor.u32 %v542_v17, %v541_v15 }
 0x287   :  { %6674 = vmatmul.msk.bf16.gmra.mxu3 %vm1916_vm15, %v1892_v59 }
 0x289   :  { %1019 = vrot.lane.b32.xlu2 %v8349_v2, %s7178_s22  ;;  %v8437_v32 = vpop.f32.mrf.mxu0 }
 0x28a   :  { %1083 = vrot.lane.b32.xlu0 %v8323_v20, %s7175_s19  ;;  %1149 = vrot.lane.b32.xlu1 %v8364_v63, %s7177_s21 }
 0x28b   :  { %v1330_v29 = vpop.permute.xlu2 %1329 }
 0x28c   :  { %v1004_v16 = vpop.permute.xlu1 %1003  ;;  %v908_v42 = vpop.permute.xlu0 %907 }
 0x28d   :  { %v1492_v41 = vsel %vm1446_vm8, %v1418_v33, %v908_v42 }
 0x28e   :  { %v1557_v26 = vsel %vm1511_vm9, %v1492_v41, %v1004_v16 }
 0x28f   :  { %v1622_v45 = vsel %vm1576_vm10, %v1557_v26, %v1068_v38 }
 0x291   :  { %1215 = vrot.lane.b32.xlu2 %v618_v48, %s7180_s26  ;;  %v8447_v58 = vpop.f32.mrf.mxu0 }
 0x292   :  { %1279 = vrot.lane.b32.xlu0 %v7033_v54, %s7182_s28  ;;  %1345 = vrot.lane.b32.xlu1 %v765_v37, %s7181_s27 }
 0x293   :  { %v1146_v28 = vpop.permute.xlu2 %1145 }
 0x294   :  { %v1200_v46 = vpop.permute.xlu1 %1199  ;;  %v1134_v31 = vpop.permute.xlu0 %1133 }
 0x295   :  { %v1687_v36 = vsel %vm1641_vm11, %v1622_v45, %v1134_v31 }
 0x296   :  { %v1752_v59 = vsel %vm1706_vm12, %v1687_v36, %v1200_v46 }
 0x299   :  { %829 = vrot.lane.b32.xlu2 %v8323_v20, %s7176_s20  ;;  %v619_v20 = vsel %vm7256_vm4, 0, %v544_v13 }
 0x29a   :  { %925 = vrot.lane.b32.xlu0 %v8364_v63, %s7179_s23  ;;  %1021 = vrot.lane.b32.xlu1 %v618_v48, %s7178_s22  ;;  %v690_v63 = vrot.slane %v542_v17, 1 }
 0x29b   :  { %v1342_v43 = vpop.permute.xlu2 %1341 }
 0x29c   :  { %v920_v55 = vpop.permute.xlu1 %919  ;;  %v1264_v11 = vpop.permute.xlu0 %1263  ;;  %v691_v51 = vor.u32 %v690_v63, %v539_v61 }
 0x29d   :  { %v1817_v38 = vsel %vm1771_vm13, %v1752_v59, %v1264_v11  ;;  %v1504_v33 = vsel %vm1446_vm8, %v1436_v7, %v920_v55 }
 0x29e   :  { %v1882_v62 = vsel %vm1836_vm14, %v1817_v38, %v1330_v29  ;;  %v8460_v29 = vpop.f32.mrf.mxu0 }
 0x29f   :  { %6669 = vmatmul.msk.bf16.gmra.mxu0 %vm1916_vm15, %v1882_v62 }
 0x2a1   :  { %1085 = vrot.lane.b32.xlu2 %v7033_v54, %s7175_s19  ;;  %v766_v54 = vsel %vm7264_vm5, %v691_v51, 0 }
 0x2a2   :  { %1151 = vrot.lane.b32.xlu0 %v765_v37, %s7177_s21  ;;  %1217 = vrot.lane.b32.xlu1 %v619_v20, %s7180_s26 }
 0x2a3   :  { %v1006_v16 = vpop.permute.xlu2 %1005 }
 0x2a4   :  { %v1080_v42 = vpop.permute.xlu1 %1079  ;;  %v1016_v27 = vpop.permute.xlu0 %1015 }
 0x2a5   :  { %v1569_v48 = vsel %vm1511_vm9, %v1504_v33, %v1016_v27 }
 0x2a6   :  { %v1634_v41 = vsel %vm1576_vm10, %v1569_v48, %v1080_v42  ;;  %v8470_v46 = vpop.f32.mrf.mxu0 }
 0x2a7   :  { %v1699_v24 = vsel %vm1641_vm11, %v1634_v41, %v1146_v28 }
 0x2a9   :  { %1281 = vrot.lane.b32.xlu2 %v7034_v19, %s7182_s28 }
 0x2aa   :  { %1347 = vrot.lane.b32.xlu0 %v766_v54, %s7181_s27 }
 0x2ab   :  { %v1202_v23 = vpop.permute.xlu2 %1201 }
 0x2ac   :  { %v1276_v37 = vpop.permute.xlu1 %1275  ;;  %v1212_v61 = vpop.permute.xlu0 %1211 }
 0x2ad   :  { %v1764_v31 = vsel %vm1706_vm12, %v1699_v24, %v1212_v61 }
 0x2ae   :  { %v1829_v26 = vsel %vm1771_vm13, %v1764_v31, %v1276_v37  ;;  %v8476_v36 = vpop.f32.mrf.mxu0 }
 0x2af   :  { %v1894_v15 = vsel %vm1836_vm14, %v1829_v26, %v1342_v43 }
 0x2b0   :  { %6675 = vmatmul.msk.bf16.gmra.mxu3 %vm1916_vm15, %v1894_v15 }
 0x2b3   :  { %v922_v19 = vpop.permute.xlu2 %921 }
 0x2b4   :  { %v910_v17 = vpop.permute.xlu1 %909  ;;  %v814_v45 = vpop.permute.xlu0 %813 }
 0x2b5   :  { %v1421_v28 = vsel %vm1349_vm7, %v8143_v14, %v814_v45 }
 0x2b6   :  { %v8480_v59 = vpop.f32.mrf.mxu0  ;;  %v1494_v38 = vsel %vm1446_vm8, %v1421_v28, %v910_v17 }
 0x2b7   :  { %v1559_v62 = vsel %vm1511_vm9, %v1494_v38, %v1006_v16 }
 0x2bb   :  { %v1082_v11 = vpop.permute.xlu2 %1081 }
 0x2bc   :  { %v1136_v13 = vpop.permute.xlu1 %1135  ;;  %v1070_v55 = vpop.permute.xlu0 %1069 }
 0x2bd   :  { %v1624_v63 = vsel %vm1576_vm10, %v1559_v62, %v1070_v55 }
 0x2be   :  { %v1689_v7 = vsel %vm1641_vm11, %v1624_v63, %v1136_v13  ;;  %v8486_v51 = vpop.f32.mrf.mxu0 }
 0x2bf   :  { %v1754_v27 = vsel %vm1706_vm12, %v1689_v7, %v1202_v23 }
 0x2c3   :  { %v1278_v42 = vpop.permute.xlu2 %1277 }
 0x2c4   :  { %v1266_v43 = vpop.permute.xlu1 %1265  ;;  %v826_v20 = vpop.permute.xlu0 %825 }
 0x2c5   :  { %v1819_v14 = vsel %vm1771_vm13, %v1754_v27, %v1266_v43  ;;  %v1439_v16 = vsel %vm1349_vm7, %v8188_v56, %v826_v20 }
 0x2c6   :  { %v8494_v41 = vpop.f32.mrf.mxu0  ;;  %v1506_v24 = vsel %vm1446_vm8, %v1439_v16, %v922_v19 }
 0x2cb   :  { %v912_v61 = vpop.permute.xlu2 %911 }
 0x2cc   :  { %v1018_v33 = vpop.permute.xlu1 %1017  ;;  %v1332_v48 = vpop.permute.xlu0 %1331 }
 0x2cd   :  { %v1884_v54 = vsel %vm1836_vm14, %v1819_v14, %v1332_v48  ;;  %v1571_v37 = vsel %vm1511_vm9, %v1506_v24, %v1018_v33 }
 0x2ce   :  { %6670 = vmatmul.msk.bf16.gmra.mxu0 %vm1916_vm15, %v1884_v54  ;;  %v1636_v26 = vsel %vm1576_vm10, %v1571_v37, %v1082_v11  ;;  %v8501_v45 = vpop.f32.mrf.mxu0 }
 0x2d3   :  { %v1138_v19 = vpop.permute.xlu2 %1137 }
 0x2d4   :  { %v1214_v31 = vpop.permute.xlu1 %1213  ;;  %v1148_v23 = vpop.permute.xlu0 %1147 }
 0x2d5   :  { %v1701_v15 = vsel %vm1641_vm11, %v1636_v26, %v1148_v23 }
 0x2d6   :  { %v1766_v17 = vsel %vm1706_vm12, %v1701_v15, %v1214_v31  ;;  %v8506_v38 = vpop.f32.mrf.mxu0 }
 0x2d7   :  { %v1831_v56 = vsel %vm1771_vm13, %v1766_v17, %v1278_v42 }
 0x2db   :  { %v1268_v63 = vpop.permute.xlu2 %1267 }
 0x2dc   :  { %v816_v13 = vpop.permute.xlu1 %815  ;;  %v1344_v55 = vpop.permute.xlu0 %1343 }
 0x2dd   :  { %v1896_v28 = vsel %vm1836_vm14, %v1831_v56, %v1344_v55  ;;  %v1424_v11 = vsel %vm1349_vm7, %v8237_v49, %v816_v13 }
 0x2de   :  { %6676 = vmatmul.msk.bf16.gmra.mxu3 %vm1916_vm15, %v1896_v28  ;;  %v1496_v20 = vsel %vm1446_vm8, %v1424_v11, %v912_v61  ;;  %v8512_v14 = vpop.f32.mrf.mxu0 }
 0x2e3   :  { %v1020_v16 = vpop.permute.xlu2 %1019 }
 0x2e4   :  { %v1072_v62 = vpop.permute.xlu1 %1071  ;;  %v1008_v43 = vpop.permute.xlu0 %1007 }
 0x2e5   :  { %v1561_v7 = vsel %vm1511_vm9, %v1496_v20, %v1008_v43 }
 0x2e6   :  { %v1626_v33 = vsel %vm1576_vm10, %v1561_v7, %v1072_v62  ;;  %v8518_v31 = vpop.f32.mrf.mxu0 }
 0x2e7   :  { %v1691_v48 = vsel %vm1641_vm11, %v1626_v33, %v1138_v19 }
 0x2eb   :  { %v1216_v15 = vpop.permute.xlu2 %1215 }
 0x2ec   :  { %v828_v42 = vpop.permute.xlu1 %827  ;;  %v1204_v27 = vpop.permute.xlu0 %1203 }
 0x2ed   :  { %v1756_v54 = vsel %vm1706_vm12, %v1691_v48, %v1204_v27  ;;  %v1442_v23 = vsel %vm1349_vm7, %v8280_v47, %v828_v42 }
 0x2ee   :  { %v1821_v49 = vsel %vm1771_vm13, %v1756_v54, %v1268_v63  ;;  %v8527_v28 = vpop.f32.mrf.mxu0 }
 0x2f3   :  { %v830_v47 = vpop.permute.xlu2 %829 }
 0x2f4   :  { %v1334_v24 = vpop.permute.xlu1 %1333  ;;  %v924_v37 = vpop.permute.xlu0 %923  ;;  %v1445_v42 = vsel %vm1349_vm7, %v8349_v2, %v830_v47  ;;  %v2228_v47 = vmul.f32 %v7925_v50, %v7925_v50 }
 0x2f5   :  { %v1886_v61 = vsel %vm1836_vm14, %v1821_v49, %v1334_v24  ;;  %v1508_v26 = vsel %vm1446_vm8, %v1442_v23, %v924_v37 }
 0x2f6   :  { %6671 = vmatmul.msk.bf16.gmra.mxu0 %vm1916_vm15, %v1886_v61  ;;  %v1573_v13 = vsel %vm1511_vm9, %v1508_v26, %v1020_v16  ;;  %v8533_v7 = vpop.f32.mrf.mxu0 }
 0x2fb   :  { %v1086_v54 = vpop.permute.xlu2 %1085 }
 0x2fc   :  { %v1084_v17 = vpop.permute.xlu0 %1083  ;;  %v1150_v56 = vpop.permute.xlu1 %1149 }
 0x2fd   :  { %v1638_v55 = vsel %vm1576_vm10, %v1573_v13, %v1084_v17  ;;  %v2226_v17 = vmul.f32 %v7874_v5, %v7874_v5  ;;  %v2156_v13 = vadd.f32 %v7874_v5, %v7853_v34 }
 0x2fe   :  { %v1703_v19 = vsel %vm1641_vm11, %v1638_v55, %v1150_v56  ;;  %v8539_v16 = vpop.f32.mrf.mxu0  ;;  %v2225_v56 = vmul.f32 %v7853_v34, %v7853_v34  ;;  %v2227_v55 = vmul.f32 %v7905_v22, %v7905_v22 }
 0x2ff   :  { %v1768_v11 = vsel %vm1706_vm12, %v1703_v19, %v1216_v15 }
 0x303   :  { %v1282_v2 = vpop.permute.xlu2 %1281 }
 0x304   :  { %v1280_v62 = vpop.permute.xlu0 %1279  ;;  %v1346_v43 = vpop.permute.xlu1 %1345 }
 0x305   :  { %v1833_v20 = vsel %vm1771_vm13, %v1768_v11, %v1280_v62 }
 0x306   :  { %v1898_v63 = vsel %vm1836_vm14, %v1833_v20, %v1346_v43  ;;  %v8544_v26 = vpop.f32.mrf.mxu0  ;;  %v2157_v43 = vadd.f32 %v2156_v13, %v7905_v22  ;;  %v2289_v20 = vadd.f32 %v2226_v17, %v2225_v56  ;;  %v2233_v13 = vmul.f32 %v8070_v44, %v8070_v44 }
 0x307   :  { %6677 = vmatmul.msk.bf16.gmra.mxu3 %vm1916_vm15, %v1898_v63 }
 0x308   :  { %v2290_v63 = vadd.f32 %v2289_v20, %v2227_v55 }
 0x30c   :  { %v926_v27 = vpop.permute.xlu0 %925  ;;  %v1022_v33 = vpop.permute.xlu1 %1021 }
 0x30d   :  { %v1510_v48 = vsel %vm1446_vm8, %v1445_v42, %v926_v27  ;;  %v2158_v42 = vadd.f32 %v2157_v43, %v7925_v50  ;;  %v2229_v27 = vmul.f32 %v7952_v35, %v7952_v35 }
 0x30e   :  { %v1575_v49 = vsel %vm1511_vm9, %v1510_v48, %v1022_v33  ;;  %v2291_v48 = vadd.f32 %v2290_v63, %v2228_v47  ;;  %v2235_v47 = vmul.f32 %v8105_v25, %v8105_v25 }
 0x30f   :  { %v1640_v37 = vsel %vm1576_vm10, %v1575_v49, %v1086_v54  ;;  %v2159_v33 = vadd.f32 %v2158_v42, %v7952_v35  ;;  %v2230_v54 = vmul.f32 %v7986_v39, %v7986_v39  ;;  %v8567_v49 = vpop.f32.mrf.mxu0 }
 0x314   :  { %v1152_v24 = vpop.permute.xlu0 %1151  ;;  %v1218_v23 = vpop.permute.xlu1 %1217 }
 0x315   :  { %v1705_v61 = vsel %vm1641_vm11, %v1640_v37, %v1152_v24  ;;  %v2292_v24 = vadd.f32 %v2291_v48, %v2229_v27  ;;  %v2160_v37 = vadd.f32 %v2159_v33, %v7986_v39  ;;  %v2236_v27 = vmul.f32 %v8130_v30, %v8130_v30 }
 0x316   :  { %v1770_v15 = vsel %vm1706_vm12, %v1705_v61, %v1218_v23  ;;  %v2231_v61 = vmul.f32 %v8012_v52, %v8012_v52 }
 0x317   :  { %v1835_v19 = vsel %vm1771_vm13, %v1770_v15, %v1282_v2  ;;  %v2161_v23 = vadd.f32 %v2160_v37, %v8012_v52  ;;  %v2293_v15 = vadd.f32 %v2292_v24, %v2230_v54  ;;  %v2232_v2 = vmul.f32 %v8040_v6, %v8040_v6 }
 0x318   :  { %v2237_v54 = vmul.f32 %v8152_v1, %v8152_v1 }
 0x319   :  { %v2294_v17 = vadd.f32 %v2293_v15, %v2231_v61  ;;  %v2162_v56 = vadd.f32 %v2161_v23, %v8040_v6  ;;  %v2238_v61 = vmul.f32 %v8177_v18, %v8177_v18 }
 0x31b   :  { %v2163_v55 = vadd.f32 %v2162_v56, %v8070_v44 }
 0x31c   :  { %v1348_v11 = vpop.permute.xlu0 %1347 }
 0x31d   :  { %v1900_v62 = vsel %vm1836_vm14, %v1835_v19, %v1348_v11  ;;  %v2295_v19 = vadd.f32 %v2294_v17, %v2232_v2  ;;  %v2234_v11 = vmul.f32 %v8089_v21, %v8089_v21  ;;  %v2164_v20 = vadd.f32 %v2163_v55, %v8089_v21  ;;  %v8598_v17 = vpop.f32.mrf.mxu3 }
 0x31e   :  { %6678 = vmatmul.msk.bf16.gmra.mxu3 %vm1916_vm15, %v1900_v62  ;;  %v8581_v62 = vpop.f32.mrf.mxu0  ;;  %v2239_v2 = vmul.f32 %v8209_v10, %v8209_v10  ;;  %13900 = vst [vmem:[#allocation12_spill] sm:$0xff] %v8598_v17 }
 0x31f   :  { %v2296_v43 = vadd.f32 %v2295_v19, %v2233_v13  ;;  %v2165_v63 = vadd.f32 %v2164_v20, %v8105_v25  ;;  %v2240_v19 = vmul.f32 %v8228_v3, %v8228_v3  ;;  %v2241_v20 = vmul.f32 %v8301_v4, %v8301_v4 }
 0x321   :  { %v2297_v42 = vadd.f32 %v2296_v43, %v2234_v11  ;;  %v2166_v48 = vadd.f32 %v2165_v63, %v8130_v30 }
 0x323   :  { %v2298_v33 = vadd.f32 %v2297_v42, %v2235_v47  ;;  %v2167_v24 = vadd.f32 %v2166_v48, %v8152_v1  ;;  %v2242_v42 = vmul.f32 %v8315_v57, %v8315_v57  ;;  %v2243_v48 = vmul.f32 %v8359_v8, %v8359_v8 }
 0x325   :  { %v2299_v37 = vadd.f32 %v2298_v33, %v2236_v27  ;;  %v2168_v15 = vadd.f32 %v2167_v24, %v8177_v18 }
 0x326   :  { %v8600_v56 = vpop.f32.mrf.mxu0 }
 0x327   :  { %v2300_v23 = vadd.f32 %v2299_v37, %v2237_v54  ;;  %v2169_v13 = vadd.f32 %v2168_v15, %v8209_v10 }
 0x329   :  { %v2301_v55 = vadd.f32 %v2300_v23, %v2238_v61  ;;  %v2170_v43 = vadd.f32 %v2169_v13, %v8228_v3  ;;  %v2244_v61 = vmul.f32 %v8374_v53, %v8374_v53  ;;  %v8619_v23 = vpop.f32.mrf.mxu3  ;;  %v2245_v13 = vmul.f32 %v8387_v0, %v8387_v0 }
 0x32a   :  { %13901 = vst [vmem:[#allocation13_spill] sm:$0xff] %v8619_v23 }
 0x32b   :  { %v2302_v11 = vadd.f32 %v2301_v55, %v2239_v2  ;;  %v2171_v47 = vadd.f32 %v2170_v43, %v8301_v4 }
 0x32d   :  { %v2303_v63 = vadd.f32 %v2302_v11, %v2240_v19  ;;  %v2172_v33 = vadd.f32 %v2171_v47, %v8315_v57  ;;  %v2246_v11 = vmul.f32 %v8403_v40, %v8403_v40  ;;  %v2247_v47 = vmul.f32 %v8416_v60, %v8416_v60 }
 0x32e   :  { %v8614_v54 = vpop.f32.mrf.mxu0 }
 0x32f   :  { %v2304_v27 = vadd.f32 %v2303_v63, %v2241_v20  ;;  %v2173_v24 = vadd.f32 %v2172_v33, %v8359_v8 }
 0x331   :  { %v2305_v37 = vadd.f32 %v2304_v27, %v2242_v42  ;;  %v2174_v2 = vadd.f32 %v2173_v24, %v8374_v53  ;;  %v2248_v27 = vmul.f32 %v8437_v32, %v8437_v32  ;;  %v8633_v33 = vpop.f32.mrf.mxu3 }
 0x332   :  { %13902 = vst [vmem:[#allocation14_spill] sm:$0xff] %v8633_v33 }
 0x333   :  { %v2306_v15 = vadd.f32 %v2305_v37, %v2243_v48  ;;  %v2175_v55 = vadd.f32 %v2174_v2, %v8387_v0 }
 0x335   :  { %v2307_v19 = vadd.f32 %v2306_v15, %v2244_v61  ;;  %v2176_v20 = vadd.f32 %v2175_v55, %v8403_v40  ;;  %v2249_v61 = vmul.f32 %v8447_v58, %v8447_v58 }
 0x336   :  { %v8635_v48 = vpop.f32.mrf.mxu0 }
 0x337   :  { %v2308_v43 = vadd.f32 %v2307_v19, %v2245_v13  ;;  %v2177_v63 = vadd.f32 %v2176_v20, %v8416_v60  ;;  %v2250_v13 = vmul.f32 %v8460_v29, %v8460_v29 }
 0x339   :  { %v2309_v42 = vadd.f32 %v2308_v43, %v2246_v11  ;;  %v2178_v37 = vadd.f32 %v2177_v63, %v8437_v32  ;;  %v2251_v11 = vmul.f32 %v8470_v46, %v8470_v46 }
 0x33b   :  { %v2310_v24 = vadd.f32 %v2309_v42, %v2247_v47  ;;  %v2179_v15 = vadd.f32 %v2178_v37, %v8447_v58  ;;  %v2252_v47 = vmul.f32 %v8476_v36, %v8476_v36  ;;  %v8654_v37 = vpop.f32.mrf.mxu3 }
 0x33c   :  { %13903 = vst [vmem:[#allocation15_spill] sm:$0xff] %v8654_v37 }
 0x33d   :  { %v2311_v2 = vadd.f32 %v2310_v24, %v2248_v27  ;;  %v2180_v19 = vadd.f32 %v2179_v15, %v8460_v29  ;;  %v2253_v24 = vmul.f32 %v8480_v59, %v8480_v59 }
 0x33e   :  { %v8649_v63 = vpop.f32.mrf.mxu0 }
 0x33f   :  { %v2312_v55 = vadd.f32 %v2311_v2, %v2249_v61  ;;  %v2181_v43 = vadd.f32 %v2180_v19, %v8470_v46  ;;  %v2254_v2 = vmul.f32 %v8486_v51, %v8486_v51  ;;  %v2255_v19 = vmul.f32 %v8494_v41, %v8494_v41 }
 0x341   :  { %v2313_v20 = vadd.f32 %v2312_v55, %v2250_v13  ;;  %v2182_v27 = vadd.f32 %v2181_v43, %v8476_v36 }
 0x343   :  { %v2314_v42 = vadd.f32 %v2313_v20, %v2251_v11  ;;  %v2183_v61 = vadd.f32 %v2182_v27, %v8480_v59  ;;  %v2256_v20 = vmul.f32 %v8501_v45, %v8501_v45 }
 0x345   :  { %v2315_v15 = vadd.f32 %v2314_v42, %v2252_v47  ;;  %v2184_v55 = vadd.f32 %v2183_v61, %v8486_v51  ;;  %v2257_v47 = vmul.f32 %v8506_v38, %v8506_v38  ;;  %v8668_v42 = vpop.f32.mrf.mxu3 }
 0x346   :  { %v8670_v27 = vpop.f32.mrf.mxu0 }
 0x347   :  { %v2316_v13 = vadd.f32 %v2315_v15, %v2253_v24  ;;  %v2185_v11 = vadd.f32 %v2184_v55, %v8494_v41  ;;  %v2258_v15 = vmul.f32 %v8512_v14, %v8512_v14  ;;  %v2259_v55 = vmul.f32 %v8518_v31, %v8518_v31 }
 0x349   :  { %v2317_v43 = vadd.f32 %v2316_v13, %v2254_v2  ;;  %v2186_v9 = vadd.f32 %v2185_v11, %v8501_v45 }
 0x34b   :  { %v2318_v12 = vadd.f32 %v2317_v43, %v2255_v19  ;;  %v2187_v24 = vadd.f32 %v2186_v9, %v8506_v38  ;;  %v2260_v43 = vmul.f32 %v8527_v28, %v8527_v28  ;;  %v2261_v9 = vmul.f32 %v8533_v7, %v8533_v7 }
 0x34d   :  { %v2319_v61 = vadd.f32 %v2318_v12, %v2256_v20  ;;  %v2188_v13 = vadd.f32 %v2187_v24, %v8512_v14  ;;  %v2262_v24 = vmul.f32 %v8539_v16, %v8539_v16 }
 0x34e   :  { %v8684_v12 = vpop.f32.mrf.mxu0 }
 0x34f   :  { %v2320_v2 = vadd.f32 %v2319_v61, %v2257_v47  ;;  %v2189_v19 = vadd.f32 %v2188_v13, %v8518_v31  ;;  %13904 = vst [vmem:[#allocation16_spill] sm:$0xff] %v8684_v12  ;;  %v8689_v61 = vpop.f32.mrf.mxu3  ;;  %v2263_v13 = vmul.f32 %v8544_v26, %v8544_v26 }
 0x351   :  { %v2321_v11 = vadd.f32 %v2320_v2, %v2258_v15  ;;  %v2190_v52 = vadd.f32 %v2189_v19, %v8527_v28 }
 0x353   :  { %v2322_v6 = vadd.f32 %v2321_v11, %v2259_v55  ;;  %v2191_v20 = vadd.f32 %v2190_v52, %v8533_v7  ;;  %v2264_v11 = vmul.f32 %v8567_v49, %v8567_v49 }
 0x355   :  { %v2323_v47 = vadd.f32 %v2322_v6, %v2260_v43  ;;  %v2192_v2 = vadd.f32 %v2191_v20, %v8539_v16  ;;  %v2265_v6 = vmul.f32 %v8581_v62, %v8581_v62  ;;  %v2266_v20 = vmul.f32 %v8600_v56, %v8600_v56 }
 0x356   :  { %v8705_v35 = vpop.f32.mrf.mxu0 }
 0x357   :  { %v2324_v15 = vadd.f32 %v2323_v47, %v2261_v9  ;;  %v2193_v55 = vadd.f32 %v2192_v2, %v8544_v26  ;;  %v8703_v47 = vpop.f32.mrf.mxu3  ;;  %13906 = vst [vmem:[#allocation18_spill] sm:$0xff] %v8705_v35  ;;  %v2267_v2 = vmul.f32 %v8614_v54, %v8614_v54 }
 0x358   :  { %13905 = vst [vmem:[#allocation17_spill] sm:$0xff] %v8703_v47 }
 0x359   :  { %v2325_v19 = vadd.f32 %v2324_v15, %v2262_v24  ;;  %v2194_v52 = vadd.f32 %v2193_v55, %v8567_v49 }
 0x35b   :  { %v2326_v39 = vadd.f32 %v2325_v19, %v2263_v13  ;;  %v2195_v43 = vadd.f32 %v2194_v52, %v8581_v62  ;;  %v2268_v19 = vmul.f32 %v8635_v48, %v8635_v48  ;;  %v2269_v52 = vmul.f32 %v8649_v63, %v8649_v63 }
 0x35d   :  { %v2327_v9 = vadd.f32 %v2326_v39, %v2264_v11  ;;  %v2196_v15 = vadd.f32 %v2195_v43, %v8600_v56  ;;  %v2270_v43 = vmul.f32 %v8670_v27, %v8670_v27 }
 0x35f   :  { %v2328_v24 = vadd.f32 %v2327_v9, %v2265_v6  ;;  %v2197_v13 = vadd.f32 %v2196_v15, %v8614_v54  ;;  %v8724_v15 = vpop.f32.mrf.mxu3 }
 0x360   :  { %13908 = vst [vmem:[#allocation20_spill] sm:$0xff] %v8724_v15 }
 0x361   :  { %v2329_v55 = vadd.f32 %v2328_v24, %v2266_v20  ;;  %v2198_v11 = vadd.f32 %v2197_v13, %v8635_v48  ;;  %v2271_v24 = vmul.f32 %v8684_v12, %v8684_v12 }
 0x363   :  { %v2330_v39 = vadd.f32 %v2329_v55, %v2267_v2  ;;  %v2199_v50 = vadd.f32 %v2198_v11, %v8649_v63  ;;  %v2272_v55 = vmul.f32 %v8705_v35, %v8705_v35 }
 0x365   :  { %v2331_v6 = vadd.f32 %v2330_v39, %v2268_v19  ;;  %v2200_v20 = vadd.f32 %v2199_v50, %v8670_v27 }
 0x367   :  { %v2332_v22 = vadd.f32 %v2331_v6, %v2269_v52  ;;  %v2201_v2 = vadd.f32 %v2200_v20, %v8684_v12  ;;  %v2275_v20 = vmul.f32 %v8598_v17, %v8598_v17 }
 0x369   :  { %v2333_v13 = vadd.f32 %v2332_v22, %v2270_v43  ;;  %v2202_v39 = vadd.f32 %v2201_v2, %v8705_v35  ;;  %v8738_v43 = vpop.f32.mrf.mxu3 }
 0x36a   :  { %13910 = vst [vmem:[#allocation22_spill] sm:$0xff] %v8738_v43 }
 0x36b   :  { %v2334_v19 = vadd.f32 %v2333_v13, %v2271_v24  ;;  %v2276_v13 = vmul.f32 %v8619_v23, %v8619_v23 }
 0x36d   :  { %v2335_v50 = vadd.f32 %v2334_v19, %v2272_v55 }
 0x373   :  { %v8719_v9 = vpop.f32.mrf.mxu0 }
 0x374   :  { %13907 = vst [vmem:[#allocation19_spill] sm:$0xff] %v8719_v9  ;;  %v2273_v11 = vmul.f32 %v8719_v9, %v8719_v9  ;;  %v2203_v52 = vadd.f32 %v2202_v39, %v8719_v9  ;;  %v2277_v39 = vmul.f32 %v8633_v33, %v8633_v33 }
 0x376   :  { %v2336_v5 = vadd.f32 %v2335_v50, %v2273_v11 }
 0x37b   :  { %v8733_v6 = vpop.f32.mrf.mxu0 }
 0x37c   :  { %13909 = vst [vmem:[#allocation21_spill] sm:$0xff] %v8733_v6  ;;  %v2204_v34 = vadd.f32 %v2203_v52, %v8733_v6  ;;  %v2274_v22 = vmul.f32 %v8733_v6, %v8733_v6  ;;  %v2278_v6 = vmul.f32 %v8654_v37, %v8654_v37 }
 0x37e   :  { %v2205_v24 = vadd.f32 %v2204_v34, %v8598_v17  ;;  %v2337_v2 = vadd.f32 %v2336_v5, %v2274_v22  ;;  %v8752_v34 = vpop.f32.mrf.mxu3  ;;  %v2279_v22 = vmul.f32 %v8668_v42, %v8668_v42 }
 0x37f   :  { %13911 = vst [vmem:[#allocation23_spill] sm:$0xff] %v8752_v34 }
 0x380   :  { %v2206_v55 = vadd.f32 %v2205_v24, %v8619_v23  ;;  %v2338_v19 = vadd.f32 %v2337_v2, %v2275_v20  ;;  %v2280_v2 = vmul.f32 %v8689_v61, %v8689_v61 }
 0x382   :  { %v2207_v11 = vadd.f32 %v2206_v55, %v8633_v33  ;;  %v2339_v52 = vadd.f32 %v2338_v19, %v2276_v13 }
 0x384   :  { %v2340_v50 = vadd.f32 %v2339_v52, %v2277_v39  ;;  %v2208_v9 = vadd.f32 %v2207_v11, %v8654_v37  ;;  %v2281_v39 = vmul.f32 %v8703_v47, %v8703_v47  ;;  %v2282_v52 = vmul.f32 %v8724_v15, %v8724_v15 }
 0x386   :  { %v2341_v5 = vadd.f32 %v2340_v50, %v2278_v6  ;;  %v2209_v20 = vadd.f32 %v2208_v9, %v8668_v42 }
 0x388   :  { %v2342_v24 = vadd.f32 %v2341_v5, %v2279_v22  ;;  %v2210_v13 = vadd.f32 %v2209_v20, %v8689_v61  ;;  %v2283_v22 = vmul.f32 %v8738_v43, %v8738_v43 }
 0x38a   :  { %v8760_v55 = vpop.f32.mrf.mxu3  ;;  %v2343_v19 = vadd.f32 %v2342_v24, %v2280_v2  ;;  %v2211_v11 = vadd.f32 %v2210_v13, %v8703_v47  ;;  %v2284_v2 = vmul.f32 %v8752_v34, %v8752_v34 }
 0x38b   :  { %13912 = vst [vmem:[#allocation24_spill] sm:$0xff] %v8760_v55 }
 0x38c   :  { %v2344_v6 = vadd.f32 %v2343_v19, %v2281_v39  ;;  %v2212_v9 = vadd.f32 %v2211_v11, %v8724_v15  ;;  %v8779_v19 = vld [vmem:[%s13527_s4 + $0x78] sm:$0xff] }
 0x38d   :  { %13914 = vst [vmem:[#allocation26_spill] sm:$0xff] %v8779_v19  ;;  %4002 = vmatpush.bf16.msra.mxu2 %v8779_v19 }
 0x38e   :  { %v2345_v50 = vadd.f32 %v2344_v6, %v2282_v52  ;;  %v2213_v20 = vadd.f32 %v2212_v9, %v8738_v43  ;;  %v2285_v52 = vmul.f32 %v8760_v55, %v8760_v55 }
 0x390   :  { %v2346_v24 = vadd.f32 %v2345_v50, %v2283_v22  ;;  %v2214_v13 = vadd.f32 %v2213_v20, %v8752_v34 }
 0x392   :  { %v8768_v5 = vpop.f32.mrf.mxu3  ;;  %v2347_v39 = vadd.f32 %v2346_v24, %v2284_v2  ;;  %v2215_v6 = vadd.f32 %v2214_v13, %v8760_v55 }
 0x393   :  { %13913 = vst [vmem:[#allocation25_spill] sm:$0xff] %v8768_v5  ;;  %v2286_v50 = vmul.f32 %v8768_v5, %v8768_v5 }
 0x394   :  { %v2348_v9 = vadd.f32 %v2347_v39, %v2285_v52  ;;  %v2216_v22 = vadd.f32 %v2215_v6, %v8768_v5  ;;  %v8791_v39 = vld [vmem:[%s13527_s4 + $0x70] sm:$0xff] }
 0x395   :  { %13915 = vst [vmem:[#allocation27_spill] sm:$0xff] %v8791_v39  ;;  %4003 = vmatpush.bf16.msra.mxu2 %v8791_v39  ;;  %v13953_v39 = vld [vmem:[#allocation14_spill] sm:$0xff] }
 0x396   :  { %v2349_v33 = vadd.f32 %v2348_v9, %v2286_v50 }
 0x3a1   :  { %v2149_v11 = vpop.f32.mrf.mxu3 }
 0x3a2   :  { %v2287_v20 = vmul.f32 %v2149_v11, %v2149_v11  ;;  %v2217_v37 = vadd.f32 %v2216_v22, %v2149_v11 }
 0x3a4   :  { %v2350_v17 = vadd.f32 %v2349_v33, %v2287_v20 }
 0x3a9   :  { %v2151_v23 = vpop.f32.mrf.mxu3 }
 0x3aa   :  { %v2218_v24 = vadd.f32 %v2217_v37, %v2151_v23  ;;  %v2288_v2 = vmul.f32 %v2151_v23, %v2151_v23 }
 0x3ac   :  { %v2219_v19 = vrot.slane %v2218_v24, 4  ;;  %v2351_v35 = vadd.f32 %v2350_v17, %v2288_v2 }
 0x3ae   :  { %v2220_v12 = vadd.f32 %v2219_v19, %v2218_v24  ;;  %v2352_v13 = vrot.slane %v2351_v35, 4 }
 0x3b0   :  { %v2221_v52 = vrot.slane %v2220_v12, 2  ;;  %v2353_v55 = vadd.f32 %v2352_v13, %v2351_v35 }
 0x3b2   :  { %v2222_v6 = vadd.f32 %v2221_v52, %v2220_v12  ;;  %v2354_v22 = vrot.slane %v2353_v55, 2  ;;  %v2154_v12 = vld [vmem:[%s13528_s2] sm:$0x1] }
 0x3b4   :  { %v2223_v9 = vrot.slane %v2222_v6, 1  ;;  %v2355_v50 = vadd.f32 %v2354_v22, %v2353_v55 }
 0x3b6   :  { %v2224_v33 = vadd.f32 %v2223_v9, %v2222_v6  ;;  %v2356_v37 = vrot.slane %v2355_v50, 1  ;;  %v2155_v6 = vld [vmem:[%s13529_s3] sm:$0x1] }
 0x3b8   :  { %v2357_v20 = vadd.f32 %v2356_v37, %v2355_v50  ;;  %v2358_v5 = vmul.f32 0.001953125, %v2224_v33 }
 0x3ba   :  { %v2359_v17 = vmul.f32 0.001953125, %v2357_v20  ;;  %v2360_v19 = vmul.f32 %v2358_v5, %v2358_v5 }
 0x3bc   :  { %v2361_v24 = vsub.f32 %v2359_v17, %v2360_v19  ;;  %v7044_v17 = vld [vmem:[%s13527_s4 + $0x38] sm:$0xff] }
 0x3bd   :  { %3833 = vmatpush.bf16.msra.mxu1 %v7044_v17  ;;  %7112 = vmatpush.bf16.msrb.mxu3 %v7044_v17 }
 0x3be   :  { %v2362_v2 = vadd.f32 1e-05, %v2361_v24 }
 0x3c0   :  { %7137 = vrsqrt.f32 %v2362_v2  ;;  %vm2369_vm1 = vweird.f32 %v2362_v2 }
 0x3c6   :  { %v7138_v34 = vpop.eup %7137 }
 0x3c7   :  { %v2364_v43 = vmul.f32 %v7138_v34, %v2362_v2  ;;  %vm2370_vm0 = vweird.f32 %v7138_v34 }
 0x3c8   :  { %vm2371_vm2 = vmor %vm2369_vm1, %vm2370_vm0 }
 0x3c9   :  { %v2365_v15 = vmul.f32 %v7138_v34, %v2364_v43 }
 0x3cb   :  { %v2366_v47 = vmul.f32 0.5, %v2365_v15 }
 0x3cd   :  { %v2367_v35 = vsub.f32 1.5, %v2366_v47 }
 0x3cf   :  { %v2368_v55 = vmul.f32 %v7138_v34, %v2367_v35 }
 0x3d1   :  { %v2372_v13 = vsel %vm2371_vm2, %v7138_v34, %v2368_v55 }
 0x3d2   :  { %v2373_v52 = vmul.f32 %v2372_v13, %v2154_v12  ;;  %v7043_v13 = vld [vmem:[%s13527_s4 + $0x30] sm:$0xff] }
 0x3d3   :  { %3834 = vmatpush.bf16.msra.mxu1 %v7043_v13  ;;  %7113 = vmatpush.bf16.msrb.mxu3 %v7043_v13 }
 0x3d4   :  { %v2374_v22 = vmul.f32 %v2373_v52, %v2358_v5  ;;  %v8800_v9 = vperm.slane %v2373_v52, 0 }
 0x3d6   :  { %v2375_v43 = vsub.f32 %v2155_v6, %v2374_v22  ;;  %v2439_v47 = vmul.f32 %v8800_v9, %v2149_v11  ;;  %v2440_v15 = vmul.f32 %v8800_v9, %v2151_v23  ;;  %v8814_v11 = vld [vmem:[%s13527_s4 + $0x68] sm:$0xff]  ;;  %v2385_v2 = vmul.f32 %v8800_v9, %v8070_v44 }
 0x3d7   :  { %13917 = vst [vmem:[#allocation29_spill] sm:$0xff] %v8814_v11  ;;  %v2386_v35 = vmul.f32 %v8800_v9, %v8089_v21  ;;  %v2387_v12 = vmul.f32 %v8800_v9, %v8105_v25  ;;  %v2388_v55 = vmul.f32 %v8800_v9, %v8130_v30  ;;  %4004 = vmatpush.bf16.msra.mxu2 %v8814_v11 }
 0x3d8   :  { %v8804_v50 = vperm.slane %v2375_v43, 0  ;;  %v2389_v44 = vmul.f32 %v8800_v9, %v8152_v1  ;;  %v2390_v21 = vmul.f32 %v8800_v9, %v8177_v18  ;;  %v2391_v25 = vmul.f32 %v8800_v9, %v8209_v10  ;;  %v8847_v1 = vld [vmem:[%s13527_s4 + $0x60] sm:$0xff] }
 0x3d9   :  { %v2392_v30 = vmul.f32 %v8800_v9, %v8228_v3  ;;  %v2393_v6 = vmul.f32 %v8800_v9, %v8301_v4  ;;  %v2394_v22 = vmul.f32 %v8800_v9, %v8315_v57  ;;  %v2395_v43 = vmul.f32 %v8800_v9, %v8359_v8  ;;  %13919 = vst [vmem:[#allocation31_spill] sm:$0xff] %v8847_v1 }
 0x3da   :  { %13916 = vst [vmem:[#allocation28_spill] sm:$0xff] %v8804_v50  ;;  %v2506_v33 = vadd.f32 %v8804_v50, %v2439_v47  ;;  %v2507_v37 = vadd.f32 %v8804_v50, %v2440_v15  ;;  %v2396_v18 = vmul.f32 %v8800_v9, %v8374_v53  ;;  %v2397_v10 = vmul.f32 %v8800_v9, %v8387_v0  ;;  %v7042_v0 = vld [vmem:[%s13527_s4 + $0x28] sm:$0xff] }
 0x3db   :  { %v2398_v3 = vmul.f32 %v8800_v9, %v8403_v40  ;;  %v2399_v4 = vmul.f32 %v8800_v9, %v8416_v60  ;;  %v2400_v57 = vmul.f32 %v8800_v9, %v8437_v32  ;;  %v2401_v8 = vmul.f32 %v8800_v9, %v8447_v58  ;;  %4005 = vmatpush.bf16.msra.mxu2 %v8847_v1  ;;  %v13949_v1 = vld [vmem:[#allocation12_spill] sm:$0xff] }
 0x3dc   :  { %v2570_v34 = vmax.f32 %v2506_v33, 0.0  ;;  %v2571_v20 = vmax.f32 %v2507_v37, 0.0  ;;  %v2402_v47 = vmul.f32 %v8800_v9, %v8460_v29  ;;  %v2403_v53 = vmul.f32 %v8800_v9, %v8470_v46  ;;  %3835 = vmatpush.bf16.msra.mxu1 %v7042_v0  ;;  %7114 = vmatpush.bf16.msrb.mxu3 %v7042_v0 }
 0x3dd   :  { %v2404_v40 = vmul.f32 %v8800_v9, %v8476_v36  ;;  %v2405_v60 = vmul.f32 %v8800_v9, %v8480_v59  ;;  %v2406_v32 = vmul.f32 %v8800_v9, %v8486_v51  ;;  %v2407_v58 = vmul.f32 %v8800_v9, %v8494_v41  ;;  %v8888_v59 = vld [vmem:[%s13527_s4 + $0x58] sm:$0xff] }
 0x3de   :  { %v2634_v5 = vpack.c.bf16 %v2570_v34, %v2570_v34  ;;  %v2635_v19 = vpack.c.bf16 %v2571_v20, %v2571_v20  ;;  %v2408_v29 = vmul.f32 %v8800_v9, %v8501_v45  ;;  %v2409_v46 = vmul.f32 %v8800_v9, %v8506_v38  ;;  %13920 = vst [vmem:[#allocation32_spill] sm:$0xff] %v8888_v59 }
 0x3df   :  { %v2410_v15 = vmul.f32 %v8800_v9, %v8512_v14  ;;  %v2411_v36 = vmul.f32 %v8800_v9, %v8518_v31  ;;  %v2412_v51 = vmul.f32 %v8800_v9, %v8527_v28  ;;  %v2413_v41 = vmul.f32 %v8800_v9, %v8533_v7  ;;  %4006 = vmatpush.bf16.msra.mxu2 %v8888_v59  ;;  %v7041_v7 = vld [vmem:[%s13527_s4 + $0x20] sm:$0xff] }
 0x3e0   :  { %v2762_v23 = vunpack.c.l.b16 %v2634_v5  ;;  %v2763_v24 = vunpack.c.l.b16 %v2635_v19  ;;  %v2414_v45 = vmul.f32 %v8800_v9, %v8539_v16  ;;  %v2415_v38 = vmul.f32 %v8800_v9, %v8544_v26  ;;  %3836 = vmatpush.bf16.msra.mxu1 %v7041_v7  ;;  %7115 = vmatpush.bf16.msrb.mxu3 %v7041_v7  ;;  %v13929_v7 = vld [vmem:[#allocation23_spill] sm:$0xff] }
 0x3e1   :  { %v2416_v14 = vmul.f32 %v8800_v9, %v8567_v49  ;;  %v2417_v31 = vmul.f32 %v8800_v9, %v8581_v62  ;;  %v2418_v33 = vmul.f32 %v8800_v9, %v8600_v56  ;;  %v2419_v28 = vmul.f32 %v8800_v9, %v8614_v54 }
 0x3e2   :  { %v8828_v52 = vpack.c.b16 %v2763_v24, %v2762_v23  ;;  %v2420_v16 = vmul.f32 %v8800_v9, %v8635_v48  ;;  %v2421_v26 = vmul.f32 %v8800_v9, %v8649_v63  ;;  %v2422_v49 = vmul.f32 %v8800_v9, %v8670_v27  ;;  %v8934_v63 = vld [vmem:[%s13527_s4 + $0x50] sm:$0xff] }
 0x3e3   :  { %v8917_v62 = vadd.f32 %v8804_v50, %v2385_v2  ;;  %v8920_v56 = vadd.f32 %v8804_v50, %v2386_v35  ;;  %v8923_v54 = vadd.f32 %v8804_v50, %v2387_v12  ;;  %v8926_v37 = vadd.f32 %v8804_v50, %v2388_v55  ;;  %13921 = vst [vmem:[#allocation33_spill] sm:$0xff] %v8934_v63  ;;  %v7040_v2 = vld [vmem:[%s13527_s4 + $0x18] sm:$0xff] }
 0x3e4   :  { %13918 = vst [vmem:[#allocation30_spill] sm:$0xff] %v8828_v52  ;;  %v8929_v48 = vadd.f32 %v8804_v50, %v2389_v44  ;;  %v8937_v27 = vadd.f32 %v8804_v50, %v2390_v21  ;;  %v8940_v34 = vadd.f32 %v8804_v50, %v2391_v25  ;;  %v8943_v20 = vadd.f32 %v8804_v50, %v2392_v30 }
 0x3e5   :  { %v8946_v17 = vadd.f32 %v8804_v50, %v2393_v6  ;;  %v8949_v5 = vadd.f32 %v8804_v50, %v2394_v22  ;;  %v8952_v19 = vadd.f32 %v8804_v50, %v2395_v43  ;;  %v8955_v23 = vadd.f32 %v8804_v50, %v2396_v18  ;;  %4007 = vmatpush.bf16.msra.mxu2 %v8934_v63  ;;  %v8991_v6 = vld [vmem:[%s13527_s4 + $0x48] sm:$0xff]  ;;  %v13942_v63 = vld [vmem:[#allocation16_spill] sm:$0xff] }
 0x3e6   :  { %v8958_v24 = vadd.f32 %v8804_v50, %v2397_v10  ;;  %v8965_v35 = vadd.f32 %v8804_v50, %v2398_v3  ;;  %v8968_v12 = vadd.f32 %v8804_v50, %v2399_v4  ;;  %v8971_v55 = vadd.f32 %v8804_v50, %v2400_v57  ;;  %3837 = vmatpush.bf16.msra.mxu1 %v7040_v2 }
 0x3e7   :  { %v8974_v13 = vadd.f32 %v8804_v50, %v2401_v8  ;;  %v8977_v44 = vadd.f32 %v8804_v50, %v2402_v47  ;;  %v8980_v21 = vadd.f32 %v8804_v50, %v2403_v53  ;;  %v8983_v25 = vadd.f32 %v8804_v50, %v2404_v40  ;;  %13922 = vst [vmem:[#allocation34_spill] sm:$0xff] %v8991_v6  ;;  %v7039_v47 = vld [vmem:[%s13527_s4 + $0x10] sm:$0xff] }
 0x3e8   :  { %v8986_v30 = vadd.f32 %v8804_v50, %v2405_v60  ;;  %v8994_v22 = vadd.f32 %v8804_v50, %v2406_v32  ;;  %v8997_v43 = vadd.f32 %v8804_v50, %v2407_v58  ;;  %v9000_v18 = vadd.f32 %v8804_v50, %v2408_v29  ;;  %7116 = vmatpush.bf16.msrb.mxu3 %v7040_v2  ;;  %v13931_v2 = vld [vmem:[#allocation25_spill] sm:$0xff] }
 0x3e9   :  { %v9003_v10 = vadd.f32 %v8804_v50, %v2409_v46  ;;  %v9006_v3 = vadd.f32 %v8804_v50, %v2410_v15  ;;  %v9009_v4 = vadd.f32 %v8804_v50, %v2411_v36  ;;  %v9012_v57 = vadd.f32 %v8804_v50, %v2412_v51  ;;  %4008 = vmatpush.bf16.msra.mxu2 %v8991_v6  ;;  %v9048_v15 = vld [vmem:[%s13527_s4 + $0x40] sm:$0xff] }
 0x3ea   :  { %v9015_v8 = vadd.f32 %v8804_v50, %v2413_v41  ;;  %v9022_v53 = vadd.f32 %v8804_v50, %v2414_v45  ;;  %v9025_v0 = vadd.f32 %v8804_v50, %v2415_v38  ;;  %v9028_v40 = vadd.f32 %v8804_v50, %v2416_v14  ;;  %3838 = vmatpush.bf16.msra.mxu1 %v7039_v47  ;;  %v13926_v41 = vld [vmem:[#allocation17_spill] sm:$0xff]  ;;  %v13927_v14 = vld [vmem:[#allocation20_spill] sm:$0xff] }
 0x3eb   :  { %13923 = vst [vmem:[#allocation35_spill] sm:$0xff] %v9003_v10  ;;  %v9031_v60 = vadd.f32 %v8804_v50, %v2417_v31  ;;  %v9034_v32 = vadd.f32 %v8804_v50, %v2418_v33  ;;  %v9037_v58 = vadd.f32 %v8804_v50, %v2419_v28  ;;  %v9040_v29 = vadd.f32 %v8804_v50, %v2420_v16  ;;  %v13928_v33 = vld [vmem:[#allocation22_spill] sm:$0xff] }
 0x3ec   :  { %13924 = vst [vmem:[#allocation36_spill] sm:$0xff] %v9006_v3  ;;  %v9043_v46 = vadd.f32 %v8804_v50, %v2421_v26  ;;  %v2431_v36 = vmul.f32 %v8800_v9, %v8668_v42  ;;  %v2432_v51 = vmul.f32 %v8800_v9, %v8689_v61  ;;  %v2433_v45 = vmul.f32 %v8800_v9, %v13926_v41  ;;  %v13930_v42 = vld [vmem:[#allocation24_spill] sm:$0xff]  ;;  %v7068_v61 = vld [vmem:[%s13527_s4 + $0xf8] sm:$0xff] }
 0x3ed   :  { %13925 = vst [vmem:[#allocation37_spill] sm:$0xff] %v9048_v15  ;;  %v9057_v38 = vadd.f32 %v8804_v50, %v2422_v49  ;;  %7117 = vmatpush.bf16.msrb.mxu3 %v7039_v47  ;;  %v2434_v31 = vmul.f32 %v8800_v9, %v13927_v14  ;;  %v2435_v28 = vmul.f32 %v8800_v9, %v13928_v33  ;;  %v7038_v49 = vld [vmem:[%s13527_s4 + $0x8] sm:$0xff] }
 0x3ee   :  { %v2436_v16 = vmul.f32 %v8800_v9, %v13929_v7  ;;  %v2437_v26 = vmul.f32 %v8800_v9, %v13930_v42  ;;  %4009 = vmatpush.bf16.msra.mxu2 %v9048_v15  ;;  %v2438_v47 = vmul.f32 %v8800_v9, %v13931_v2  ;;  %v9077_v41 = vadd.f32 %v8804_v50, %v2431_v36 }
 0x3ef   :  { %v9080_v14 = vadd.f32 %v8804_v50, %v2432_v51  ;;  %v9083_v33 = vadd.f32 %v8804_v50, %v2433_v45  ;;  %v9086_v7 = vadd.f32 %v8804_v50, %v2434_v31  ;;  %v9089_v42 = vadd.f32 %v8804_v50, %v2435_v28  ;;  %4340 = vmatpush.bf16.msrb.mxu0 %v7068_v61  ;;  %v13932_v51 = vld [vmem:[#allocation4_spill] sm:$0xff]  ;;  %v13933_v31 = vld [vmem:[#allocation5_spill] sm:$0xff]  ;;  %v13934_v28 = vld [vmem:[#allocation6_spill] sm:$0xff] }
 0x3f0   :  { %v9092_v52 = vadd.f32 %v8804_v50, %v2436_v16  ;;  %v9095_v2 = vadd.f32 %v8804_v50, %v2437_v26  ;;  %v9098_v36 = vadd.f32 %v8804_v50, %v2438_v47  ;;  %3839 = vmatpush.bf16.msra.mxu1 %v7038_v49  ;;  %v2377_v45 = vmul.f32 %v8800_v9, %v13932_v51  ;;  %v13935_v16 = vld [vmem:[#allocation7_spill] sm:$0xff]  ;;  %v13936_v26 = vld [vmem:[#allocation8_spill] sm:$0xff]  ;;  %v13938_v47 = vld [vmem:[#allocation9_spill] sm:$0xff] }
 0x3f1   :  { %7118 = vmatpush.bf16.msrb.mxu3 %v7038_v49  ;;  %v2378_v3 = vmul.f32 %v8800_v9, %v13933_v31  ;;  %v2379_v10 = vmul.f32 %v8800_v9, %v13934_v28  ;;  %v2380_v15 = vmul.f32 %v8800_v9, %v13935_v16  ;;  %v9110_v61 = vmul.f32 %v8800_v9, %v13936_v26  ;;  %v13940_v49 = vld [vmem:[#allocation10_spill] sm:$0xff] }
 0x3f2   :  { %v9114_v6 = vmul.f32 %v8800_v9, %v13938_v47  ;;  %v9118_v51 = vmul.f32 %v8800_v9, %v13940_v49  ;;  %v9121_v31 = vadd.f32 %v8804_v50, %v2377_v45  ;;  %v2423_v26 = vmul.f32 %v8800_v9, %v13942_v63  ;;  %v13946_v45 = vld [vmem:[#allocation11_spill] sm:$0xff]  ;;  %v13951_v63 = vld [vmem:[#allocation13_spill] sm:$0xff] }
 0x3f3   :  { %13937 = vst [vmem:[#allocation17_spill] sm:$0xff] %v9110_v61  ;;  %v9124_v28 = vadd.f32 %v8804_v50, %v2378_v3  ;;  %v9127_v16 = vadd.f32 %v8804_v50, %v2379_v10  ;;  %v13943_v61 = vld [vmem:[#allocation18_spill] sm:$0xff]  ;;  %v9136_v49 = vadd.f32 %v8804_v50, %v2380_v15  ;;  %v13948_v3 = vld [vmem:[#allocation21_spill] sm:$0xff]  ;;  %v9146_v11 = vmul.f32 %v8800_v9, %v13949_v1 }
 0x3f4   :  { %13939 = vst [vmem:[#allocation20_spill] sm:$0xff] %v9114_v6  ;;  %v2424_v47 = vmul.f32 %v8800_v9, %v13943_v61  ;;  %v13944_v6 = vld [vmem:[#allocation19_spill] sm:$0xff]  ;;  %v2426_v10 = vmul.f32 %v8800_v9, %v13948_v3  ;;  %v9150_v61 = vmul.f32 %v8800_v9, %v13951_v63  ;;  %v9157_v15 = vadd.f32 %v8804_v50, %v2423_v26 }
 0x3f5   :  { %13941 = vst [vmem:[#allocation22_spill] sm:$0xff] %v9118_v51  ;;  %v2425_v59 = vmul.f32 %v8800_v9, %v13944_v6  ;;  %v9140_v51 = vmul.f32 %v8800_v9, %v13946_v45  ;;  %v9154_v6 = vmul.f32 %v8800_v9, %v13953_v39  ;;  %v2509_v63 = vmax.f32 %v9124_v28, 0.0 }
 0x3f6   :  { %13945 = vst [vmem:[#allocation23_spill] sm:$0xff] %v9136_v49  ;;  %v9160_v45 = vadd.f32 %v8804_v50, %v2424_v47  ;;  %v9166_v1 = vadd.f32 %v8804_v50, %v2426_v10  ;;  %v2516_v26 = vmax.f32 %v8917_v62, 0.0  ;;  %v2518_v47 = vmax.f32 %v8923_v54, 0.0 }
 0x3f7   :  { %13947 = vst [vmem:[#allocation24_spill] sm:$0xff] %v9140_v51  ;;  %v9163_v3 = vadd.f32 %v8804_v50, %v2425_v59  ;;  %v2508_v51 = vmax.f32 %v9121_v31, 0.0  ;;  %v2519_v59 = vmax.f32 %v8926_v37, 0.0  ;;  %v2521_v10 = vmax.f32 %v8937_v27, 0.0 }
 0x3f8   :  { %13950 = vst [vmem:[#allocation25_spill] sm:$0xff] %v9146_v11  ;;  %v2520_v11 = vmax.f32 %v8929_v48, 0.0  ;;  %v2522_v31 = vmax.f32 %v8940_v34, 0.0  ;;  %v2523_v28 = vmax.f32 %v8943_v20, 0.0  ;;  %v2525_v39 = vmax.f32 %v8949_v5, 0.0 }
 0x3f9   :  { %13952 = vst [vmem:[#allocation4_spill] sm:$0xff] %v9150_v61  ;;  %v2524_v61 = vmax.f32 %v8946_v17, 0.0  ;;  %v2526_v62 = vmax.f32 %v8952_v19, 0.0  ;;  %v2528_v54 = vmax.f32 %v8958_v24, 0.0  ;;  %v2529_v37 = vmax.f32 %v8965_v35, 0.0 }
 0x3fa   :  { %13954 = vst [vmem:[#allocation5_spill] sm:$0xff] %v9154_v6  ;;  %v2517_v6 = vmax.f32 %v8920_v56, 0.0  ;;  %v2527_v56 = vmax.f32 %v8955_v23, 0.0  ;;  %v2530_v48 = vmax.f32 %v8968_v12, 0.0  ;;  %v2531_v27 = vmax.f32 %v8971_v55, 0.0 }
 0x3fb   :  { %13955 = vst [vmem:[#allocation6_spill] sm:$0xff] %v9166_v1  ;;  %v2532_v34 = vmax.f32 %v8974_v13, 0.0  ;;  %v2533_v20 = vmax.f32 %v8977_v44, 0.0  ;;  %v2534_v17 = vmax.f32 %v8980_v21, 0.0  ;;  %v2535_v5 = vmax.f32 %v8983_v25, 0.0 }
 0x3fc   :  { %v2536_v19 = vmax.f32 %v8986_v30, 0.0  ;;  %v2537_v23 = vmax.f32 %v8994_v22, 0.0  ;;  %v2538_v24 = vmax.f32 %v8997_v43, 0.0  ;;  %v2539_v35 = vmax.f32 %v9000_v18, 0.0 }
 0x3fd   :  { %v2542_v12 = vmax.f32 %v9009_v4, 0.0  ;;  %v2543_v55 = vmax.f32 %v9012_v57, 0.0  ;;  %v2544_v13 = vmax.f32 %v9015_v8, 0.0  ;;  %v2545_v44 = vmax.f32 %v9022_v53, 0.0 }
 0x3fe   :  { %v2546_v21 = vmax.f32 %v9025_v0, 0.0  ;;  %v2547_v25 = vmax.f32 %v9028_v40, 0.0  ;;  %v2548_v30 = vmax.f32 %v9031_v60, 0.0  ;;  %v2549_v22 = vmax.f32 %v9034_v32, 0.0 }
 0x3ff   :  { %v2550_v43 = vmax.f32 %v9037_v58, 0.0  ;;  %v2551_v18 = vmax.f32 %v9040_v29, 0.0  ;;  %v2552_v4 = vmax.f32 %v9043_v46, 0.0  ;;  %v2553_v57 = vmax.f32 %v9057_v38, 0.0 }
 0x400   :  { %v2554_v8 = vmax.f32 %v9157_v15, 0.0  ;;  %v2555_v53 = vmax.f32 %v9160_v45, 0.0  ;;  %v2556_v0 = vmax.f32 %v9163_v3, 0.0  ;;  %v2562_v60 = vmax.f32 %v9077_v41, 0.0  ;;  %v7037_v41 = vld [vmem:[%s13527_s4] sm:$0xff] }
 0x401   :  { %v2563_v32 = vmax.f32 %v9080_v14, 0.0  ;;  %v2564_v58 = vmax.f32 %v9083_v33, 0.0  ;;  %v2565_v29 = vmax.f32 %v9086_v7, 0.0  ;;  %v2566_v46 = vmax.f32 %v9089_v42, 0.0  ;;  %v7067_v14 = vld [vmem:[%s13527_s4 + $0xf0] sm:$0xff]  ;;  %3840 = vmatpush.bf16.msra.mxu1 %v7037_v41  ;;  %7119 = vmatpush.bf16.msrb.mxu3 %v7037_v41 }
 0x402   :  { %v2567_v38 = vmax.f32 %v9092_v52, 0.0  ;;  %v9220_v50 = vpack.c.bf16 %v2508_v51, %v2508_v51  ;;  %v9222_v3 = vpack.c.bf16 %v2509_v63, %v2509_v63  ;;  %v9224_v40 = vpack.c.bf16 %v2516_v26, %v2516_v26  ;;  %4341 = vmatpush.bf16.msrb.mxu0 %v7067_v14 }
 0x403   :  { %v9232_v33 = vpack.c.bf16 %v2517_v6, %v2517_v6  ;;  %v9234_v52 = vpack.c.bf16 %v2518_v47, %v2518_v47  ;;  %v9236_v7 = vpack.c.bf16 %v2519_v59, %v2519_v59  ;;  %v9238_v42 = vpack.c.bf16 %v2520_v11, %v2520_v11  ;;  %v7066_v11 = vld [vmem:[%s13527_s4 + $0xe8] sm:$0xff]  ;;  %v7084_v59 = vld [vmem:[%s13527_s4 + $0x178] sm:$0xff] }
 0x404   :  { %v9240_v51 = vpack.c.bf16 %v2521_v10, %v2521_v10  ;;  %v9242_v63 = vpack.c.bf16 %v2522_v31, %v2522_v31  ;;  %v9244_v26 = vpack.c.bf16 %v2523_v28, %v2523_v28  ;;  %v9246_v45 = vpack.c.bf16 %v2524_v61, %v2524_v61  ;;  %v7076_v28 = vld [vmem:[%s13527_s4 + $0x138] sm:$0xff]  ;;  %4678 = vmatpush.bf16.msrb.mxu2 %v7084_v59 }
 0x405   :  { %v9248_v15 = vpack.c.bf16 %v2525_v39, %v2525_v39  ;;  %v9250_v49 = vpack.c.bf16 %v2526_v62, %v2526_v62  ;;  %v9252_v6 = vpack.c.bf16 %v2527_v56, %v2527_v56  ;;  %v9254_v47 = vpack.c.bf16 %v2528_v54, %v2528_v54  ;;  %4509 = vmatpush.bf16.msrb.mxu1 %v7076_v28 }
 0x406   :  { %v9262_v61 = vpack.c.bf16 %v2529_v37, %v2529_v37  ;;  %v9264_v10 = vpack.c.bf16 %v2530_v48, %v2530_v48  ;;  %v9266_v39 = vpack.c.bf16 %v2531_v27, %v2531_v27  ;;  %v9268_v31 = vpack.c.bf16 %v2532_v34, %v2532_v34  ;;  %4342 = vmatpush.bf16.msrb.mxu0 %v7066_v11 }
 0x407   :  { %v9273_v62 = vpack.c.bf16 %v2533_v20, %v2533_v20  ;;  %v9275_v56 = vpack.c.bf16 %v2534_v17, %v2534_v17  ;;  %v9277_v54 = vpack.c.bf16 %v2535_v5, %v2535_v5  ;;  %v9279_v14 = vpack.c.bf16 %v2536_v19, %v2536_v19  ;;  %v7065_v19 = vld [vmem:[%s13527_s4 + $0xe0] sm:$0xff] }
 0x408   :  { %v9281_v37 = vpack.c.bf16 %v2537_v23, %v2537_v23  ;;  %v9283_v48 = vpack.c.bf16 %v2538_v24, %v2538_v24  ;;  %v9285_v27 = vpack.c.bf16 %v2539_v35, %v2539_v35  ;;  %v9287_v34 = vpack.c.bf16 %v2542_v12, %v2542_v12 }
 0x409   :  { %v9289_v1 = vpack.c.bf16 %v2543_v55, %v2543_v55  ;;  %v9291_v20 = vpack.c.bf16 %v2544_v13, %v2544_v13  ;;  %v9293_v17 = vpack.c.bf16 %v2545_v44, %v2545_v44  ;;  %v9295_v5 = vpack.c.bf16 %v2546_v21, %v2546_v21  ;;  %v13956_v55 = vld [vmem:[#allocation26_spill] sm:$0xff] }
 0x40a   :  { %v9300_v23 = vpack.c.bf16 %v2547_v25, %v2547_v25  ;;  %v9302_v24 = vpack.c.bf16 %v2548_v30, %v2548_v30  ;;  %v9304_v35 = vpack.c.bf16 %v2549_v22, %v2549_v22  ;;  %v9306_v12 = vpack.c.bf16 %v2550_v43, %v2550_v43  ;;  %7120 = vmatpush.bf16.msra.mxu3 %v13956_v55 }
 0x40b   :  { %v9309_v13 = vpack.c.bf16 %v2551_v18, %v2551_v18  ;;  %v9311_v44 = vpack.c.bf16 %v2552_v4, %v2552_v4  ;;  %v9313_v21 = vpack.c.bf16 %v2553_v57, %v2553_v57  ;;  %v9315_v41 = vpack.c.bf16 %v2554_v8, %v2554_v8  ;;  %4343 = vmatpush.bf16.msrb.mxu0 %v7065_v19  ;;  %v7064_v57 = vld [vmem:[%s13527_s4 + $0xd8] sm:$0xff] }
 0x40c   :  { %v9317_v11 = vpack.c.bf16 %v2555_v53, %v2555_v53  ;;  %v9319_v25 = vpack.c.bf16 %v2556_v0, %v2556_v0  ;;  %v9321_v30 = vpack.c.bf16 %v2562_v60, %v2562_v60  ;;  %v9323_v22 = vpack.c.bf16 %v2563_v32, %v2563_v32 }
 0x40d   :  { %v9325_v43 = vpack.c.bf16 %v2564_v58, %v2564_v58  ;;  %v9327_v59 = vpack.c.bf16 %v2565_v29, %v2565_v29  ;;  %v9329_v18 = vpack.c.bf16 %v2566_v46, %v2566_v46  ;;  %v9331_v4 = vpack.c.bf16 %v2567_v38, %v2567_v38  ;;  %v13959_v29 = vld [vmem:[#allocation27_spill] sm:$0xff] }
 0x40e   :  { %v13957_v8 = vmax.f32 %v9095_v2, 0.0  ;;  %v13958_v0 = vmax.f32 %v9098_v36, 0.0  ;;  %v2700_v32 = vunpack.c.l.b16 %v9220_v50  ;;  %7121 = vmatpush.bf16.msra.mxu3 %v13959_v29  ;;  %v2708_v46 = vunpack.c.l.b16 %v9224_v40  ;;  %v13992_v50 = vld [vmem:[#allocation34_spill] sm:$0xff] }
 0x40f   :  { %v2709_v38 = vunpack.c.l.b16 %v9232_v33  ;;  %v2710_v2 = vunpack.c.l.b16 %v9234_v52  ;;  %v2711_v28 = vunpack.c.l.b16 %v9236_v7  ;;  %v2712_v19 = vunpack.c.l.b16 %v9238_v42  ;;  %4344 = vmatpush.bf16.msrb.mxu0 %v7064_v57  ;;  %v7063_v52 = vld [vmem:[%s13527_s4 + $0xd0] sm:$0xff] }
 0x410   :  { %v9339_v53 = vpack.c.bf16 %v13957_v8, %v13957_v8  ;;  %v9344_v60 = vpack.c.bf16 %v13958_v0, %v13958_v0  ;;  %v2713_v36 = vunpack.c.l.b16 %v9240_v51  ;;  %v2714_v55 = vunpack.c.l.b16 %v9242_v63 }
 0x411   :  { %v2715_v8 = vunpack.c.l.b16 %v9244_v26  ;;  %v2716_v0 = vunpack.c.l.b16 %v9246_v45  ;;  %v2717_v29 = vunpack.c.l.b16 %v9248_v15  ;;  %v2718_v40 = vunpack.c.l.b16 %v9250_v49  ;;  %v13960_v45 = vld [vmem:[#allocation29_spill] sm:$0xff] }
 0x412   :  { %v2719_v33 = vunpack.c.l.b16 %v9252_v6  ;;  %v2720_v7 = vunpack.c.l.b16 %v9254_v47  ;;  %v2721_v42 = vunpack.c.l.b16 %v9262_v61  ;;  %v2722_v51 = vunpack.c.l.b16 %v9264_v10  ;;  %7122 = vmatpush.bf16.msra.mxu3 %v13960_v45 }
 0x413   :  { %v2723_v63 = vunpack.c.l.b16 %v9266_v39  ;;  %v2724_v15 = vunpack.c.l.b16 %v9268_v31  ;;  %v2725_v49 = vunpack.c.l.b16 %v9273_v62  ;;  %v2726_v26 = vunpack.c.l.b16 %v9275_v56  ;;  %4345 = vmatpush.bf16.msrb.mxu0 %v7063_v52  ;;  %v7062_v56 = vld [vmem:[%s13527_s4 + $0xc8] sm:$0xff] }
 0x414   :  { %v2727_v6 = vunpack.c.l.b16 %v9277_v54  ;;  %v2728_v57 = vunpack.c.l.b16 %v9279_v14  ;;  %v2729_v47 = vunpack.c.l.b16 %v9281_v37  ;;  %v2730_v61 = vunpack.c.l.b16 %v9283_v48 }
 0x415   :  { %v2731_v10 = vunpack.c.l.b16 %v9285_v27  ;;  %v2734_v39 = vunpack.c.l.b16 %v9287_v34  ;;  %v2735_v45 = vunpack.c.l.b16 %v9289_v1  ;;  %v2736_v31 = vunpack.c.l.b16 %v9291_v20  ;;  %v13961_v27 = vld [vmem:[#allocation31_spill] sm:$0xff] }
 0x416   :  { %v2737_v62 = vunpack.c.l.b16 %v9293_v17  ;;  %v2738_v54 = vunpack.c.l.b16 %v9295_v5  ;;  %v2739_v14 = vunpack.c.l.b16 %v9300_v23  ;;  %v2740_v37 = vunpack.c.l.b16 %v9302_v24  ;;  %7123 = vmatpush.bf16.msra.mxu3 %v13961_v27 }
 0x417   :  { %v2741_v48 = vunpack.c.l.b16 %v9304_v35  ;;  %v2742_v1 = vunpack.c.l.b16 %v9306_v12  ;;  %v2743_v34 = vunpack.c.l.b16 %v9309_v13  ;;  %v2744_v20 = vunpack.c.l.b16 %v9311_v44  ;;  %4346 = vmatpush.bf16.msrb.mxu0 %v7062_v56  ;;  %v7061_v44 = vld [vmem:[%s13527_s4 + $0xc0] sm:$0xff] }
 0x418   :  { %v2745_v17 = vunpack.c.l.b16 %v9313_v21  ;;  %v2746_v52 = vunpack.c.l.b16 %v9315_v41  ;;  %v2747_v5 = vunpack.c.l.b16 %v9317_v11  ;;  %v2754_v23 = vunpack.c.l.b16 %v9321_v30 }
 0x419   :  { %v2755_v24 = vunpack.c.l.b16 %v9323_v22  ;;  %v2756_v35 = vunpack.c.l.b16 %v9325_v43  ;;  %v2757_v27 = vunpack.c.l.b16 %v9327_v59  ;;  %v2758_v12 = vunpack.c.l.b16 %v9329_v18  ;;  %v13962_v22 = vld [vmem:[#allocation32_spill] sm:$0xff] }
 0x41a   :  { %v2759_v13 = vunpack.c.l.b16 %v9331_v4  ;;  %v2760_v21 = vunpack.c.l.b16 %v9339_v53  ;;  %v2761_v41 = vunpack.c.l.b16 %v9344_v60  ;;  %v9406_v11 = vpack.c.b16 %v2709_v38, %v2708_v46  ;;  %7124 = vmatpush.bf16.msra.mxu3 %v13962_v22  ;;  %v13998_v22 = vld [vmem:[#allocation24_spill] sm:$0xff] }
 0x41b   :  { %v9408_v30 = vpack.c.b16 %v2711_v28, %v2710_v2  ;;  %v9411_v43 = vpack.c.b16 %v2713_v36, %v2712_v19  ;;  %v9413_v59 = vpack.c.b16 %v2715_v8, %v2714_v55  ;;  %v9415_v18 = vpack.c.b16 %v2717_v29, %v2716_v0  ;;  %4347 = vmatpush.bf16.msrb.mxu0 %v7061_v44  ;;  %v13975_v0 = vld [vmem:[#allocation33_spill] sm:$0xff]  ;;  %v13976_v29 = vld [vmem:[#allocation15_spill] sm:$0xff] }
 0x41c   :  { %v9417_v4 = vpack.c.b16 %v2719_v33, %v2718_v40  ;;  %v9419_v56 = vpack.c.b16 %v2721_v42, %v2720_v7  ;;  %v9421_v58 = vpack.c.b16 %v2723_v63, %v2722_v51  ;;  %v9423_v53 = vpack.c.b16 %v2725_v49, %v2724_v15  ;;  %v13978_v42 = vld [vmem:[#allocation6_spill] sm:$0xff] }
 0x41d   :  { %v9425_v60 = vpack.c.b16 %v2727_v6, %v2726_v26  ;;  %v9427_v46 = vpack.c.b16 %v2729_v47, %v2728_v57  ;;  %v9429_v38 = vpack.c.b16 %v2731_v10, %v2730_v61  ;;  %v9431_v2 = vpack.c.b16 %v2735_v45, %v2734_v39  ;;  %v13985_v47 = vld [vmem:[#allocation23_spill] sm:$0xff]  ;;  %v13989_v45 = vld [vmem:[#allocation17_spill] sm:$0xff] }
 0x41e   :  { %13963 = vst [vmem:[#allocation7_spill] sm:$0xff] %v9419_v56  ;;  %v9433_v28 = vpack.c.b16 %v2737_v62, %v2736_v31  ;;  %v9435_v19 = vpack.c.b16 %v2739_v14, %v2738_v54  ;;  %v9437_v36 = vpack.c.b16 %v2741_v48, %v2740_v37  ;;  %v9439_v55 = vpack.c.b16 %v2743_v34, %v2742_v1  ;;  %v13990_v31 = vld [vmem:[#allocation28_spill] sm:$0xff] }
 0x41f   :  { %13964 = vst [vmem:[#allocation8_spill] sm:$0xff] %v9421_v58  ;;  %v9441_v8 = vpack.c.b16 %v2745_v17, %v2744_v20  ;;  %7125 = vmatpush.bf16.msra.mxu3 %v13975_v0  ;;  %v2430_v40 = vmul.f32 %v8800_v9, %v13976_v29  ;;  %v13977_v33 = vmax.f32 %v9127_v16, 0.0  ;;  %v13979_v51 = vmax.f32 %v13978_v42, 0.0  ;;  %v13991_v54 = vld [vmem:[#allocation20_spill] sm:$0xff]  ;;  %v13993_v17 = vld [vmem:[#allocation25_spill] sm:$0xff] }
 0x420   :  { %13965 = vst [vmem:[#allocation9_spill] sm:$0xff] %v9423_v53  ;;  %v9452_v15 = vpack.c.b16 %v2747_v5, %v2746_v52  ;;  %v9454_v49 = vpack.c.b16 %v2755_v24, %v2754_v23  ;;  %v9456_v26 = vpack.c.b16 %v2757_v27, %v2756_v35  ;;  %v9458_v6 = vpack.c.b16 %v2759_v13, %v2758_v12  ;;  %v13994_v5 = vld [vmem:[#allocation4_spill] sm:$0xff]  ;;  %v13999_v29 = vld [vmem:[#allocation5_spill] sm:$0xff] }
 0x421   :  { %13966 = vst [vmem:[#allocation10_spill] sm:$0xff] %v9425_v60  ;;  %v2574_v7 = vpack.c.bf16 %v13977_v33, %v13977_v33  ;;  %v2621_v63 = vpack.c.bf16 %v13979_v51, %v13979_v51  ;;  %v9460_v57 = vpack.c.b16 %v2761_v41, %v2760_v21  ;;  %v13986_v9 = vmax.f32 %v13985_v47, 0.0  ;;  %v13997_v21 = vld [vmem:[#allocation22_spill] sm:$0xff] }
 0x422   :  { %13967 = vst [vmem:[#allocation16_spill] sm:$0xff] %v9427_v46  ;;  %v13987_v61 = vunpack.c.l.b16 %v9222_v3  ;;  %v13581_v39 = vshrl.u32 %v9452_v15, 16  ;;  %v2448_v62 = vadd.f32 %v13990_v31, %v13989_v45  ;;  %v2449_v14 = vadd.f32 %v13990_v31, %v13991_v54 }
 0x423   :  { %13968 = vst [vmem:[#allocation18_spill] sm:$0xff] %v9429_v38  ;;  %v2575_v16 = vpack.c.bf16 %v13986_v9, %v13986_v9  ;;  %v2748_v37 = vunpack.c.l.b16 %v9319_v25  ;;  %v13575_v48 = vmov 0   ;;  %7126 = vmatpush.bf16.msra.mxu3 %v13992_v50  ;;  %v2749_v3 = vunpack.c.l.b16 %v2621_v63 }
 0x424   :  { %13969 = vst [vmem:[#allocation19_spill] sm:$0xff] %v9431_v2  ;;  %v9469_v10 = vpack.c.b16 %v13987_v61, %v2700_v32  ;;  %4010 = vmatmul.bf16.vlgmr.msra.gmra.mxu2 %v13575_v48  ;;  %v2975_v1 = vrot.slane %v13575_v48, 7  ;;  %v3143_v34 = vrot.slane %v13581_v39, 7  ;;  %v13585_v20 = vshll.u32 %v9452_v15, 16 }
 0x425   :  { %13970 = vst [vmem:[#allocation11_spill] sm:$0xff] %v9433_v28  ;;  %v2494_v52 = vadd.f32 %v13990_v31, %v13993_v17  ;;  %v2495_v25 = vadd.f32 %v13990_v31, %v13994_v5  ;;  %v2702_v23 = vunpack.c.l.b16 %v2574_v7  ;;  %v2703_v27 = vunpack.c.l.b16 %v2575_v16  ;;  %v14000_v7 = vld [vmem:[#allocation37_spill] sm:$0xff] }
 0x426   :  { %13971 = vst [vmem:[#allocation21_spill] sm:$0xff] %v9435_v19  ;;  %v2980_v32 = vshrl.u32 %v9469_v10, 16  ;;  %v9490_v35 = vsel %vm7256_vm4, 0, %v2975_v1  ;;  %v2983_v13 = vshll.u32 %v9469_v10, 16  ;;  %v3146_v44 = vor.u32 %v13585_v20, %v3143_v34 }
 0x427   :  { %13972 = vst [vmem:[#allocation12_spill] sm:$0xff] %v9437_v36  ;;  %3841 = vmatmul.bf16.vlgmr.msra.gmra.mxu1 %v9490_v35  ;;  %v2450_v41 = vadd.f32 %v13990_v31, %v13997_v21  ;;  %v2451_v0 = vadd.f32 %v13990_v31, %v13998_v22  ;;  %v2496_v33 = vadd.f32 %v13990_v31, %v13999_v29  ;;  %v2512_v9 = vmax.f32 %v2448_v62, 0.0 }
 0x428   :  { %13973 = vst [vmem:[#allocation13_spill] sm:$0xff] %v9439_v55  ;;  %v2982_v12 = vrot.slane %v2980_v32, 7  ;;  %7127 = vmatpush.bf16.msra.mxu3 %v14000_v7  ;;  %v2497_v42 = vadd.f32 %v13990_v31, %v2430_v40  ;;  %v9506_v51 = vpack.c.b16 %v2749_v3, %v2748_v37  ;;  %v9512_v47 = vsel %vm7256_vm4, 0, %v3146_v44 }
 0x429   :  { %13974 = vst [vmem:[#allocation14_spill] sm:$0xff] %v9441_v8  ;;  %v2513_v16 = vmax.f32 %v2449_v14, 0.0  ;;  %3961 = vmatmul.bf16.vlgmr.msrb.gmra.mxu3 %v9512_v47  ;;  %v2558_v61 = vmax.f32 %v2494_v52, 0.0  ;;  %v2559_v45 = vmax.f32 %v2495_v25, 0.0  ;;  %v9515_v54 = vpack.c.b16 %v2703_v27, %v2702_v23 }
 0x42a   :  { %13980 = vst [vmem:[#allocation26_spill] sm:$0xff] %v9452_v15  ;;  %v2985_v63 = vor.u32 %v2983_v13, %v2982_v12  ;;  %v2514_v31 = vmax.f32 %v2450_v41, 0.0  ;;  %v2515_v37 = vmax.f32 %v2451_v0, 0.0  ;;  %v2560_v1 = vmax.f32 %v2496_v33, 0.0  ;;  %v14004_v33 = vld [vmem:[#allocation35_spill] sm:$0xff] }
 0x42b   :  { %13981 = vst [vmem:[#allocation27_spill] sm:$0xff] %v9454_v49  ;;  %v2561_v50 = vmax.f32 %v2497_v42, 0.0  ;;  %v13580_v3 = vshrl.u32 %v9506_v51, 16  ;;  %v2576_v34 = vpack.c.bf16 %v2512_v9, %v2512_v9  ;;  %v2577_v17 = vpack.c.bf16 %v2513_v16, %v2513_v16  ;;  %v14005_v42 = vld [vmem:[#allocation36_spill] sm:$0xff] }
 0x42c   :  { %13982 = vst [vmem:[#allocation29_spill] sm:$0xff] %v9456_v26  ;;  %v3237_v40 = vsel %vm7256_vm4, 0, %v2985_v63  ;;  %v2622_v62 = vpack.c.bf16 %v2558_v61, %v2558_v61  ;;  %v2623_v14 = vpack.c.bf16 %v2559_v45, %v2559_v45  ;;  %v2987_v5 = vshrl.u32 %v9515_v54, 16  ;;  %v7083_v61 = vld [vmem:[%s13527_s4 + $0x170] sm:$0xff] }
 0x42d   :  { %13983 = vst [vmem:[#allocation31_spill] sm:$0xff] %v9458_v6  ;;  %4348 = vmatmul.bf16.vlgmr.msrb.gmra.mxu0 %v3237_v40  ;;  %v2578_v52 = vpack.c.bf16 %v2514_v31, %v2514_v31  ;;  %v2579_v25 = vpack.c.bf16 %v2515_v37, %v2515_v37  ;;  %v2624_v23 = vpack.c.bf16 %v2560_v1, %v2560_v1  ;;  %v3150_v12 = vrot.slane %v13580_v3, 7 }
 0x42e   :  { %13984 = vst [vmem:[#allocation32_spill] sm:$0xff] %v9460_v57  ;;  %v2625_v27 = vpack.c.bf16 %v2561_v50, %v2561_v50  ;;  %v2704_v44 = vunpack.c.l.b16 %v2576_v34  ;;  %v2705_v21 = vunpack.c.l.b16 %v2577_v17  ;;  %v2750_v41 = vunpack.c.l.b16 %v2622_v62  ;;  %4679 = vmatpush.bf16.msrb.mxu2 %v7083_v61  ;;  %v7075_v62 = vld [vmem:[%s13527_s4 + $0x130] sm:$0xff] }
 0x42f   :  { %13988 = vst [vmem:[#allocation33_spill] sm:$0xff] %v9469_v10  ;;  %v2751_v22 = vunpack.c.l.b16 %v2623_v14  ;;  %v2989_v0 = vrot.slane %v2987_v5, 7  ;;  %v13584_v29 = vshll.u32 %v9506_v51, 16  ;;  %v2540_v7 = vmax.f32 %v14004_v33, 0.0  ;;  %4510 = vmatpush.bf16.msrb.mxu1 %v7075_v62 }
 0x430   :  { %13996 = vst [vmem:[#allocation15_spill] sm:$0xff] %v9490_v35  ;;  %v2541_v63 = vmax.f32 %v14005_v42, 0.0  ;;  %v2706_v9 = vunpack.c.l.b16 %v2578_v52  ;;  %v2707_v16 = vunpack.c.l.b16 %v2579_v25  ;;  %v2752_v45 = vunpack.c.l.b16 %v2624_v23 }
 0x431   :  { %14001 = vst [vmem:[#allocation6_spill] sm:$0xff] %v9506_v51  ;;  %v2753_v31 = vunpack.c.l.b16 %v2625_v27  ;;  %v2990_v37 = vshll.u32 %v9515_v54, 16  ;;  %v3153_v1 = vor.u32 %v13584_v29, %v3150_v12  ;;  %v9533_v50 = vpack.c.b16 %v2705_v21, %v2704_v44 }
 0x432   :  { %14002 = vst [vmem:[#allocation23_spill] sm:$0xff] %v9512_v47  ;;  %v9535_v34 = vpack.c.b16 %v2751_v22, %v2750_v41  ;;  %v2604_v14 = vpack.c.bf16 %v2540_v7, %v2540_v7  ;;  %v2605_v52 = vpack.c.bf16 %v2541_v63, %v2541_v63  ;;  %v9540_v25 = vpack.c.b16 %v2707_v16, %v2706_v9 }
 0x433   :  { %14003 = vst [vmem:[#allocation17_spill] sm:$0xff] %v9515_v54  ;;  %v2992_v17 = vor.u32 %v2990_v37, %v2989_v0  ;;  %v9542_v23 = vpack.c.b16 %v2753_v31, %v2752_v45  ;;  %v9546_v27 = vsel %vm7256_vm4, 0, %v3153_v1  ;;  %v2997_v42 = vshll.u32 %v9533_v50, 16 }
 0x434   :  { %4015 = vmatmul.bf16.gmra.mxu2 %v9469_v10  ;;  %14006 = vst [vmem:[#allocation28_spill] sm:$0xff] %v9533_v50  ;;  %v13579_v44 = vshrl.u32 %v9535_v34, 16  ;;  %v2732_v21 = vunpack.c.l.b16 %v2604_v14  ;;  %v2733_v41 = vunpack.c.l.b16 %v2605_v52  ;;  %v3001_v22 = vshrl.u32 %v9540_v25, 16 }
 0x435   :  { %14007 = vst [vmem:[#allocation20_spill] sm:$0xff] %v9535_v34  ;;  %v9552_v12 = vsel %vm7256_vm4, 0, %v2992_v17  ;;  %v13577_v0 = vshrl.u32 %v9542_v23, 16  ;;  %v13583_v16 = vshll.u32 %v9535_v34, 16  ;;  %v3271_v45 = vrot.slane %v2983_v13, 1 }
 0x436   :  { %14008 = vst [vmem:[#allocation34_spill] sm:$0xff] %v9542_v23  ;;  %v3157_v7 = vrot.slane %v13579_v44, 7  ;;  %v3003_v63 = vrot.slane %v3001_v22, 7  ;;  %v9561_v9 = vpack.c.b16 %v2733_v41, %v2732_v21  ;;  %v3004_v1 = vshll.u32 %v9540_v25, 16 }
 0x437   :  { %3846 = vmatmul.bf16.gmra.mxu1 %v3237_v40  ;;  %14009 = vst [vmem:[#allocation25_spill] sm:$0xff] %v9546_v27  ;;  %v2994_v40 = vshrl.u32 %v9533_v50, 16  ;;  %v3164_v61 = vrot.slane %v13577_v0, 7  ;;  %v13578_v62 = vshll.u32 %v9542_v23, 16  ;;  %v9574_v14 = vor.u32 %v3271_v45, %v2980_v32 }
 0x438   :  { %14010 = vst [vmem:[#allocation4_spill] sm:$0xff] %v9552_v12  ;;  %v3160_v17 = vor.u32 %v13583_v16, %v3157_v7  ;;  %v3006_v52 = vor.u32 %v3004_v1, %v3003_v63  ;;  %v3273_v21 = vrot.slane %v2990_v37, 1  ;;  %v13586_v63 = vshrl.u32 %v9406_v11, 16 }
 0x439   :  { %3966 = vmatmul.bf16.gmra.mxu3 %v9546_v27  ;;  %v2996_v33 = vrot.slane %v2994_v40, 7  ;;  %14011 = vst [vmem:[#allocation2_spill] sm:$0xff] %v9561_v9  ;;  %v3167_v41 = vor.u32 %v13578_v62, %v3164_v61  ;;  %v3275_v45 = vrot.slane %v2997_v42, 1  ;;  %v13588_v0 = vshll.u32 %v9411_v43, 16 }
 0x43a   :  { %v9584_v7 = vor.u32 %v3273_v21, %v2987_v5  ;;  %v9589_v32 = vsel %vm7256_vm4, 0, %v3160_v17  ;;  %v9595_v61 = vsel %vm7256_vm4, 0, %v3006_v52  ;;  %v13587_v5 = vshll.u32 %v9408_v30, 16 }
 0x43b   :  { %v2999_v31 = vor.u32 %v2997_v42, %v2996_v33  ;;  %v13582_v33 = vshll.u32 %v9406_v11, 16  ;;  %14013 = vst [vmem:[#allocation24_spill] sm:$0xff] %v9589_v32  ;;  %v3277_v21 = vrot.slane %v3004_v1, 1  ;;  %v9601_v48 = vsel %vm7256_vm4, 0, %v3167_v41 }
 0x43c   :  { %14014 = vst [vmem:[#allocation5_spill] sm:$0xff] %v9595_v61  ;;  %v13592_v17 = vshrl.u32 %v9411_v43, 16  ;;  %v9605_v62 = vor.u32 %v3275_v45, %v2994_v40  ;;  %v13589_v42 = vshll.u32 %v9413_v59, 16  ;;  %v13590_v52 = vshll.u32 %v9415_v18, 16 }
 0x43d   :  { %4353 = vmatmul.bf16.gmra.mxu0 %v9552_v12  ;;  %v9581_v13 = vsel %vm7256_vm4, 0, %v2999_v31  ;;  %v13591_v31 = vshrl.u32 %v9408_v30, 16  ;;  %14015 = vst [vmem:[#allocation37_spill] sm:$0xff] %v9601_v48  ;;  %v9610_v37 = vor.u32 %v3277_v21, %v3001_v22  ;;  %v3279_v1 = vrot.slane %v13582_v33, 1 }
 0x43e   :  { %14012 = vst [vmem:[#allocation22_spill] sm:$0xff] %v9581_v13  ;;  %v13594_v41 = vshrl.u32 %v9413_v59, 16  ;;  %v13595_v44 = vshrl.u32 %v9415_v18, 16  ;;  %v13593_v40 = vshll.u32 %v9417_v4, 16  ;;  %v13596_v39 = vshll.u32 %v9419_v56, 16 }
 0x43f   :  { %v9624_v21 = vor.u32 %v3279_v1, %v13586_v63  ;;  %v13597_v33 = vshll.u32 %v9421_v58, 16  ;;  %v3281_v29 = vrot.slane %v13587_v5, 1  ;;  %v3283_v20 = vrot.slane %v13588_v0, 1 }
 0x440   :  { %v13598_v45 = vshll.u32 %v9423_v53, 16  ;;  %v3285_v22 = vrot.slane %v13589_v42, 1  ;;  %v3287_v1 = vrot.slane %v13590_v52, 1  ;;  %v13600_v63 = vshll.u32 %v9427_v46, 16 }
 0x441   :  { %v9641_v16 = vor.u32 %v3281_v29, %v13591_v31  ;;  %v9645_v5 = vor.u32 %v3283_v20, %v13592_v17  ;;  %v3289_v0 = vrot.slane %v13593_v40, 1  ;;  %v3291_v29 = vrot.slane %v13596_v39, 1 }
 0x442   :  { %v9652_v42 = vor.u32 %v3285_v22, %v13594_v41  ;;  %v9656_v52 = vor.u32 %v3287_v1, %v13595_v44  ;;  %v14018_v40 = vshrl.u32 %v9417_v4, 16  ;;  %v14020_v1 = vshrl.u32 %v9419_v56, 16 }
 0x443   :  { %v3293_v39 = vrot.slane %v13597_v33, 1  ;;  %v3295_v20 = vrot.slane %v13598_v45, 1  ;;  %v14022_v17 = vshll.u32 %v9425_v60, 16  ;;  %v14023_v33 = vshrl.u32 %v9421_v58, 16 }
 0x444   :  { %4020 = vmatmul.bf16.gmra.mxu2 %v9515_v54  ;;  %14016 = vst [vmem:[#allocation35_spill] sm:$0xff] %v9652_v42  ;;  %v9665_v3 = vor.u32 %v3289_v0, %v14018_v40  ;;  %v9671_v44 = vor.u32 %v3291_v29, %v14020_v1  ;;  %v3299_v40 = vrot.slane %v13600_v63, 1  ;;  %v14025_v45 = vshrl.u32 %v9423_v53, 16 }
 0x445   :  { %14017 = vst [vmem:[#allocation36_spill] sm:$0xff] %v9656_v52  ;;  %v3297_v0 = vrot.slane %v14022_v17, 1  ;;  %v9688_v31 = vor.u32 %v3293_v39, %v14023_v33  ;;  %v14027_v17 = vshrl.u32 %v9425_v60, 16  ;;  %v14029_v63 = vshrl.u32 %v9427_v46, 16 }
 0x446   :  { %14019 = vst [vmem:[#allocation38_spill] sm:$0xff] %v9665_v3  ;;  %v9692_v22 = vor.u32 %v3295_v20, %v14025_v45  ;;  %v14031_v29 = vshll.u32 %v9561_v9, 16  ;;  %v13602_v1 = vshrl.u32 %v9431_v2, 16  ;;  %v14032_v33 = vshll.u32 %v9431_v2, 16 }
 0x447   :  { %3851 = vmatmul.bf16.gmra.mxu1 %v9552_v12  ;;  %14021 = vst [vmem:[#allocation39_spill] sm:$0xff] %v9671_v44  ;;  %v9696_v12 = vor.u32 %v3297_v0, %v14027_v17  ;;  %v9700_v44 = vor.u32 %v3299_v40, %v14029_v63  ;;  %v14033_v45 = vshll.u32 %v9433_v28, 16  ;;  %v14039_v0 = vshll.u32 %v9435_v19, 16 }
 0x448   :  { %14024 = vst [vmem:[#allocation40_spill] sm:$0xff] %v9688_v31  ;;  %v3303_v41 = vrot.slane %v14031_v29, 1  ;;  %v3305_v31 = vrot.slane %v14032_v33, 1  ;;  %v14034_v29 = vshrl.u32 %v9561_v9, 16  ;;  %v14040_v40 = vshll.u32 %v9437_v36, 16 }
 0x449   :  { %3971 = vmatmul.bf16.gmra.mxu3 %v9589_v32  ;;  %14026 = vst [vmem:[#allocation41_spill] sm:$0xff] %v9692_v22  ;;  %v3307_v20 = vrot.slane %v14033_v45, 1  ;;  %v14037_v45 = vshrl.u32 %v9433_v28, 16  ;;  %v14042_v39 = vshll.u32 %v9439_v55, 16  ;;  %v14051_v22 = vshll.u32 %v9441_v8, 16 }
 0x44a   :  { %14028 = vst [vmem:[#allocation42_spill] sm:$0xff] %v9696_v12  ;;  %v9716_v17 = vor.u32 %v3303_v41, %v14034_v29  ;;  %v9721_v33 = vor.u32 %v3305_v31, %v13602_v1  ;;  %v3311_v12 = vrot.slane %v14040_v40, 1  ;;  %v14041_v41 = vshll.u32 %v9429_v38, 16 }
 0x44b   :  { %14030 = vst [vmem:[#allocation43_spill] sm:$0xff] %v9700_v44  ;;  %v9725_v44 = vor.u32 %v3307_v20, %v14037_v45  ;;  %v3179_v31 = vshll.u32 %v9456_v26, 16  ;;  %v3186_v20 = vshll.u32 %v9458_v6, 16  ;;  %v14045_v40 = vshrl.u32 %v9437_v36, 16 }
 0x44c   :  { %14035 = vst [vmem:[#allocation44_spill] sm:$0xff] %v9716_v17  ;;  %v3301_v29 = vrot.slane %v14041_v41, 1  ;;  %v3313_v17 = vrot.slane %v14042_v39, 1  ;;  %v14047_v41 = vshrl.u32 %v9429_v38, 16  ;;  %v14049_v39 = vshrl.u32 %v9439_v55, 16 }
 0x44d   :  { %4358 = vmatmul.bf16.gmra.mxu0 %v9581_v13  ;;  %14036 = vst [vmem:[#allocation45_spill] sm:$0xff] %v9721_v33  ;;  %v9746_v63 = vor.u32 %v3311_v12, %v14045_v40  ;;  %v14053_v12 = vshll.u32 %v9506_v51, 16  ;;  %v14064_v32 = vshll.u32 %v9542_v23, 16  ;;  %v3329_v54 = vrot.slane %v3186_v20, 1 }
 0x44e   :  { %14038 = vst [vmem:[#allocation46_spill] sm:$0xff] %v9725_v44  ;;  %v9750_v44 = vor.u32 %v3301_v29, %v14047_v41  ;;  %v9754_v33 = vor.u32 %v3313_v17, %v14049_v39  ;;  %v14054_v29 = vshll.u32 %v9535_v34, 16  ;;  %v3193_v17 = vshll.u32 %v9460_v57, 16  ;;  %v14055_v39 = vld [vmem:[#allocation30_spill] sm:$0xff] }
 0x44f   :  { %14046 = vst [vmem:[#allocation48_spill] sm:$0xff] %v9746_v63  ;;  %v3319_v40 = vrot.slane %v14053_v12, 1  ;;  %v3323_v52 = vrot.slane %v14064_v32, 1  ;;  %v14072_v27 = vshrl.u32 %v9406_v11, 16 }
 0x450   :  { %14048 = vst [vmem:[#allocation49_spill] sm:$0xff] %v9750_v44  ;;  %v3321_v41 = vrot.slane %v14054_v29, 1  ;;  %v3176_v44 = vshrl.u32 %v9456_v26, 16  ;;  %v14062_v29 = vshrl.u32 %v9535_v34, 16  ;;  %v3331_v32 = vrot.slane %v3193_v17, 1 }
 0x451   :  { %14050 = vst [vmem:[#allocation50_spill] sm:$0xff] %v9754_v33  ;;  %v3183_v33 = vshrl.u32 %v9458_v6, 16  ;;  %v3010_v42 = vrot.slane %v14072_v27, 7  ;;  %v14076_v27 = vshll.u32 %v9406_v11, 16 }
 0x454   :  { %4025 = vmatmul.bf16.gmra.mxu2 %v9533_v50  ;;  %v9783_v50 = vor.u32 %v3321_v41, %v14062_v29  ;;  %v9799_v29 = vor.u32 %v3329_v54, %v3183_v33 }
 0x456   :  { %14063 = vst [vmem:[#allocation54_spill] sm:$0xff] %v9783_v50  ;;  %v13614_v50 = vshrl.u32 %v14055_v39, 16 }
 0x457   :  { %3856 = vmatmul.bf16.gmra.mxu1 %v9581_v13  ;;  %v3309_v13 = vrot.slane %v14039_v0, 1  ;;  %v14043_v0 = vshrl.u32 %v9435_v19, 16  ;;  %14070 = vst [vmem:[#allocation58_spill] sm:$0xff] %v9799_v29  ;;  %v14108_v29 = vshrl.u32 %v9421_v58, 16 }
 0x459   :  { %3976 = vmatmul.bf16.gmra.mxu3 %v9601_v48  ;;  %v9742_v1 = vor.u32 %v3309_v13, %v14043_v0  ;;  %v3315_v48 = vrot.slane %v14051_v22, 1  ;;  %v3169_v13 = vshrl.u32 %v9454_v49, 16  ;;  %v14052_v0 = vshll.u32 %v9452_v15, 16 }
 0x45a   :  { %v14056_v22 = vshrl.u32 %v9441_v8, 16 }
 0x45b   :  { %14044 = vst [vmem:[#allocation47_spill] sm:$0xff] %v9742_v1  ;;  %v3317_v45 = vrot.slane %v14052_v0, 1  ;;  %v14058_v1 = vshrl.u32 %v9452_v15, 16  ;;  %v14060_v0 = vshrl.u32 %v9506_v51, 16 }
 0x45c   :  { %v9771_v63 = vor.u32 %v3315_v48, %v14056_v22  ;;  %v14065_v48 = vshll.u32 %v9454_v49, 16 }
 0x45d   :  { %4363 = vmatmul.bf16.gmra.mxu0 %v9595_v61  ;;  %v9775_v3 = vor.u32 %v3317_v45, %v14058_v1  ;;  %v9779_v12 = vor.u32 %v3319_v40, %v14060_v0  ;;  %v3171_v1 = vrot.slane %v3169_v13, 7  ;;  %v3190_v45 = vshrl.u32 %v9460_v57, 16 }
 0x45e   :  { %14057 = vst [vmem:[#allocation51_spill] sm:$0xff] %v9771_v63  ;;  %v3325_v22 = vrot.slane %v14065_v48, 1  ;;  %v3327_v63 = vrot.slane %v3179_v31, 1  ;;  %v14066_v40 = vshrl.u32 %v9542_v23, 16  ;;  %v14071_v48 = vshll.u32 %v14055_v39, 16 }
 0x45f   :  { %14059 = vst [vmem:[#allocation52_spill] sm:$0xff] %v9775_v3  ;;  %v9806_v10 = vor.u32 %v3331_v32, %v3190_v45 }
 0x460   :  { %14061 = vst [vmem:[#allocation53_spill] sm:$0xff] %v9779_v12  ;;  %v9793_v0 = vor.u32 %v3323_v52, %v14066_v40  ;;  %v9795_v12 = vor.u32 %v3325_v22, %v3169_v13  ;;  %v9797_v41 = vor.u32 %v3327_v63, %v3176_v44  ;;  %v3333_v3 = vrot.slane %v14071_v48, 1  ;;  %v7082_v52 = vld [vmem:[%s13527_s4 + $0x168] sm:$0xff] }
 0x461   :  { %14073 = vst [vmem:[#allocation59_spill] sm:$0xff] %v9806_v10  ;;  %v14075_v63 = vshll.u32 %v9454_v49, 16  ;;  %4680 = vmatpush.bf16.msrb.mxu2 %v7082_v52  ;;  %v3013_v22 = vor.u32 %v14076_v27, %v3010_v42  ;;  %v7074_v40 = vld [vmem:[%s13527_s4 + $0x128] sm:$0xff]  ;;  %v14079_v42 = vshrl.u32 %v9408_v30, 16 }
 0x462   :  { %14067 = vst [vmem:[#allocation55_spill] sm:$0xff] %v9793_v0  ;;  %v9814_v54 = vor.u32 %v3333_v3, %v13614_v50  ;;  %4511 = vmatpush.bf16.msrb.mxu1 %v7074_v40 }
 0x463   :  { %14068 = vst [vmem:[#allocation56_spill] sm:$0xff] %v9795_v12  ;;  %v3174_v13 = vor.u32 %v14075_v63, %v3171_v1  ;;  %v9831_v3 = vsel %vm7256_vm4, 0, %v3013_v22  ;;  %v3178_v1 = vrot.slane %v3176_v44, 7  ;;  %v3017_v48 = vrot.slane %v14079_v42, 7 }
 0x464   :  { %14069 = vst [vmem:[#allocation57_spill] sm:$0xff] %v9797_v41  ;;  %4030 = vmatmul.bf16.gmra.mxu2 %v9540_v25  ;;  %v14080_v63 = vshll.u32 %v9408_v30, 16  ;;  %v3185_v22 = vrot.slane %v3183_v33, 7  ;;  %v14084_v42 = vshll.u32 %v9411_v43, 16  ;;  %v14110_v41 = vshll.u32 %v9421_v58, 16 }
 0x465   :  { %14074 = vst [vmem:[#allocation60_spill] sm:$0xff] %v9814_v54  ;;  %v9826_v32 = vsel %vm7256_vm4, 0, %v3174_v13  ;;  %v3181_v52 = vor.u32 %v3179_v31, %v3178_v1  ;;  %v14083_v31 = vshrl.u32 %v9411_v43, 16 }
 0x466   :  { %14077 = vst [vmem:[#allocation61_spill] sm:$0xff] %v9826_v32  ;;  %v3020_v13 = vor.u32 %v14080_v63, %v3017_v48  ;;  %v3188_v1 = vor.u32 %v3186_v20, %v3185_v22  ;;  %v3192_v63 = vrot.slane %v3190_v45, 7  ;;  %v14087_v20 = vshrl.u32 %v9413_v59, 16 }
 0x467   :  { %3861 = vmatmul.bf16.gmra.mxu1 %v9595_v61  ;;  %14078 = vst [vmem:[#allocation62_spill] sm:$0xff] %v9831_v3  ;;  %v9842_v27 = vsel %vm7256_vm4, 0, %v3181_v52  ;;  %v3024_v40 = vrot.slane %v14083_v31, 7  ;;  %v14088_v31 = vshll.u32 %v9413_v59, 16 }
 0x468   :  { %14081 = vst [vmem:[#allocation63_spill] sm:$0xff] %v9842_v27  ;;  %v9847_v44 = vsel %vm7256_vm4, 0, %v3020_v13  ;;  %v9858_v52 = vsel %vm7256_vm4, 0, %v3188_v1  ;;  %v3031_v13 = vrot.slane %v14087_v20, 7  ;;  %v3195_v22 = vor.u32 %v3193_v17, %v3192_v63  ;;  %v7081_v1 = vld [vmem:[%s13527_s4 + $0x160] sm:$0xff] }
 0x469   :  { %3981 = vmatmul.bf16.gmra.mxu3 %v9826_v32  ;;  %14082 = vst [vmem:[#allocation64_spill] sm:$0xff] %v9847_v44  ;;  %v3027_v48 = vor.u32 %v14084_v42, %v3024_v40  ;;  %v7073_v42 = vld [vmem:[%s13527_s4 + $0x120] sm:$0xff]  ;;  %4681 = vmatpush.bf16.msrb.mxu2 %v7081_v1 }
 0x46a   :  { %14085 = vst [vmem:[#allocation65_spill] sm:$0xff] %v9858_v52  ;;  %v3034_v40 = vor.u32 %v14088_v31, %v3031_v13  ;;  %v9880_v45 = vsel %vm7256_vm4, 0, %v3195_v22  ;;  %4512 = vmatpush.bf16.msrb.mxu1 %v7073_v42  ;;  %v14092_v22 = vshll.u32 %v9415_v18, 16 }
 0x46b   :  { %v9863_v33 = vsel %vm7256_vm4, 0, %v3027_v48  ;;  %14089 = vst [vmem:[#allocation67_spill] sm:$0xff] %v9880_v45  ;;  %v14091_v48 = vshrl.u32 %v9415_v18, 16 }
 0x46c   :  { %14086 = vst [vmem:[#allocation66_spill] sm:$0xff] %v9863_v33  ;;  %v9885_v17 = vsel %vm7256_vm4, 0, %v3034_v40 }
 0x46d   :  { %4368 = vmatmul.bf16.gmra.mxu0 %v9831_v3  ;;  %14090 = vst [vmem:[#allocation68_spill] sm:$0xff] %v9885_v17  ;;  %v3038_v63 = vrot.slane %v14091_v48, 7 }
 0x46f   :  { %v3041_v31 = vor.u32 %v14092_v22, %v3038_v63  ;;  %v14095_v63 = vshrl.u32 %v9417_v4, 16 }
 0x471   :  { %v9901_v40 = vsel %vm7256_vm4, 0, %v3041_v31 }
 0x472   :  { %14093 = vst [vmem:[#allocation69_spill] sm:$0xff] %v9901_v40 }
 0x474   :  { %4035 = vmatmul.bf16.gmra.mxu2 %v9406_v11 }
 0x477   :  { %3866 = vmatmul.bf16.gmra.mxu1 %v9831_v3 }
 0x479   :  { %3986 = vmatmul.bf16.gmra.mxu3 %v9842_v27 }
 0x47d   :  { %4373 = vmatmul.bf16.gmra.mxu0 %v9847_v44 }
 0x484   :  { %4040 = vmatmul.bf16.gmra.mxu2 %v9408_v30 }
 0x487   :  { %3871 = vmatmul.bf16.gmra.mxu1 %v9847_v44  ;;  %v14097_v44 = vshll.u32 %v9417_v4, 16 }
 0x489   :  { %3991 = vmatmul.bf16.gmra.mxu3 %v9858_v52 }
 0x48d   :  { %4378 = vmatmul.bf16.gmra.mxu0 %v9863_v33 }
 0x494   :  { %4045 = vmatmul.bf16.gmra.mxu2 %v9411_v43 }
 0x497   :  { %3876 = vmatmul.bf16.gmra.mxu1 %v9863_v33 }
 0x499   :  { %3996 = vmatmul.bf16.gmra.mxu3 %v9880_v45 }
 0x49d   :  { %4383 = vmatmul.bf16.gmra.mxu0 %v9885_v17 }
 0x4a4   :  { %v3842_v20 = vpop.f32.mrf.mxu1  ;;  %4050 = vmatmul.bf16.gmra.mxu2 %v9413_v59 }
 0x4a7   :  { %v4011_v13 = vpop.f32.mrf.mxu2  ;;  %3881 = vmatmul.bf16.gmra.mxu1 %v9885_v17 }
 0x4a8   :  { %v9894_v1 = vadd.f32 %v4011_v13, %v3842_v20  ;;  %v3045_v20 = vrot.slane %v14095_v63, 7 }
 0x4a9   :  { %4130 = vmatmul.bf16.vlgmr.msra.gmra.mxu3 %v9452_v15 }
 0x4aa   :  { %v9896_v42 = vpop.f32.mrf.mxu0  ;;  %v3048_v3 = vor.u32 %v14097_v44, %v3045_v20  ;;  %v14101_v44 = vshrl.u32 %v9419_v56, 16 }
 0x4ac   :  { %v3844_v48 = vpop.f32.mrf.mxu1  ;;  %v9904_v50 = vpop.f32.mrf.mxu3  ;;  %v3052_v20 = vrot.slane %v14101_v44, 7  ;;  %v7072_v44 = vld [vmem:[%s13527_s4 + $0x118] sm:$0xff] }
 0x4ad   :  { %4388 = vmatmul.bf16.gmra.mxu0 %v9901_v40  ;;  %14094 = vst [vmem:[#allocation70_spill] sm:$0xff] %v9904_v50  ;;  %4513 = vmatpush.bf16.msrb.mxu1 %v7072_v44 }
 0x4af   :  { %v4013_v54 = vpop.f32.mrf.mxu2 }
 0x4b0   :  { %v9906_v17 = vadd.f32 %v4013_v54, %v3844_v48  ;;  %v9925_v48 = vsel %vm7256_vm4, 0, %v3048_v3 }
 0x4b1   :  { %14098 = vst [vmem:[#allocation72_spill] sm:$0xff] %v9925_v48 }
 0x4b2   :  { %v9908_v33 = vpop.f32.mrf.mxu0 }
 0x4b4   :  { %4055 = vmatmul.bf16.gmra.mxu2 %v9415_v18  ;;  %v3847_v13 = vpop.f32.mrf.mxu1  ;;  %v9913_v22 = vpop.f32.mrf.mxu3 }
 0x4b5   :  { %14096 = vst [vmem:[#allocation71_spill] sm:$0xff] %v9913_v22 }
 0x4b7   :  { %v4016_v31 = vpop.f32.mrf.mxu2  ;;  %3886 = vmatmul.bf16.gmra.mxu1 %v9901_v40 }
 0x4b8   :  { %v9918_v61 = vadd.f32 %v4016_v31, %v3847_v13 }
 0x4b9   :  { %4135 = vmatmul.bf16.gmra.mxu3 %v9506_v51  ;;  %v14103_v51 = vshll.u32 %v9419_v56, 16 }
 0x4ba   :  { %v9920_v54 = vpop.f32.mrf.mxu0 }
 0x4bb   :  { %v3055_v15 = vor.u32 %v14103_v51, %v3052_v20 }
 0x4bc   :  { %v3849_v63 = vpop.f32.mrf.mxu1  ;;  %v9928_v22 = vpop.f32.mrf.mxu3 }
 0x4bd   :  { %4393 = vmatmul.bf16.gmra.mxu0 %v9925_v48  ;;  %14099 = vst [vmem:[#allocation73_spill] sm:$0xff] %v9928_v22 }
 0x4bf   :  { %v4018_v50 = vpop.f32.mrf.mxu2 }
 0x4c0   :  { %v9930_v40 = vadd.f32 %v4018_v50, %v3849_v63  ;;  %v7080_v50 = vld [vmem:[%s13527_s4 + $0x158] sm:$0xff] }
 0x4c1   :  { %4682 = vmatpush.bf16.msrb.mxu2 %v7080_v50  ;;  %v3059_v50 = vrot.slane %v14108_v29, 7 }
 0x4c2   :  { %v9932_v10 = vpop.f32.mrf.mxu0 }
 0x4c3   :  { %14100 = vst [vmem:[#allocation74_spill] sm:$0xff] %v9932_v10  ;;  %v3062_v12 = vor.u32 %v14110_v41, %v3059_v50  ;;  %v14115_v41 = vshrl.u32 %v9423_v53, 16 }
 0x4c4   :  { %4060 = vmatmul.bf16.gmra.mxu2 %v9417_v4  ;;  %v3852_v13 = vpop.f32.mrf.mxu1  ;;  %v9937_v31 = vpop.f32.mrf.mxu3 }
 0x4c5   :  { %14102 = vst [vmem:[#allocation75_spill] sm:$0xff] %v9937_v31  ;;  %v9979_v29 = vsel %vm7256_vm4, 0, %v3062_v12  ;;  %v3066_v50 = vrot.slane %v14115_v41, 7 }
 0x4c6   :  { %14112 = vst [vmem:[#allocation82_spill] sm:$0xff] %v9979_v29 }
 0x4c7   :  { %v4021_v3 = vpop.f32.mrf.mxu2  ;;  %3891 = vmatmul.bf16.gmra.mxu1 %v9925_v48  ;;  %v9955_v48 = vsel %vm7256_vm4, 0, %v3055_v15 }
 0x4c8   :  { %v9945_v63 = vadd.f32 %v4021_v3, %v3852_v13  ;;  %14105 = vst [vmem:[#allocation77_spill] sm:$0xff] %v9955_v48 }
 0x4c9   :  { %4140 = vmatmul.bf16.gmra.mxu3 %v9535_v34 }
 0x4ca   :  { %v9950_v22 = vpop.f32.mrf.mxu0 }
 0x4cb   :  { %14104 = vst [vmem:[#allocation76_spill] sm:$0xff] %v9950_v22 }
 0x4cc   :  { %v3854_v51 = vpop.f32.mrf.mxu1  ;;  %v9958_v20 = vpop.f32.mrf.mxu3 }
 0x4cd   :  { %4398 = vmatmul.bf16.gmra.mxu0 %v9955_v48  ;;  %14106 = vst [vmem:[#allocation78_spill] sm:$0xff] %v9958_v20 }
 0x4cf   :  { %v4023_v13 = vpop.f32.mrf.mxu2 }
 0x4d0   :  { %v9960_v3 = vadd.f32 %v4023_v13, %v3854_v51 }
 0x4d2   :  { %v9962_v31 = vpop.f32.mrf.mxu0 }
 0x4d3   :  { %14107 = vst [vmem:[#allocation79_spill] sm:$0xff] %v9962_v31 }
 0x4d4   :  { %4065 = vmatmul.bf16.gmra.mxu2 %v9419_v56  ;;  %v3857_v44 = vpop.f32.mrf.mxu1  ;;  %v9967_v34 = vpop.f32.mrf.mxu3 }
 0x4d5   :  { %14109 = vst [vmem:[#allocation80_spill] sm:$0xff] %v9967_v34 }
 0x4d7   :  { %v4026_v15 = vpop.f32.mrf.mxu2  ;;  %3896 = vmatmul.bf16.gmra.mxu1 %v9955_v48 }
 0x4d8   :  { %v9972_v20 = vadd.f32 %v4026_v15, %v3857_v44 }
 0x4d9   :  { %4145 = vmatmul.bf16.gmra.mxu3 %v9542_v23  ;;  %v14117_v23 = vshll.u32 %v9423_v53, 16 }
 0x4da   :  { %v9974_v51 = vpop.f32.mrf.mxu0 }
 0x4db   :  { %14111 = vst [vmem:[#allocation81_spill] sm:$0xff] %v9974_v51  ;;  %v3069_v51 = vor.u32 %v14117_v23, %v3066_v50  ;;  %v14122_v23 = vshrl.u32 %v9425_v60, 16 }
 0x4dc   :  { %v3859_v13 = vpop.f32.mrf.mxu1  ;;  %v9982_v34 = vpop.f32.mrf.mxu3 }
 0x4dd   :  { %4403 = vmatmul.bf16.gmra.mxu0 %v9979_v29  ;;  %14113 = vst [vmem:[#allocation83_spill] sm:$0xff] %v9982_v34  ;;  %v3073_v50 = vrot.slane %v14122_v23, 7  ;;  %v7071_v23 = vld [vmem:[%s13527_s4 + $0x110] sm:$0xff] }
 0x4de   :  { %4514 = vmatpush.bf16.msrb.mxu1 %v7071_v23  ;;  %v14129_v23 = vshrl.u32 %v9427_v46, 16 }
 0x4df   :  { %v4028_v0 = vpop.f32.mrf.mxu2 }
 0x4e0   :  { %v9984_v48 = vadd.f32 %v4028_v0, %v3859_v13  ;;  %v10003_v13 = vsel %vm7256_vm4, 0, %v3069_v51 }
 0x4e1   :  { %14119 = vst [vmem:[#allocation87_spill] sm:$0xff] %v10003_v13 }
 0x4e2   :  { %v9986_v31 = vpop.f32.mrf.mxu0 }
 0x4e3   :  { %14114 = vst [vmem:[#allocation84_spill] sm:$0xff] %v9986_v31 }
 0x4e4   :  { %4070 = vmatmul.bf16.gmra.mxu2 %v9421_v58  ;;  %v3862_v44 = vpop.f32.mrf.mxu1  ;;  %v9991_v15 = vpop.f32.mrf.mxu3 }
 0x4e5   :  { %14116 = vst [vmem:[#allocation85_spill] sm:$0xff] %v9991_v15 }
 0x4e7   :  { %v4031_v12 = vpop.f32.mrf.mxu2  ;;  %3901 = vmatmul.bf16.gmra.mxu1 %v9979_v29 }
 0x4e8   :  { %v9996_v34 = vadd.f32 %v4031_v12, %v3862_v44 }
 0x4e9   :  { %4150 = vmatmul.bf16.gmra.mxu3 %v9454_v49  ;;  %v14124_v49 = vshll.u32 %v9425_v60, 16 }
 0x4ea   :  { %v9998_v0 = vpop.f32.mrf.mxu0 }
 0x4eb   :  { %14118 = vst [vmem:[#allocation86_spill] sm:$0xff] %v9998_v0  ;;  %v3076_v0 = vor.u32 %v14124_v49, %v3073_v50 }
 0x4ec   :  { %v3864_v41 = vpop.f32.mrf.mxu1  ;;  %v10006_v15 = vpop.f32.mrf.mxu3 }
 0x4ed   :  { %4408 = vmatmul.bf16.gmra.mxu0 %v10003_v13  ;;  %14120 = vst [vmem:[#allocation88_spill] sm:$0xff] %v10006_v15  ;;  %v10036_v49 = vsel %vm7256_vm4, 0, %v3076_v0  ;;  %v3080_v0 = vrot.slane %v14129_v23, 7  ;;  %v7057_v23 = vld [vmem:[%s13527_s4 + $0xa0] sm:$0xff] }
 0x4ee   :  { %14126 = vst [vmem:[#allocation92_spill] sm:$0xff] %v10036_v49 }
 0x4ef   :  { %v4033_v31 = vpop.f32.mrf.mxu2 }
 0x4f0   :  { %v10008_v29 = vadd.f32 %v4033_v31, %v3864_v41  ;;  %v7079_v31 = vld [vmem:[%s13527_s4 + $0x150] sm:$0xff] }
 0x4f1   :  { %4683 = vmatpush.bf16.msrb.mxu2 %v7079_v31  ;;  %v7059_v31 = vld [vmem:[%s13527_s4 + $0xb0] sm:$0xff] }
 0x4f2   :  { %v10010_v58 = vpop.f32.mrf.mxu0 }
 0x4f3   :  { %14121 = vst [vmem:[#allocation89_spill] sm:$0xff] %v10010_v58 }
 0x4f4   :  { %4075 = vmatmul.bf16.gmra.mxu2 %v9423_v53  ;;  %v3867_v44 = vpop.f32.mrf.mxu1  ;;  %v10015_v12 = vpop.f32.mrf.mxu3  ;;  %v14152_v53 = vshrl.u32 %v9431_v2, 16 }
 0x4f5   :  { %14123 = vst [vmem:[#allocation90_spill] sm:$0xff] %v10015_v12  ;;  %v7060_v12 = vld [vmem:[%s13527_s4 + $0xb8] sm:$0xff] }
 0x4f6   :  { %4171 = vmatpush.bf16.msrb.mxu3 %v7060_v12  ;;  %v3101_v56 = vrot.slane %v14152_v53, 7 }
 0x4f7   :  { %v4036_v51 = vpop.f32.mrf.mxu2  ;;  %3906 = vmatmul.bf16.gmra.mxu1 %v10003_v13 }
 0x4f8   :  { %v10023_v41 = vadd.f32 %v4036_v51, %v3867_v44 }
 0x4f9   :  { %4155 = vmatmul.bf16.gmra.mxu3 %v9456_v26 }
 0x4fa   :  { %v10031_v15 = vpop.f32.mrf.mxu0  ;;  %4172 = vmatpush.bf16.msrb.mxu3 %v7059_v31 }
 0x4fb   :  { %14125 = vst [vmem:[#allocation91_spill] sm:$0xff] %v10031_v15 }
 0x4fc   :  { %v3869_v50 = vpop.f32.mrf.mxu1  ;;  %v10039_v44 = vpop.f32.mrf.mxu3 }
 0x4fd   :  { %4413 = vmatmul.bf16.gmra.mxu0 %v10036_v49  ;;  %14127 = vst [vmem:[#allocation93_spill] sm:$0xff] %v10039_v44  ;;  %v7058_v44 = vld [vmem:[%s13527_s4 + $0xa8] sm:$0xff] }
 0x4fe   :  { %4173 = vmatpush.bf16.msrb.mxu3 %v7058_v44  ;;  %v7056_v44 = vld [vmem:[%s13527_s4 + $0x98] sm:$0xff] }
 0x4ff   :  { %v4038_v51 = vpop.f32.mrf.mxu2 }
 0x500   :  { %v10041_v13 = vadd.f32 %v4038_v51, %v3869_v50  ;;  %v14131_v51 = vshll.u32 %v9427_v46, 16 }
 0x502   :  { %v10046_v15 = vpop.f32.mrf.mxu0  ;;  %4174 = vmatpush.bf16.msrb.mxu3 %v7057_v23  ;;  %v14136_v23 = vshrl.u32 %v9429_v38, 16 }
 0x503   :  { %14128 = vst [vmem:[#allocation94_spill] sm:$0xff] %v10046_v15  ;;  %v3083_v15 = vor.u32 %v14131_v51, %v3080_v0 }
 0x504   :  { %4080 = vmatmul.bf16.gmra.mxu2 %v9425_v60  ;;  %v3872_v12 = vpop.f32.mrf.mxu1  ;;  %v10054_v26 = vpop.f32.mrf.mxu3 }
 0x505   :  { %14130 = vst [vmem:[#allocation95_spill] sm:$0xff] %v10054_v26  ;;  %v10069_v26 = vsel %vm7256_vm4, 0, %v3083_v15 }
 0x506   :  { %14133 = vst [vmem:[#allocation97_spill] sm:$0xff] %v10069_v26  ;;  %4175 = vmatpush.bf16.msrb.mxu3 %v7056_v44 }
 0x507   :  { %v4041_v50 = vpop.f32.mrf.mxu2  ;;  %3911 = vmatmul.bf16.gmra.mxu1 %v10036_v49  ;;  %v7055_v49 = vld [vmem:[%s13527_s4 + $0x90] sm:$0xff] }
 0x508   :  { %v10059_v31 = vadd.f32 %v4041_v50, %v3872_v12 }
 0x509   :  { %4160 = vmatmul.bf16.gmra.mxu3 %v9458_v6  ;;  %v3087_v6 = vrot.slane %v14136_v23, 7 }
 0x50a   :  { %v10064_v60 = vpop.f32.mrf.mxu0  ;;  %4176 = vmatpush.bf16.msrb.mxu3 %v7055_v49  ;;  %v7053_v49 = vld [vmem:[%s13527_s4 + $0x80] sm:$0xff] }
 0x50b   :  { %14132 = vst [vmem:[#allocation96_spill] sm:$0xff] %v10064_v60 }
 0x50c   :  { %v3874_v0 = vpop.f32.mrf.mxu1  ;;  %v10075_v12 = vpop.f32.mrf.mxu3 }
 0x50d   :  { %4418 = vmatmul.bf16.gmra.mxu0 %v10069_v26  ;;  %14134 = vst [vmem:[#allocation98_spill] sm:$0xff] %v10075_v12  ;;  %v7054_v12 = vld [vmem:[%s13527_s4 + $0x88] sm:$0xff] }
 0x50e   :  { %4177 = vmatpush.bf16.msrb.mxu3 %v7054_v12 }
 0x50f   :  { %v4043_v50 = vpop.f32.mrf.mxu2 }
 0x510   :  { %v10077_v51 = vadd.f32 %v4043_v50, %v3874_v0  ;;  %v14138_v50 = vshll.u32 %v9429_v38, 16 }
 0x512   :  { %v10082_v15 = vpop.f32.mrf.mxu0  ;;  %v3090_v58 = vor.u32 %v14138_v50, %v3087_v6  ;;  %4178 = vmatpush.bf16.msrb.mxu3 %v7053_v49  ;;  %v14143_v50 = vshrl.u32 %v9561_v9, 16 }
 0x513   :  { %14135 = vst [vmem:[#allocation99_spill] sm:$0xff] %v10082_v15 }
 0x514   :  { %4085 = vmatmul.bf16.gmra.mxu2 %v9427_v46  ;;  %v3877_v60 = vpop.f32.mrf.mxu1  ;;  %v10090_v44 = vpop.f32.mrf.mxu3  ;;  %v3094_v38 = vrot.slane %v14143_v50, 7  ;;  %v7078_v50 = vld [vmem:[%s13527_s4 + $0x148] sm:$0xff] }
 0x515   :  { %14137 = vst [vmem:[#allocation100_spill] sm:$0xff] %v10090_v44  ;;  %v10105_v44 = vsel %vm7256_vm4, 0, %v3090_v58  ;;  %4684 = vmatpush.bf16.msrb.mxu2 %v7078_v50 }
 0x516   :  { %14140 = vst [vmem:[#allocation102_spill] sm:$0xff] %v10105_v44 }
 0x517   :  { %v4046_v0 = vpop.f32.mrf.mxu2  ;;  %3916 = vmatmul.bf16.gmra.mxu1 %v10069_v26 }
 0x518   :  { %v10095_v15 = vadd.f32 %v4046_v0, %v3877_v60 }
 0x519   :  { %4165 = vmatmul.bf16.gmra.mxu3 %v9460_v57 }
 0x51a   :  { %v10100_v23 = vpop.f32.mrf.mxu0 }
 0x51b   :  { %14139 = vst [vmem:[#allocation101_spill] sm:$0xff] %v10100_v23  ;;  %v14144_v23 = vmov 0  }
 0x51c   :  { %v3879_v26 = vpop.f32.mrf.mxu1  ;;  %v10108_v6 = vpop.f32.mrf.mxu3  ;;  %v3269_v57 = vrot.slane %v14144_v23, 1 }
 0x51d   :  { %4423 = vmatmul.bf16.gmra.mxu0 %v10105_v44  ;;  %14141 = vst [vmem:[#allocation103_spill] sm:$0xff] %v10108_v6  ;;  %v14146_v44 = vshll.u32 %v9561_v9, 16 }
 0x51f   :  { %v4048_v60 = vpop.f32.mrf.mxu2  ;;  %v3097_v6 = vor.u32 %v14146_v44, %v3094_v38 }
 0x520   :  { %v10110_v12 = vadd.f32 %v4048_v60, %v3879_v26  ;;  %v10125_v60 = vsel %vm7264_vm5, %v3269_v57, 0 }
 0x521   :  { %14148 = vst [vmem:[#allocation3_spill] sm:$0xff] %v10125_v60  ;;  %v3253_v38 = vsel %vm7256_vm4, 0, %v3097_v6  ;;  %v14154_v6 = vshll.u32 %v9431_v2, 16 }
 0x522   :  { %v10112_v0 = vpop.f32.mrf.mxu0 }
 0x523   :  { %14142 = vst [vmem:[#allocation104_spill] sm:$0xff] %v10112_v0  ;;  %v3104_v22 = vor.u32 %v14154_v6, %v3101_v56  ;;  %v14159_v6 = vshrl.u32 %v9433_v28, 16 }
 0x524   :  { %4090 = vmatmul.bf16.gmra.mxu2 %v14144_v23  ;;  %v3882_v58 = vpop.f32.mrf.mxu1  ;;  %v10118_v46 = vpop.f32.mrf.mxu3 }
 0x525   :  { %14145 = vst [vmem:[#allocation105_spill] sm:$0xff] %v10118_v46  ;;  %v7070_v46 = vld [vmem:[%s13527_s4 + $0x108] sm:$0xff]  ;;  %v10165_v53 = vsel %vm7256_vm4, 0, %v3104_v22 }
 0x526   :  { %4515 = vmatpush.bf16.msrb.mxu1 %v7070_v46  ;;  %14156 = vst [vmem:[#allocation111_spill] sm:$0xff] %v10165_v53 }
 0x527   :  { %v4051_v49 = vpop.f32.mrf.mxu2  ;;  %3921 = vmatmul.bf16.gmra.mxu1 %v9490_v35 }
 0x528   :  { %v10130_v0 = vadd.f32 %v4051_v49, %v3882_v58 }
 0x529   :  { %4179 = vmatmul.bf16.vlgmr.msrb.gmra.mxu3 %v10125_v60 }
 0x52a   :  { %v10135_v23 = vpop.f32.mrf.mxu0 }
 0x52b   :  { %14149 = vst [vmem:[#allocation106_spill] sm:$0xff] %v10135_v23 }
 0x52c   :  { %v3884_v57 = vpop.f32.mrf.mxu1  ;;  %v10140_v44 = vpop.f32.mrf.mxu3 }
 0x52d   :  { %4428 = vmatmul.bf16.gmra.mxu0 %v3253_v38  ;;  %14150 = vst [vmem:[#allocation107_spill] sm:$0xff] %v10140_v44 }
 0x52f   :  { %v4053_v35 = vpop.f32.mrf.mxu2 }
 0x530   :  { %v10142_v58 = vadd.f32 %v4053_v35, %v3884_v57  ;;  %v10160_v35 = vsel %vm7264_vm5, %v9574_v14, 0  ;;  %v3108_v14 = vrot.slane %v14159_v6, 7 }
 0x532   :  { %v10144_v49 = vpop.f32.mrf.mxu0 }
 0x533   :  { %14151 = vst [vmem:[#allocation108_spill] sm:$0xff] %v10144_v49  ;;  %v14161_v49 = vshll.u32 %v9433_v28, 16 }
 0x534   :  { %4095 = vmatmul.bf16.gmra.mxu2 %v9561_v9  ;;  %v3887_v50 = vpop.f32.mrf.mxu1  ;;  %v10149_v23 = vpop.f32.mrf.mxu3 }
 0x535   :  { %14153 = vst [vmem:[#allocation109_spill] sm:$0xff] %v10149_v23  ;;  %v3111_v9 = vor.u32 %v14161_v49, %v3108_v14 }
 0x537   :  { %v4056_v46 = vpop.f32.mrf.mxu2  ;;  %3926 = vmatmul.bf16.gmra.mxu1 %v3253_v38  ;;  %v10194_v6 = vsel %vm7256_vm4, 0, %v3111_v9  ;;  %v5576_v9 = vld [vmem:[%s13530_s7] sm:$0x3] }
 0x538   :  { %v10153_v10 = vadd.f32 %v4056_v46, %v3887_v50  ;;  %14164 = vst [vmem:[#allocation117_spill] sm:$0xff] %v10194_v6 }
 0x539   :  { %4184 = vmatmul.bf16.gmra.mxu3 %v10160_v35 }
 0x53a   :  { %v10155_v44 = vpop.f32.mrf.mxu0 }
 0x53b   :  { %14155 = vst [vmem:[#allocation110_spill] sm:$0xff] %v10155_v44 }
 0x53c   :  { %v3889_v57 = vpop.f32.mrf.mxu1  ;;  %v10168_v38 = vpop.f32.mrf.mxu3 }
 0x53d   :  { %4433 = vmatmul.bf16.gmra.mxu0 %v10165_v53  ;;  %14157 = vst [vmem:[#allocation112_spill] sm:$0xff] %v10168_v38 }
 0x53f   :  { %v4058_v56 = vpop.f32.mrf.mxu2 }
 0x540   :  { %v10170_v50 = vadd.f32 %v4058_v56, %v3889_v57  ;;  %v10189_v56 = vsel %vm7264_vm5, %v9584_v7, 0 }
 0x541   :  { %14163 = vst [vmem:[#allocation116_spill] sm:$0xff] %v10189_v56 }
 0x542   :  { %v10172_v46 = vpop.f32.mrf.mxu0 }
 0x543   :  { %14158 = vst [vmem:[#allocation113_spill] sm:$0xff] %v10172_v46 }
 0x544   :  { %4100 = vmatmul.bf16.gmra.mxu2 %v9431_v2  ;;  %v3892_v23 = vpop.f32.mrf.mxu1  ;;  %v10177_v44 = vpop.f32.mrf.mxu3 }
 0x545   :  { %14160 = vst [vmem:[#allocation114_spill] sm:$0xff] %v10177_v44 }
 0x547   :  { %v4061_v22 = vpop.f32.mrf.mxu2  ;;  %3931 = vmatmul.bf16.gmra.mxu1 %v10165_v53 }
 0x548   :  { %v10182_v38 = vadd.f32 %v4061_v22, %v3892_v23  ;;  %v14168_v22 = vshrl.u32 %v9435_v19, 16 }
 0x549   :  { %4189 = vmatmul.bf16.gmra.mxu3 %v10189_v56 }
 0x54a   :  { %v10184_v57 = vpop.f32.mrf.mxu0  ;;  %v3115_v7 = vrot.slane %v14168_v22, 7  ;;  %v5642_v22 = vsel %vm1981_vm6, %v5576_v9, 0 }
 0x54b   :  { %14162 = vst [vmem:[#allocation115_spill] sm:$0xff] %v10184_v57 }
 0x54c   :  { %v3894_v44 = vpop.f32.mrf.mxu1  ;;  %v10197_v53 = vpop.f32.mrf.mxu3 }
 0x54d   :  { %4438 = vmatmul.bf16.gmra.mxu0 %v10194_v6  ;;  %14165 = vst [vmem:[#allocation118_spill] sm:$0xff] %v10197_v53  ;;  %v7077_v53 = vld [vmem:[%s13527_s4 + $0x140] sm:$0xff] }
 0x54e   :  { %4685 = vmatpush.bf16.msrb.mxu2 %v7077_v53 }
 0x54f   :  { %v4063_v23 = vpop.f32.mrf.mxu2 }
 0x550   :  { %v10199_v49 = vadd.f32 %v4063_v23, %v3894_v44  ;;  %v14170_v44 = vshll.u32 %v9435_v19, 16 }
 0x552   :  { %14166 = vst [vmem:[#allocation119_spill] sm:$0xff] %v10199_v49  ;;  %v10201_v14 = vpop.f32.mrf.mxu0  ;;  %v3118_v23 = vor.u32 %v14170_v44, %v3115_v7  ;;  %5651 = vmatpush.bf16.msra.mxu2 %v5642_v22  ;;  %v14179_v22 = vshll.u32 %v9437_v36, 16 }
 0x553   :  { %14167 = vst [vmem:[#allocation120_spill] sm:$0xff] %v10201_v14 }
 0x554   :  { %4105 = vmatmul.bf16.gmra.mxu2 %v9433_v28  ;;  %v3897_v57 = vpop.f32.mrf.mxu1  ;;  %v10209_v46 = vpop.f32.mrf.mxu3  ;;  %v7069_v28 = vld [vmem:[%s13527_s4 + $0x100] sm:$0xff]  ;;  %v10233_v7 = vsel %vm7256_vm4, 0, %v3118_v23 }
 0x555   :  { %14169 = vst [vmem:[#allocation121_spill] sm:$0xff] %v10209_v46  ;;  %4516 = vmatpush.bf16.msrb.mxu1 %v7069_v28 }
 0x556   :  { %14174 = vst [vmem:[#allocation125_spill] sm:$0xff] %v10233_v7 }
 0x557   :  { %v4066_v2 = vpop.f32.mrf.mxu2  ;;  %3936 = vmatmul.bf16.gmra.mxu1 %v10194_v6  ;;  %v10228_v6 = vsel %vm7264_vm5, %v9605_v62, 0  ;;  %v14177_v62 = vshrl.u32 %v9437_v36, 16 }
 0x558   :  { %v10218_v14 = vadd.f32 %v4066_v2, %v3897_v57  ;;  %14173 = vst [vmem:[#allocation124_spill] sm:$0xff] %v10228_v6 }
 0x559   :  { %4194 = vmatmul.bf16.gmra.mxu3 %v10228_v6  ;;  %v3122_v53 = vrot.slane %v14177_v62, 7 }
 0x55a   :  { %14171 = vst [vmem:[#allocation122_spill] sm:$0xff] %v10218_v14  ;;  %v10223_v49 = vpop.f32.mrf.mxu0 }
 0x55b   :  { %14172 = vst [vmem:[#allocation123_spill] sm:$0xff] %v10223_v49  ;;  %v3125_v14 = vor.u32 %v14179_v22, %v3122_v53  ;;  %v14186_v22 = vshrl.u32 %v9439_v55, 16 }
 0x55c   :  { %v3899_v2 = vpop.f32.mrf.mxu1  ;;  %v10236_v57 = vpop.f32.mrf.mxu3 }
 0x55d   :  { %4443 = vmatmul.bf16.gmra.mxu0 %v10233_v7  ;;  %14175 = vst [vmem:[#allocation126_spill] sm:$0xff] %v10236_v57  ;;  %v10262_v62 = vsel %vm7256_vm4, 0, %v3125_v14 }
 0x55e   :  { %14183 = vst [vmem:[#allocation132_spill] sm:$0xff] %v10262_v62 }
 0x55f   :  { %v4068_v9 = vpop.f32.mrf.mxu2 }
 0x560   :  { %v10238_v44 = vadd.f32 %v4068_v9, %v3899_v2  ;;  %v10257_v9 = vsel %vm7264_vm5, %v9610_v37, 0  ;;  %v3129_v37 = vrot.slane %v14186_v22, 7 }
 0x561   :  { %14182 = vst [vmem:[#allocation131_spill] sm:$0xff] %v10257_v9 }
 0x562   :  { %v10240_v46 = vpop.f32.mrf.mxu0 }
 0x563   :  { %14176 = vst [vmem:[#allocation127_spill] sm:$0xff] %v10240_v46 }
 0x564   :  { %4110 = vmatmul.bf16.gmra.mxu2 %v9435_v19  ;;  %v3902_v28 = vpop.f32.mrf.mxu1  ;;  %v10245_v49 = vpop.f32.mrf.mxu3  ;;  %v14188_v19 = vshll.u32 %v9439_v55, 16 }
 0x565   :  { %14178 = vst [vmem:[#allocation128_spill] sm:$0xff] %v10245_v49 }
 0x567   :  { %v4071_v23 = vpop.f32.mrf.mxu2  ;;  %3941 = vmatmul.bf16.gmra.mxu1 %v10233_v7 }
 0x568   :  { %v10250_v57 = vadd.f32 %v4071_v23, %v3902_v28 }
 0x569   :  { %4199 = vmatmul.bf16.gmra.mxu3 %v10257_v9 }
 0x56a   :  { %14180 = vst [vmem:[#allocation129_spill] sm:$0xff] %v10250_v57  ;;  %v10252_v2 = vpop.f32.mrf.mxu0  ;;  %v3132_v57 = vor.u32 %v14188_v19, %v3129_v37  ;;  %v7092_v37 = vld [vmem:[%s13527_s4 + $0x1b8] sm:$0xff] }
 0x56b   :  { %14181 = vst [vmem:[#allocation130_spill] sm:$0xff] %v10252_v2  ;;  %4847 = vmatpush.bf16.msra.mxu3 %v7092_v37  ;;  %v7100_v37 = vld [vmem:[%s13527_s4 + $0x1f8] sm:$0xff] }
 0x56c   :  { %v3904_v49 = vpop.f32.mrf.mxu1  ;;  %v10265_v7 = vpop.f32.mrf.mxu3  ;;  %v10291_v22 = vsel %vm7256_vm4, 0, %v3132_v57  ;;  %5016 = vmatpush.bf16.msra.mxu0 %v7100_v37 }
 0x56d   :  { %4448 = vmatmul.bf16.gmra.mxu0 %v10262_v62  ;;  %14184 = vst [vmem:[#allocation133_spill] sm:$0xff] %v10265_v7 }
 0x56e   :  { %14191 = vst [vmem:[#allocation138_spill] sm:$0xff] %v10291_v22 }
 0x56f   :  { %v4073_v53 = vpop.f32.mrf.mxu2 }
 0x570   :  { %v10267_v28 = vadd.f32 %v4073_v53, %v3904_v49  ;;  %v10286_v53 = vsel %vm7264_vm5, %v9624_v21, 0 }
 0x571   :  { %14190 = vst [vmem:[#allocation137_spill] sm:$0xff] %v10286_v53 }
 0x572   :  { %v10269_v23 = vpop.f32.mrf.mxu0 }
 0x573   :  { %14185 = vst [vmem:[#allocation134_spill] sm:$0xff] %v10269_v23 }
 0x574   :  { %4115 = vmatmul.bf16.gmra.mxu2 %v9437_v36  ;;  %v3907_v2 = vpop.f32.mrf.mxu1  ;;  %v10274_v46 = vpop.f32.mrf.mxu3 }
 0x575   :  { %14187 = vst [vmem:[#allocation135_spill] sm:$0xff] %v10274_v46 }
 0x577   :  { %v4076_v14 = vpop.f32.mrf.mxu2  ;;  %3946 = vmatmul.bf16.gmra.mxu1 %v10262_v62 }
 0x578   :  { %v10279_v7 = vadd.f32 %v4076_v14, %v3907_v2  ;;  %v14194_v14 = vshrl.u32 %v9441_v8, 16 }
 0x579   :  { %4204 = vmatmul.bf16.gmra.mxu3 %v10286_v53 }
 0x57a   :  { %v10281_v49 = vpop.f32.mrf.mxu0 }
 0x57b   :  { %14189 = vst [vmem:[#allocation136_spill] sm:$0xff] %v10281_v49  ;;  %v3136_v49 = vrot.slane %v14194_v14, 7  ;;  %v7108_v14 = vld [vmem:[%s13527_s4 + $0x238] sm:$0xff] }
 0x57c   :  { %v3909_v46 = vpop.f32.mrf.mxu1  ;;  %v10294_v62 = vpop.f32.mrf.mxu3  ;;  %5185 = vmatpush.bf16.msra.mxu1 %v7108_v14 }
 0x57d   :  { %4453 = vmatmul.bf16.gmra.mxu0 %v10291_v22  ;;  %14192 = vst [vmem:[#allocation139_spill] sm:$0xff] %v10294_v62 }
 0x57f   :  { %v4078_v19 = vpop.f32.mrf.mxu2 }
 0x580   :  { %v10296_v2 = vadd.f32 %v4078_v19, %v3909_v46  ;;  %v14196_v46 = vshll.u32 %v9441_v8, 16 }
 0x582   :  { %v10301_v21 = vpop.f32.mrf.mxu0  ;;  %v3139_v19 = vor.u32 %v14196_v46, %v3136_v49 }
 0x583   :  { %14193 = vst [vmem:[#allocation140_spill] sm:$0xff] %v10301_v21 }
 0x584   :  { %4120 = vmatmul.bf16.gmra.mxu2 %v9439_v55  ;;  %v3912_v57 = vpop.f32.mrf.mxu1  ;;  %v10306_v23 = vpop.f32.mrf.mxu3 }
 0x585   :  { %14195 = vst [vmem:[#allocation141_spill] sm:$0xff] %v10306_v23  ;;  %v10324_v23 = vsel %vm7264_vm5, %v9641_v16, 0 }
 0x586   :  { %14199 = vst [vmem:[#allocation144_spill] sm:$0xff] %v10324_v23 }
 0x587   :  { %v4081_v36 = vpop.f32.mrf.mxu2  ;;  %3951 = vmatmul.bf16.gmra.mxu1 %v10291_v22 }
 0x588   :  { %v10311_v62 = vadd.f32 %v4081_v36, %v3912_v57  ;;  %v10329_v36 = vsel %vm7256_vm4, 0, %v3139_v19 }
 0x589   :  { %4209 = vmatmul.bf16.gmra.mxu3 %v10324_v23  ;;  %14200 = vst [vmem:[#allocation145_spill] sm:$0xff] %v10329_v36 }
 0x58a   :  { %14197 = vst [vmem:[#allocation142_spill] sm:$0xff] %v10311_v62  ;;  %v10319_v21 = vpop.f32.mrf.mxu0 }
 0x58b   :  { %14198 = vst [vmem:[#allocation143_spill] sm:$0xff] %v10319_v21 }
 0x58c   :  { %v3914_v49 = vpop.f32.mrf.mxu1  ;;  %v10332_v57 = vpop.f32.mrf.mxu3 }
 0x58d   :  { %4458 = vmatmul.bf16.gmra.mxu0 %v10329_v36  ;;  %14201 = vst [vmem:[#allocation146_spill] sm:$0xff] %v10332_v57  ;;  %v10349_v57 = vsel %vm7264_vm5, %v9645_v5, 0  ;;  %v14212_v5 = vld [vmem:[#allocation33_spill] sm:$0xff] }
 0x58e   :  { %14207 = vst [vmem:[#allocation152_spill] sm:$0xff] %v10349_v57 }
 0x58f   :  { %v4083_v46 = vpop.f32.mrf.mxu2 }
 0x590   :  { %v10334_v22 = vadd.f32 %v4083_v46, %v3914_v49 }
 0x592   :  { %14202 = vst [vmem:[#allocation147_spill] sm:$0xff] %v10334_v22  ;;  %v10336_v21 = vpop.f32.mrf.mxu0 }
 0x593   :  { %14203 = vst [vmem:[#allocation148_spill] sm:$0xff] %v10336_v21 }
 0x594   :  { %4125 = vmatmul.bf16.gmra.mxu2 %v9441_v8  ;;  %v3917_v16 = vpop.f32.mrf.mxu1  ;;  %v10339_v55 = vpop.f32.mrf.mxu3 }
 0x595   :  { %14204 = vst [vmem:[#allocation149_spill] sm:$0xff] %v10339_v55 }
 0x597   :  { %v4086_v37 = vpop.f32.mrf.mxu2  ;;  %3956 = vmatmul.bf16.gmra.mxu1 %v10329_v36 }
 0x598   :  { %v10342_v19 = vadd.f32 %v4086_v37, %v3917_v16 }
 0x599   :  { %4214 = vmatmul.bf16.gmra.mxu3 %v10349_v57 }
 0x59a   :  { %14205 = vst [vmem:[#allocation150_spill] sm:$0xff] %v10342_v19  ;;  %v10344_v14 = vpop.f32.mrf.mxu0 }
 0x59b   :  { %14206 = vst [vmem:[#allocation151_spill] sm:$0xff] %v10344_v14 }
 0x59c   :  { %v3919_v49 = vpop.f32.mrf.mxu1  ;;  %v10353_v46 = vpop.f32.mrf.mxu3 }
 0x59d   :  { %4463 = vmatmul.bf16.gmra.mxu0 %v9512_v47  ;;  %14208 = vst [vmem:[#allocation153_spill] sm:$0xff] %v10353_v46  ;;  %v14215_v47 = vld [vmem:[#allocation35_spill] sm:$0xff] }
 0x59e   :  { %v10370_v46 = vsel %vm7264_vm5, %v14215_v47, 0 }
 0x59f   :  { %v4088_v55 = vpop.f32.mrf.mxu2  ;;  %14216 = vst [vmem:[#allocation35_spill] sm:$0xff] %v10370_v46 }
 0x5a0   :  { %v10355_v21 = vadd.f32 %v4088_v55, %v3919_v49  ;;  %v14217_v49 = vld [vmem:[#allocation25_spill] sm:$0xff] }
 0x5a2   :  { %14209 = vst [vmem:[#allocation154_spill] sm:$0xff] %v10355_v21  ;;  %v10357_v36 = vpop.f32.mrf.mxu0  ;;  %v14220_v21 = vld [vmem:[#allocation17_spill] sm:$0xff] }
 0x5a3   :  { %14210 = vst [vmem:[#allocation155_spill] sm:$0xff] %v10357_v36 }
 0x5a4   :  { %4686 = vmatmul.bf16.vlgmr.msrb.gmra.mxu2 %v10160_v35  ;;  %v3922_v16 = vpop.f32.mrf.mxu1  ;;  %v10360_v37 = vpop.f32.mrf.mxu3 }
 0x5a5   :  { %14211 = vst [vmem:[#allocation156_spill] sm:$0xff] %v10360_v37 }
 0x5a7   :  { %v4091_v14 = vpop.f32.mrf.mxu2  ;;  %4517 = vmatmul.bf16.vlgmr.msrb.gmra.mxu1 %v14212_v5 }
 0x5a8   :  { %v10363_v8 = vadd.f32 %v4091_v14, %v3922_v16 }
 0x5a9   :  { %4219 = vmatmul.bf16.gmra.mxu3 %v10370_v46 }
 0x5aa   :  { %14213 = vst [vmem:[#allocation33_spill] sm:$0xff] %v10363_v8  ;;  %v10365_v19 = vpop.f32.mrf.mxu0 }
 0x5ab   :  { %14214 = vst [vmem:[#allocation157_spill] sm:$0xff] %v10365_v19 }
 0x5ac   :  { %v3924_v55 = vpop.f32.mrf.mxu1  ;;  %v4180_v35 = vpop.f32.mrf.mxu3 }
 0x5ad   :  { %4468 = vmatmul.bf16.gmra.mxu0 %v14217_v49  ;;  %v10375_v37 = vadd.f32 %v4180_v35, %v9894_v1  ;;  %v14223_v1 = vld [vmem:[#allocation36_spill] sm:$0xff] }
 0x5ae   :  { %v14225_v35 = vld [vmem:[#allocation24_spill] sm:$0xff] }
 0x5af   :  { %v4093_v36 = vpop.f32.mrf.mxu2 }
 0x5b0   :  { %v10377_v5 = vadd.f32 %v4093_v36, %v3924_v55  ;;  %v10393_v36 = vsel %vm7264_vm5, %v14223_v1, 0 }
 0x5b1   :  { %14224 = vst [vmem:[#allocation36_spill] sm:$0xff] %v10393_v36 }
 0x5b2   :  { %14218 = vst [vmem:[#allocation158_spill] sm:$0xff] %v10377_v5  ;;  %v10379_v14 = vpop.f32.mrf.mxu0 }
 0x5b3   :  { %14219 = vst [vmem:[#allocation159_spill] sm:$0xff] %v10379_v14 }
 0x5b4   :  { %4691 = vmatmul.bf16.gmra.mxu2 %v10189_v56  ;;  %v3927_v16 = vpop.f32.mrf.mxu1  ;;  %v4182_v19 = vpop.f32.mrf.mxu3 }
 0x5b5   :  { %v10383_v47 = vadd.f32 %v4182_v19, %v9906_v17 }
 0x5b7   :  { %v4096_v8 = vpop.f32.mrf.mxu2  ;;  %4522 = vmatmul.bf16.gmra.mxu1 %v14220_v21 }
 0x5b8   :  { %v10386_v49 = vadd.f32 %v4096_v8, %v3927_v16  ;;  %v7091_v8 = vld [vmem:[%s13527_s4 + $0x1b0] sm:$0xff] }
 0x5b9   :  { %4224 = vmatmul.bf16.gmra.mxu3 %v10393_v36 }
 0x5ba   :  { %14221 = vst [vmem:[#allocation17_spill] sm:$0xff] %v10386_v49  ;;  %v10388_v22 = vpop.f32.mrf.mxu0  ;;  %4848 = vmatpush.bf16.msra.mxu3 %v7091_v8 }
 0x5bb   :  { %14222 = vst [vmem:[#allocation160_spill] sm:$0xff] %v10388_v22 }
 0x5bc   :  { %v3929_v55 = vpop.f32.mrf.mxu1  ;;  %v4185_v56 = vpop.f32.mrf.mxu3 }
 0x5bd   :  { %4473 = vmatmul.bf16.gmra.mxu0 %v14225_v35  ;;  %v10398_v17 = vadd.f32 %v4185_v56, %v9918_v61  ;;  %v14228_v61 = vld [vmem:[#allocation28_spill] sm:$0xff] }
 0x5bf   :  { %v4098_v19 = vpop.f32.mrf.mxu2 }
 0x5c0   :  { %v10400_v14 = vadd.f32 %v4098_v19, %v3929_v55  ;;  %v7099_v55 = vld [vmem:[%s13527_s4 + $0x1f0] sm:$0xff] }
 0x5c1   :  { %v7107_v19 = vld [vmem:[%s13527_s4 + $0x230] sm:$0xff]  ;;  %5017 = vmatpush.bf16.msra.mxu0 %v7099_v55 }
 0x5c2   :  { %14226 = vst [vmem:[#allocation161_spill] sm:$0xff] %v10400_v14  ;;  %v10405_v16 = vpop.f32.mrf.mxu0  ;;  %5186 = vmatpush.bf16.msra.mxu1 %v7107_v19 }
 0x5c3   :  { %14227 = vst [vmem:[#allocation162_spill] sm:$0xff] %v10405_v16 }
 0x5c4   :  { %4696 = vmatmul.bf16.gmra.mxu2 %v10228_v6  ;;  %v3932_v1 = vpop.f32.mrf.mxu1  ;;  %v4187_v22 = vpop.f32.mrf.mxu3  ;;  %v14231_v6 = vld [vmem:[#allocation38_spill] sm:$0xff] }
 0x5c5   :  { %v10409_v35 = vadd.f32 %v4187_v22, %v9930_v40  ;;  %v10425_v40 = vsel %vm7264_vm5, %v14231_v6, 0 }
 0x5c6   :  { %14232 = vst [vmem:[#allocation38_spill] sm:$0xff] %v10425_v40 }
 0x5c7   :  { %v4101_v49 = vpop.f32.mrf.mxu2  ;;  %4527 = vmatmul.bf16.gmra.mxu1 %v14228_v61 }
 0x5c8   :  { %v10412_v56 = vadd.f32 %v4101_v49, %v3932_v1  ;;  %v14233_v49 = vld [vmem:[#allocation37_spill] sm:$0xff] }
 0x5c9   :  { %4229 = vmatmul.bf16.gmra.mxu3 %v10425_v40 }
 0x5ca   :  { %14229 = vst [vmem:[#allocation28_spill] sm:$0xff] %v10412_v56  ;;  %v10420_v8 = vpop.f32.mrf.mxu0 }
 0x5cb   :  { %14230 = vst [vmem:[#allocation163_spill] sm:$0xff] %v10420_v8 }
 0x5cc   :  { %v3934_v22 = vpop.f32.mrf.mxu1  ;;  %v4190_v1 = vpop.f32.mrf.mxu3 }
 0x5cd   :  { %4478 = vmatmul.bf16.gmra.mxu0 %v14233_v49  ;;  %v10430_v16 = vadd.f32 %v4190_v1, %v9945_v63  ;;  %v14237_v63 = vld [vmem:[#allocation39_spill] sm:$0xff] }
 0x5cf   :  { %v4103_v56 = vpop.f32.mrf.mxu2 }
 0x5d0   :  { %v10432_v14 = vadd.f32 %v4103_v56, %v3934_v22  ;;  %v10448_v56 = vsel %vm7264_vm5, %v14237_v63, 0 }
 0x5d1   :  { %14238 = vst [vmem:[#allocation39_spill] sm:$0xff] %v10448_v56 }
 0x5d2   :  { %v10434_v8 = vpop.f32.mrf.mxu0 }
 0x5d3   :  { %14234 = vst [vmem:[#allocation164_spill] sm:$0xff] %v10434_v8 }
 0x5d4   :  { %4701 = vmatmul.bf16.gmra.mxu2 %v10257_v9  ;;  %v3937_v6 = vpop.f32.mrf.mxu1  ;;  %v4192_v5 = vpop.f32.mrf.mxu3 }
 0x5d5   :  { %v10438_v62 = vadd.f32 %v4192_v5, %v9960_v3 }
 0x5d7   :  { %v4106_v55 = vpop.f32.mrf.mxu2  ;;  %4532 = vmatmul.bf16.gmra.mxu1 %v9540_v25 }
 0x5d8   :  { %v10441_v19 = vadd.f32 %v4106_v55, %v3937_v6 }
 0x5d9   :  { %4234 = vmatmul.bf16.gmra.mxu3 %v10448_v56 }
 0x5da   :  { %14235 = vst [vmem:[#allocation165_spill] sm:$0xff] %v10441_v19  ;;  %v10443_v49 = vpop.f32.mrf.mxu0 }
 0x5db   :  { %14236 = vst [vmem:[#allocation166_spill] sm:$0xff] %v10443_v49 }
 0x5dc   :  { %v3939_v22 = vpop.f32.mrf.mxu1  ;;  %v4195_v1 = vpop.f32.mrf.mxu3 }
 0x5dd   :  { %4483 = vmatmul.bf16.gmra.mxu0 %v9826_v32  ;;  %v10453_v3 = vadd.f32 %v4195_v1, %v9972_v20  ;;  %v14242_v20 = vld [vmem:[#allocation40_spill] sm:$0xff] }
 0x5df   :  { %v4108_v5 = vpop.f32.mrf.mxu2 }
 0x5e0   :  { %v10455_v9 = vadd.f32 %v4108_v5, %v3939_v22  ;;  %v10471_v22 = vsel %vm7264_vm5, %v14242_v20, 0 }
 0x5e1   :  { %14243 = vst [vmem:[#allocation40_spill] sm:$0xff] %v10471_v22 }
 0x5e2   :  { %v10457_v6 = vpop.f32.mrf.mxu0 }
 0x5e3   :  { %14239 = vst [vmem:[#allocation167_spill] sm:$0xff] %v10457_v6 }
 0x5e4   :  { %4706 = vmatmul.bf16.gmra.mxu2 %v10286_v53  ;;  %v3942_v55 = vpop.f32.mrf.mxu1  ;;  %v4197_v49 = vpop.f32.mrf.mxu3 }
 0x5e5   :  { %v10461_v63 = vadd.f32 %v4197_v49, %v9984_v48 }
 0x5e7   :  { %v4111_v8 = vpop.f32.mrf.mxu2  ;;  %4537 = vmatmul.bf16.gmra.mxu1 %v9406_v11 }
 0x5e8   :  { %v10464_v32 = vadd.f32 %v4111_v8, %v3942_v55 }
 0x5e9   :  { %4239 = vmatmul.bf16.gmra.mxu3 %v10471_v22 }
 0x5ea   :  { %14240 = vst [vmem:[#allocation168_spill] sm:$0xff] %v10464_v32  ;;  %v10466_v19 = vpop.f32.mrf.mxu0 }
 0x5eb   :  { %14241 = vst [vmem:[#allocation169_spill] sm:$0xff] %v10466_v19 }
 0x5ec   :  { %v3944_v1 = vpop.f32.mrf.mxu1  ;;  %v4200_v5 = vpop.f32.mrf.mxu3 }
 0x5ed   :  { %4488 = vmatmul.bf16.gmra.mxu0 %v9842_v27  ;;  %v10476_v48 = vadd.f32 %v4200_v5, %v9996_v34  ;;  %v14246_v34 = vld [vmem:[#allocation41_spill] sm:$0xff] }
 0x5ef   :  { %v4113_v49 = vpop.f32.mrf.mxu2 }
 0x5f0   :  { %v10478_v53 = vadd.f32 %v4113_v49, %v3944_v1  ;;  %v10494_v1 = vsel %vm7264_vm5, %v14246_v34, 0 }
 0x5f1   :  { %14247 = vst [vmem:[#allocation41_spill] sm:$0xff] %v10494_v1 }
 0x5f2   :  { %v10480_v8 = vpop.f32.mrf.mxu0 }
 0x5f3   :  { %14244 = vst [vmem:[#allocation170_spill] sm:$0xff] %v10480_v8  ;;  %v14255_v8 = vshrl.u32 %v14055_v39, 16 }
 0x5f4   :  { %4711 = vmatmul.bf16.gmra.mxu2 %v10324_v23  ;;  %v3947_v55 = vpop.f32.mrf.mxu1  ;;  %v4202_v19 = vpop.f32.mrf.mxu3 }
 0x5f5   :  { %v10484_v20 = vadd.f32 %v4202_v19, %v10008_v29 }
 0x5f7   :  { %v4116_v6 = vpop.f32.mrf.mxu2  ;;  %4542 = vmatmul.bf16.gmra.mxu1 %v9408_v30 }
 0x5f8   :  { %v10487_v27 = vadd.f32 %v4116_v6, %v3947_v55  ;;  %v7090_v6 = vld [vmem:[%s13527_s4 + $0x1a8] sm:$0xff] }
 0x5f9   :  { %4244 = vmatmul.bf16.gmra.mxu3 %v10494_v1 }
 0x5fa   :  { %v10489_v32 = vpop.f32.mrf.mxu0  ;;  %4849 = vmatpush.bf16.msra.mxu3 %v7090_v6 }
 0x5fb   :  { %14245 = vst [vmem:[#allocation171_spill] sm:$0xff] %v10489_v32 }
 0x5fc   :  { %v3949_v5 = vpop.f32.mrf.mxu1  ;;  %v4205_v49 = vpop.f32.mrf.mxu3 }
 0x5fd   :  { %4493 = vmatmul.bf16.gmra.mxu0 %v9858_v52  ;;  %v10499_v29 = vadd.f32 %v4205_v49, %v10023_v41  ;;  %v7098_v52 = vld [vmem:[%s13527_s4 + $0x1e8] sm:$0xff]  ;;  %v7097_v49 = vld [vmem:[%s13527_s4 + $0x1e0] sm:$0xff] }
 0x5fe   :  { %5018 = vmatpush.bf16.msra.mxu0 %v7098_v52  ;;  %v7096_v52 = vld [vmem:[%s13527_s4 + $0x1d8] sm:$0xff] }
 0x5ff   :  { %v4118_v19 = vpop.f32.mrf.mxu2 }
 0x600   :  { %v10501_v23 = vadd.f32 %v4118_v19, %v3949_v5  ;;  %v7106_v19 = vld [vmem:[%s13527_s4 + $0x228] sm:$0xff] }
 0x601   :  { %5187 = vmatpush.bf16.msra.mxu1 %v7106_v19 }
 0x602   :  { %v10506_v55 = vpop.f32.mrf.mxu0  ;;  %5019 = vmatpush.bf16.msra.mxu0 %v7097_v49 }
 0x603   :  { %14248 = vst [vmem:[#allocation172_spill] sm:$0xff] %v10506_v55  ;;  %v14251_v55 = vld [vmem:[#allocation42_spill] sm:$0xff] }
 0x604   :  { %4716 = vmatmul.bf16.gmra.mxu2 %v10349_v57  ;;  %v3952_v34 = vpop.f32.mrf.mxu1  ;;  %v4207_v32 = vpop.f32.mrf.mxu3 }
 0x605   :  { %v10513_v41 = vadd.f32 %v4207_v32, %v10041_v13  ;;  %v10529_v32 = vsel %vm7264_vm5, %v14251_v55, 0  ;;  %v7095_v55 = vld [vmem:[%s13527_s4 + $0x1d0] sm:$0xff] }
 0x606   :  { %14252 = vst [vmem:[#allocation42_spill] sm:$0xff] %v10529_v32  ;;  %5020 = vmatpush.bf16.msra.mxu0 %v7096_v52 }
 0x607   :  { %v4121_v5 = vpop.f32.mrf.mxu2  ;;  %4547 = vmatmul.bf16.gmra.mxu1 %v9411_v43 }
 0x608   :  { %v10522_v6 = vadd.f32 %v4121_v5, %v3952_v34 }
 0x609   :  { %4249 = vmatmul.bf16.gmra.mxu3 %v10529_v32 }
 0x60a   :  { %14249 = vst [vmem:[#allocation173_spill] sm:$0xff] %v10522_v6  ;;  %v10524_v57 = vpop.f32.mrf.mxu0  ;;  %5021 = vmatpush.bf16.msra.mxu0 %v7095_v55  ;;  %v3199_v6 = vrot.slane %v14255_v8, 7  ;;  %v7093_v8 = vld [vmem:[%s13527_s4 + $0x1c0] sm:$0xff] }
 0x60b   :  { %14250 = vst [vmem:[#allocation174_spill] sm:$0xff] %v10524_v57 }
 0x60c   :  { %v3954_v13 = vpop.f32.mrf.mxu1  ;;  %v4210_v34 = vpop.f32.mrf.mxu3 }
 0x60d   :  { %4498 = vmatmul.bf16.gmra.mxu0 %v9880_v45  ;;  %v10537_v5 = vadd.f32 %v4210_v34, %v10059_v31  ;;  %v7094_v31 = vld [vmem:[%s13527_s4 + $0x1c8] sm:$0xff] }
 0x60e   :  { %5022 = vmatpush.bf16.msra.mxu0 %v7094_v31 }
 0x60f   :  { %v4123_v57 = vpop.f32.mrf.mxu2 }
 0x610   :  { %v10542_v19 = vadd.f32 %v4123_v57, %v3954_v13  ;;  %v14256_v13 = vshll.u32 %v14055_v39, 16 }
 0x612   :  { %14253 = vst [vmem:[#allocation175_spill] sm:$0xff] %v10542_v19  ;;  %v10544_v49 = vpop.f32.mrf.mxu0  ;;  %v3202_v55 = vor.u32 %v14256_v13, %v3199_v6  ;;  %v14258_v19 = vld [vmem:[#allocation43_spill] sm:$0xff]  ;;  %5023 = vmatpush.bf16.msra.mxu0 %v7093_v8 }
 0x613   :  { %14254 = vst [vmem:[#allocation176_spill] sm:$0xff] %v10544_v49 }
 0x614   :  { %4721 = vmatmul.bf16.gmra.mxu2 %v10370_v46  ;;  %v3957_v45 = vpop.f32.mrf.mxu1  ;;  %v4212_v52 = vpop.f32.mrf.mxu3  ;;  %v10573_v31 = vsel %vm7256_vm4, 0, %v3202_v55 }
 0x615   :  { %v10553_v34 = vadd.f32 %v4212_v52, %v10077_v51  ;;  %v10568_v51 = vsel %vm7264_vm5, %v14258_v19, 0  ;;  %14260 = vst [vmem:[#allocation178_spill] sm:$0xff] %v10573_v31  ;;  %v4350_v19 = vadd.f32 %v9896_v42, %v10375_v37 }
 0x616   :  { %14259 = vst [vmem:[#allocation43_spill] sm:$0xff] %v10568_v51 }
 0x617   :  { %v4126_v57 = vpop.f32.mrf.mxu2  ;;  %4552 = vmatmul.bf16.gmra.mxu1 %v9413_v59 }
 0x618   :  { %v10561_v46 = vadd.f32 %v4126_v57, %v3957_v45 }
 0x619   :  { %4254 = vmatmul.bf16.gmra.mxu3 %v10568_v51 }
 0x61a   :  { %v10563_v49 = vpop.f32.mrf.mxu0 }
 0x61b   :  { %14257 = vst [vmem:[#allocation177_spill] sm:$0xff] %v10563_v49 }
 0x61c   :  { %v3959_v6 = vpop.f32.mrf.mxu1  ;;  %v4215_v52 = vpop.f32.mrf.mxu3 }
 0x61d   :  { %4503 = vmatmul.bf16.gmra.mxu0 %v10573_v31  ;;  %v10577_v45 = vadd.f32 %v4215_v52, %v10095_v15 }
 0x61f   :  { %v4128_v57 = vpop.f32.mrf.mxu2 }
 0x620   :  { %v10579_v13 = vadd.f32 %v4128_v57, %v3959_v6  ;;  %v4352_v6 = vadd.f32 %v9908_v33, %v10383_v47 }
 0x622   :  { %v10581_v39 = vpop.f32.mrf.mxu0 }
 0x624   :  { %4726 = vmatmul.bf16.gmra.mxu2 %v10393_v36  ;;  %v4518_v24 = vpop.f32.mrf.mxu1  ;;  %v4217_v8 = vpop.f32.mrf.mxu3 }
 0x625   :  { %v4519_v55 = vadd.f32 %v4518_v24, %v4350_v19  ;;  %v10587_v49 = vadd.f32 %v4217_v8, %v10110_v12  ;;  %v4355_v24 = vadd.f32 %v9920_v54, %v10398_v17  ;;  %v14262_v54 = vld [vmem:[#allocation74_spill] sm:$0xff] }
 0x626   :  { %v4357_v17 = vadd.f32 %v14262_v54, %v10409_v35  ;;  %v14265_v35 = vld [vmem:[#allocation76_spill] sm:$0xff] }
 0x627   :  { %v4687_v31 = vpop.f32.mrf.mxu2  ;;  %4557 = vmatmul.bf16.gmra.mxu1 %v9415_v18  ;;  %v4360_v54 = vadd.f32 %v14265_v35, %v10430_v16  ;;  %v14269_v16 = vld [vmem:[#allocation45_spill] sm:$0xff] }
 0x628   :  { %v10608_v47 = vadd.f32 %v4687_v31, %v4519_v55  ;;  %v10648_v35 = vsel %vm7264_vm5, %v14269_v16, 0 }
 0x629   :  { %4259 = vmatmul.bf16.gmra.mxu3 %v10125_v60  ;;  %14270 = vst [vmem:[#allocation45_spill] sm:$0xff] %v10648_v35 }
 0x62a   :  { %v10590_v15 = vpop.f32.mrf.mxu0 }
 0x62c   :  { %v4520_v52 = vpop.f32.mrf.mxu1  ;;  %v4220_v37 = vpop.f32.mrf.mxu3 }
 0x62d   :  { %5024 = vmatmul.bf16.vlgmr.msra.gmra.mxu0 %v14220_v21  ;;  %v4521_v42 = vadd.f32 %v4520_v52, %v4352_v6  ;;  %v10597_v57 = vadd.f32 %v4220_v37, %v10130_v0  ;;  %v14261_v6 = vld [vmem:[#allocation44_spill] sm:$0xff] }
 0x62e   :  { %v10615_v52 = vsel %vm7264_vm5, %v14261_v6, 0 }
 0x62f   :  { %v4689_v12 = vpop.f32.mrf.mxu2 }
 0x632   :  { %v10599_v19 = vpop.f32.mrf.mxu0 }
 0x634   :  { %4731 = vmatmul.bf16.gmra.mxu2 %v10425_v40  ;;  %v4523_v8 = vpop.f32.mrf.mxu1  ;;  %v4222_v36 = vpop.f32.mrf.mxu3  ;;  %v14266_v40 = vld [vmem:[#allocation7_spill] sm:$0xff] }
 0x635   :  { %v4524_v60 = vadd.f32 %v4523_v8, %v4355_v24  ;;  %v10605_v33 = vadd.f32 %v4222_v36, %v10142_v58  ;;  %v7089_v24 = vld [vmem:[%s13527_s4 + $0x1a0] sm:$0xff]  ;;  %v10627_v8 = vadd.f32 %v4689_v12, %v4521_v42 }
 0x636   :  { %4850 = vmatpush.bf16.msra.mxu3 %v7089_v24  ;;  %v7105_v42 = vld [vmem:[%s13527_s4 + $0x220] sm:$0xff] }
 0x637   :  { %v4692_v21 = vpop.f32.mrf.mxu2  ;;  %4562 = vmatmul.bf16.gmra.mxu1 %v9417_v4  ;;  %14263 = vst [vmem:[#allocation44_spill] sm:$0xff] %v10627_v8  ;;  %v14274_v8 = vld [vmem:[#allocation119_spill] sm:$0xff] }
 0x638   :  { %v10641_v12 = vadd.f32 %v4692_v21, %v4524_v60  ;;  %5188 = vmatpush.bf16.msra.mxu1 %v7105_v42  ;;  %v14273_v42 = vld [vmem:[#allocation81_spill] sm:$0xff] }
 0x639   :  { %4264 = vmatmul.bf16.gmra.mxu3 %v10615_v52  ;;  %v4365_v16 = vadd.f32 %v14273_v42, %v10453_v3  ;;  %v14280_v3 = vld [vmem:[#allocation84_spill] sm:$0xff] }
 0x63a   :  { %v10610_v0 = vpop.f32.mrf.mxu0  ;;  %14267 = vst [vmem:[#allocation76_spill] sm:$0xff] %v10641_v12 }
 0x63c   :  { %v4525_v37 = vpop.f32.mrf.mxu1  ;;  %v4225_v36 = vpop.f32.mrf.mxu3 }
 0x63d   :  { %5029 = vmatmul.bf16.gmra.mxu0 %v14228_v61  ;;  %v4526_v58 = vadd.f32 %v4525_v37, %v4357_v17  ;;  %v10622_v31 = vadd.f32 %v4225_v36, %v10153_v10 }
 0x63f   :  { %v4694_v55 = vpop.f32.mrf.mxu2 }
 0x642   :  { %v10629_v6 = vpop.f32.mrf.mxu0 }
 0x643   :  { %14264 = vst [vmem:[#allocation74_spill] sm:$0xff] %v10629_v6 }
 0x644   :  { %4736 = vmatmul.bf16.gmra.mxu2 %v10448_v56  ;;  %v4528_v61 = vpop.f32.mrf.mxu1  ;;  %v4227_v37 = vpop.f32.mrf.mxu3 }
 0x645   :  { %v4529_v17 = vadd.f32 %v4528_v61, %v4360_v54  ;;  %v10635_v10 = vadd.f32 %v4227_v37, %v10170_v50  ;;  %v14271_v50 = vld [vmem:[#allocation79_spill] sm:$0xff] }
 0x646   :  { %v4362_v54 = vadd.f32 %v14271_v50, %v10438_v62 }
 0x647   :  { %v4697_v36 = vpop.f32.mrf.mxu2  ;;  %4567 = vmatmul.bf16.gmra.mxu1 %v14266_v40 }
 0x649   :  { %4269 = vmatmul.bf16.gmra.mxu3 %v10648_v35 }
 0x64a   :  { %v10643_v24 = vpop.f32.mrf.mxu0 }
 0x64b   :  { %14268 = vst [vmem:[#allocation7_spill] sm:$0xff] %v10643_v24  ;;  %v10657_v24 = vadd.f32 %v4694_v55, %v4526_v58  ;;  %v14278_v58 = vld [vmem:[#allocation46_spill] sm:$0xff] }
 0x64c   :  { %v4530_v61 = vpop.f32.mrf.mxu1  ;;  %v4230_v56 = vpop.f32.mrf.mxu3  ;;  %v10675_v55 = vsel %vm7264_vm5, %v14278_v58, 0  ;;  %v14283_v58 = vld [vmem:[#allocation86_spill] sm:$0xff] }
 0x64d   :  { %5034 = vmatmul.bf16.gmra.mxu0 %v9540_v25  ;;  %v4531_v37 = vadd.f32 %v4530_v61, %v4362_v54  ;;  %v10655_v60 = vadd.f32 %v4230_v56, %v10182_v38  ;;  %v14275_v61 = vld [vmem:[#allocation8_spill] sm:$0xff]  ;;  %v10668_v38 = vadd.f32 %v4697_v36, %v4529_v17 }
 0x64e   :  { %14279 = vst [vmem:[#allocation8_spill] sm:$0xff] %v10675_v55 }
 0x64f   :  { %v4699_v21 = vpop.f32.mrf.mxu2  ;;  %14276 = vst [vmem:[#allocation81_spill] sm:$0xff] %v10668_v38  ;;  %v4370_v38 = vadd.f32 %v14283_v58, %v10476_v48  ;;  %v14289_v48 = vld [vmem:[#allocation89_spill] sm:$0xff] }
 0x652   :  { %v10659_v12 = vpop.f32.mrf.mxu0 }
 0x653   :  { %14272 = vst [vmem:[#allocation79_spill] sm:$0xff] %v10659_v12 }
 0x654   :  { %4741 = vmatmul.bf16.gmra.mxu2 %v10471_v22  ;;  %v4533_v6 = vpop.f32.mrf.mxu1  ;;  %v4232_v50 = vpop.f32.mrf.mxu3  ;;  %v10684_v22 = vadd.f32 %v4699_v21, %v4531_v37  ;;  %v14287_v21 = vld [vmem:[#allocation47_spill] sm:$0xff] }
 0x655   :  { %v4534_v62 = vadd.f32 %v4533_v6, %v4365_v16  ;;  %v10665_v25 = vadd.f32 %v4232_v50, %v14274_v8  ;;  %v4367_v6 = vadd.f32 %v14280_v3, %v10461_v63  ;;  %v14281_v50 = vld [vmem:[#allocation122_spill] sm:$0xff] }
 0x657   :  { %v4702_v54 = vpop.f32.mrf.mxu2  ;;  %4572 = vmatmul.bf16.gmra.mxu1 %v14275_v61 }
 0x659   :  { %4274 = vmatmul.bf16.gmra.mxu3 %v10675_v55 }
 0x65a   :  { %v10670_v56 = vpop.f32.mrf.mxu0 }
 0x65b   :  { %14277 = vst [vmem:[#allocation119_spill] sm:$0xff] %v10670_v56 }
 0x65c   :  { %v4535_v42 = vpop.f32.mrf.mxu1  ;;  %v4235_v16 = vpop.f32.mrf.mxu3 }
 0x65d   :  { %5039 = vmatmul.bf16.gmra.mxu0 %v9406_v11  ;;  %v4536_v8 = vadd.f32 %v4535_v42, %v4367_v6  ;;  %v10682_v17 = vadd.f32 %v4235_v16, %v14281_v50  ;;  %v14284_v42 = vld [vmem:[#allocation9_spill] sm:$0xff]  ;;  %v10695_v16 = vadd.f32 %v4702_v54, %v4534_v62  ;;  %v10702_v50 = vsel %vm7264_vm5, %v14287_v21, 0  ;;  %v14292_v21 = vld [vmem:[#allocation91_spill] sm:$0xff] }
 0x65e   :  { %14288 = vst [vmem:[#allocation86_spill] sm:$0xff] %v10702_v50 }
 0x65f   :  { %v4704_v36 = vpop.f32.mrf.mxu2  ;;  %14285 = vst [vmem:[#allocation84_spill] sm:$0xff] %v10695_v16  ;;  %v4375_v16 = vadd.f32 %v14292_v21, %v10499_v29  ;;  %v14298_v29 = vld [vmem:[#allocation94_spill] sm:$0xff] }
 0x662   :  { %v10686_v56 = vpop.f32.mrf.mxu0 }
 0x663   :  { %14282 = vst [vmem:[#allocation46_spill] sm:$0xff] %v10686_v56 }
 0x664   :  { %4746 = vmatmul.bf16.gmra.mxu2 %v10494_v1  ;;  %v4538_v12 = vpop.f32.mrf.mxu1  ;;  %v4237_v3 = vpop.f32.mrf.mxu3  ;;  %v10711_v1 = vadd.f32 %v4704_v36, %v4536_v8  ;;  %v14296_v36 = vld [vmem:[#allocation48_spill] sm:$0xff] }
 0x665   :  { %v4539_v63 = vadd.f32 %v4538_v12, %v4370_v38  ;;  %v10692_v11 = vadd.f32 %v4237_v3, %v10238_v44  ;;  %v4372_v12 = vadd.f32 %v14289_v48, %v10484_v20  ;;  %v14290_v3 = vld [vmem:[#allocation129_spill] sm:$0xff] }
 0x667   :  { %v4707_v6 = vpop.f32.mrf.mxu2  ;;  %4577 = vmatmul.bf16.gmra.mxu1 %v14284_v42 }
 0x669   :  { %4279 = vmatmul.bf16.gmra.mxu3 %v10702_v50 }
 0x66a   :  { %v10697_v37 = vpop.f32.mrf.mxu0 }
 0x66b   :  { %14286 = vst [vmem:[#allocation122_spill] sm:$0xff] %v10697_v37 }
 0x66c   :  { %v4540_v38 = vpop.f32.mrf.mxu1  ;;  %v4240_v58 = vpop.f32.mrf.mxu3 }
 0x66d   :  { %5044 = vmatmul.bf16.gmra.mxu0 %v9408_v30  ;;  %v4541_v44 = vadd.f32 %v4540_v38, %v4372_v12  ;;  %v10709_v62 = vadd.f32 %v4240_v58, %v14290_v3  ;;  %v14293_v38 = vld [vmem:[#allocation10_spill] sm:$0xff]  ;;  %v10722_v58 = vadd.f32 %v4707_v6, %v4539_v63  ;;  %v10729_v3 = vsel %vm7264_vm5, %v14296_v36, 0 }
 0x66e   :  { %14297 = vst [vmem:[#allocation129_spill] sm:$0xff] %v10729_v3 }
 0x66f   :  { %v4709_v54 = vpop.f32.mrf.mxu2  ;;  %14294 = vst [vmem:[#allocation47_spill] sm:$0xff] %v10722_v58 }
 0x670   :  { %v10741_v36 = vadd.f32 %v4709_v54, %v4541_v44  ;;  %v7104_v44 = vld [vmem:[%s13527_s4 + $0x218] sm:$0xff] }
 0x671   :  { %5189 = vmatpush.bf16.msra.mxu1 %v7104_v44 }
 0x672   :  { %v10713_v37 = vpop.f32.mrf.mxu0  ;;  %14299 = vst [vmem:[#allocation91_spill] sm:$0xff] %v10741_v36 }
 0x673   :  { %14291 = vst [vmem:[#allocation9_spill] sm:$0xff] %v10713_v37  ;;  %v14324_v37 = vld [vmem:[#allocation154_spill] sm:$0xff] }
 0x674   :  { %4751 = vmatmul.bf16.gmra.mxu2 %v10529_v32  ;;  %v4543_v56 = vpop.f32.mrf.mxu1  ;;  %v4242_v48 = vpop.f32.mrf.mxu3 }
 0x675   :  { %v4544_v20 = vadd.f32 %v4543_v56, %v4375_v16  ;;  %v10719_v30 = vadd.f32 %v4242_v48, %v10267_v28  ;;  %v4377_v56 = vadd.f32 %v14298_v29, %v10513_v41  ;;  %v7088_v48 = vld [vmem:[%s13527_s4 + $0x198] sm:$0xff]  ;;  %v14301_v41 = vld [vmem:[#allocation96_spill] sm:$0xff] }
 0x676   :  { %4851 = vmatpush.bf16.msra.mxu3 %v7088_v48  ;;  %v4380_v29 = vadd.f32 %v14301_v41, %v10537_v5  ;;  %v14305_v5 = vld [vmem:[#allocation50_spill] sm:$0xff] }
 0x677   :  { %v4712_v12 = vpop.f32.mrf.mxu2  ;;  %4582 = vmatmul.bf16.gmra.mxu1 %v14293_v38  ;;  %v10762_v41 = vsel %vm7264_vm5, %v14305_v5, 0  ;;  %v14311_v5 = vld [vmem:[#allocation49_spill] sm:$0xff] }
 0x678   :  { %v10755_v54 = vadd.f32 %v4712_v12, %v4544_v20  ;;  %14306 = vst [vmem:[#allocation96_spill] sm:$0xff] %v10762_v41  ;;  %v14308_v20 = vld [vmem:[#allocation142_spill] sm:$0xff]  ;;  %v10778_v44 = vsel %vm7264_vm5, %v14311_v5, 0  ;;  %v14318_v5 = vld [vmem:[#allocation51_spill] sm:$0xff] }
 0x679   :  { %4284 = vmatmul.bf16.gmra.mxu3 %v10729_v3  ;;  %v10794_v36 = vsel %vm7264_vm5, %v14318_v5, 0  ;;  %v14323_v5 = vld [vmem:[#allocation106_spill] sm:$0xff] }
 0x67a   :  { %v10724_v8 = vpop.f32.mrf.mxu0  ;;  %14303 = vst [vmem:[#allocation48_spill] sm:$0xff] %v10755_v54 }
 0x67b   :  { %14295 = vst [vmem:[#allocation89_spill] sm:$0xff] %v10724_v8  ;;  %v14302_v8 = vld [vmem:[#allocation16_spill] sm:$0xff] }
 0x67c   :  { %v4545_v16 = vpop.f32.mrf.mxu1  ;;  %v4245_v21 = vpop.f32.mrf.mxu3 }
 0x67d   :  { %5049 = vmatmul.bf16.gmra.mxu0 %v9411_v43  ;;  %v4546_v28 = vadd.f32 %v4545_v16, %v4377_v56  ;;  %v10736_v63 = vadd.f32 %v4245_v21, %v10279_v7 }
 0x67f   :  { %v4714_v6 = vpop.f32.mrf.mxu2 }
 0x680   :  { %v10771_v54 = vadd.f32 %v4714_v6, %v4546_v28  ;;  %v14315_v6 = vld [vmem:[#allocation18_spill] sm:$0xff] }
 0x682   :  { %v10743_v32 = vpop.f32.mrf.mxu0  ;;  %14309 = vst [vmem:[#allocation16_spill] sm:$0xff] %v10771_v54 }
 0x683   :  { %14300 = vst [vmem:[#allocation10_spill] sm:$0xff] %v10743_v32 }
 0x684   :  { %4756 = vmatmul.bf16.gmra.mxu2 %v10568_v51  ;;  %v4548_v43 = vpop.f32.mrf.mxu1  ;;  %v4247_v16 = vpop.f32.mrf.mxu3 }
 0x685   :  { %v4549_v56 = vadd.f32 %v4548_v43, %v4380_v29  ;;  %v10749_v7 = vadd.f32 %v4247_v16, %v10296_v2  ;;  %v14307_v2 = vld [vmem:[#allocation99_spill] sm:$0xff] }
 0x686   :  { %v4382_v29 = vadd.f32 %v14307_v2, %v10553_v34  ;;  %14312 = vst [vmem:[#allocation99_spill] sm:$0xff] %v10778_v44  ;;  %v14313_v34 = vld [vmem:[#allocation101_spill] sm:$0xff] }
 0x687   :  { %v4717_v21 = vpop.f32.mrf.mxu2  ;;  %4587 = vmatmul.bf16.gmra.mxu1 %v14302_v8  ;;  %v4385_v2 = vadd.f32 %v14313_v34, %v10577_v45  ;;  %14319 = vst [vmem:[#allocation101_spill] sm:$0xff] %v10794_v36  ;;  %v14320_v45 = vld [vmem:[#allocation104_spill] sm:$0xff] }
 0x688   :  { %v4387_v34 = vadd.f32 %v14320_v45, %v10587_v49 }
 0x689   :  { %4289 = vmatmul.bf16.gmra.mxu3 %v10762_v41 }
 0x68a   :  { %v10757_v48 = vpop.f32.mrf.mxu0 }
 0x68b   :  { %14304 = vst [vmem:[#allocation94_spill] sm:$0xff] %v10757_v48 }
 0x68c   :  { %v4550_v43 = vpop.f32.mrf.mxu1  ;;  %v4250_v51 = vpop.f32.mrf.mxu3 }
 0x68d   :  { %5054 = vmatmul.bf16.gmra.mxu0 %v9413_v59  ;;  %v4551_v16 = vadd.f32 %v4550_v43, %v4382_v29  ;;  %v10769_v12 = vadd.f32 %v4250_v51, %v14308_v20  ;;  %v14314_v51 = vld [vmem:[#allocation147_spill] sm:$0xff] }
 0x68f   :  { %v4719_v48 = vpop.f32.mrf.mxu2 }
 0x692   :  { %v10773_v32 = vpop.f32.mrf.mxu0 }
 0x693   :  { %14310 = vst [vmem:[#allocation50_spill] sm:$0xff] %v10773_v32  ;;  %v10787_v32 = vadd.f32 %v4717_v21, %v4549_v56 }
 0x694   :  { %4761 = vmatmul.bf16.gmra.mxu2 %v10778_v44  ;;  %v4553_v59 = vpop.f32.mrf.mxu1  ;;  %v4252_v43 = vpop.f32.mrf.mxu3  ;;  %v10803_v44 = vadd.f32 %v4719_v48, %v4551_v16  ;;  %v14328_v16 = vld [vmem:[#allocation52_spill] sm:$0xff] }
 0x695   :  { %v4554_v29 = vadd.f32 %v4553_v59, %v4385_v2  ;;  %v10784_v20 = vadd.f32 %v4252_v43, %v14314_v51  ;;  %14316 = vst [vmem:[#allocation142_spill] sm:$0xff] %v10787_v32  ;;  %v14321_v51 = vld [vmem:[#allocation150_spill] sm:$0xff]  ;;  %v4390_v32 = vadd.f32 %v14323_v5, %v10597_v57  ;;  %v14331_v5 = vld [vmem:[#allocation33_spill] sm:$0xff] }
 0x697   :  { %v4722_v28 = vpop.f32.mrf.mxu2  ;;  %4592 = vmatmul.bf16.gmra.mxu1 %v14315_v6 }
 0x699   :  { %4294 = vmatmul.bf16.gmra.mxu3 %v10794_v36 }
 0x69a   :  { %v10789_v54 = vpop.f32.mrf.mxu0 }
 0x69b   :  { %14317 = vst [vmem:[#allocation49_spill] sm:$0xff] %v10789_v54 }
 0x69c   :  { %v4555_v2 = vpop.f32.mrf.mxu1  ;;  %v4255_v43 = vpop.f32.mrf.mxu3 }
 0x69d   :  { %5059 = vmatmul.bf16.gmra.mxu0 %v9415_v18  ;;  %v4556_v59 = vadd.f32 %v4555_v2, %v4387_v34  ;;  %v10801_v56 = vadd.f32 %v4255_v43, %v14321_v51  ;;  %v14325_v2 = vld [vmem:[#allocation2_spill] sm:$0xff]  ;;  %v10814_v43 = vadd.f32 %v4722_v28, %v4554_v29  ;;  %v10821_v51 = vsel %vm7264_vm5, %v14328_v16, 0 }
 0x69e   :  { %14329 = vst [vmem:[#allocation104_spill] sm:$0xff] %v10821_v51  ;;  %v14333_v16 = vld [vmem:[#allocation110_spill] sm:$0xff] }
 0x69f   :  { %v4724_v21 = vpop.f32.mrf.mxu2  ;;  %14326 = vst [vmem:[#allocation18_spill] sm:$0xff] %v10814_v43 }
 0x6a2   :  { %v10805_v54 = vpop.f32.mrf.mxu0 }
 0x6a3   :  { %14322 = vst [vmem:[#allocation147_spill] sm:$0xff] %v10805_v54  ;;  %v14334_v54 = vld [vmem:[#allocation158_spill] sm:$0xff] }
 0x6a4   :  { %4766 = vmatmul.bf16.gmra.mxu2 %v10615_v52  ;;  %v4558_v58 = vpop.f32.mrf.mxu1  ;;  %v4257_v45 = vpop.f32.mrf.mxu3 }
 0x6a5   :  { %v4559_v49 = vadd.f32 %v4558_v58, %v4390_v32  ;;  %v10811_v18 = vadd.f32 %v4257_v45, %v14324_v37  ;;  %v14330_v32 = vld [vmem:[#allocation108_spill] sm:$0xff]  ;;  %v10830_v45 = vadd.f32 %v4724_v21, %v4556_v59  ;;  %v14338_v21 = vld [vmem:[#allocation53_spill] sm:$0xff] }
 0x6a6   :  { %v4392_v57 = vadd.f32 %v14330_v32, %v10605_v33 }
 0x6a7   :  { %v4727_v34 = vpop.f32.mrf.mxu2  ;;  %4597 = vmatmul.bf16.gmra.mxu1 %v14325_v2 }
 0x6a9   :  { %4299 = vmatmul.bf16.gmra.mxu3 %v10821_v51 }
 0x6aa   :  { %v10816_v48 = vpop.f32.mrf.mxu0 }
 0x6ab   :  { %14327 = vst [vmem:[#allocation51_spill] sm:$0xff] %v10816_v48  ;;  %v4395_v48 = vadd.f32 %v14333_v16, %v10622_v31  ;;  %v14340_v31 = vld [vmem:[#allocation113_spill] sm:$0xff] }
 0x6ac   :  { %v4560_v52 = vpop.f32.mrf.mxu1  ;;  %v4260_v58 = vpop.f32.mrf.mxu3 }
 0x6ad   :  { %5064 = vmatmul.bf16.gmra.mxu0 %v9417_v4  ;;  %v4561_v37 = vadd.f32 %v4560_v52, %v4392_v57  ;;  %v10828_v29 = vadd.f32 %v4260_v58, %v14331_v5  ;;  %v14335_v52 = vld [vmem:[#allocation19_spill] sm:$0xff]  ;;  %v10841_v58 = vadd.f32 %v4727_v34, %v4559_v49  ;;  %v10848_v5 = vsel %vm7264_vm5, %v14338_v21, 0 }
 0x6ae   :  { %14339 = vst [vmem:[#allocation2_spill] sm:$0xff] %v10848_v5 }
 0x6af   :  { %v4729_v28 = vpop.f32.mrf.mxu2  ;;  %14336 = vst [vmem:[#allocation106_spill] sm:$0xff] %v10841_v58 }
 0x6b0   :  { %v10860_v21 = vadd.f32 %v4729_v28, %v4561_v37  ;;  %v7103_v37 = vld [vmem:[%s13527_s4 + $0x210] sm:$0xff] }
 0x6b1   :  { %5190 = vmatpush.bf16.msra.mxu1 %v7103_v37  ;;  %v14354_v37 = vld [vmem:[#allocation123_spill] sm:$0xff] }
 0x6b2   :  { %v10832_v2 = vpop.f32.mrf.mxu0  ;;  %14342 = vst [vmem:[#allocation52_spill] sm:$0xff] %v10860_v21 }
 0x6b3   :  { %14332 = vst [vmem:[#allocation150_spill] sm:$0xff] %v10832_v2  ;;  %v14346_v2 = vld [vmem:[#allocation11_spill] sm:$0xff] }
 0x6b4   :  { %4771 = vmatmul.bf16.gmra.mxu2 %v10648_v35  ;;  %v4563_v43 = vpop.f32.mrf.mxu1  ;;  %v4262_v32 = vpop.f32.mrf.mxu3  ;;  %v7087_v35 = vld [vmem:[%s13527_s4 + $0x190] sm:$0xff] }
 0x6b5   :  { %v4564_v33 = vadd.f32 %v4563_v43, %v4395_v48  ;;  %v10838_v4 = vadd.f32 %v4262_v32, %v14334_v54  ;;  %v4397_v43 = vadd.f32 %v14340_v31, %v10635_v10  ;;  %v14341_v32 = vld [vmem:[#allocation17_spill] sm:$0xff]  ;;  %4852 = vmatpush.bf16.msra.mxu3 %v7087_v35  ;;  %v14344_v10 = vld [vmem:[#allocation115_spill] sm:$0xff] }
 0x6b6   :  { %v4400_v31 = vadd.f32 %v14344_v10, %v10655_v60  ;;  %v14349_v60 = vld [vmem:[#allocation54_spill] sm:$0xff] }
 0x6b7   :  { %v4732_v57 = vpop.f32.mrf.mxu2  ;;  %4602 = vmatmul.bf16.gmra.mxu1 %v14335_v52  ;;  %v10881_v10 = vsel %vm7264_vm5, %v14349_v60, 0  ;;  %v4405_v60 = vadd.f32 %v14354_v37, %v10682_v17  ;;  %v14360_v17 = vld [vmem:[#allocation127_spill] sm:$0xff] }
 0x6b8   :  { %v10874_v28 = vadd.f32 %v4732_v57, %v4564_v33  ;;  %14350 = vst [vmem:[#allocation158_spill] sm:$0xff] %v10881_v10  ;;  %v14352_v33 = vld [vmem:[#allocation28_spill] sm:$0xff] }
 0x6b9   :  { %4304 = vmatmul.bf16.gmra.mxu3 %v10848_v5 }
 0x6ba   :  { %v10843_v59 = vpop.f32.mrf.mxu0  ;;  %14347 = vst [vmem:[#allocation33_spill] sm:$0xff] %v10874_v28 }
 0x6bb   :  { %14337 = vst [vmem:[#allocation154_spill] sm:$0xff] %v10843_v59 }
 0x6bc   :  { %v4565_v48 = vpop.f32.mrf.mxu1  ;;  %v4265_v16 = vpop.f32.mrf.mxu3 }
 0x6bd   :  { %5069 = vmatmul.bf16.gmra.mxu0 %v14266_v40  ;;  %v4566_v54 = vadd.f32 %v4565_v48, %v4397_v43  ;;  %v10855_v49 = vadd.f32 %v4265_v16, %v14341_v32  ;;  %v14345_v16 = vld [vmem:[#allocation161_spill] sm:$0xff] }
 0x6bf   :  { %v4734_v34 = vpop.f32.mrf.mxu2 }
 0x6c0   :  { %v10890_v28 = vadd.f32 %v4734_v34, %v4566_v54  ;;  %v14358_v34 = vld [vmem:[#allocation55_spill] sm:$0xff] }
 0x6c2   :  { %v10862_v59 = vpop.f32.mrf.mxu0 }
 0x6c3   :  { %14343 = vst [vmem:[#allocation108_spill] sm:$0xff] %v10862_v59 }
 0x6c4   :  { %4776 = vmatmul.bf16.gmra.mxu2 %v10675_v55  ;;  %v4568_v40 = vpop.f32.mrf.mxu1  ;;  %v4267_v48 = vpop.f32.mrf.mxu3 }
 0x6c5   :  { %v4569_v43 = vadd.f32 %v4568_v40, %v4400_v31  ;;  %v10868_v32 = vadd.f32 %v4267_v48, %v14345_v16  ;;  %v14351_v31 = vld [vmem:[#allocation120_spill] sm:$0xff] }
 0x6c6   :  { %v4402_v40 = vadd.f32 %v14351_v31, %v10665_v25 }
 0x6c7   :  { %v4737_v58 = vpop.f32.mrf.mxu2  ;;  %4607 = vmatmul.bf16.gmra.mxu1 %v14346_v2 }
 0x6c9   :  { %4309 = vmatmul.bf16.gmra.mxu3 %v10881_v10 }
 0x6ca   :  { %v10876_v35 = vpop.f32.mrf.mxu0 }
 0x6cb   :  { %14348 = vst [vmem:[#allocation110_spill] sm:$0xff] %v10876_v35 }
 0x6cc   :  { %v4570_v48 = vpop.f32.mrf.mxu1  ;;  %v4270_v55 = vpop.f32.mrf.mxu3 }
 0x6cd   :  { %5074 = vmatmul.bf16.gmra.mxu0 %v14275_v61  ;;  %v4571_v16 = vadd.f32 %v4570_v48, %v4402_v40  ;;  %v10888_v57 = vadd.f32 %v4270_v55, %v14352_v33  ;;  %v14355_v48 = vld [vmem:[#allocation21_spill] sm:$0xff]  ;;  %v10901_v55 = vadd.f32 %v4737_v58, %v4569_v43  ;;  %v10908_v33 = vsel %vm7264_vm5, %v14358_v34, 0  ;;  %v14363_v34 = vld [vmem:[#allocation130_spill] sm:$0xff] }
 0x6ce   :  { %14359 = vst [vmem:[#allocation17_spill] sm:$0xff] %v10908_v33 }
 0x6cf   :  { %v4739_v35 = vpop.f32.mrf.mxu2  ;;  %14356 = vst [vmem:[#allocation53_spill] sm:$0xff] %v10901_v55  ;;  %v4410_v55 = vadd.f32 %v14363_v34, %v10709_v62  ;;  %v14369_v62 = vld [vmem:[#allocation134_spill] sm:$0xff] }
 0x6d2   :  { %v10892_v59 = vpop.f32.mrf.mxu0 }
 0x6d3   :  { %14353 = vst [vmem:[#allocation19_spill] sm:$0xff] %v10892_v59 }
 0x6d4   :  { %4781 = vmatmul.bf16.gmra.mxu2 %v10702_v50  ;;  %v4573_v21 = vpop.f32.mrf.mxu1  ;;  %v4272_v31 = vpop.f32.mrf.mxu3  ;;  %v10917_v50 = vadd.f32 %v4739_v35, %v4571_v16  ;;  %v14367_v16 = vld [vmem:[#allocation56_spill] sm:$0xff] }
 0x6d5   :  { %v4574_v25 = vadd.f32 %v4573_v21, %v4405_v60  ;;  %v10898_v61 = vadd.f32 %v4272_v31, %v10432_v14  ;;  %v4407_v21 = vadd.f32 %v14360_v17, %v10692_v11  ;;  %v14361_v31 = vld [vmem:[#allocation165_spill] sm:$0xff] }
 0x6d7   :  { %v4742_v40 = vpop.f32.mrf.mxu2  ;;  %4612 = vmatmul.bf16.gmra.mxu1 %v14355_v48 }
 0x6d9   :  { %4314 = vmatmul.bf16.gmra.mxu3 %v10908_v33 }
 0x6da   :  { %v10903_v54 = vpop.f32.mrf.mxu0 }
 0x6db   :  { %14357 = vst [vmem:[#allocation113_spill] sm:$0xff] %v10903_v54 }
 0x6dc   :  { %v4575_v37 = vpop.f32.mrf.mxu1  ;;  %v4275_v60 = vpop.f32.mrf.mxu3 }
 0x6dd   :  { %5079 = vmatmul.bf16.gmra.mxu0 %v14284_v42  ;;  %v4576_v14 = vadd.f32 %v4575_v37, %v4407_v21  ;;  %v10915_v58 = vadd.f32 %v4275_v60, %v14361_v31  ;;  %v14364_v37 = vld [vmem:[#allocation12_spill] sm:$0xff]  ;;  %v10928_v60 = vadd.f32 %v4742_v40, %v4574_v25  ;;  %v10935_v31 = vsel %vm7264_vm5, %v14367_v16, 0 }
 0x6de   :  { %14368 = vst [vmem:[#allocation54_spill] sm:$0xff] %v10935_v31  ;;  %v14372_v16 = vld [vmem:[#allocation136_spill] sm:$0xff] }
 0x6df   :  { %v4744_v43 = vpop.f32.mrf.mxu2  ;;  %14365 = vst [vmem:[#allocation161_spill] sm:$0xff] %v10928_v60  ;;  %v4415_v60 = vadd.f32 %v14372_v16, %v10736_v63  ;;  %v14378_v63 = vld [vmem:[#allocation140_spill] sm:$0xff] }
 0x6e2   :  { %v10919_v54 = vpop.f32.mrf.mxu0 }
 0x6e3   :  { %14362 = vst [vmem:[#allocation115_spill] sm:$0xff] %v10919_v54 }
 0x6e4   :  { %4786 = vmatmul.bf16.gmra.mxu2 %v10729_v3  ;;  %v4578_v59 = vpop.f32.mrf.mxu1  ;;  %v4277_v17 = vpop.f32.mrf.mxu3  ;;  %v10944_v3 = vadd.f32 %v4744_v43, %v4576_v14  ;;  %v14375_v14 = vld [vmem:[#allocation57_spill] sm:$0xff] }
 0x6e5   :  { %v4579_v11 = vadd.f32 %v4578_v59, %v4410_v55  ;;  %v10925_v42 = vadd.f32 %v4277_v17, %v10455_v9  ;;  %v4412_v59 = vadd.f32 %v14369_v62, %v10719_v30  ;;  %v14370_v17 = vld [vmem:[#allocation168_spill] sm:$0xff]  ;;  %v10960_v43 = vsel %vm7264_vm5, %v14375_v14, 0 }
 0x6e6   :  { %14376 = vst [vmem:[#allocation123_spill] sm:$0xff] %v10960_v43 }
 0x6e7   :  { %v4747_v21 = vpop.f32.mrf.mxu2  ;;  %4617 = vmatmul.bf16.gmra.mxu1 %v14364_v37 }
 0x6e9   :  { %4319 = vmatmul.bf16.gmra.mxu3 %v10935_v31 }
 0x6ea   :  { %v10930_v35 = vpop.f32.mrf.mxu0 }
 0x6eb   :  { %14366 = vst [vmem:[#allocation11_spill] sm:$0xff] %v10930_v35 }
 0x6ec   :  { %v4580_v55 = vpop.f32.mrf.mxu1  ;;  %v4280_v34 = vpop.f32.mrf.mxu3 }
 0x6ed   :  { %5084 = vmatmul.bf16.gmra.mxu0 %v14293_v38  ;;  %v4581_v9 = vadd.f32 %v4580_v55, %v4412_v59  ;;  %v10942_v25 = vadd.f32 %v4280_v34, %v14370_v17  ;;  %v14373_v55 = vld [vmem:[#allocation13_spill] sm:$0xff]  ;;  %v10955_v34 = vadd.f32 %v4747_v21, %v4579_v11 }
 0x6ef   :  { %v4749_v40 = vpop.f32.mrf.mxu2  ;;  %14374 = vst [vmem:[#allocation28_spill] sm:$0xff] %v10955_v34  ;;  %v14391_v34 = vld [vmem:[#allocation175_spill] sm:$0xff] }
 0x6f0   :  { %v10974_v14 = vadd.f32 %v4749_v40, %v4581_v9  ;;  %v7102_v9 = vld [vmem:[%s13527_s4 + $0x208] sm:$0xff] }
 0x6f1   :  { %5191 = vmatpush.bf16.msra.mxu1 %v7102_v9  ;;  %v14390_v9 = vld [vmem:[#allocation151_spill] sm:$0xff] }
 0x6f2   :  { %v10946_v35 = vpop.f32.mrf.mxu0  ;;  %14379 = vst [vmem:[#allocation55_spill] sm:$0xff] %v10974_v14 }
 0x6f3   :  { %14371 = vst [vmem:[#allocation120_spill] sm:$0xff] %v10946_v35 }
 0x6f4   :  { %4791 = vmatmul.bf16.gmra.mxu2 %v10762_v41  ;;  %v4583_v54 = vpop.f32.mrf.mxu1  ;;  %v4282_v62 = vpop.f32.mrf.mxu3  ;;  %v14380_v41 = vld [vmem:[#allocation143_spill] sm:$0xff] }
 0x6f5   :  { %v4584_v30 = vadd.f32 %v4583_v54, %v4415_v60  ;;  %v10952_v38 = vadd.f32 %v4282_v62, %v10478_v53  ;;  %v4417_v54 = vadd.f32 %v14378_v63, %v10749_v7  ;;  %v7086_v62 = vld [vmem:[%s13527_s4 + $0x188] sm:$0xff] }
 0x6f6   :  { %4853 = vmatpush.bf16.msra.mxu3 %v7086_v62 }
 0x6f7   :  { %v4752_v59 = vpop.f32.mrf.mxu2  ;;  %4622 = vmatmul.bf16.gmra.mxu1 %v14373_v55 }
 0x6f8   :  { %v10988_v40 = vadd.f32 %v4752_v59, %v4584_v30  ;;  %v14388_v30 = vld [vmem:[#allocation173_spill] sm:$0xff] }
 0x6f9   :  { %4324 = vmatmul.bf16.gmra.mxu3 %v10960_v43 }
 0x6fa   :  { %v10962_v17 = vpop.f32.mrf.mxu0  ;;  %14383 = vst [vmem:[#allocation165_spill] sm:$0xff] %v10988_v40 }
 0x6fb   :  { %14377 = vst [vmem:[#allocation21_spill] sm:$0xff] %v10962_v17  ;;  %v4420_v17 = vadd.f32 %v14380_v41, %v10769_v12  ;;  %v14384_v41 = vld [vmem:[#allocation58_spill] sm:$0xff] }
 0x6fc   :  { %v4585_v60 = vpop.f32.mrf.mxu1  ;;  %v4285_v16 = vpop.f32.mrf.mxu3  ;;  %v10993_v12 = vsel %vm7264_vm5, %v14384_v41, 0  ;;  %v4425_v41 = vadd.f32 %v14390_v9, %v10801_v56  ;;  %v14395_v56 = vld [vmem:[#allocation59_spill] sm:$0xff] }
 0x6fd   :  { %5089 = vmatmul.bf16.gmra.mxu0 %v14302_v8  ;;  %v4586_v53 = vadd.f32 %v4585_v60, %v4417_v54  ;;  %v10969_v11 = vadd.f32 %v4285_v16, %v10487_v27  ;;  %v14382_v16 = vld [vmem:[#allocation14_spill] sm:$0xff]  ;;  %14385 = vst [vmem:[#allocation130_spill] sm:$0xff] %v10993_v12 }
 0x6ff   :  { %v4754_v21 = vpop.f32.mrf.mxu2 }
 0x702   :  { %v10979_v8 = vpop.f32.mrf.mxu0 }
 0x703   :  { %14381 = vst [vmem:[#allocation127_spill] sm:$0xff] %v10979_v8  ;;  %v11004_v8 = vadd.f32 %v4754_v21, %v4586_v53 }
 0x704   :  { %4796 = vmatmul.bf16.gmra.mxu2 %v10794_v36  ;;  %v4588_v7 = vpop.f32.mrf.mxu1  ;;  %v4287_v54 = vpop.f32.mrf.mxu3 }
 0x705   :  { %v4589_v63 = vadd.f32 %v4588_v7, %v4420_v17  ;;  %v10982_v27 = vadd.f32 %v4287_v54, %v10501_v23  ;;  %v14386_v23 = vld [vmem:[#allocation148_spill] sm:$0xff]  ;;  %14389 = vst [vmem:[#allocation56_spill] sm:$0xff] %v11004_v8 }
 0x706   :  { %v4422_v17 = vadd.f32 %v14386_v23, %v10784_v20 }
 0x707   :  { %v4757_v60 = vpop.f32.mrf.mxu2  ;;  %4627 = vmatmul.bf16.gmra.mxu1 %v14382_v16 }
 0x708   :  { %v11016_v53 = vadd.f32 %v4757_v60, %v4589_v63 }
 0x709   :  { %4329 = vmatmul.bf16.gmra.mxu3 %v10993_v12 }
 0x70a   :  { %v10999_v36 = vpop.f32.mrf.mxu0  ;;  %14393 = vst [vmem:[#allocation134_spill] sm:$0xff] %v11016_v53 }
 0x70b   :  { %14387 = vst [vmem:[#allocation12_spill] sm:$0xff] %v10999_v36 }
 0x70c   :  { %v4590_v62 = vpop.f32.mrf.mxu1  ;;  %v4290_v54 = vpop.f32.mrf.mxu3 }
 0x70d   :  { %5094 = vmatmul.bf16.gmra.mxu0 %v14315_v6  ;;  %v4591_v7 = vadd.f32 %v4590_v62, %v4422_v17  ;;  %v11002_v59 = vadd.f32 %v4290_v54, %v14388_v30  ;;  %v14392_v62 = vld [vmem:[#allocation26_spill] sm:$0xff]  ;;  %v11023_v30 = vsel %vm7264_vm5, %v14395_v56, 0 }
 0x70e   :  { %v7085_v54 = vld [vmem:[%s13527_s4 + $0x180] sm:$0xff]  ;;  %14396 = vst [vmem:[#allocation136_spill] sm:$0xff] %v11023_v30 }
 0x70f   :  { %v4759_v40 = vpop.f32.mrf.mxu2  ;;  %4854 = vmatpush.bf16.msra.mxu3 %v7085_v54  ;;  %v14401_v54 = vld [vmem:[#allocation157_spill] sm:$0xff] }
 0x710   :  { %v11032_v53 = vadd.f32 %v4759_v40, %v4591_v7  ;;  %v4430_v56 = vadd.f32 %v14401_v54, %v10828_v29  ;;  %v14405_v40 = vld [vmem:[#allocation159_spill] sm:$0xff] }
 0x711   :  { %v4432_v7 = vadd.f32 %v14405_v40, %v10838_v4  ;;  %v14407_v29 = vld [vmem:[#allocation107_spill] sm:$0xff]  ;;  %v14411_v4 = vld [vmem:[#allocation109_spill] sm:$0xff] }
 0x712   :  { %v11018_v21 = vpop.f32.mrf.mxu0  ;;  %14399 = vst [vmem:[#allocation13_spill] sm:$0xff] %v11032_v53  ;;  %v14406_v53 = vld [vmem:[#allocation70_spill] sm:$0xff] }
 0x713   :  { %14394 = vst [vmem:[#allocation168_spill] sm:$0xff] %v11018_v21  ;;  %v4132_v54 = vadd.f32 %v14407_v29, %v14406_v53 }
 0x714   :  { %4801 = vmatmul.bf16.gmra.mxu2 %v10821_v51  ;;  %v4593_v14 = vpop.f32.mrf.mxu1  ;;  %v4292_v23 = vpop.f32.mrf.mxu3 }
 0x715   :  { %v4594_v20 = vadd.f32 %v4593_v14, %v4425_v41  ;;  %v11010_v6 = vadd.f32 %v4292_v23, %v14391_v34  ;;  %v14397_v34 = vld [vmem:[#allocation155_spill] sm:$0xff]  ;;  %v14398_v41 = vmov 0  }
 0x716   :  { %v4427_v14 = vadd.f32 %v14397_v34, %v10811_v18 }
 0x717   :  { %v4762_v17 = vpop.f32.mrf.mxu2  ;;  %4632 = vmatmul.bf16.gmra.mxu1 %v14392_v62 }
 0x719   :  { %4334 = vmatmul.bf16.gmra.mxu3 %v11023_v30 }
 0x71a   :  { %v11034_v21 = vpop.f32.mrf.mxu0 }
 0x71b   :  { %14400 = vst [vmem:[#allocation57_spill] sm:$0xff] %v11034_v21 }
 0x71c   :  { %v4595_v9 = vpop.f32.mrf.mxu1  ;;  %v4295_v51 = vpop.f32.mrf.mxu3 }
 0x71d   :  { %5099 = vmatmul.bf16.gmra.mxu0 %v14398_v41  ;;  %v4596_v23 = vadd.f32 %v4595_v9, %v4427_v14  ;;  %v11030_v63 = vadd.f32 %v4295_v51, %v10561_v46  ;;  %v14402_v9 = vld [vmem:[#allocation6_spill] sm:$0xff]  ;;  %v11043_v46 = vadd.f32 %v4762_v17, %v4594_v20  ;;  %v14404_v51 = vld [vmem:[#allocation4_spill] sm:$0xff] }
 0x71e   :  { %v14409_v17 = vld [vmem:[#allocation160_spill] sm:$0xff] }
 0x71f   :  { %v4764_v60 = vpop.f32.mrf.mxu2  ;;  %14403 = vst [vmem:[#allocation140_spill] sm:$0xff] %v11043_v46  ;;  %v14410_v46 = vld [vmem:[#allocation71_spill] sm:$0xff] }
 0x720   :  { %v11055_v20 = vadd.f32 %v4764_v60, %v4596_v23  ;;  %v4134_v40 = vadd.f32 %v14411_v4, %v14410_v46  ;;  %v14414_v60 = vld [vmem:[#allocation22_spill] sm:$0xff]  ;;  %v14416_v46 = vld [vmem:[#allocation73_spill] sm:$0xff] }
 0x722   :  { %v11050_v21 = vpop.f32.mrf.mxu0 }
 0x723   :  { %14408 = vst [vmem:[#allocation143_spill] sm:$0xff] %v11050_v21 }
 0x724   :  { %4806 = vmatmul.bf16.gmra.mxu2 %v10848_v5  ;;  %v4598_v8 = vpop.f32.mrf.mxu1  ;;  %v4297_v34 = vpop.f32.mrf.mxu3 }
 0x725   :  { %v4599_v18 = vadd.f32 %v4598_v8, %v4430_v56  ;;  %v11040_v36 = vadd.f32 %v4297_v34, %v10579_v13 }
 0x727   :  { %v4767_v14 = vpop.f32.mrf.mxu2  ;;  %4637 = vmatmul.bf16.gmra.mxu1 %v14402_v9 }
 0x728   :  { %v11067_v23 = vadd.f32 %v4767_v14, %v4599_v18  ;;  %v14420_v14 = vld [vmem:[#allocation163_spill] sm:$0xff] }
 0x729   :  { %4855 = vmatmul.bf16.vlgmr.msra.gmra.mxu3 %v14404_v51  ;;  %v4435_v51 = vadd.f32 %v14409_v17, %v10855_v49  ;;  %v14415_v49 = vld [vmem:[#allocation162_spill] sm:$0xff] }
 0x72a   :  { %v11062_v35 = vpop.f32.mrf.mxu0  ;;  %14413 = vst [vmem:[#allocation14_spill] sm:$0xff] %v11067_v23  ;;  %v14421_v23 = vld [vmem:[#allocation75_spill] sm:$0xff] }
 0x72c   :  { %v4600_v5 = vpop.f32.mrf.mxu1  ;;  %v4300_v8 = vpop.f32.mrf.mxu3 }
 0x72d   :  { %5104 = vmatmul.bf16.gmra.mxu0 %v14335_v52  ;;  %v4601_v13 = vadd.f32 %v4600_v5, %v4432_v7  ;;  %v11053_v56 = vadd.f32 %v4300_v8, %v4132_v54  ;;  %v14412_v7 = vld [vmem:[#allocation20_spill] sm:$0xff]  ;;  %v4437_v54 = vadd.f32 %v14415_v49, %v10868_v32  ;;  %v14422_v32 = vld [vmem:[#allocation114_spill] sm:$0xff] }
 0x72e   :  { %v14417_v8 = vld [vmem:[#allocation112_spill] sm:$0xff]  ;;  %v4139_v49 = vadd.f32 %v14422_v32, %v14421_v23  ;;  %v14426_v23 = vld [vmem:[#allocation5_spill] sm:$0xff]  ;;  %v14429_v32 = vld [vmem:[#allocation118_spill] sm:$0xff] }
 0x72f   :  { %v4769_v34 = vpop.f32.mrf.mxu2  ;;  %v4137_v17 = vadd.f32 %v14417_v8, %v14416_v46 }
 0x732   :  { %v11079_v18 = vpop.f32.mrf.mxu0 }
 0x733   :  { %14419 = vst [vmem:[#allocation148_spill] sm:$0xff] %v11079_v18 }
 0x734   :  { %4811 = vmatmul.bf16.gmra.mxu2 %v10881_v10  ;;  %v4603_v53 = vpop.f32.mrf.mxu1  ;;  %v4302_v21 = vpop.f32.mrf.mxu3  ;;  %v11077_v10 = vadd.f32 %v4769_v34, %v4601_v13  ;;  %v7101_v13 = vld [vmem:[%s13527_s4 + $0x200] sm:$0xff] }
 0x735   :  { %v4604_v29 = vadd.f32 %v4603_v53, %v4435_v51  ;;  %v11064_v52 = vadd.f32 %v4302_v21, %v4134_v40  ;;  %5192 = vmatpush.bf16.msra.mxu1 %v7101_v13  ;;  %v14431_v13 = vld [vmem:[#allocation166_spill] sm:$0xff] }
 0x736   :  { %14418 = vst [vmem:[#allocation58_spill] sm:$0xff] %v11077_v10 }
 0x737   :  { %v4772_v5 = vpop.f32.mrf.mxu2  ;;  %4642 = vmatmul.bf16.gmra.mxu1 %v14412_v7 }
 0x738   :  { %v11092_v34 = vadd.f32 %v4772_v5, %v4604_v29 }
 0x739   :  { %4860 = vmatmul.bf16.gmra.mxu3 %v14414_v60  ;;  %v4440_v60 = vadd.f32 %v14420_v14, %v10888_v57 }
 0x73a   :  { %14424 = vst [vmem:[#allocation173_spill] sm:$0xff] %v11092_v34  ;;  %v11094_v57 = vpop.f32.mrf.mxu0  ;;  %v4445_v34 = vadd.f32 %v14431_v13, %v10915_v58  ;;  %v14437_v58 = vld [vmem:[#allocation167_spill] sm:$0xff] }
 0x73b   :  { %14425 = vst [vmem:[#allocation151_spill] sm:$0xff] %v11094_v57  ;;  %v14433_v57 = vld [vmem:[#allocation121_spill] sm:$0xff] }
 0x73c   :  { %v4605_v4 = vpop.f32.mrf.mxu1  ;;  %v4305_v53 = vpop.f32.mrf.mxu3 }
 0x73d   :  { %5109 = vmatmul.bf16.gmra.mxu0 %v14346_v2  ;;  %v4606_v51 = vadd.f32 %v4605_v4, %v4437_v54  ;;  %v11075_v21 = vadd.f32 %v4305_v53, %v4137_v17  ;;  %v14423_v4 = vld [vmem:[#allocation34_spill] sm:$0xff]  ;;  %v14427_v53 = vld [vmem:[#allocation164_spill] sm:$0xff] }
 0x73e   :  { %v4442_v14 = vadd.f32 %v14427_v53, %v10898_v61 }
 0x73f   :  { %v4774_v40 = vpop.f32.mrf.mxu2 }
 0x740   :  { %v11104_v5 = vadd.f32 %v4774_v40, %v4606_v51  ;;  %v14436_v40 = vld [vmem:[#allocation62_spill] sm:$0xff] }
 0x742   :  { %14430 = vst [vmem:[#allocation175_spill] sm:$0xff] %v11104_v5  ;;  %v11110_v61 = vpop.f32.mrf.mxu0  ;;  %v14444_v5 = vld [vmem:[#allocation29_spill] sm:$0xff] }
 0x744   :  { %4816 = vmatmul.bf16.gmra.mxu2 %v10908_v33  ;;  %v4608_v46 = vpop.f32.mrf.mxu1  ;;  %v4307_v2 = vpop.f32.mrf.mxu3 }
 0x745   :  { %v4609_v8 = vadd.f32 %v4608_v46, %v4440_v60  ;;  %v11086_v54 = vadd.f32 %v4307_v2, %v4139_v49  ;;  %v14428_v60 = vld [vmem:[#allocation78_spill] sm:$0xff] }
 0x746   :  { %v4142_v49 = vadd.f32 %v14429_v32, %v14428_v60  ;;  %v14434_v32 = vld [vmem:[#allocation27_spill] sm:$0xff] }
 0x747   :  { %v4777_v17 = vpop.f32.mrf.mxu2  ;;  %4647 = vmatmul.bf16.gmra.mxu1 %v14423_v4 }
 0x748   :  { %v11116_v51 = vadd.f32 %v4777_v17, %v4609_v8  ;;  %v14441_v17 = vld [vmem:[#allocation169_spill] sm:$0xff] }
 0x749   :  { %4865 = vmatmul.bf16.gmra.mxu3 %v14426_v23  ;;  %v14432_v23 = vld [vmem:[#allocation80_spill] sm:$0xff] }
 0x74a   :  { %v4144_v18 = vadd.f32 %v14433_v57, %v14432_v23  ;;  %14435 = vst [vmem:[#allocation26_spill] sm:$0xff] %v11116_v51  ;;  %v14438_v57 = vld [vmem:[#allocation83_spill] sm:$0xff]  ;;  %v14442_v51 = vld [vmem:[#allocation85_spill] sm:$0xff] }
 0x74c   :  { %v4610_v46 = vpop.f32.mrf.mxu1  ;;  %v4310_v33 = vpop.f32.mrf.mxu3 }
 0x74d   :  { %5114 = vmatmul.bf16.gmra.mxu0 %v14355_v48  ;;  %v4611_v2 = vadd.f32 %v4610_v46, %v4442_v14  ;;  %v11102_v10 = vadd.f32 %v4310_v33, %v4142_v49  ;;  %v4447_v49 = vadd.f32 %v14437_v58, %v10925_v42  ;;  %v14439_v46 = vld [vmem:[#allocation126_spill] sm:$0xff]  ;;  %v14443_v42 = vld [vmem:[#allocation128_spill] sm:$0xff] }
 0x74e   :  { %v4147_v13 = vadd.f32 %v14439_v46, %v14438_v57  ;;  %v4149_v58 = vadd.f32 %v14443_v42, %v14442_v51  ;;  %v14448_v51 = vld [vmem:[#allocation88_spill] sm:$0xff] }
 0x74f   :  { %v4779_v29 = vpop.f32.mrf.mxu2 }
 0x750   :  { %v11128_v8 = vadd.f32 %v4779_v29, %v4611_v2  ;;  %v14446_v29 = vld [vmem:[#allocation64_spill] sm:$0xff] }
 0x752   :  { %14440 = vst [vmem:[#allocation59_spill] sm:$0xff] %v11128_v8  ;;  %v14453_v8 = vld [vmem:[#allocation90_spill] sm:$0xff] }
 0x754   :  { %4821 = vmatmul.bf16.gmra.mxu2 %v10935_v31  ;;  %v4613_v53 = vpop.f32.mrf.mxu1  ;;  %v4312_v48 = vpop.f32.mrf.mxu3 }
 0x755   :  { %v4614_v60 = vadd.f32 %v4613_v53, %v4445_v34  ;;  %v11113_v14 = vadd.f32 %v4312_v48, %v4144_v18  ;;  %v11124_v18 = vpop.f32.mrf.mxu0 }
 0x757   :  { %v4782_v33 = vpop.f32.mrf.mxu2  ;;  %4652 = vmatmul.bf16.gmra.mxu1 %v14434_v32 }
 0x759   :  { %4870 = vmatmul.bf16.gmra.mxu3 %v14436_v40  ;;  %v4450_v40 = vadd.f32 %v14441_v17, %v10942_v25  ;;  %v14447_v25 = vld [vmem:[#allocation170_spill] sm:$0xff]  ;;  %v14449_v17 = vld [vmem:[#allocation133_spill] sm:$0xff] }
 0x75a   :  { %v4152_v42 = vadd.f32 %v14449_v17, %v14448_v51 }
 0x75c   :  { %v4615_v23 = vpop.f32.mrf.mxu1  ;;  %v4315_v53 = vpop.f32.mrf.mxu3 }
 0x75d   :  { %5119 = vmatmul.bf16.gmra.mxu0 %v14364_v37  ;;  %v4616_v34 = vadd.f32 %v4615_v23, %v4447_v49  ;;  %v11126_v48 = vadd.f32 %v4315_v53, %v4147_v13  ;;  %v11138_v13 = vadd.f32 %v4782_v33, %v4614_v60  ;;  %v11140_v2 = vpop.f32.mrf.mxu0  ;;  %v4452_v53 = vadd.f32 %v14447_v25, %v10952_v38  ;;  %v14454_v38 = vld [vmem:[#allocation135_spill] sm:$0xff] }
 0x75e   :  { %v4154_v25 = vadd.f32 %v14454_v38, %v14453_v8 }
 0x75f   :  { %v4784_v31 = vpop.f32.mrf.mxu2  ;;  %14445 = vst [vmem:[#allocation155_spill] sm:$0xff] %v11138_v13 }
 0x760   :  { %v11150_v60 = vadd.f32 %v4784_v31, %v4616_v34  ;;  %v14457_v34 = vld [vmem:[#allocation66_spill] sm:$0xff] }
 0x762   :  { %14450 = vst [vmem:[#allocation157_spill] sm:$0xff] %v11150_v60  ;;  %v14460_v60 = vld [vmem:[#allocation139_spill] sm:$0xff] }
 0x764   :  { %4826 = vmatmul.bf16.gmra.mxu2 %v10960_v43  ;;  %v4618_v57 = vpop.f32.mrf.mxu1  ;;  %v4317_v37 = vpop.f32.mrf.mxu3 }
 0x765   :  { %v4619_v46 = vadd.f32 %v4618_v57, %v4450_v40  ;;  %v11135_v49 = vadd.f32 %v4317_v37, %v4149_v58  ;;  %v11152_v33 = vpop.f32.mrf.mxu0 }
 0x766   :  { %14451 = vst [vmem:[#allocation6_spill] sm:$0xff] %v11152_v33 }
 0x767   :  { %v4787_v23 = vpop.f32.mrf.mxu2  ;;  %4657 = vmatmul.bf16.gmra.mxu1 %v14444_v5 }
 0x768   :  { %v11162_v31 = vadd.f32 %v4787_v23, %v4619_v46  ;;  %v14462_v23 = vld [vmem:[#allocation174_spill] sm:$0xff] }
 0x769   :  { %4875 = vmatmul.bf16.gmra.mxu3 %v14446_v29  ;;  %v14452_v29 = vld [vmem:[#allocation171_spill] sm:$0xff] }
 0x76a   :  { %v4455_v13 = vadd.f32 %v14452_v29, %v10969_v11  ;;  %14456 = vst [vmem:[#allocation4_spill] sm:$0xff] %v11162_v31  ;;  %v14459_v29 = vld [vmem:[#allocation93_spill] sm:$0xff]  ;;  %v14463_v31 = vld [vmem:[#allocation95_spill] sm:$0xff] }
 0x76b   :  { %v4157_v8 = vadd.f32 %v14460_v60, %v14459_v29 }
 0x76c   :  { %v4620_v43 = vpop.f32.mrf.mxu1  ;;  %v4320_v58 = vpop.f32.mrf.mxu3 }
 0x76d   :  { %5124 = vmatmul.bf16.gmra.mxu0 %v14373_v55  ;;  %v4621_v40 = vadd.f32 %v4620_v43, %v4452_v53  ;;  %v11148_v57 = vadd.f32 %v4320_v58, %v4152_v42  ;;  %v14455_v42 = vld [vmem:[#allocation31_spill] sm:$0xff]  ;;  %v14458_v58 = vld [vmem:[#allocation172_spill] sm:$0xff]  ;;  %v11169_v38 = vpop.f32.mrf.mxu0 }
 0x76e   :  { %v4457_v11 = vadd.f32 %v14458_v58, %v10982_v27  ;;  %14461 = vst [vmem:[#allocation159_spill] sm:$0xff] %v11169_v38  ;;  %v14464_v27 = vld [vmem:[#allocation141_spill] sm:$0xff] }
 0x76f   :  { %v4789_v37 = vpop.f32.mrf.mxu2  ;;  %v4159_v58 = vadd.f32 %v14464_v27, %v14463_v31  ;;  %v14469_v31 = vld [vmem:[#allocation98_spill] sm:$0xff] }
 0x770   :  { %v11174_v46 = vadd.f32 %v4789_v37, %v4621_v40  ;;  %v14467_v37 = vld [vmem:[#allocation68_spill] sm:$0xff] }
 0x774   :  { %4831 = vmatmul.bf16.gmra.mxu2 %v10993_v12  ;;  %v4623_v51 = vpop.f32.mrf.mxu1  ;;  %v4322_v55 = vpop.f32.mrf.mxu3 }
 0x775   :  { %v4624_v17 = vadd.f32 %v4623_v51, %v4455_v13  ;;  %v11159_v43 = vadd.f32 %v4322_v55, %v4154_v25  ;;  %v11181_v33 = vpop.f32.mrf.mxu0 }
 0x777   :  { %v4792_v53 = vpop.f32.mrf.mxu2  ;;  %4662 = vmatmul.bf16.gmra.mxu1 %v14455_v42 }
 0x778   :  { %v11186_v40 = vadd.f32 %v4792_v53, %v4624_v17  ;;  %v14472_v53 = vld [vmem:[#allocation60_spill] sm:$0xff] }
 0x779   :  { %4880 = vmatmul.bf16.gmra.mxu3 %v14457_v34  ;;  %v4460_v34 = vadd.f32 %v14462_v23, %v11002_v59  ;;  %v14468_v59 = vld [vmem:[#allocation176_spill] sm:$0xff] }
 0x77a   :  { %14466 = vst [vmem:[#allocation70_spill] sm:$0xff] %v11186_v40 }
 0x77c   :  { %v4625_v12 = vpop.f32.mrf.mxu1  ;;  %v4325_v25 = vpop.f32.mrf.mxu3 }
 0x77d   :  { %5129 = vmatmul.bf16.gmra.mxu0 %v14382_v16  ;;  %v4626_v13 = vadd.f32 %v4625_v12, %v4457_v11  ;;  %v11172_v51 = vadd.f32 %v4325_v25, %v4157_v8  ;;  %v14465_v11 = vld [vmem:[#allocation32_spill] sm:$0xff]  ;;  %v4462_v8 = vadd.f32 %v14468_v59, %v11010_v6  ;;  %v14470_v25 = vld [vmem:[#allocation146_spill] sm:$0xff]  ;;  %v11198_v17 = vpop.f32.mrf.mxu0  ;;  %v14474_v6 = vld [vmem:[#allocation177_spill] sm:$0xff] }
 0x77e   :  { %v4162_v23 = vadd.f32 %v14470_v25, %v14469_v31  ;;  %v4465_v59 = vadd.f32 %v14474_v6, %v11030_v63  ;;  %v14475_v31 = vld [vmem:[#allocation100_spill] sm:$0xff]  ;;  %v14476_v25 = vld [vmem:[#allocation149_spill] sm:$0xff]  ;;  %v4467_v63 = vadd.f32 %v10581_v39, %v11040_v36  ;;  %v14480_v6 = vld [vmem:[#allocation103_spill] sm:$0xff] }
 0x77f   :  { %v4794_v55 = vpop.f32.mrf.mxu2  ;;  %v7143_v36 = vld [vmem:[%s13525_s0 + $0x8] sm:$0xff] }
 0x784   :  { %4836 = vmatmul.bf16.gmra.mxu2 %v11023_v30  ;;  %v4628_v60 = vpop.f32.mrf.mxu1  ;;  %v4327_v38 = vpop.f32.mrf.mxu3  ;;  %v11196_v30 = vadd.f32 %v4794_v55, %v4626_v13 }
 0x785   :  { %v4629_v29 = vadd.f32 %v4628_v60, %v4460_v34  ;;  %v11183_v16 = vadd.f32 %v4327_v38, %v4159_v58  ;;  %v11215_v26 = vpop.f32.mrf.mxu0 }
 0x786   :  { %14471 = vst [vmem:[#allocation107_spill] sm:$0xff] %v11196_v30 }
 0x787   :  { %v4797_v12 = vpop.f32.mrf.mxu2  ;;  %4667 = vmatmul.bf16.gmra.mxu1 %v14465_v11 }
 0x788   :  { %v11213_v30 = vadd.f32 %v4797_v12, %v4629_v29  ;;  %v4470_v12 = vadd.f32 %v10590_v15, %v11053_v56  ;;  %v14485_v56 = vld [vmem:[#allocation72_spill] sm:$0xff] }
 0x789   :  { %4885 = vmatmul.bf16.gmra.mxu3 %v14467_v37  ;;  %v11203_v37 = vsel %vm7264_vm5, %v14472_v53, 0  ;;  %v14479_v53 = vld [vmem:[#allocation69_spill] sm:$0xff] }
 0x78a   :  { %14473 = vst [vmem:[#allocation160_spill] sm:$0xff] %v11203_v37 }
 0x78b   :  { %14478 = vst [vmem:[#allocation71_spill] sm:$0xff] %v11213_v30  ;;  %v14483_v30 = vld [vmem:[#allocation156_spill] sm:$0xff] }
 0x78c   :  { %v4630_v27 = vpop.f32.mrf.mxu1  ;;  %v4330_v60 = vpop.f32.mrf.mxu3 }
 0x78d   :  { %5134 = vmatmul.bf16.gmra.mxu0 %v14392_v62  ;;  %v4631_v34 = vadd.f32 %v4630_v27, %v4462_v8  ;;  %v11194_v38 = vadd.f32 %v4330_v60, %v4162_v23  ;;  %v4164_v62 = vadd.f32 %v14476_v25, %v14475_v31  ;;  %v14477_v60 = vld [vmem:[#allocation30_spill] sm:$0xff]  ;;  %v14481_v31 = vld [vmem:[#allocation153_spill] sm:$0xff]  ;;  %v11231_v39 = vpop.f32.mrf.mxu0 }
 0x78e   :  { %v4167_v25 = vadd.f32 %v14481_v31, %v14480_v6 }
 0x78f   :  { %v4799_v58 = vpop.f32.mrf.mxu2 }
 0x790   :  { %v11225_v29 = vadd.f32 %v4799_v58, %v4631_v34  ;;  %v14484_v58 = vld [vmem:[#allocation116_spill] sm:$0xff] }
 0x794   :  { %4841 = vmatmul.bf16.gmra.mxu2 %v11203_v37  ;;  %v4633_v8 = vpop.f32.mrf.mxu1  ;;  %v4332_v27 = vpop.f32.mrf.mxu3 }
 0x795   :  { %v4634_v23 = vadd.f32 %v4633_v8, %v4465_v59  ;;  %v11210_v13 = vadd.f32 %v4332_v27, %v4164_v62 }
 0x797   :  { %v4802_v55 = vpop.f32.mrf.mxu2  ;;  %4672 = vmatmul.bf16.gmra.mxu1 %v14477_v60 }
 0x798   :  { %v11240_v15 = vadd.f32 %v4802_v55, %v4634_v23  ;;  %v4475_v23 = vadd.f32 %v10610_v0, %v11075_v21  ;;  %v14488_v0 = vld [vmem:[#allocation77_spill] sm:$0xff]  ;;  %v14489_v21 = vld [vmem:[#allocation74_spill] sm:$0xff] }
 0x799   :  { %4890 = vmatmul.bf16.gmra.mxu3 %v14479_v53  ;;  %v14482_v53 = vld [vmem:[#allocation105_spill] sm:$0xff] }
 0x79a   :  { %v4169_v40 = vadd.f32 %v14483_v30, %v14482_v53  ;;  %v4472_v30 = vadd.f32 %v10599_v19, %v11064_v52  ;;  %v11246_v53 = vpop.f32.mrf.mxu0  ;;  %v7144_v19 = vld [vmem:[%s13525_s0 + $0x10] sm:$0xff] }
 0x79c   :  { %v4635_v37 = vpop.f32.mrf.mxu1  ;;  %v4335_v62 = vpop.f32.mrf.mxu3 }
 0x79d   :  { %5139 = vmatmul.bf16.gmra.mxu0 %v14402_v9  ;;  %v4636_v59 = vadd.f32 %v4635_v37, %v4467_v63  ;;  %v11223_v8 = vadd.f32 %v4335_v62, %v4167_v25 }
 0x79f   :  { %v4804_v27 = vpop.f32.mrf.mxu2 }
 0x7a4   :  { %6967 = vmatmul.msk.bf16.vlgmr.msra.gmra.mxu2 %vm1349_vm7, %v7143_v36  ;;  %v4638_v9 = vpop.f32.mrf.mxu1  ;;  %v4337_v63 = vpop.f32.mrf.mxu3  ;;  %v11251_v36 = vadd.f32 %v4804_v27, %v4636_v59 }
 0x7a5   :  { %v4639_v37 = vadd.f32 %v4638_v9, %v4470_v12  ;;  %v11237_v6 = vadd.f32 %v4337_v63, %v4169_v40  ;;  %v14486_v9 = vld [vmem:[#allocation44_spill] sm:$0xff]  ;;  %v11265_v27 = vpop.f32.mrf.mxu0 }
 0x7a7   :  { %v4807_v34 = vpop.f32.mrf.mxu2  ;;  %5193 = vmatmul.bf16.vlgmr.msra.gmra.mxu1 %v14484_v58  ;;  %v14487_v58 = vld [vmem:[#allocation124_spill] sm:$0xff] }
 0x7a8   :  { %v11263_v59 = vadd.f32 %v4807_v34, %v4639_v37  ;;  %v14492_v34 = vld [vmem:[#allocation7_spill] sm:$0xff] }
 0x7a9   :  { %4895 = vmatmul.bf16.gmra.mxu3 %v14485_v56  ;;  %v4477_v56 = vadd.f32 %v14489_v21, %v11086_v54  ;;  %v7145_v54 = vld [vmem:[%s13525_s0 + $0x18] sm:$0xff] }
 0x7ac   :  { %v4640_v31 = vpop.f32.mrf.mxu1  ;;  %v4856_v62 = vpop.f32.mrf.mxu3 }
 0x7ad   :  { %5144 = vmatmul.bf16.gmra.mxu0 %v14412_v7  ;;  %v4641_v25 = vadd.f32 %v4640_v31, %v4472_v30  ;;  %v11249_v40 = vadd.f32 %v4856_v62, %v10608_v47  ;;  %v11276_v37 = vpop.f32.mrf.mxu0 }
 0x7af   :  { %v4809_v12 = vpop.f32.mrf.mxu2 }
 0x7b4   :  { %6968 = vmatmul.msk.bf16.gmra.mxu2 %vm1349_vm7, %v7144_v19  ;;  %v4643_v52 = vpop.f32.mrf.mxu1  ;;  %v4858_v55 = vpop.f32.mrf.mxu3 }
 0x7b5   :  { %v4644_v7 = vadd.f32 %v4643_v52, %v4475_v23  ;;  %v11260_v63 = vadd.f32 %v4858_v55, %v14486_v9  ;;  %v14490_v23 = vld [vmem:[#allocation76_spill] sm:$0xff]  ;;  %v11274_v55 = vadd.f32 %v4809_v12, %v4641_v25  ;;  %v4480_v9 = vadd.f32 %v14492_v34, %v11102_v10  ;;  %v14493_v25 = vld [vmem:[#allocation131_spill] sm:$0xff] }
 0x7b6   :  { %v14496_v10 = vld [vmem:[#allocation79_spill] sm:$0xff] }
 0x7b7   :  { %v4812_v47 = vpop.f32.mrf.mxu2  ;;  %5198 = vmatmul.bf16.gmra.mxu1 %v14487_v58  ;;  %14491 = vst [vmem:[#allocation109_spill] sm:$0xff] %v11274_v55 }
 0x7b8   :  { %v11288_v12 = vadd.f32 %v4812_v47, %v4644_v7  ;;  %v14499_v7 = vld [vmem:[#allocation119_spill] sm:$0xff] }
 0x7b9   :  { %4900 = vmatmul.bf16.gmra.mxu3 %v14488_v0  ;;  %v4485_v47 = vadd.f32 %v14499_v7, %v11126_v48  ;;  %v14502_v48 = vld [vmem:[#allocation87_spill] sm:$0xff] }
 0x7ba   :  { %14494 = vst [vmem:[#allocation20_spill] sm:$0xff] %v11288_v12 }
 0x7bc   :  { %v4645_v30 = vpop.f32.mrf.mxu1  ;;  %v4861_v62 = vpop.f32.mrf.mxu3 }
 0x7bd   :  { %5149 = vmatmul.bf16.gmra.mxu0 %v14423_v4  ;;  %v4646_v31 = vadd.f32 %v4645_v30, %v4477_v56  ;;  %v11272_v19 = vadd.f32 %v4861_v62, %v14490_v23  ;;  %v14495_v30 = vld [vmem:[#allocation82_spill] sm:$0xff]  ;;  %v4482_v62 = vadd.f32 %v14496_v10, %v11113_v14  ;;  %v11293_v23 = vpop.f32.mrf.mxu0 }
 0x7be   :  { %v7146_v14 = vld [vmem:[%s13525_s0 + $0x20] sm:$0xff] }
 0x7bf   :  { %v4814_v52 = vpop.f32.mrf.mxu2 }
 0x7c0   :  { %v11299_v55 = vadd.f32 %v4814_v52, %v4646_v31  ;;  %v14500_v31 = vld [vmem:[#allocation137_spill] sm:$0xff] }
 0x7c2   :  { %14498 = vst [vmem:[#allocation22_spill] sm:$0xff] %v11299_v55 }
 0x7c4   :  { %6969 = vmatmul.msk.bf16.gmra.mxu2 %vm1349_vm7, %v7145_v54  ;;  %v4648_v4 = vpop.f32.mrf.mxu1  ;;  %v4863_v0 = vpop.f32.mrf.mxu3 }
 0x7c5   :  { %v4649_v58 = vadd.f32 %v4648_v4, %v4480_v9  ;;  %v11285_v21 = vadd.f32 %v4863_v0, %v10657_v24  ;;  %v14497_v4 = vld [vmem:[#allocation81_spill] sm:$0xff]  ;;  %v11307_v10 = vpop.f32.mrf.mxu0 }
 0x7c7   :  { %v4817_v56 = vpop.f32.mrf.mxu2  ;;  %5203 = vmatmul.bf16.gmra.mxu1 %v14493_v25 }
 0x7c8   :  { %v11313_v52 = vadd.f32 %v4817_v56, %v4649_v58  ;;  %v14506_v58 = vld [vmem:[#allocation122_spill] sm:$0xff] }
 0x7c9   :  { %4905 = vmatmul.bf16.gmra.mxu3 %v14495_v30  ;;  %v4490_v56 = vadd.f32 %v14506_v58, %v11148_v57  ;;  %v14509_v57 = vld [vmem:[#allocation92_spill] sm:$0xff] }
 0x7ca   :  { %14501 = vst [vmem:[#allocation162_spill] sm:$0xff] %v11313_v52 }
 0x7cc   :  { %v4650_v34 = vpop.f32.mrf.mxu1  ;;  %v4866_v54 = vpop.f32.mrf.mxu3 }
 0x7cd   :  { %5154 = vmatmul.bf16.gmra.mxu0 %v14434_v32  ;;  %v4651_v9 = vadd.f32 %v4650_v34, %v4482_v62  ;;  %v11297_v24 = vadd.f32 %v4866_v54, %v14497_v4  ;;  %v14503_v54 = vld [vmem:[#allocation46_spill] sm:$0xff]  ;;  %v11324_v12 = vpop.f32.mrf.mxu0 }
 0x7ce   :  { %v4487_v4 = vadd.f32 %v14503_v54, %v11135_v49  ;;  %v7147_v49 = vld [vmem:[%s13525_s0 + $0x28] sm:$0xff] }
 0x7cf   :  { %v4819_v0 = vpop.f32.mrf.mxu2 }
 0x7d4   :  { %6970 = vmatmul.msk.bf16.gmra.mxu2 %vm1349_vm7, %v7146_v14  ;;  %v4653_v25 = vpop.f32.mrf.mxu1  ;;  %v4868_v32 = vpop.f32.mrf.mxu3 }
 0x7d5   :  { %v4654_v30 = vadd.f32 %v4653_v25, %v4485_v47  ;;  %v11310_v62 = vadd.f32 %v4868_v32, %v10684_v22  ;;  %v14504_v25 = vld [vmem:[#allocation84_spill] sm:$0xff]  ;;  %v11322_v32 = vadd.f32 %v4819_v0, %v4651_v9 }
 0x7d6   :  { %v14507_v9 = vld [vmem:[#allocation144_spill] sm:$0xff] }
 0x7d7   :  { %v4822_v34 = vpop.f32.mrf.mxu2  ;;  %5208 = vmatmul.bf16.gmra.mxu1 %v14500_v31  ;;  %14505 = vst [vmem:[#allocation73_spill] sm:$0xff] %v11322_v32 }
 0x7d8   :  { %v11336_v0 = vadd.f32 %v4822_v34, %v4654_v30  ;;  %v14513_v30 = vld [vmem:[#allocation89_spill] sm:$0xff] }
 0x7d9   :  { %4910 = vmatmul.bf16.gmra.mxu3 %v14502_v48  ;;  %v4495_v34 = vadd.f32 %v14513_v30, %v11172_v51  ;;  %v14517_v51 = vld [vmem:[#allocation97_spill] sm:$0xff] }
 0x7da   :  { %14508 = vst [vmem:[#allocation112_spill] sm:$0xff] %v11336_v0 }
 0x7dc   :  { %v4655_v7 = vpop.f32.mrf.mxu1  ;;  %v4871_v14 = vpop.f32.mrf.mxu3 }
 0x7dd   :  { %5159 = vmatmul.bf16.gmra.mxu0 %v14444_v5  ;;  %v4656_v47 = vadd.f32 %v4655_v7, %v4487_v4  ;;  %v11320_v55 = vadd.f32 %v4871_v14, %v14504_v25  ;;  %v11338_v7 = vpop.f32.mrf.mxu0  ;;  %v14510_v14 = vld [vmem:[#allocation9_spill] sm:$0xff] }
 0x7de   :  { %v4492_v25 = vadd.f32 %v14510_v14, %v11159_v43  ;;  %v7148_v43 = vld [vmem:[%s13525_s0 + $0x30] sm:$0xff] }
 0x7df   :  { %v4824_v22 = vpop.f32.mrf.mxu2 }
 0x7e0   :  { %v11347_v32 = vadd.f32 %v4824_v22, %v4656_v47  ;;  %v14515_v47 = vld [vmem:[#allocation152_spill] sm:$0xff] }
 0x7e2   :  { %14512 = vst [vmem:[#allocation163_spill] sm:$0xff] %v11347_v32 }
 0x7e4   :  { %6971 = vmatmul.msk.bf16.gmra.mxu2 %vm1349_vm7, %v7147_v49  ;;  %v4658_v5 = vpop.f32.mrf.mxu1  ;;  %v4873_v48 = vpop.f32.mrf.mxu3 }
 0x7e5   :  { %v4659_v31 = vadd.f32 %v4658_v5, %v4490_v56  ;;  %v11333_v54 = vadd.f32 %v4873_v48, %v10711_v1  ;;  %v14511_v5 = vld [vmem:[#allocation47_spill] sm:$0xff] }
 0x7e7   :  { %v4827_v4 = vpop.f32.mrf.mxu2  ;;  %5213 = vmatmul.bf16.gmra.mxu1 %v14507_v9  ;;  %v11351_v9 = vpop.f32.mrf.mxu0 }
 0x7e8   :  { %v11361_v22 = vadd.f32 %v4827_v4, %v4659_v31  ;;  %v14521_v31 = vld [vmem:[#allocation94_spill] sm:$0xff] }
 0x7e9   :  { %4915 = vmatmul.bf16.gmra.mxu3 %v14509_v57  ;;  %v4500_v4 = vadd.f32 %v14521_v31, %v11194_v38  ;;  %v14525_v38 = vld [vmem:[#allocation102_spill] sm:$0xff] }
 0x7ea   :  { %14516 = vst [vmem:[#allocation75_spill] sm:$0xff] %v11361_v22 }
 0x7ec   :  { %v4660_v58 = vpop.f32.mrf.mxu1  ;;  %v4876_v49 = vpop.f32.mrf.mxu3 }
 0x7ed   :  { %5164 = vmatmul.bf16.gmra.mxu0 %v14455_v42  ;;  %v4661_v56 = vadd.f32 %v4660_v58, %v4492_v25  ;;  %v11345_v1 = vadd.f32 %v4876_v49, %v14511_v5  ;;  %v14514_v25 = vld [vmem:[#allocation91_spill] sm:$0xff]  ;;  %v14518_v5 = vld [vmem:[#allocation10_spill] sm:$0xff] }
 0x7ee   :  { %v4497_v30 = vadd.f32 %v14518_v5, %v11183_v16  ;;  %v7149_v16 = vld [vmem:[%s13525_s0 + $0x38] sm:$0xff] }
 0x7ef   :  { %v4829_v48 = vpop.f32.mrf.mxu2 }
 0x7f0   :  { %v11372_v52 = vadd.f32 %v4829_v48, %v4661_v56 }
 0x7f2   :  { %14520 = vst [vmem:[#allocation114_spill] sm:$0xff] %v11372_v52 }
 0x7f4   :  { %6972 = vmatmul.msk.bf16.gmra.mxu2 %vm1349_vm7, %v7148_v43  ;;  %v4663_v42 = vpop.f32.mrf.mxu1  ;;  %v4878_v14 = vpop.f32.mrf.mxu3 }
 0x7f5   :  { %v4664_v57 = vadd.f32 %v4663_v42, %v4495_v34  ;;  %v11358_v58 = vadd.f32 %v4878_v14, %v14514_v25  ;;  %v11367_v34 = vpop.f32.mrf.mxu0  ;;  %v14519_v42 = vld [vmem:[#allocation48_spill] sm:$0xff] }
 0x7f7   :  { %v4832_v49 = vpop.f32.mrf.mxu2  ;;  %5218 = vmatmul.bf16.gmra.mxu1 %v14515_v47 }
 0x7f8   :  { %v11384_v56 = vadd.f32 %v4832_v49, %v4664_v57  ;;  %v14529_v49 = vld [vmem:[#allocation49_spill] sm:$0xff] }
 0x7f9   :  { %4920 = vmatmul.bf16.gmra.mxu3 %v14517_v51  ;;  %v14522_v51 = vld [vmem:[#allocation16_spill] sm:$0xff] }
 0x7fa   :  { %14524 = vst [vmem:[#allocation34_spill] sm:$0xff] %v11384_v56 }
 0x7fc   :  { %v4665_v32 = vpop.f32.mrf.mxu1  ;;  %v4881_v0 = vpop.f32.mrf.mxu3 }
 0x7fd   :  { %5169 = vmatmul.bf16.gmra.mxu0 %v14465_v11  ;;  %v4666_v43 = vadd.f32 %v4665_v32, %v4497_v30  ;;  %v11370_v14 = vadd.f32 %v4881_v0, %v14519_v42  ;;  %v14523_v30 = vld [vmem:[#allocation35_spill] sm:$0xff]  ;;  %v11386_v48 = vpop.f32.mrf.mxu0  ;;  %v14526_v42 = vld [vmem:[#allocation50_spill] sm:$0xff] }
 0x7fe   :  { %v4502_v31 = vadd.f32 %v14526_v42, %v11210_v13  ;;  %v7150_v13 = vld [vmem:[%s13525_s0 + $0x40] sm:$0xff] }
 0x7ff   :  { %v4834_v25 = vpop.f32.mrf.mxu2 }
 0x800   :  { %v11395_v22 = vadd.f32 %v4834_v25, %v4666_v43  ;;  %v14530_v43 = vld [vmem:[#allocation36_spill] sm:$0xff] }
 0x802   :  { %14528 = vst [vmem:[#allocation5_spill] sm:$0xff] %v11395_v22 }
 0x804   :  { %6973 = vmatmul.msk.bf16.gmra.mxu2 %vm1349_vm7, %v7149_v16  ;;  %v4668_v11 = vpop.f32.mrf.mxu1  ;;  %v4883_v47 = vpop.f32.mrf.mxu3 }
 0x805   :  { %v4669_v32 = vadd.f32 %v4668_v11, %v4500_v4  ;;  %v11381_v5 = vadd.f32 %v4883_v47, %v14522_v51  ;;  %v14527_v11 = vld [vmem:[#allocation142_spill] sm:$0xff]  ;;  %v11397_v57 = vpop.f32.mrf.mxu0 }
 0x807   :  { %v4837_v0 = vpop.f32.mrf.mxu2  ;;  %5223 = vmatmul.bf16.gmra.mxu1 %v14523_v30  ;;  %v4505_v30 = vadd.f32 %v14529_v49, %v11223_v8  ;;  %v14533_v8 = vld [vmem:[#allocation147_spill] sm:$0xff] }
 0x808   :  { %v11409_v25 = vadd.f32 %v4837_v0, %v4669_v32  ;;  %v14536_v32 = vld [vmem:[#allocation51_spill] sm:$0xff] }
 0x809   :  { %4925 = vmatmul.bf16.gmra.mxu3 %v14525_v38  ;;  %v5026_v0 = vadd.f32 %v14536_v32, %v11249_v40  ;;  %v14541_v40 = vld [vmem:[#allocation111_spill] sm:$0xff] }
 0x80a   :  { %14531 = vst [vmem:[#allocation164_spill] sm:$0xff] %v11409_v25 }
 0x80c   :  { %v4670_v52 = vpop.f32.mrf.mxu1  ;;  %v4886_v16 = vpop.f32.mrf.mxu3 }
 0x80d   :  { %5174 = vmatmul.bf16.gmra.mxu0 %v14477_v60  ;;  %v4671_v4 = vadd.f32 %v4670_v52, %v4502_v31  ;;  %v11393_v47 = vadd.f32 %v4886_v16, %v14527_v11  ;;  %v14532_v16 = vld [vmem:[#allocation15_spill] sm:$0xff]  ;;  %v4507_v11 = vadd.f32 %v14533_v8, %v11237_v6  ;;  %v11414_v49 = vpop.f32.mrf.mxu0 }
 0x80e   :  { %v7151_v6 = vld [vmem:[%s13525_s0 + $0x48] sm:$0xff] }
 0x80f   :  { %v4839_v51 = vpop.f32.mrf.mxu2 }
 0x810   :  { %v11420_v56 = vadd.f32 %v4839_v51, %v4671_v4  ;;  %v14539_v4 = vld [vmem:[#allocation38_spill] sm:$0xff] }
 0x812   :  { %14535 = vst [vmem:[#allocation78_spill] sm:$0xff] %v11420_v56 }
 0x814   :  { %6974 = vmatmul.msk.bf16.gmra.mxu2 %vm1349_vm7, %v7150_v13  ;;  %v4673_v60 = vpop.f32.mrf.mxu1  ;;  %v4888_v38 = vpop.f32.mrf.mxu3 }
 0x815   :  { %v4674_v52 = vadd.f32 %v4673_v60, %v4505_v30  ;;  %v11406_v42 = vadd.f32 %v4888_v38, %v10803_v44  ;;  %v14534_v60 = vld [vmem:[#allocation18_spill] sm:$0xff] }
 0x817   :  { %v4842_v31 = vpop.f32.mrf.mxu2  ;;  %5228 = vmatmul.bf16.gmra.mxu1 %v14530_v43 }
 0x818   :  { %v11436_v51 = vadd.f32 %v4842_v31, %v4674_v52  ;;  %v7152_v31 = vld [vmem:[%s13525_s0 + $0x50] sm:$0xff] }
 0x819   :  { %4930 = vmatmul.bf16.gmra.mxu3 %v14532_v16 }
 0x81a   :  { %14540 = vst [vmem:[#allocation80_spill] sm:$0xff] %v11436_v51  ;;  %v14555_v51 = vld [vmem:[#allocation33_spill] sm:$0xff] }
 0x81c   :  { %v4675_v22 = vpop.f32.mrf.mxu1  ;;  %v4891_v13 = vpop.f32.mrf.mxu3 }
 0x81d   :  { %5179 = vmatmul.bf16.gmra.mxu0 %v14398_v41  ;;  %v4676_v30 = vadd.f32 %v4675_v22, %v4507_v11  ;;  %v11418_v44 = vadd.f32 %v4891_v13, %v14534_v60  ;;  %v14542_v13 = vld [vmem:[#allocation150_spill] sm:$0xff] }
 0x81e   :  { %v5028_v60 = vadd.f32 %v14542_v13, %v11260_v63 }
 0x81f   :  { %v4844_v38 = vpop.f32.mrf.mxu2 }
 0x824   :  { %6975 = vmatmul.msk.bf16.gmra.mxu2 %vm1349_vm7, %v7151_v6  ;;  %v5194_v43 = vpop.f32.mrf.mxu1  ;;  %v4893_v41 = vpop.f32.mrf.mxu3 }
 0x825   :  { %v11428_v8 = vadd.f32 %v5194_v43, %v5026_v0  ;;  %v11431_v22 = vadd.f32 %v4893_v41, %v10830_v45  ;;  %v14544_v43 = vld [vmem:[#allocation106_spill] sm:$0xff]  ;;  %v11448_v41 = vadd.f32 %v4844_v38, %v4676_v30  ;;  %v14551_v30 = vld [vmem:[#allocation39_spill] sm:$0xff]  ;;  %v14552_v38 = vld [vmem:[#allocation117_spill] sm:$0xff] }
 0x827   :  { %14537 = vst [vmem:[#allocation118_spill] sm:$0xff] %v11428_v8  ;;  %v11433_v11 = vpop.f32.mrf.mxu2  ;;  %5233 = vmatmul.bf16.gmra.mxu1 %v14539_v4  ;;  %v14547_v4 = vld [vmem:[#allocation154_spill] sm:$0xff]  ;;  %v14573_v8 = vld [vmem:[#allocation161_spill] sm:$0xff] }
 0x828   :  { %14538 = vst [vmem:[#allocation166_spill] sm:$0xff] %v11433_v11  ;;  %v5031_v52 = vadd.f32 %v14547_v4, %v11272_v19  ;;  %v14553_v19 = vld [vmem:[#allocation108_spill] sm:$0xff] }
 0x829   :  { %4935 = vmatmul.bf16.gmra.mxu3 %v14541_v40  ;;  %14546 = vst [vmem:[#allocation62_spill] sm:$0xff] %v11448_v41 }
 0x82c   :  { %v5196_v32 = vpop.f32.mrf.mxu1  ;;  %v4896_v0 = vpop.f32.mrf.mxu3 }
 0x82d   :  { %v11441_v6 = vadd.f32 %v5196_v32, %v5028_v60  ;;  %v11444_v56 = vadd.f32 %v4896_v0, %v14544_v43  ;;  %v14549_v60 = vld [vmem:[#allocation52_spill] sm:$0xff]  ;;  %v5033_v43 = vadd.f32 %v14553_v19, %v11285_v21 }
 0x82f   :  { %14543 = vst [vmem:[#allocation121_spill] sm:$0xff] %v11441_v6  ;;  %v11446_v45 = vpop.f32.mrf.mxu2  ;;  %v14582_v6 = vld [vmem:[#allocation28_spill] sm:$0xff] }
 0x830   :  { %14545 = vst [vmem:[#allocation27_spill] sm:$0xff] %v11446_v45 }
 0x834   :  { %6976 = vmatmul.msk.bf16.gmra.mxu2 %vm1349_vm7, %v7152_v31  ;;  %v5199_v63 = vpop.f32.mrf.mxu1  ;;  %v4898_v13 = vpop.f32.mrf.mxu3 }
 0x835   :  { %v11456_v40 = vadd.f32 %v5199_v63, %v5031_v52  ;;  %v11459_v32 = vadd.f32 %v4898_v13, %v14549_v60  ;;  %v14557_v13 = vld [vmem:[#allocation110_spill] sm:$0xff] }
 0x836   :  { %v5036_v60 = vadd.f32 %v14557_v13, %v11297_v24  ;;  %v14562_v24 = vld [vmem:[#allocation19_spill] sm:$0xff] }
 0x837   :  { %14548 = vst [vmem:[#allocation167_spill] sm:$0xff] %v11456_v40  ;;  %v11461_v0 = vpop.f32.mrf.mxu2  ;;  %5238 = vmatmul.bf16.gmra.mxu1 %v14551_v30  ;;  %v7153_v30 = vld [vmem:[%s13525_s0 + $0x58] sm:$0xff]  ;;  %v5038_v13 = vadd.f32 %v14562_v24, %v11310_v62 }
 0x838   :  { %14550 = vst [vmem:[#allocation83_spill] sm:$0xff] %v11461_v0  ;;  %v14564_v40 = vld [vmem:[#allocation53_spill] sm:$0xff] }
 0x839   :  { %4940 = vmatmul.bf16.gmra.mxu3 %v14552_v38 }
 0x83c   :  { %v5201_v4 = vpop.f32.mrf.mxu1  ;;  %v4901_v31 = vpop.f32.mrf.mxu3 }
 0x83d   :  { %v11467_v41 = vadd.f32 %v5201_v4, %v5033_v43  ;;  %v11470_v52 = vadd.f32 %v4901_v31, %v14555_v51  ;;  %v14560_v4 = vld [vmem:[#allocation40_spill] sm:$0xff]  ;;  %v14561_v31 = vld [vmem:[#allocation125_spill] sm:$0xff] }
 0x83f   :  { %14554 = vst [vmem:[#allocation126_spill] sm:$0xff] %v11467_v41  ;;  %v11472_v63 = vpop.f32.mrf.mxu2 }
 0x840   :  { %14556 = vst [vmem:[#allocation169_spill] sm:$0xff] %v11472_v63 }
 0x844   :  { %6977 = vmatmul.msk.bf16.gmra.mxu2 %vm1349_vm7, %v7153_v30  ;;  %v5204_v38 = vpop.f32.mrf.mxu1  ;;  %v4903_v19 = vpop.f32.mrf.mxu3 }
 0x845   :  { %v11480_v21 = vadd.f32 %v5204_v38, %v5036_v60  ;;  %v11483_v43 = vadd.f32 %v4903_v19, %v10890_v28  ;;  %v14566_v28 = vld [vmem:[#allocation113_spill] sm:$0xff] }
 0x846   :  { %v5041_v19 = vadd.f32 %v14566_v28, %v11320_v55  ;;  %v14571_v55 = vld [vmem:[#allocation115_spill] sm:$0xff] }
 0x847   :  { %14558 = vst [vmem:[#allocation85_spill] sm:$0xff] %v11480_v21  ;;  %v11485_v51 = vpop.f32.mrf.mxu2  ;;  %5243 = vmatmul.bf16.gmra.mxu1 %v14560_v4  ;;  %v7154_v4 = vld [vmem:[%s13525_s0 + $0x60] sm:$0xff]  ;;  %v5043_v28 = vadd.f32 %v14571_v55, %v11333_v54 }
 0x848   :  { %14559 = vst [vmem:[#allocation128_spill] sm:$0xff] %v11485_v51 }
 0x849   :  { %4945 = vmatmul.bf16.gmra.mxu3 %v14561_v31 }
 0x84c   :  { %v5206_v25 = vpop.f32.mrf.mxu1  ;;  %v4906_v30 = vpop.f32.mrf.mxu3 }
 0x84d   :  { %v11491_v41 = vadd.f32 %v5206_v25, %v5038_v13  ;;  %v11494_v60 = vadd.f32 %v4906_v30, %v14564_v40  ;;  %v14569_v13 = vld [vmem:[#allocation41_spill] sm:$0xff]  ;;  %v14570_v30 = vld [vmem:[#allocation132_spill] sm:$0xff] }
 0x84f   :  { %14563 = vst [vmem:[#allocation29_spill] sm:$0xff] %v11491_v41  ;;  %v11496_v38 = vpop.f32.mrf.mxu2 }
 0x850   :  { %14565 = vst [vmem:[#allocation64_spill] sm:$0xff] %v11496_v38 }
 0x854   :  { %6978 = vmatmul.msk.bf16.gmra.mxu2 %vm1349_vm7, %v7154_v4  ;;  %v5209_v31 = vpop.f32.mrf.mxu1  ;;  %v4908_v25 = vpop.f32.mrf.mxu3 }
 0x855   :  { %v11504_v62 = vadd.f32 %v5209_v31, %v5041_v19  ;;  %v11507_v24 = vadd.f32 %v4908_v25, %v10917_v50  ;;  %v14575_v50 = vld [vmem:[#allocation11_spill] sm:$0xff] }
 0x856   :  { %v5046_v25 = vadd.f32 %v14575_v50, %v11345_v1  ;;  %v14580_v1 = vld [vmem:[#allocation120_spill] sm:$0xff] }
 0x857   :  { %14567 = vst [vmem:[#allocation170_spill] sm:$0xff] %v11504_v62  ;;  %v11509_v40 = vpop.f32.mrf.mxu2  ;;  %5248 = vmatmul.bf16.gmra.mxu1 %v14569_v13  ;;  %v7155_v13 = vld [vmem:[%s13525_s0 + $0x68] sm:$0xff]  ;;  %v5048_v50 = vadd.f32 %v14580_v1, %v11358_v58 }
 0x858   :  { %14568 = vst [vmem:[#allocation88_spill] sm:$0xff] %v11509_v40  ;;  %v14586_v1 = vld [vmem:[#allocation55_spill] sm:$0xff] }
 0x859   :  { %4950 = vmatmul.bf16.gmra.mxu3 %v14570_v30 }
 0x85c   :  { %v5211_v41 = vpop.f32.mrf.mxu1  ;;  %v4911_v4 = vpop.f32.mrf.mxu3 }
 0x85d   :  { %v11515_v21 = vadd.f32 %v5211_v41, %v5043_v28  ;;  %v11518_v19 = vadd.f32 %v4911_v4, %v14573_v8  ;;  %v14578_v28 = vld [vmem:[#allocation42_spill] sm:$0xff] }
 0x85e   :  { %v14579_v4 = vld [vmem:[#allocation138_spill] sm:$0xff] }
 0x85f   :  { %14572 = vst [vmem:[#allocation133_spill] sm:$0xff] %v11515_v21  ;;  %v11520_v31 = vpop.f32.mrf.mxu2 }
 0x860   :  { %14574 = vst [vmem:[#allocation171_spill] sm:$0xff] %v11520_v31 }
 0x864   :  { %6979 = vmatmul.msk.bf16.gmra.mxu2 %vm1349_vm7, %v7155_v13  ;;  %v5214_v30 = vpop.f32.mrf.mxu1  ;;  %v4913_v41 = vpop.f32.mrf.mxu3 }
 0x865   :  { %v11528_v54 = vadd.f32 %v5214_v30, %v5046_v25  ;;  %v11531_v55 = vadd.f32 %v4913_v41, %v10944_v3  ;;  %v14584_v3 = vld [vmem:[#allocation21_spill] sm:$0xff] }
 0x866   :  { %v5051_v41 = vadd.f32 %v14584_v3, %v11370_v14  ;;  %v14590_v14 = vld [vmem:[#allocation127_spill] sm:$0xff] }
 0x867   :  { %14576 = vst [vmem:[#allocation90_spill] sm:$0xff] %v11528_v54  ;;  %v11533_v8 = vpop.f32.mrf.mxu2  ;;  %5253 = vmatmul.bf16.gmra.mxu1 %v14578_v28  ;;  %v7156_v28 = vld [vmem:[%s13525_s0 + $0x70] sm:$0xff]  ;;  %v5053_v3 = vadd.f32 %v14590_v14, %v11381_v5 }
 0x868   :  { %14577 = vst [vmem:[#allocation135_spill] sm:$0xff] %v11533_v8  ;;  %v14592_v8 = vld [vmem:[#allocation165_spill] sm:$0xff]  ;;  %v14596_v14 = vld [vmem:[#allocation56_spill] sm:$0xff] }
 0x869   :  { %4955 = vmatmul.bf16.gmra.mxu3 %v14579_v4 }
 0x86c   :  { %v5216_v21 = vpop.f32.mrf.mxu1  ;;  %v4916_v13 = vpop.f32.mrf.mxu3 }
 0x86d   :  { %v11539_v62 = vadd.f32 %v5216_v21, %v5048_v50  ;;  %v11542_v25 = vadd.f32 %v4916_v13, %v14582_v6  ;;  %v14588_v13 = vld [vmem:[#allocation43_spill] sm:$0xff] }
 0x86f   :  { %14581 = vst [vmem:[#allocation31_spill] sm:$0xff] %v11539_v62  ;;  %v11544_v30 = vpop.f32.mrf.mxu2  ;;  %v14589_v62 = vld [vmem:[#allocation145_spill] sm:$0xff] }
 0x870   :  { %14583 = vst [vmem:[#allocation66_spill] sm:$0xff] %v11544_v30 }
 0x874   :  { %6980 = vmatmul.msk.bf16.gmra.mxu2 %vm1349_vm7, %v7156_v28  ;;  %v5219_v4 = vpop.f32.mrf.mxu1  ;;  %v4918_v21 = vpop.f32.mrf.mxu3 }
 0x875   :  { %v11552_v58 = vadd.f32 %v5219_v4, %v5051_v41  ;;  %v11555_v50 = vadd.f32 %v4918_v21, %v14586_v1  ;;  %v14594_v21 = vld [vmem:[#allocation12_spill] sm:$0xff] }
 0x876   :  { %v5056_v1 = vadd.f32 %v14594_v21, %v11393_v47  ;;  %v14600_v47 = vld [vmem:[#allocation168_spill] sm:$0xff] }
 0x877   :  { %14585 = vst [vmem:[#allocation172_spill] sm:$0xff] %v11552_v58  ;;  %v11557_v6 = vpop.f32.mrf.mxu2  ;;  %5258 = vmatmul.bf16.gmra.mxu1 %v14588_v13  ;;  %v7157_v13 = vld [vmem:[%s13525_s0 + $0x78] sm:$0xff]  ;;  %v5058_v21 = vadd.f32 %v14600_v47, %v11406_v42 }
 0x878   :  { %14587 = vst [vmem:[#allocation93_spill] sm:$0xff] %v11557_v6  ;;  %v14602_v6 = vld [vmem:[#allocation134_spill] sm:$0xff]  ;;  %v14606_v47 = vld [vmem:[#allocation13_spill] sm:$0xff] }
 0x879   :  { %4960 = vmatmul.bf16.gmra.mxu3 %v14589_v62 }
 0x87c   :  { %v5221_v54 = vpop.f32.mrf.mxu1  ;;  %v4921_v28 = vpop.f32.mrf.mxu3 }
 0x87d   :  { %v11563_v30 = vadd.f32 %v5221_v54, %v5053_v3  ;;  %v11566_v41 = vadd.f32 %v4921_v28, %v14592_v8  ;;  %v14598_v28 = vld [vmem:[#allocation99_spill] sm:$0xff] }
 0x87f   :  { %14591 = vst [vmem:[#allocation139_spill] sm:$0xff] %v11563_v30  ;;  %v11568_v4 = vpop.f32.mrf.mxu2  ;;  %v14599_v30 = vld [vmem:[#allocation23_spill] sm:$0xff] }
 0x880   :  { %14593 = vst [vmem:[#allocation174_spill] sm:$0xff] %v11568_v4 }
 0x884   :  { %6981 = vmatmul.msk.bf16.gmra.mxu2 %vm1349_vm7, %v7157_v13  ;;  %v5224_v62 = vpop.f32.mrf.mxu1  ;;  %v4923_v54 = vpop.f32.mrf.mxu3 }
 0x885   :  { %v11576_v5 = vadd.f32 %v5224_v62, %v5056_v1  ;;  %v11579_v3 = vadd.f32 %v4923_v54, %v14596_v14  ;;  %v14604_v54 = vld [vmem:[#allocation57_spill] sm:$0xff] }
 0x886   :  { %v5061_v14 = vadd.f32 %v14604_v54, %v11418_v44  ;;  %v14610_v44 = vld [vmem:[#allocation143_spill] sm:$0xff] }
 0x887   :  { %14595 = vst [vmem:[#allocation95_spill] sm:$0xff] %v11576_v5  ;;  %v11581_v8 = vpop.f32.mrf.mxu2  ;;  %5263 = vmatmul.bf16.gmra.mxu1 %v14598_v28  ;;  %v7158_v28 = vld [vmem:[%s13525_s0 + $0x80] sm:$0xff]  ;;  %v5063_v54 = vadd.f32 %v14610_v44, %v11431_v22 }
 0x888   :  { %14597 = vst [vmem:[#allocation141_spill] sm:$0xff] %v11581_v8  ;;  %v14612_v8 = vld [vmem:[#allocation140_spill] sm:$0xff] }
 0x889   :  { %4965 = vmatmul.bf16.gmra.mxu3 %v14599_v30 }
 0x88c   :  { %v5226_v58 = vpop.f32.mrf.mxu1  ;;  %v4926_v13 = vpop.f32.mrf.mxu3 }
 0x88d   :  { %v11587_v4 = vadd.f32 %v5226_v58, %v5058_v21  ;;  %v11590_v1 = vadd.f32 %v4926_v13, %v14602_v6  ;;  %v14608_v13 = vld [vmem:[#allocation3_spill] sm:$0xff] }
 0x88f   :  { %14601 = vst [vmem:[#allocation32_spill] sm:$0xff] %v11587_v4  ;;  %v11592_v62 = vpop.f32.mrf.mxu2  ;;  %v14609_v4 = vld [vmem:[#allocation25_spill] sm:$0xff] }
 0x890   :  { %14603 = vst [vmem:[#allocation68_spill] sm:$0xff] %v11592_v62 }
 0x894   :  { %6982 = vmatmul.msk.bf16.gmra.mxu2 %vm1349_vm7, %v7158_v28  ;;  %v5229_v30 = vpop.f32.mrf.mxu1  ;;  %v4928_v58 = vpop.f32.mrf.mxu3 }
 0x895   :  { %v11600_v42 = vadd.f32 %v5229_v30, %v5061_v14  ;;  %v11603_v21 = vadd.f32 %v4928_v58, %v14606_v47  ;;  %v5066_v58 = vadd.f32 %v11062_v35, %v11444_v56  ;;  %v7159_v47 = vld [vmem:[%s13525_s0 + $0x98] sm:$0xff]  ;;  %v14618_v35 = vld [vmem:[#allocation148_spill] sm:$0xff] }
 0x896   :  { %v5068_v56 = vadd.f32 %v14618_v35, %v11459_v32  ;;  %v14624_v35 = vld [vmem:[#allocation58_spill] sm:$0xff] }
 0x897   :  { %14605 = vst [vmem:[#allocation176_spill] sm:$0xff] %v11600_v42  ;;  %v11605_v6 = vpop.f32.mrf.mxu2  ;;  %5268 = vmatmul.bf16.gmra.mxu1 %v14608_v13 }
 0x898   :  { %14607 = vst [vmem:[#allocation98_spill] sm:$0xff] %v11605_v6 }
 0x899   :  { %4970 = vmatmul.bf16.gmra.mxu3 %v14609_v4 }
 0x89c   :  { %v5231_v5 = vpop.f32.mrf.mxu1  ;;  %v4931_v28 = vpop.f32.mrf.mxu3 }
 0x89d   :  { %v11611_v62 = vadd.f32 %v5231_v5, %v5063_v54  ;;  %v11614_v14 = vadd.f32 %v4931_v28, %v14612_v8  ;;  %v14616_v54 = vld [vmem:[#allocation45_spill] sm:$0xff]  ;;  %v14617_v28 = vld [vmem:[#allocation24_spill] sm:$0xff] }
 0x89f   :  { %14611 = vst [vmem:[#allocation146_spill] sm:$0xff] %v11611_v62  ;;  %v11616_v30 = vpop.f32.mrf.mxu2 }
 0x8a0   :  { %14613 = vst [vmem:[#allocation60_spill] sm:$0xff] %v11616_v30  ;;  %v14620_v30 = vld [vmem:[#allocation14_spill] sm:$0xff] }
 0x8a4   :  { %6983 = vmatmul.msk.bf16.gmra.mxu2 %vm1349_vm7, %v7159_v47  ;;  %v5234_v4 = vpop.f32.mrf.mxu1  ;;  %v4933_v5 = vpop.f32.mrf.mxu3 }
 0x8a5   :  { %v11624_v22 = vadd.f32 %v5234_v4, %v5066_v58  ;;  %v11627_v44 = vadd.f32 %v4933_v5, %v11055_v20  ;;  %v14622_v20 = vld [vmem:[#allocation151_spill] sm:$0xff] }
 0x8a6   :  { %v5071_v5 = vadd.f32 %v14622_v20, %v11470_v52  ;;  %v5073_v52 = vadd.f32 %v11110_v61, %v11483_v43 }
 0x8a7   :  { %14614 = vst [vmem:[#allocation177_spill] sm:$0xff] %v11624_v22  ;;  %v11629_v8 = vpop.f32.mrf.mxu2  ;;  %5273 = vmatmul.bf16.gmra.mxu1 %v14616_v54  ;;  %v7160_v54 = vld [vmem:[%s13525_s0 + $0xa0] sm:$0xff] }
 0x8a8   :  { %14615 = vst [vmem:[#allocation100_spill] sm:$0xff] %v11629_v8 }
 0x8a9   :  { %4975 = vmatmul.bf16.gmra.mxu3 %v14617_v28 }
 0x8ac   :  { %v5236_v62 = vpop.f32.mrf.mxu1  ;;  %v4936_v47 = vpop.f32.mrf.mxu3 }
 0x8ad   :  { %v11635_v42 = vadd.f32 %v5236_v62, %v5068_v56  ;;  %v11638_v58 = vadd.f32 %v4936_v47, %v14620_v30  ;;  %v14626_v47 = vld [vmem:[#allocation8_spill] sm:$0xff] }
 0x8af   :  { %14619 = vst [vmem:[#allocation149_spill] sm:$0xff] %v11635_v42  ;;  %v11640_v4 = vpop.f32.mrf.mxu2  ;;  %v14627_v42 = vld [vmem:[#allocation37_spill] sm:$0xff] }
 0x8b0   :  { %14621 = vst [vmem:[#allocation30_spill] sm:$0xff] %v11640_v4  ;;  %v14629_v4 = vld [vmem:[#allocation173_spill] sm:$0xff] }
 0x8b4   :  { %6984 = vmatmul.msk.bf16.gmra.mxu2 %vm1349_vm7, %v7160_v54  ;;  %v5239_v28 = vpop.f32.mrf.mxu1  ;;  %v4938_v62 = vpop.f32.mrf.mxu3 }
 0x8b5   :  { %v11648_v32 = vadd.f32 %v5239_v28, %v5071_v5  ;;  %v11651_v56 = vadd.f32 %v4938_v62, %v14624_v35  ;;  %v5076_v62 = vadd.f32 %v11124_v18, %v11494_v60  ;;  %v7161_v35 = vld [vmem:[%s13525_s0 + $0xa8] sm:$0xff]  ;;  %v5078_v18 = vadd.f32 %v11140_v2, %v11507_v24 }
 0x8b7   :  { %14623 = vst [vmem:[#allocation69_spill] sm:$0xff] %v11648_v32  ;;  %v11653_v30 = vpop.f32.mrf.mxu2  ;;  %5278 = vmatmul.bf16.gmra.mxu1 %v14626_v47  ;;  %v14631_v47 = vld [vmem:[#allocation175_spill] sm:$0xff]  ;;  %v14636_v32 = vld [vmem:[#allocation26_spill] sm:$0xff] }
 0x8b8   :  { %14625 = vst [vmem:[#allocation103_spill] sm:$0xff] %v11653_v30 }
 0x8b9   :  { %4980 = vmatmul.bf16.gmra.mxu3 %v14627_v42 }
 0x8bc   :  { %v5241_v20 = vpop.f32.mrf.mxu1  ;;  %v4941_v54 = vpop.f32.mrf.mxu3 }
 0x8bd   :  { %v11659_v22 = vadd.f32 %v5241_v20, %v5073_v52  ;;  %v11662_v5 = vadd.f32 %v4941_v54, %v14629_v4  ;;  %v14633_v20 = vld [vmem:[#allocation86_spill] sm:$0xff]  ;;  %v14634_v54 = vld [vmem:[#allocation61_spill] sm:$0xff] }
 0x8bf   :  { %14628 = vst [vmem:[#allocation153_spill] sm:$0xff] %v11659_v22  ;;  %v11664_v28 = vpop.f32.mrf.mxu2 }
 0x8c4   :  { %6985 = vmatmul.msk.bf16.gmra.mxu2 %vm1349_vm7, %v7161_v35  ;;  %v5244_v42 = vpop.f32.mrf.mxu1  ;;  %v4943_v43 = vpop.f32.mrf.mxu3 }
 0x8c5   :  { %v11672_v61 = vadd.f32 %v5244_v42, %v5076_v62  ;;  %v11675_v52 = vadd.f32 %v4943_v43, %v14631_v47  ;;  %v14638_v43 = vld [vmem:[#allocation6_spill] sm:$0xff] }
 0x8c6   :  { %v5081_v47 = vadd.f32 %v14638_v43, %v11518_v19  ;;  %v14644_v19 = vld [vmem:[#allocation159_spill] sm:$0xff] }
 0x8c7   :  { %14630 = vst [vmem:[#allocation105_spill] sm:$0xff] %v11672_v61  ;;  %v11677_v4 = vpop.f32.mrf.mxu2  ;;  %5283 = vmatmul.bf16.gmra.mxu1 %v14633_v20  ;;  %v7162_v20 = vld [vmem:[%s13525_s0 + $0xb0] sm:$0xff]  ;;  %v5083_v43 = vadd.f32 %v14644_v19, %v11531_v55 }
 0x8c8   :  { %14632 = vst [vmem:[#allocation156_spill] sm:$0xff] %v11677_v4  ;;  %v14646_v4 = vld [vmem:[#allocation155_spill] sm:$0xff] }
 0x8c9   :  { %4985 = vmatmul.bf16.gmra.mxu3 %v14634_v54 }
 0x8cc   :  { %v5246_v60 = vpop.f32.mrf.mxu1  ;;  %v4946_v35 = vpop.f32.mrf.mxu3 }
 0x8cd   :  { %v11683_v22 = vadd.f32 %v5246_v60, %v5078_v18  ;;  %v11686_v62 = vadd.f32 %v4946_v35, %v14636_v32  ;;  %v14640_v18 = vld [vmem:[#allocation59_spill] sm:$0xff]  ;;  %v14642_v35 = vld [vmem:[#allocation129_spill] sm:$0xff] }
 0x8cf   :  { %14635 = vst [vmem:[#allocation116_spill] sm:$0xff] %v11683_v22  ;;  %v11688_v42 = vpop.f32.mrf.mxu2  ;;  %v14643_v22 = vld [vmem:[#allocation63_spill] sm:$0xff] }
 0x8d0   :  { %14637 = vst [vmem:[#allocation72_spill] sm:$0xff] %v11688_v42 }
 0x8d4   :  { %6986 = vmatmul.msk.bf16.gmra.mxu2 %vm1349_vm7, %v7162_v20  ;;  %v5249_v54 = vpop.f32.mrf.mxu1  ;;  %v4948_v24 = vpop.f32.mrf.mxu3 }
 0x8d5   :  { %v11696_v2 = vadd.f32 %v5249_v54, %v5081_v47  ;;  %v11699_v60 = vadd.f32 %v4948_v24, %v14640_v18  ;;  %v5086_v24 = vadd.f32 %v11181_v33, %v11542_v25  ;;  %v7163_v18 = vld [vmem:[%s13525_s0 + $0xb8] sm:$0xff]  ;;  %v5088_v33 = vadd.f32 %v11198_v17, %v11555_v50 }
 0x8d7   :  { %14639 = vst [vmem:[#allocation44_spill] sm:$0xff] %v11696_v2  ;;  %v11701_v32 = vpop.f32.mrf.mxu2  ;;  %5288 = vmatmul.bf16.gmra.mxu1 %v14642_v35  ;;  %v14649_v35 = vld [vmem:[#allocation157_spill] sm:$0xff]  ;;  %v14654_v2 = vld [vmem:[#allocation4_spill] sm:$0xff] }
 0x8d8   :  { %14641 = vst [vmem:[#allocation124_spill] sm:$0xff] %v11701_v32 }
 0x8d9   :  { %4990 = vmatmul.bf16.gmra.mxu3 %v14643_v22 }
 0x8dc   :  { %v5251_v61 = vpop.f32.mrf.mxu1  ;;  %v4951_v20 = vpop.f32.mrf.mxu3 }
 0x8dd   :  { %v11707_v42 = vadd.f32 %v5251_v61, %v5083_v43  ;;  %v11710_v47 = vadd.f32 %v4951_v20, %v14646_v4  ;;  %v14651_v43 = vld [vmem:[#allocation96_spill] sm:$0xff]  ;;  %v14652_v20 = vld [vmem:[#allocation65_spill] sm:$0xff] }
 0x8df   :  { %14645 = vst [vmem:[#allocation77_spill] sm:$0xff] %v11707_v42  ;;  %v11712_v54 = vpop.f32.mrf.mxu2 }
 0x8e0   :  { %14647 = vst [vmem:[#allocation74_spill] sm:$0xff] %v11712_v54 }
 0x8e4   :  { %6987 = vmatmul.msk.bf16.gmra.mxu2 %vm1349_vm7, %v7163_v18  ;;  %v5254_v22 = vpop.f32.mrf.mxu1  ;;  %v4953_v61 = vpop.f32.mrf.mxu3 }
 0x8e5   :  { %v11720_v55 = vadd.f32 %v5254_v22, %v5086_v24  ;;  %v11723_v19 = vadd.f32 %v4953_v61, %v14649_v35  ;;  %v5091_v61 = vadd.f32 %v11215_v26, %v11566_v41  ;;  %v11740_v35 = vpop.f32.mrf.mxu0  ;;  %v14659_v26 = vld [vmem:[#allocation67_spill] sm:$0xff]  ;;  %v5093_v41 = vadd.f32 %v11231_v39, %v11579_v3 }
 0x8e7   :  { %14648 = vst [vmem:[#allocation76_spill] sm:$0xff] %v11720_v55  ;;  %v11725_v4 = vpop.f32.mrf.mxu2  ;;  %5293 = vmatmul.bf16.gmra.mxu1 %v14651_v43  ;;  %v7164_v43 = vld [vmem:[%s13525_s0 + $0xc0] sm:$0xff] }
 0x8e8   :  { %14650 = vst [vmem:[#allocation7_spill] sm:$0xff] %v11725_v4 }
 0x8e9   :  { %4995 = vmatmul.bf16.gmra.mxu3 %v14652_v20 }
 0x8ec   :  { %v5256_v25 = vpop.f32.mrf.mxu1  ;;  %v4956_v18 = vpop.f32.mrf.mxu3 }
 0x8ed   :  { %v11731_v42 = vadd.f32 %v5256_v25, %v5088_v33  ;;  %v11734_v24 = vadd.f32 %v4956_v18, %v14654_v2  ;;  %v14658_v25 = vld [vmem:[#allocation101_spill] sm:$0xff]  ;;  %v11759_v55 = vpop.f32.mrf.mxu0 }
 0x8ef   :  { %14653 = vst [vmem:[#allocation131_spill] sm:$0xff] %v11731_v42  ;;  %v11736_v22 = vpop.f32.mrf.mxu2 }
 0x8f0   :  { %14655 = vst [vmem:[#allocation82_spill] sm:$0xff] %v11736_v22 }
 0x8f4   :  { %6988 = vmatmul.msk.bf16.gmra.mxu2 %vm1349_vm7, %v7164_v43  ;;  %v5259_v17 = vpop.f32.mrf.mxu1  ;;  %v4958_v20 = vpop.f32.mrf.mxu3 }
 0x8f5   :  { %v11746_v50 = vadd.f32 %v5259_v17, %v5091_v61  ;;  %v11749_v2 = vadd.f32 %v4958_v20, %v11174_v46  ;;  %v14661_v61 = vld [vmem:[#allocation70_spill] sm:$0xff]  ;;  %v5096_v20 = vadd.f32 %v11246_v53, %v11590_v1  ;;  %v5098_v1 = vadd.f32 %v11265_v27, %v11603_v21 }
 0x8f6   :  { %v14667_v53 = vld [vmem:[#allocation178_spill] sm:$0xff] }
 0x8f7   :  { %14656 = vst [vmem:[#allocation79_spill] sm:$0xff] %v11746_v50  ;;  %v11751_v33 = vpop.f32.mrf.mxu2  ;;  %5298 = vmatmul.bf16.gmra.mxu1 %v14658_v25  ;;  %v7165_v25 = vld [vmem:[%s13525_s0 + $0xc8] sm:$0xff] }
 0x8f8   :  { %14657 = vst [vmem:[#allocation81_spill] sm:$0xff] %v11751_v33 }
 0x8f9   :  { %5000 = vmatmul.bf16.gmra.mxu3 %v14659_v26 }
 0x8fc   :  { %v5261_v18 = vpop.f32.mrf.mxu1  ;;  %v4961_v43 = vpop.f32.mrf.mxu3 }
 0x8fd   :  { %v11757_v42 = vadd.f32 %v5261_v18, %v5093_v41  ;;  %v11762_v17 = vadd.f32 %v4961_v43, %v14661_v61  ;;  %v14664_v41 = vld [vmem:[#allocation107_spill] sm:$0xff]  ;;  %v14666_v61 = vld [vmem:[#allocation104_spill] sm:$0xff] }
 0x8ff   :  { %14660 = vst [vmem:[#allocation119_spill] sm:$0xff] %v11757_v42  ;;  %v11764_v46 = vpop.f32.mrf.mxu2  ;;  %v11780_v42 = vpop.f32.mrf.mxu0 }
 0x900   :  { %14662 = vst [vmem:[#allocation137_spill] sm:$0xff] %v11764_v46 }
 0x904   :  { %6989 = vmatmul.msk.bf16.gmra.mxu2 %vm1349_vm7, %v7165_v25  ;;  %v5264_v39 = vpop.f32.mrf.mxu1  ;;  %v4963_v26 = vpop.f32.mrf.mxu3 }
 0x905   :  { %v11772_v3 = vadd.f32 %v5264_v39, %v5096_v20  ;;  %v11775_v18 = vadd.f32 %v4963_v26, %v14664_v41  ;;  %v14669_v39 = vld [vmem:[#allocation71_spill] sm:$0xff] }
 0x907   :  { %14663 = vst [vmem:[#allocation87_spill] sm:$0xff] %v11772_v3  ;;  %v11777_v43 = vpop.f32.mrf.mxu2  ;;  %5303 = vmatmul.bf16.gmra.mxu1 %v14666_v61  ;;  %v11792_v41 = vpop.f32.mrf.mxu0  ;;  %v5101_v61 = vadd.f32 %v11276_v37, %v11614_v14  ;;  %v5103_v37 = vadd.f32 %v11293_v23, %v11627_v44 }
 0x908   :  { %14665 = vst [vmem:[#allocation46_spill] sm:$0xff] %v11777_v43 }
 0x909   :  { %5005 = vmatmul.bf16.gmra.mxu3 %v14667_v53  ;;  %v7166_v53 = vld [vmem:[%s13525_s0 + $0xd0] sm:$0xff] }
 0x90c   :  { %v5266_v50 = vpop.f32.mrf.mxu1  ;;  %v4966_v20 = vpop.f32.mrf.mxu3 }
 0x90d   :  { %v11785_v25 = vadd.f32 %v5266_v50, %v5098_v1  ;;  %v11788_v3 = vadd.f32 %v4966_v20, %v14669_v39  ;;  %v14673_v39 = vld [vmem:[#allocation2_spill] sm:$0xff] }
 0x90f   :  { %14668 = vst [vmem:[#allocation84_spill] sm:$0xff] %v11785_v25  ;;  %v11790_v26 = vpop.f32.mrf.mxu2  ;;  %v11811_v14 = vpop.f32.mrf.mxu0 }
 0x910   :  { %14670 = vst [vmem:[#allocation122_spill] sm:$0xff] %v11790_v26 }
 0x914   :  { %6990 = vmatmul.msk.bf16.gmra.mxu2 %vm1349_vm7, %v7166_v53  ;;  %v5269_v27 = vpop.f32.mrf.mxu1  ;;  %v4968_v50 = vpop.f32.mrf.mxu3 }
 0x915   :  { %v11800_v21 = vadd.f32 %v5269_v27, %v5101_v61  ;;  %v11803_v1 = vadd.f32 %v4968_v50, %v11225_v29  ;;  %v5106_v50 = vadd.f32 %v11307_v10, %v11638_v58  ;;  %v5108_v10 = vadd.f32 %v11324_v12, %v11651_v56 }
 0x917   :  { %14671 = vst [vmem:[#allocation144_spill] sm:$0xff] %v11800_v21  ;;  %v11805_v20 = vpop.f32.mrf.mxu2  ;;  %5308 = vmatmul.bf16.gmra.mxu1 %v14673_v39  ;;  %v11828_v39 = vpop.f32.mrf.mxu0 }
 0x918   :  { %14672 = vst [vmem:[#allocation92_spill] sm:$0xff] %v11805_v20 }
 0x919   :  { %5010 = vmatmul.bf16.gmra.mxu3 %v14532_v16  ;;  %v7167_v16 = vld [vmem:[%s13525_s0 + $0xd8] sm:$0xff] }
 0x91c   :  { %v5271_v25 = vpop.f32.mrf.mxu1  ;;  %v4971_v61 = vpop.f32.mrf.mxu3 }
 0x91d   :  { %v11813_v53 = vadd.f32 %v5271_v25, %v5103_v37  ;;  %v11816_v27 = vadd.f32 %v4971_v61, %v11240_v15  ;;  %v14678_v61 = vld [vmem:[#allocation158_spill] sm:$0xff] }
 0x91f   :  { %14674 = vst [vmem:[#allocation9_spill] sm:$0xff] %v11813_v53  ;;  %v11818_v29 = vpop.f32.mrf.mxu2 }
 0x920   :  { %14675 = vst [vmem:[#allocation47_spill] sm:$0xff] %v11818_v29 }
 0x924   :  { %6991 = vmatmul.msk.bf16.gmra.mxu2 %vm1349_vm7, %v7167_v16  ;;  %v5274_v23 = vpop.f32.mrf.mxu1  ;;  %v4973_v25 = vpop.f32.mrf.mxu3 }
 0x925   :  { %v11826_v44 = vadd.f32 %v5274_v23, %v5106_v50  ;;  %v11831_v15 = vadd.f32 %v4973_v25, %v11251_v36  ;;  %v5111_v36 = vadd.f32 %v11338_v7, %v11662_v5  ;;  %v7168_v25 = vld [vmem:[%s13525_s0 + $0xe0] sm:$0xff]  ;;  %v5113_v7 = vadd.f32 %v11351_v9, %v11675_v52 }
 0x927   :  { %14676 = vst [vmem:[#allocation89_spill] sm:$0xff] %v11826_v44  ;;  %v11833_v37 = vpop.f32.mrf.mxu2  ;;  %5313 = vmatmul.bf16.gmra.mxu1 %v14678_v61  ;;  %v11845_v44 = vpop.f32.mrf.mxu0 }
 0x928   :  { %14677 = vst [vmem:[#allocation91_spill] sm:$0xff] %v11833_v37 }
 0x92c   :  { %v5276_v58 = vpop.f32.mrf.mxu1  ;;  %v4976_v16 = vpop.f32.mrf.mxu3 }
 0x92d   :  { %v11838_v53 = vadd.f32 %v5276_v58, %v5108_v10  ;;  %v11841_v50 = vadd.f32 %v4976_v16, %v11263_v59  ;;  %v14682_v10 = vld [vmem:[#allocation109_spill] sm:$0xff] }
 0x92e   :  { %v14684_v16 = vld [vmem:[#allocation17_spill] sm:$0xff] }
 0x92f   :  { %14679 = vst [vmem:[#allocation152_spill] sm:$0xff] %v11838_v53  ;;  %v11843_v23 = vpop.f32.mrf.mxu2  ;;  %v11861_v53 = vpop.f32.mrf.mxu0 }
 0x930   :  { %14680 = vst [vmem:[#allocation97_spill] sm:$0xff] %v11843_v23  ;;  %v14686_v23 = vld [vmem:[#allocation20_spill] sm:$0xff] }
 0x934   :  { %6992 = vmatmul.msk.bf16.gmra.mxu2 %vm1349_vm7, %v7168_v25  ;;  %v5279_v12 = vpop.f32.mrf.mxu1  ;;  %v4978_v61 = vpop.f32.mrf.mxu3 }
 0x935   :  { %v11853_v56 = vadd.f32 %v5279_v12, %v5111_v36  ;;  %v11856_v59 = vadd.f32 %v4978_v61, %v14682_v10  ;;  %v5116_v61 = vadd.f32 %v11367_v34, %v11686_v62  ;;  %v5118_v34 = vadd.f32 %v11386_v48, %v11699_v60 }
 0x937   :  { %14681 = vst [vmem:[#allocation10_spill] sm:$0xff] %v11853_v56  ;;  %v11858_v58 = vpop.f32.mrf.mxu2  ;;  %5318 = vmatmul.bf16.gmra.mxu1 %v14684_v16  ;;  %v11874_v10 = vpop.f32.mrf.mxu0  ;;  %v7169_v16 = vld [vmem:[%s13525_s0 + $0xe8] sm:$0xff] }
 0x938   :  { %14683 = vst [vmem:[#allocation48_spill] sm:$0xff] %v11858_v58 }
 0x93c   :  { %v5281_v5 = vpop.f32.mrf.mxu1  ;;  %v4981_v25 = vpop.f32.mrf.mxu3 }
 0x93d   :  { %v11865_v21 = vadd.f32 %v5281_v5, %v5113_v7  ;;  %v11868_v36 = vadd.f32 %v4981_v25, %v14686_v23  ;;  %v14689_v5 = vld [vmem:[#allocation22_spill] sm:$0xff] }
 0x93f   :  { %14685 = vst [vmem:[#allocation94_spill] sm:$0xff] %v11865_v21  ;;  %v11870_v12 = vpop.f32.mrf.mxu2  ;;  %v14690_v21 = vld [vmem:[#allocation54_spill] sm:$0xff]  ;;  %v11892_v58 = vpop.f32.mrf.mxu0 }
 0x940   :  { %14687 = vst [vmem:[#allocation16_spill] sm:$0xff] %v11870_v12 }
 0x944   :  { %6993 = vmatmul.msk.bf16.gmra.mxu2 %vm1349_vm7, %v7169_v16  ;;  %v5284_v9 = vpop.f32.mrf.mxu1  ;;  %v4983_v7 = vpop.f32.mrf.mxu3  ;;  %v14692_v16 = vld [vmem:[#allocation162_spill] sm:$0xff] }
 0x945   :  { %v11880_v52 = vadd.f32 %v5284_v9, %v5116_v61  ;;  %v11883_v23 = vadd.f32 %v4983_v7, %v14689_v5  ;;  %v5121_v7 = vadd.f32 %v11397_v57, %v11710_v47 }
 0x947   :  { %14688 = vst [vmem:[#allocation35_spill] sm:$0xff] %v11880_v52  ;;  %v11885_v25 = vpop.f32.mrf.mxu2  ;;  %5323 = vmatmul.bf16.gmra.mxu1 %v14690_v21  ;;  %v7170_v21 = vld [vmem:[%s13525_s0 + $0xf0] sm:$0xff] }
 0x94c   :  { %v5286_v62 = vpop.f32.mrf.mxu1  ;;  %v4986_v12 = vpop.f32.mrf.mxu3 }
 0x94d   :  { %v11890_v56 = vadd.f32 %v5286_v62, %v5118_v34  ;;  %v4987_v61 = vadd.f32 %v4986_v12, %v14692_v16  ;;  %v14696_v34 = vld [vmem:[#allocation123_spill] sm:$0xff]  ;;  %v11908_v62 = vpop.f32.mrf.mxu0  ;;  %v5123_v12 = vadd.f32 %v11414_v49, %v11723_v19  ;;  %v14701_v19 = vld [vmem:[#allocation130_spill] sm:$0xff] }
 0x94f   :  { %14691 = vst [vmem:[#allocation102_spill] sm:$0xff] %v11890_v56  ;;  %v11895_v9 = vpop.f32.mrf.mxu2 }
 0x950   :  { %14693 = vst [vmem:[#allocation50_spill] sm:$0xff] %v11895_v9 }
 0x954   :  { %6994 = vmatmul.msk.bf16.gmra.mxu2 %vm1349_vm7, %v7170_v21  ;;  %v5289_v48 = vpop.f32.mrf.mxu1  ;;  %v7171_v21 = vld [vmem:[%s13525_s0 + $0xf8] sm:$0xff] }
 0x955   :  { %v11903_v60 = vadd.f32 %v5289_v48, %v5121_v7  ;;  %v11916_v56 = vpop.f32.mrf.mxu0  ;;  %v5126_v7 = vadd.f32 %v11740_v35, %v11734_v24 }
 0x957   :  { %14694 = vst [vmem:[#allocation142_spill] sm:$0xff] %v11903_v60  ;;  %v11905_v5 = vpop.f32.mrf.mxu2  ;;  %5328 = vmatmul.bf16.gmra.mxu1 %v14696_v34 }
 0x958   :  { %14695 = vst [vmem:[#allocation49_spill] sm:$0xff] %v11905_v5 }
 0x95c   :  { %v5291_v16 = vpop.f32.mrf.mxu1 }
 0x95d   :  { %v11912_v57 = vadd.f32 %v5291_v16, %v5123_v12  ;;  %v5128_v12 = vadd.f32 %v11759_v55, %v11749_v2  ;;  %v5155_v16 = vpop.f32.mrf.mxu0  ;;  %v14706_v2 = vld [vmem:[#allocation136_spill] sm:$0xff] }
 0x95e   :  { %v11933_v24 = vadd.f32 %v5155_v16, %v4987_v61  ;;  %v5133_v61 = vadd.f32 %v11792_v41, %v11775_v18  ;;  %v7173_v16 = vld [vmem:[%s13525_s0 + $0x108] sm:$0xff]  ;;  %v14710_v18 = vld [vmem:[#allocation160_spill] sm:$0xff]  ;;  %v5138_v41 = vadd.f32 %v11828_v39, %v11803_v1  ;;  %v5143_v1 = vadd.f32 %v11861_v53, %v11831_v15 }
 0x95f   :  { %14697 = vst [vmem:[#allocation36_spill] sm:$0xff] %v11912_v57  ;;  %v11914_v47 = vpop.f32.mrf.mxu2  ;;  %v5886_v53 = vmul.f32 %v11461_v0, %v11461_v0 }
 0x960   :  { %14698 = vst [vmem:[#allocation15_spill] sm:$0xff] %v11914_v47 }
 0x964   :  { %6995 = vmatmul.msk.bf16.gmra.mxu2 %vm1349_vm7, %v7171_v21  ;;  %v5294_v48 = vpop.f32.mrf.mxu1  ;;  %v5131_v21 = vadd.f32 %v11780_v42, %v11762_v17  ;;  %v5136_v17 = vadd.f32 %v11811_v14, %v11788_v3  ;;  %v5141_v14 = vadd.f32 %v11845_v44, %v11816_v27  ;;  %v5885_v44 = vmul.f32 %v11446_v45, %v11446_v45 }
 0x965   :  { %v11924_v34 = vadd.f32 %v5294_v48, %v5126_v7  ;;  %v7172_v7 = vld [vmem:[%s13525_s0 + $0x100] sm:$0xff] }
 0x967   :  { %14699 = vst [vmem:[#allocation147_spill] sm:$0xff] %v11924_v34  ;;  %v11926_v49 = vpop.f32.mrf.mxu2  ;;  %5333 = vmatmul.bf16.gmra.mxu1 %v14701_v19 }
 0x968   :  { %14700 = vst [vmem:[#allocation18_spill] sm:$0xff] %v11926_v49 }
 0x96c   :  { %v5296_v57 = vpop.f32.mrf.mxu1 }
 0x96d   :  { %v11931_v60 = vadd.f32 %v5296_v57, %v5128_v12 }
 0x96f   :  { %14702 = vst [vmem:[#allocation51_spill] sm:$0xff] %v11931_v60  ;;  %v11935_v35 = vpop.f32.mrf.mxu2 }
 0x970   :  { %14703 = vst [vmem:[#allocation38_spill] sm:$0xff] %v11935_v35 }
 0x974   :  { %6996 = vmatmul.msk.bf16.gmra.mxu2 %vm1349_vm7, %v7172_v7  ;;  %v5299_v48 = vpop.f32.mrf.mxu1 }
 0x975   :  { %v11943_v19 = vadd.f32 %v5299_v48, %v5131_v21 }
 0x977   :  { %14704 = vst [vmem:[#allocation111_spill] sm:$0xff] %v11943_v19  ;;  %v11945_v55 = vpop.f32.mrf.mxu2  ;;  %5338 = vmatmul.bf16.gmra.mxu1 %v14706_v2 }
 0x978   :  { %14705 = vst [vmem:[#allocation150_spill] sm:$0xff] %v11945_v55 }
 0x97c   :  { %v5301_v57 = vpop.f32.mrf.mxu1 }
 0x97d   :  { %v11950_v12 = vadd.f32 %v5301_v57, %v5133_v61  ;;  %v7174_v57 = vld [vmem:[%s13525_s0 + $0x110] sm:$0xff] }
 0x97f   :  { %14707 = vst [vmem:[#allocation106_spill] sm:$0xff] %v11950_v12  ;;  %v11952_v42 = vpop.f32.mrf.mxu2 }
 0x984   :  { %6997 = vmatmul.msk.bf16.gmra.mxu2 %vm1349_vm7, %v7173_v16  ;;  %v5304_v21 = vpop.f32.mrf.mxu1 }
 0x985   :  { %v11960_v7 = vadd.f32 %v5304_v21, %v5136_v17 }
 0x987   :  { %14708 = vst [vmem:[#allocation154_spill] sm:$0xff] %v11960_v7  ;;  %v11962_v48 = vpop.f32.mrf.mxu2  ;;  %5343 = vmatmul.bf16.gmra.mxu1 %v14710_v18 }
 0x988   :  { %14709 = vst [vmem:[#allocation52_spill] sm:$0xff] %v11962_v48 }
 0x98c   :  { %v5306_v2 = vpop.f32.mrf.mxu1 }
 0x98d   :  { %v11967_v61 = vadd.f32 %v5306_v2, %v5138_v41  ;;  %v5146_v41 = vadd.f32 %v11874_v10, %v11841_v50  ;;  %v5884_v2 = vmul.f32 %v11433_v11, %v11433_v11 }
 0x98f   :  { %14711 = vst [vmem:[#allocation39_spill] sm:$0xff] %v11967_v61  ;;  %v11969_v3 = vpop.f32.mrf.mxu2 }
 0x990   :  { %14712 = vst [vmem:[#allocation117_spill] sm:$0xff] %v11969_v3 }
 0x994   :  { %6998 = vmatmul.msk.bf16.gmra.mxu2 %vm1349_vm7, %v7174_v57  ;;  %v5309_v17 = vpop.f32.mrf.mxu1  ;;  %v5948_v57 = vadd.f32 %v5885_v44, %v5884_v2  ;;  %v5148_v44 = vadd.f32 %v11892_v58, %v11856_v59 }
 0x995   :  { %v11977_v16 = vadd.f32 %v5309_v17, %v5141_v14 }
 0x996   :  { %v5949_v50 = vadd.f32 %v5948_v57, %v5886_v53  ;;  %v5890_v53 = vmul.f32 %v11509_v40, %v11509_v40 }
 0x997   :  { %14713 = vst [vmem:[#allocation108_spill] sm:$0xff] %v11977_v16  ;;  %v11979_v21 = vpop.f32.mrf.mxu2  ;;  %5348 = vmatmul.bf16.gmra.mxu1 %v14608_v13  ;;  %v5815_v13 = vadd.f32 %v11446_v45, %v11433_v11  ;;  %v5888_v45 = vmul.f32 %v11485_v51, %v11485_v51 }
 0x998   :  { %14714 = vst [vmem:[#allocation33_spill] sm:$0xff] %v11979_v21 }
 0x999   :  { %v5816_v17 = vadd.f32 %v5815_v13, %v11461_v0 }
 0x99b   :  { %v5817_v10 = vadd.f32 %v5816_v17, %v11472_v63 }
 0x99c   :  { %v5311_v39 = vpop.f32.mrf.mxu1 }
 0x99d   :  { %v11984_v18 = vadd.f32 %v5311_v39, %v5143_v1  ;;  %v5887_v1 = vmul.f32 %v11472_v63, %v11472_v63 }
 0x99f   :  { %14715 = vst [vmem:[#allocation110_spill] sm:$0xff] %v11984_v18  ;;  %v11986_v27 = vpop.f32.mrf.mxu2  ;;  %v5950_v11 = vadd.f32 %v5949_v50, %v5887_v1  ;;  %v5818_v18 = vadd.f32 %v5817_v10, %v11485_v51  ;;  %v5891_v50 = vmul.f32 %v11520_v31, %v11520_v31 }
 0x9a0   :  { %14716 = vst [vmem:[#allocation40_spill] sm:$0xff] %v11986_v27 }
 0x9a1   :  { %v5951_v2 = vadd.f32 %v5950_v11, %v5888_v45  ;;  %v5819_v13 = vadd.f32 %v5818_v18, %v11496_v38  ;;  %v14720_v11 = vld [vmem:[#allocation135_spill] sm:$0xff] }
 0x9a2   :  { %v5892_v45 = vmul.f32 %v14720_v11, %v14720_v11 }
 0x9a3   :  { %v5820_v1 = vadd.f32 %v5819_v13, %v11509_v40 }
 0x9a4   :  { %v5314_v15 = vpop.f32.mrf.mxu1 }
 0x9a5   :  { %v11998_v14 = vadd.f32 %v5314_v15, %v5146_v41  ;;  %v5889_v41 = vmul.f32 %v11496_v38, %v11496_v38  ;;  %v5821_v59 = vadd.f32 %v5820_v1, %v11520_v31  ;;  %v14721_v38 = vld [vmem:[#allocation66_spill] sm:$0xff] }
 0x9a7   :  { %14717 = vst [vmem:[#allocation125_spill] sm:$0xff] %v11998_v14  ;;  %v12003_v39 = vpop.f32.mrf.mxu2  ;;  %v5952_v17 = vadd.f32 %v5951_v2, %v5889_v41  ;;  %v5822_v18 = vadd.f32 %v5821_v59, %v14720_v11  ;;  %v5151_v41 = vadd.f32 %v11908_v62, %v11868_v36  ;;  %v14725_v62 = vld [vmem:[#allocation141_spill] sm:$0xff] }
 0x9a9   :  { %v5953_v51 = vadd.f32 %v5952_v17, %v5890_v53  ;;  %v5823_v13 = vadd.f32 %v5822_v18, %v14721_v38 }
 0x9ab   :  { %v5954_v58 = vadd.f32 %v5953_v51, %v5891_v50  ;;  %v14724_v50 = vld [vmem:[#allocation174_spill] sm:$0xff] }
 0x9ac   :  { %v5316_v15 = vpop.f32.mrf.mxu1  ;;  %v5895_v59 = vmul.f32 %v14724_v50, %v14724_v50 }
 0x9ad   :  { %v12016_v57 = vadd.f32 %v5316_v15, %v5148_v44  ;;  %v5893_v44 = vmul.f32 %v14721_v38, %v14721_v38  ;;  %v5955_v2 = vadd.f32 %v5954_v58, %v5892_v45  ;;  %v14722_v15 = vld [vmem:[#allocation93_spill] sm:$0xff]  ;;  %v5896_v45 = vmul.f32 %v14725_v62, %v14725_v62  ;;  %v14726_v38 = vld [vmem:[#allocation68_spill] sm:$0xff] }
 0x9ae   :  { %v5894_v53 = vmul.f32 %v14722_v15, %v14722_v15  ;;  %v5824_v51 = vadd.f32 %v5823_v13, %v14722_v15 }
 0x9af   :  { %14718 = vst [vmem:[#allocation19_spill] sm:$0xff] %v12016_v57  ;;  %v12021_v10 = vpop.f32.mrf.mxu2  ;;  %v5956_v31 = vadd.f32 %v5955_v2, %v5893_v44  ;;  %v5153_v44 = vadd.f32 %v11916_v56, %v11883_v23  ;;  %v5900_v23 = vmul.f32 %v11629_v8, %v11629_v8 }
 0x9b0   :  { %14719 = vst [vmem:[#allocation53_spill] sm:$0xff] %v12021_v10  ;;  %v5825_v36 = vadd.f32 %v5824_v51, %v14724_v50 }
 0x9b1   :  { %v5957_v40 = vadd.f32 %v5956_v31, %v5894_v53  ;;  %v5898_v31 = vmul.f32 %v11605_v6, %v11605_v6 }
 0x9b2   :  { %v5826_v18 = vadd.f32 %v5825_v36, %v14725_v62 }
 0x9b3   :  { %v5958_v58 = vadd.f32 %v5957_v40, %v5895_v59  ;;  %v14728_v59 = vld [vmem:[#allocation60_spill] sm:$0xff] }
 0x9b4   :  { %v5319_v17 = vpop.f32.mrf.mxu1  ;;  %v5827_v13 = vadd.f32 %v5826_v18, %v14726_v38  ;;  %v5899_v36 = vmul.f32 %v14728_v59, %v14728_v59  ;;  %v14730_v18 = vld [vmem:[#allocation30_spill] sm:$0xff] }
 0x9b5   :  { %v12034_v1 = vadd.f32 %v5319_v17, %v5151_v41  ;;  %v5897_v41 = vmul.f32 %v14726_v38, %v14726_v38  ;;  %v5959_v2 = vadd.f32 %v5958_v58, %v5896_v45 }
 0x9b6   :  { %v5828_v40 = vadd.f32 %v5827_v13, %v11605_v6  ;;  %v14732_v13 = vld [vmem:[#allocation118_spill] sm:$0xff] }
 0x9b7   :  { %14723 = vst [vmem:[#allocation113_spill] sm:$0xff] %v12034_v1  ;;  %v12039_v11 = vpop.f32.mrf.mxu2  ;;  %v5960_v51 = vadd.f32 %v5959_v2, %v5897_v41  ;;  %v14731_v41 = vld [vmem:[#allocation121_spill] sm:$0xff] }
 0x9b8   :  { %v5829_v56 = vadd.f32 %v5828_v40, %v14728_v59  ;;  %v5426_v2 = vmul.f32 %v14731_v41, %v14731_v41 }
 0x9b9   :  { %v5961_v50 = vadd.f32 %v5960_v51, %v5898_v31  ;;  %v5902_v51 = vmul.f32 %v11653_v30, %v11653_v30 }
 0x9ba   :  { %v5830_v58 = vadd.f32 %v5829_v56, %v11629_v8 }
 0x9bb   :  { %v5962_v45 = vadd.f32 %v5961_v50, %v5899_v36  ;;  %v5425_v50 = vmul.f32 %v14732_v13, %v14732_v13  ;;  %v14733_v36 = vld [vmem:[#allocation167_spill] sm:$0xff] }
 0x9bc   :  { %v5321_v53 = vpop.f32.mrf.mxu1  ;;  %v5831_v31 = vadd.f32 %v5830_v58, %v14730_v18  ;;  %v5427_v56 = vmul.f32 %v14733_v36, %v14733_v36 }
 0x9bd   :  { %v12052_v17 = vadd.f32 %v5321_v53, %v5153_v44  ;;  %v5901_v44 = vmul.f32 %v14730_v18, %v14730_v18  ;;  %v5356_v53 = vadd.f32 %v14731_v41, %v14732_v13  ;;  %v5963_v6 = vadd.f32 %v5962_v45, %v5900_v23  ;;  %v14735_v41 = vld [vmem:[#allocation126_spill] sm:$0xff] }
 0x9be   :  { %v5832_v23 = vadd.f32 %v5831_v31, %v11653_v30  ;;  %v5903_v45 = vmul.f32 %v11664_v28, %v11664_v28  ;;  %v5489_v58 = vadd.f32 %v5426_v2, %v5425_v50  ;;  %v5428_v18 = vmul.f32 %v14735_v41, %v14735_v41  ;;  %v14739_v30 = vld [vmem:[#allocation72_spill] sm:$0xff] }
 0x9bf   :  { %14727 = vst [vmem:[#allocation41_spill] sm:$0xff] %v12052_v17  ;;  %v12057_v62 = vpop.f32.mrf.mxu2  ;;  %v5357_v59 = vadd.f32 %v5356_v53, %v14733_v36  ;;  %v5964_v38 = vadd.f32 %v5963_v6, %v5901_v44  ;;  %v14738_v44 = vld [vmem:[#allocation85_spill] sm:$0xff]  ;;  %v5905_v0 = vmul.f32 %v14739_v30, %v14739_v30 }
 0x9c0   :  { %14729 = vst [vmem:[#allocation132_spill] sm:$0xff] %v12057_v62  ;;  %v5490_v6 = vadd.f32 %v5489_v58, %v5427_v56  ;;  %v5429_v31 = vmul.f32 %v14738_v44, %v14738_v44  ;;  %v5906_v58 = vmul.f32 %v11701_v32, %v11701_v32 }
 0x9c1   :  { %v5358_v13 = vadd.f32 %v5357_v59, %v14735_v41  ;;  %v5965_v63 = vadd.f32 %v5964_v38, %v5902_v51  ;;  %v14740_v59 = vld [vmem:[#allocation29_spill] sm:$0xff] }
 0x9c2   :  { %v5430_v38 = vmul.f32 %v14740_v59, %v14740_v59 }
 0x9c3   :  { %v5359_v36 = vadd.f32 %v5358_v13, %v14738_v44  ;;  %v5966_v2 = vadd.f32 %v5965_v63, %v5903_v45  ;;  %v14741_v13 = vld [vmem:[#allocation170_spill] sm:$0xff]  ;;  %v12109_v44 = vpop.f32.mrf.mxu3 }
 0x9c4   :  { %v5324_v40 = vpop.f32.mrf.mxu1  ;;  %v5431_v63 = vmul.f32 %v14741_v13, %v14741_v13 }
 0x9c5   :  { %v12077_v8 = vadd.f32 %v5324_v40, %v11933_v24  ;;  %v5833_v24 = vadd.f32 %v5832_v23, %v11664_v28  ;;  %v14737_v40 = vld [vmem:[#allocation156_spill] sm:$0xff]  ;;  %v5360_v51 = vadd.f32 %v5359_v36, %v14740_v59 }
 0x9c6   :  { %v5904_v53 = vmul.f32 %v14737_v40, %v14737_v40 }
 0x9c7   :  { %14734 = vst [vmem:[#allocation115_spill] sm:$0xff] %v12077_v8  ;;  %v12085_v15 = vpop.f32.mrf.mxu2  ;;  %v5834_v50 = vadd.f32 %v5833_v24, %v14737_v40  ;;  %v5491_v8 = vadd.f32 %v5490_v6, %v5428_v18  ;;  %v5361_v45 = vadd.f32 %v5360_v51, %v14741_v13  ;;  %v5907_v6 = vmul.f32 %v11712_v54, %v11712_v54 }
 0x9c8   :  { %14736 = vst [vmem:[#allocation161_spill] sm:$0xff] %v12085_v15  ;;  %v5967_v23 = vadd.f32 %v5966_v2, %v5904_v53  ;;  %v14742_v53 = vld [vmem:[#allocation133_spill] sm:$0xff] }
 0x9c9   :  { %v5835_v56 = vadd.f32 %v5834_v50, %v14739_v30  ;;  %v5492_v41 = vadd.f32 %v5491_v8, %v5429_v31  ;;  %v5432_v2 = vmul.f32 %v14742_v53, %v14742_v53  ;;  %v5362_v8 = vadd.f32 %v5361_v45, %v14742_v53  ;;  %v14744_v45 = vld [vmem:[#allocation31_spill] sm:$0xff] }
 0x9ca   :  { %v5968_v24 = vadd.f32 %v5967_v23, %v5905_v0  ;;  %v5908_v0 = vmul.f32 %v11725_v4, %v11725_v4  ;;  %v14743_v23 = vld [vmem:[#allocation90_spill] sm:$0xff] }
 0x9cb   :  { %v5836_v18 = vadd.f32 %v5835_v56, %v11701_v32  ;;  %v5493_v36 = vadd.f32 %v5492_v41, %v5430_v38  ;;  %v5433_v56 = vmul.f32 %v14743_v23, %v14743_v23  ;;  %v5363_v13 = vadd.f32 %v5362_v8, %v14743_v23 }
 0x9cc   :  { %v5969_v31 = vadd.f32 %v5968_v24, %v5906_v58  ;;  %v5909_v32 = vmul.f32 %v11736_v22, %v11736_v22  ;;  %v5434_v58 = vmul.f32 %v14744_v45, %v14744_v45  ;;  %v12127_v24 = vpop.f32.mrf.mxu0  ;;  %v5910_v8 = vmul.f32 %v11751_v33, %v11751_v33  ;;  %v12135_v23 = vpop.f32.mrf.mxu1 }
 0x9cd   :  { %v5837_v59 = vadd.f32 %v5836_v18, %v11712_v54  ;;  %v5494_v51 = vadd.f32 %v5493_v36, %v5431_v63  ;;  %v5364_v18 = vadd.f32 %v5363_v13, %v14744_v45  ;;  %v5911_v13 = vmul.f32 %v11764_v46, %v11764_v46 }
 0x9ce   :  { %v5970_v41 = vadd.f32 %v5969_v31, %v5907_v6  ;;  %v14745_v31 = vld [vmem:[#allocation172_spill] sm:$0xff] }
 0x9cf   :  { %v12113_v50 = vpop.f32.mrf.mxu2  ;;  %v5838_v38 = vadd.f32 %v5837_v59, %v11725_v4  ;;  %v5495_v30 = vadd.f32 %v5494_v51, %v5432_v2  ;;  %v5435_v59 = vmul.f32 %v14745_v31, %v14745_v31  ;;  %v5365_v2 = vadd.f32 %v5364_v18, %v14745_v31 }
 0x9d0   :  { %v5971_v63 = vadd.f32 %v5970_v41, %v5908_v0  ;;  %v14746_v41 = vld [vmem:[#allocation139_spill] sm:$0xff]  ;;  %v5912_v18 = vmul.f32 %v11777_v43, %v11777_v43 }
 0x9d1   :  { %v5839_v36 = vadd.f32 %v5838_v38, %v11736_v22  ;;  %v5496_v6 = vadd.f32 %v5495_v30, %v5433_v56  ;;  %v5436_v38 = vmul.f32 %v14746_v41, %v14746_v41  ;;  %v5366_v30 = vadd.f32 %v5365_v2, %v14746_v41 }
 0x9d2   :  { %v5972_v51 = vadd.f32 %v5971_v63, %v5909_v32  ;;  %v12149_v32 = vpop.f32.mrf.mxu3  ;;  %v5913_v2 = vmul.f32 %v11790_v26, %v11790_v26 }
 0x9d3   :  { %v5840_v53 = vadd.f32 %v5839_v36, %v11751_v33  ;;  %v5497_v0 = vadd.f32 %v5496_v6, %v5434_v58  ;;  %v14747_v36 = vld [vmem:[#allocation95_spill] sm:$0xff] }
 0x9d4   :  { %v5973_v56 = vadd.f32 %v5972_v51, %v5910_v8  ;;  %v5437_v31 = vmul.f32 %v14747_v36, %v14747_v36  ;;  %v5367_v58 = vadd.f32 %v5366_v30, %v14747_v36  ;;  %v14748_v51 = vld [vmem:[#allocation32_spill] sm:$0xff] }
 0x9d5   :  { %v5841_v22 = vadd.f32 %v5840_v53, %v11764_v46  ;;  %v5498_v63 = vadd.f32 %v5497_v0, %v5435_v59  ;;  %v5438_v53 = vmul.f32 %v14748_v51, %v14748_v51  ;;  %v5914_v0 = vmul.f32 %v11805_v20, %v11805_v20  ;;  %v14749_v30 = vld [vmem:[#allocation176_spill] sm:$0xff] }
 0x9d6   :  { %v5974_v6 = vadd.f32 %v5973_v56, %v5911_v13  ;;  %v5368_v41 = vadd.f32 %v5367_v58, %v14748_v51  ;;  %v5439_v13 = vmul.f32 %v14749_v30, %v14749_v30  ;;  %v5915_v58 = vmul.f32 %v11818_v29, %v11818_v29  ;;  %v12173_v51 = vpop.f32.mrf.mxu1 }
 0x9d7   :  { %v12143_v45 = vpop.f32.mrf.mxu2  ;;  %v5842_v33 = vadd.f32 %v5841_v22, %v11777_v43  ;;  %v5499_v8 = vadd.f32 %v5498_v63, %v5436_v38  ;;  %v12165_v22 = vpop.f32.mrf.mxu0 }
 0x9d8   :  { %v5975_v46 = vadd.f32 %v5974_v6, %v5912_v18  ;;  %v5369_v56 = vadd.f32 %v5368_v41, %v14749_v30  ;;  %v14750_v6 = vld [vmem:[#allocation146_spill] sm:$0xff]  ;;  %v5916_v41 = vmul.f32 %v11833_v37, %v11833_v37 }
 0x9d9   :  { %v5843_v59 = vadd.f32 %v5842_v33, %v11790_v26  ;;  %v5500_v4 = vadd.f32 %v5499_v8, %v5437_v31  ;;  %v5440_v33 = vmul.f32 %v14750_v6, %v14750_v6 }
 0x9da   :  { %v5976_v63 = vadd.f32 %v5975_v46, %v5913_v2  ;;  %v5370_v8 = vadd.f32 %v5369_v56, %v14750_v6  ;;  %v14751_v2 = vld [vmem:[#allocation177_spill] sm:$0xff]  ;;  %v12187_v54 = vpop.f32.mrf.mxu3  ;;  %v14754_v6 = vld [vmem:[#allocation48_spill] sm:$0xff] }
 0x9db   :  { %v5844_v38 = vadd.f32 %v5843_v59, %v11805_v20  ;;  %v5501_v18 = vadd.f32 %v5500_v4, %v5438_v53  ;;  %v5441_v59 = vmul.f32 %v14751_v2, %v14751_v2  ;;  %v14752_v20 = vld [vmem:[#allocation97_spill] sm:$0xff] }
 0x9dc   :  { %v5977_v36 = vadd.f32 %v5976_v63, %v5914_v0  ;;  %v5371_v4 = vadd.f32 %v5370_v8, %v14751_v2  ;;  %v5917_v43 = vmul.f32 %v14752_v20, %v14752_v20  ;;  %v14753_v56 = vld [vmem:[#allocation149_spill] sm:$0xff]  ;;  %v5918_v8 = vmul.f32 %v14754_v6, %v14754_v6 }
 0x9dd   :  { %v5845_v26 = vadd.f32 %v5844_v38, %v11818_v29  ;;  %v5502_v46 = vadd.f32 %v5501_v18, %v5439_v13  ;;  %v5442_v38 = vmul.f32 %v14753_v56, %v14753_v56 }
 0x9de   :  { %v5978_v30 = vadd.f32 %v5977_v36, %v5915_v58  ;;  %v5372_v63 = vadd.f32 %v5371_v4, %v14753_v56  ;;  %v14757_v4 = vld [vmem:[#allocation153_spill] sm:$0xff] }
 0x9df   :  { %v12175_v31 = vpop.f32.mrf.mxu2  ;;  %v5846_v53 = vadd.f32 %v5845_v26, %v11833_v37  ;;  %v5503_v0 = vadd.f32 %v5502_v46, %v5440_v33  ;;  %v14755_v26 = vld [vmem:[#allocation69_spill] sm:$0xff]  ;;  %v14756_v46 = vld [vmem:[#allocation16_spill] sm:$0xff] }
 0x9e0   :  { %v5979_v13 = vadd.f32 %v5978_v30, %v5916_v41  ;;  %v5443_v36 = vmul.f32 %v14755_v26, %v14755_v26  ;;  %v5373_v58 = vadd.f32 %v5372_v63, %v14755_v26  ;;  %v5919_v29 = vmul.f32 %v14756_v46, %v14756_v46 }
 0x9e1   :  { %v5847_v18 = vadd.f32 %v5846_v53, %v14752_v20  ;;  %v5504_v2 = vadd.f32 %v5503_v0, %v5441_v59  ;;  %v5444_v30 = vmul.f32 %v14757_v4, %v14757_v4  ;;  %v12205_v53 = vpop.f32.mrf.mxu0  ;;  %v5920_v63 = vmul.f32 %v11885_v25, %v11885_v25 }
 0x9e2   :  { %v5980_v33 = vadd.f32 %v5979_v13, %v5917_v43  ;;  %v5374_v59 = vadd.f32 %v5373_v58, %v14757_v4  ;;  %v14758_v13 = vld [vmem:[#allocation105_spill] sm:$0xff]  ;;  %v5921_v58 = vmul.f32 %v11895_v9, %v11895_v9  ;;  %v12225_v20 = vpop.f32.mrf.mxu3 }
 0x9e3   :  { %v5848_v37 = vadd.f32 %v5847_v18, %v14754_v6  ;;  %v5505_v40 = vadd.f32 %v5504_v2, %v5442_v38  ;;  %v5445_v18 = vmul.f32 %v14758_v13, %v14758_v13  ;;  %v12213_v2 = vpop.f32.mrf.mxu1 }
 0x9e4   :  { %v5981_v0 = vadd.f32 %v5980_v33, %v5918_v8  ;;  %v5375_v38 = vadd.f32 %v5374_v59, %v14758_v13  ;;  %v14759_v33 = vld [vmem:[#allocation116_spill] sm:$0xff] }
 0x9e5   :  { %v5849_v56 = vadd.f32 %v5848_v37, %v14756_v46  ;;  %v5506_v43 = vadd.f32 %v5505_v40, %v5443_v36  ;;  %v5446_v37 = vmul.f32 %v14759_v33, %v14759_v33  ;;  %v5922_v46 = vmul.f32 %v11905_v5, %v11905_v5 }
 0x9e6   :  { %v5982_v6 = vadd.f32 %v5981_v0, %v5919_v29  ;;  %v5376_v4 = vadd.f32 %v5375_v38, %v14759_v33  ;;  %v5923_v38 = vmul.f32 %v11914_v47, %v11914_v47 }
 0x9e7   :  { %v12203_v41 = vpop.f32.mrf.mxu2  ;;  %v5850_v26 = vadd.f32 %v5849_v56, %v11885_v25  ;;  %v5507_v8 = vadd.f32 %v5506_v43, %v5444_v30  ;;  %v14760_v56 = vld [vmem:[#allocation44_spill] sm:$0xff] }
 0x9e8   :  { %v5983_v40 = vadd.f32 %v5982_v6, %v5920_v63  ;;  %v5447_v29 = vmul.f32 %v14760_v56, %v14760_v56  ;;  %v5377_v0 = vadd.f32 %v5376_v4, %v14760_v56  ;;  %v14761_v63 = vld [vmem:[#allocation77_spill] sm:$0xff]  ;;  %v5924_v4 = vmul.f32 %v11926_v49, %v11926_v49 }
 0x9e9   :  { %v5851_v36 = vadd.f32 %v5850_v26, %v11895_v9  ;;  %v5508_v59 = vadd.f32 %v5507_v8, %v5445_v18  ;;  %v5448_v26 = vmul.f32 %v14761_v63, %v14761_v63 }
 0x9ea   :  { %v5984_v43 = vadd.f32 %v5983_v40, %v5921_v58  ;;  %v5378_v13 = vadd.f32 %v5377_v0, %v14761_v63  ;;  %v12243_v40 = vpop.f32.mrf.mxu0  ;;  %v5925_v0 = vmul.f32 %v11935_v35, %v11935_v35  ;;  %v12263_v9 = vpop.f32.mrf.mxu3 }
 0x9eb   :  { %v5852_v30 = vadd.f32 %v5851_v36, %v11905_v5  ;;  %v5509_v6 = vadd.f32 %v5508_v59, %v5446_v37  ;;  %v14762_v36 = vld [vmem:[#allocation76_spill] sm:$0xff]  ;;  %v12251_v63 = vpop.f32.mrf.mxu1 }
 0x9ec   :  { %v5985_v18 = vadd.f32 %v5984_v43, %v5922_v46  ;;  %v5449_v58 = vmul.f32 %v14762_v36, %v14762_v36  ;;  %v5379_v37 = vadd.f32 %v5378_v13, %v14762_v36  ;;  %v14763_v43 = vld [vmem:[#allocation131_spill] sm:$0xff]  ;;  %v5926_v13 = vmul.f32 %v11945_v55, %v11945_v55 }
 0x9ed   :  { %v5853_v8 = vadd.f32 %v5852_v30, %v11914_v47  ;;  %v5510_v56 = vadd.f32 %v5509_v6, %v5447_v29  ;;  %v5450_v30 = vmul.f32 %v14763_v43, %v14763_v43 }
 0x9ee   :  { %v5986_v5 = vadd.f32 %v5985_v18, %v5923_v38  ;;  %v5380_v29 = vadd.f32 %v5379_v37, %v14763_v43 }
 0x9ef   :  { %v12235_v33 = vpop.f32.mrf.mxu2  ;;  %v5854_v59 = vadd.f32 %v5853_v8, %v11926_v49  ;;  %v5511_v46 = vadd.f32 %v5510_v56, %v5448_v26  ;;  %v14764_v8 = vld [vmem:[#allocation79_spill] sm:$0xff]  ;;  %v5927_v49 = vmul.f32 %v11952_v42, %v11952_v42 }
 0x9f0   :  { %v5987_v6 = vadd.f32 %v5986_v5, %v5924_v4  ;;  %v5451_v38 = vmul.f32 %v14764_v8, %v14764_v8  ;;  %v5381_v18 = vadd.f32 %v5380_v29, %v14764_v8  ;;  %v14765_v4 = vld [vmem:[#allocation119_spill] sm:$0xff] }
 0x9f1   :  { %v5855_v47 = vadd.f32 %v5854_v59, %v11935_v35  ;;  %v5512_v36 = vadd.f32 %v5511_v46, %v5449_v58  ;;  %v5452_v37 = vmul.f32 %v14765_v4, %v14765_v4  ;;  %v14766_v29 = vld [vmem:[#allocation87_spill] sm:$0xff] }
 0x9f2   :  { %v5988_v56 = vadd.f32 %v5987_v6, %v5925_v0  ;;  %v5382_v58 = vadd.f32 %v5381_v18, %v14765_v4  ;;  %v5928_v0 = vmul.f32 %v11962_v48, %v11962_v48  ;;  %v5453_v6 = vmul.f32 %v14766_v29, %v14766_v29  ;;  %v14767_v18 = vld [vmem:[#allocation84_spill] sm:$0xff] }
 0x9f3   :  { %v5856_v26 = vadd.f32 %v5855_v47, %v11945_v55  ;;  %v5513_v5 = vadd.f32 %v5512_v36, %v5450_v30  ;;  %v5929_v55 = vmul.f32 %v11969_v3, %v11969_v3 }
 0x9f4   :  { %v5989_v46 = vadd.f32 %v5988_v56, %v5926_v13  ;;  %v5383_v8 = vadd.f32 %v5382_v58, %v14766_v29  ;;  %v5454_v13 = vmul.f32 %v14767_v18, %v14767_v18  ;;  %v12281_v56 = vpop.f32.mrf.mxu0  ;;  %v5930_v58 = vmul.f32 %v11979_v21, %v11979_v21  ;;  %v12289_v29 = vpop.f32.mrf.mxu1 }
 0x9f5   :  { %v5857_v43 = vadd.f32 %v5856_v26, %v11952_v42  ;;  %v5514_v47 = vadd.f32 %v5513_v5, %v5451_v38 }
 0x9f6   :  { %v5990_v36 = vadd.f32 %v5989_v46, %v5927_v49  ;;  %v5384_v26 = vadd.f32 %v5383_v8, %v14767_v18  ;;  %v14768_v46 = vld [vmem:[#allocation144_spill] sm:$0xff]  ;;  %v5931_v8 = vmul.f32 %v11986_v27, %v11986_v27 }
 0x9f7   :  { %v12267_v59 = vpop.f32.mrf.mxu2  ;;  %v5858_v30 = vadd.f32 %v5857_v43, %v11962_v48  ;;  %v5515_v35 = vadd.f32 %v5514_v47, %v5452_v37  ;;  %v5455_v43 = vmul.f32 %v14768_v46, %v14768_v46 }
 0x9f8   :  { %v5991_v38 = vadd.f32 %v5990_v36, %v5928_v0  ;;  %v5385_v37 = vadd.f32 %v5384_v26, %v14768_v46  ;;  %v14769_v36 = vld [vmem:[#allocation9_spill] sm:$0xff] }
 0x9f9   :  { %v5859_v5 = vadd.f32 %v5858_v30, %v11969_v3  ;;  %v5516_v49 = vadd.f32 %v5515_v35, %v5453_v6  ;;  %v5456_v30 = vmul.f32 %v14769_v36, %v14769_v36  ;;  %v12300_v6 = vpop.f32.mrf.mxu3 }
 0x9fa   :  { %v5992_v47 = vadd.f32 %v5991_v38, %v5929_v55  ;;  %v5386_v35 = vadd.f32 %v5385_v37, %v14769_v36  ;;  %v5932_v55 = vmul.f32 %v12003_v39, %v12003_v39  ;;  %v14770_v38 = vld [vmem:[#allocation89_spill] sm:$0xff]  ;;  %v5933_v37 = vmul.f32 %v12021_v10, %v12021_v10 }
 0x9fb   :  { %v5860_v4 = vadd.f32 %v5859_v5, %v11979_v21  ;;  %v5517_v0 = vadd.f32 %v5516_v49, %v5454_v13  ;;  %v5457_v5 = vmul.f32 %v14770_v38, %v14770_v38  ;;  %v14771_v21 = vld [vmem:[#allocation152_spill] sm:$0xff] }
 0x9fc   :  { %v5993_v3 = vadd.f32 %v5992_v47, %v5930_v58  ;;  %v5387_v13 = vadd.f32 %v5386_v35, %v14770_v38  ;;  %v5458_v58 = vmul.f32 %v14771_v21, %v14771_v21  ;;  %v14772_v35 = vld [vmem:[#allocation10_spill] sm:$0xff] }
 0x9fd   :  { %v5861_v48 = vadd.f32 %v5860_v4, %v11986_v27  ;;  %v5518_v26 = vadd.f32 %v5517_v0, %v5455_v43  ;;  %v5934_v0 = vmul.f32 %v12039_v11, %v12039_v11 }
 0x9fe   :  { %v5994_v49 = vadd.f32 %v5993_v3, %v5931_v8  ;;  %v5388_v4 = vadd.f32 %v5387_v13, %v14771_v21  ;;  %v5459_v3 = vmul.f32 %v14772_v35, %v14772_v35  ;;  %v5935_v13 = vmul.f32 %v12057_v62, %v12057_v62  ;;  %v12327_v21 = vpop.f32.mrf.mxu1 }
 0x9ff   :  { %v12297_v18 = vpop.f32.mrf.mxu2  ;;  %v5862_v46 = vadd.f32 %v5861_v48, %v12003_v39  ;;  %v5519_v36 = vadd.f32 %v5518_v26, %v5456_v30  ;;  %v12319_v48 = vpop.f32.mrf.mxu0 }
 0xa00   :  { %v5995_v47 = vadd.f32 %v5994_v49, %v5932_v55  ;;  %v5389_v8 = vadd.f32 %v5388_v4, %v14772_v35  ;;  %v14773_v49 = vld [vmem:[#allocation94_spill] sm:$0xff] }
 0xa01   :  { %v5863_v43 = vadd.f32 %v5862_v46, %v12021_v10  ;;  %v5520_v27 = vadd.f32 %v5519_v36, %v5457_v5  ;;  %v5460_v46 = vmul.f32 %v14773_v49, %v14773_v49 }
 0xa02   :  { %v5996_v30 = vadd.f32 %v5995_v47, %v5933_v37  ;;  %v5390_v5 = vadd.f32 %v5389_v8, %v14773_v49  ;;  %v5936_v37 = vmul.f32 %v12085_v15, %v12085_v15  ;;  %v5461_v47 = vmul.f32 %v11880_v52, %v11880_v52 }
 0xa03   :  { %v5864_v26 = vadd.f32 %v5863_v43, %v12039_v11  ;;  %v5521_v55 = vadd.f32 %v5520_v27, %v5458_v58  ;;  %v12338_v58 = vpop.f32.mrf.mxu3  ;;  %v5937_v8 = vmul.f32 %v12113_v50, %v12113_v50 }
 0xa04   :  { %v5997_v38 = vadd.f32 %v5996_v30, %v5934_v0  ;;  %v5391_v27 = vadd.f32 %v5390_v5, %v11880_v52  ;;  %v14775_v30 = vld [vmem:[#allocation102_spill] sm:$0xff]  ;;  %v5938_v5 = vmul.f32 %v12143_v45, %v12143_v45 }
 0xa05   :  { %v5865_v10 = vadd.f32 %v5864_v26, %v12057_v62  ;;  %v5522_v4 = vadd.f32 %v5521_v55, %v5459_v3  ;;  %v5462_v26 = vmul.f32 %v14775_v30, %v14775_v30  ;;  %v14776_v62 = vld [vmem:[#allocation142_spill] sm:$0xff] }
 0xa06   :  { %v5998_v43 = vadd.f32 %v5997_v38, %v5935_v13  ;;  %v5392_v49 = vadd.f32 %v5391_v27, %v14775_v30  ;;  %v5463_v38 = vmul.f32 %v14776_v62, %v14776_v62  ;;  %v14777_v27 = vld [vmem:[#allocation36_spill] sm:$0xff] }
 0xa07   :  { %v12329_v36 = vpop.f32.mrf.mxu2  ;;  %v5866_v35 = vadd.f32 %v5865_v10, %v12085_v15  ;;  %v5523_v0 = vadd.f32 %v5522_v4, %v5460_v46  ;;  %v5939_v4 = vmul.f32 %v12175_v31, %v12175_v31 }
 0xa08   :  { %14774 = vst [vmem:[#allocation11_spill] sm:$0xff] %v12329_v36  ;;  %v5999_v3 = vadd.f32 %v5998_v43, %v5936_v37  ;;  %v5393_v10 = vadd.f32 %v5392_v49, %v14776_v62  ;;  %v5464_v37 = vmul.f32 %v14777_v27, %v14777_v27  ;;  %v12359_v43 = vpop.f32.mrf.mxu0  ;;  %v5940_v49 = vmul.f32 %v12203_v41, %v12203_v41 }
 0xa09   :  { %v5867_v55 = vadd.f32 %v5866_v35, %v12113_v50  ;;  %v5524_v52 = vadd.f32 %v5523_v0, %v5461_v47 }
 0xa0a   :  { %v6000_v13 = vadd.f32 %v5999_v3, %v5937_v8  ;;  %v5394_v47 = vadd.f32 %v5393_v10, %v14777_v27  ;;  %v5465_v3 = vmul.f32 %v11924_v34, %v11924_v34  ;;  %v5941_v10 = vmul.f32 %v12235_v33, %v12235_v33 }
 0xa0b   :  { %v5868_v46 = vadd.f32 %v5867_v55, %v12143_v45  ;;  %v5525_v15 = vadd.f32 %v5524_v52, %v5462_v26  ;;  %v12367_v52 = vpop.f32.mrf.mxu1 }
 0xa0c   :  { %v6001_v0 = vadd.f32 %v6000_v13, %v5938_v5  ;;  %v5395_v26 = vadd.f32 %v5394_v47, %v11924_v34  ;;  %v5466_v13 = vmul.f32 %v11931_v60, %v11931_v60  ;;  %v5942_v47 = vmul.f32 %v12267_v59, %v12267_v59 }
 0xa0d   :  { %v5869_v30 = vadd.f32 %v5868_v46, %v12175_v31  ;;  %v5526_v8 = vadd.f32 %v5525_v15, %v5463_v38  ;;  %v12376_v15 = vpop.f32.mrf.mxu3 }
 0xa0e   :  { %v6002_v55 = vadd.f32 %v6001_v0, %v5939_v4  ;;  %v5396_v46 = vadd.f32 %v5395_v26, %v11931_v60  ;;  %v5943_v26 = vmul.f32 %v12297_v18, %v12297_v18 }
 0xa0f   :  { %v12357_v35 = vpop.f32.mrf.mxu2  ;;  %v5870_v62 = vadd.f32 %v5869_v30, %v12203_v41  ;;  %v5527_v5 = vadd.f32 %v5526_v8, %v5464_v37  ;;  %v5467_v30 = vmul.f32 %v11943_v19, %v11943_v19 }
 0xa10   :  { %v6003_v38 = vadd.f32 %v6002_v55, %v5940_v49  ;;  %v5397_v0 = vadd.f32 %v5396_v46, %v11943_v19  ;;  %v5468_v49 = vmul.f32 %v11950_v12, %v11950_v12  ;;  %v5944_v46 = vmul.f32 %v12329_v36, %v12329_v36 }
 0xa11   :  { %v5871_v27 = vadd.f32 %v5870_v62, %v12235_v33  ;;  %v5528_v4 = vadd.f32 %v5527_v5, %v5465_v3 }
 0xa12   :  { %v6004_v37 = vadd.f32 %v6003_v38, %v5941_v10  ;;  %v5398_v55 = vadd.f32 %v5397_v0, %v11950_v12  ;;  %v12397_v38 = vpop.f32.mrf.mxu0  ;;  %v5945_v0 = vmul.f32 %v12357_v35, %v12357_v35 }
 0xa13   :  { %v5872_v8 = vadd.f32 %v5871_v27, %v12267_v59  ;;  %v5529_v60 = vadd.f32 %v5528_v4, %v5466_v13  ;;  %v5469_v27 = vmul.f32 %v11960_v7, %v11960_v7 }
 0xa14   :  { %v6005_v3 = vadd.f32 %v6004_v37, %v5942_v47  ;;  %v5399_v13 = vadd.f32 %v5398_v55, %v11960_v7  ;;  %v5470_v37 = vmul.f32 %v11967_v61, %v11967_v61 }
 0xa15   :  { %v5873_v5 = vadd.f32 %v5872_v8, %v12297_v18  ;;  %v5530_v10 = vadd.f32 %v5529_v60, %v5467_v30  ;;  %v12405_v8 = vpop.f32.mrf.mxu1 }
 0xa16   :  { %v6006_v4 = vadd.f32 %v6005_v3, %v5943_v26  ;;  %v5400_v60 = vadd.f32 %v5399_v13, %v11967_v61  ;;  %v5471_v3 = vmul.f32 %v11977_v16, %v11977_v16  ;;  %v14781_v61 = vld [vmem:[#allocation112_spill] sm:$0xff] }
 0xa17   :  { %v12389_v62 = vpop.f32.mrf.mxu2  ;;  %v5874_v19 = vadd.f32 %v5873_v5, %v12329_v36  ;;  %v5531_v47 = vadd.f32 %v5530_v10, %v5468_v49  ;;  %v12414_v49 = vpop.f32.mrf.mxu3  ;;  %v14779_v36 = vld [vmem:[#allocation110_spill] sm:$0xff] }
 0xa18   :  { %14778 = vst [vmem:[#allocation42_spill] sm:$0xff] %v12389_v62  ;;  %v6007_v30 = vadd.f32 %v6006_v4, %v5944_v46  ;;  %v5946_v55 = vmul.f32 %v12389_v62, %v12389_v62  ;;  %v5401_v5 = vadd.f32 %v5400_v60, %v11977_v16  ;;  %v5472_v46 = vmul.f32 %v14779_v36, %v14779_v36  ;;  %v14780_v60 = vld [vmem:[#allocation73_spill] sm:$0xff] }
 0xa19   :  { %v5875_v12 = vadd.f32 %v5874_v19, %v12357_v35  ;;  %v5532_v26 = vadd.f32 %v5531_v47, %v5469_v27  ;;  %v4989_v16 = vadd.f32 %v12109_v44, %v14780_v60 }
 0xa1a   :  { %v6008_v10 = vadd.f32 %v6007_v30, %v5945_v0  ;;  %v5402_v19 = vadd.f32 %v5401_v5, %v14779_v36  ;;  %v4992_v5 = vadd.f32 %v12149_v32, %v14781_v61  ;;  %v14783_v32 = vld [vmem:[#allocation75_spill] sm:$0xff] }
 0xa1b   :  { %v5876_v7 = vadd.f32 %v5875_v12, %v12389_v62  ;;  %v5533_v34 = vadd.f32 %v5532_v26, %v5470_v37  ;;  %v5473_v12 = vmul.f32 %v11998_v14, %v11998_v14 }
 0xa1c   :  { %v6009_v4 = vadd.f32 %v6008_v10, %v5946_v55  ;;  %v5403_v37 = vadd.f32 %v5402_v19, %v11998_v14  ;;  %v12434_v10 = vpop.f32.mrf.mxu0  ;;  %v5475_v19 = vmul.f32 %v12034_v1, %v12034_v1  ;;  %v14848_v14 = vld [vmem:[#allocation38_spill] sm:$0xff] }
 0xa1d   :  { %v5534_v0 = vadd.f32 %v5533_v34, %v5471_v3  ;;  %v14782_v3 = vld [vmem:[#allocation163_spill] sm:$0xff]  ;;  %v12442_v61 = vpop.f32.mrf.mxu1 }
 0xa1e   :  { %v5404_v36 = vadd.f32 %v5403_v37, %v12016_v57  ;;  %v4994_v60 = vadd.f32 %v12187_v54, %v14782_v3 }
 0xa1f   :  { %v12419_v13 = vpop.f32.mrf.mxu2  ;;  %v5535_v55 = vadd.f32 %v5534_v0, %v5472_v46  ;;  %v4997_v46 = vadd.f32 %v12225_v20, %v14783_v32 }
 0xa20   :  { %v5877_v27 = vadd.f32 %v5876_v7, %v12419_v13  ;;  %v5947_v47 = vmul.f32 %v12419_v13, %v12419_v13  ;;  %v5474_v7 = vmul.f32 %v12016_v57, %v12016_v57  ;;  %v14846_v57 = vld [vmem:[#allocation18_spill] sm:$0xff] }
 0xa21   :  { %v5536_v62 = vadd.f32 %v5535_v55, %v5473_v12  ;;  %v5161_v12 = vadd.f32 %v12165_v22, %v4992_v5  ;;  %v14785_v55 = vld [vmem:[#allocation114_spill] sm:$0xff] }
 0xa22   :  { %v5878_v30 = vrot.slane %v5877_v27, 4  ;;  %v6010_v26 = vadd.f32 %v6009_v4, %v5947_v47  ;;  %v5158_v4 = vadd.f32 %v12127_v24, %v4989_v16  ;;  %v5405_v47 = vadd.f32 %v5404_v36, %v12034_v1  ;;  %v5011_v24 = vpop.f32.mrf.mxu3  ;;  %v14786_v1 = vld [vmem:[#allocation115_spill] sm:$0xff] }
 0xa23   :  { %v4999_v16 = vadd.f32 %v12263_v9, %v14785_v55 }
 0xa24   :  { %v5879_v44 = vadd.f32 %v5878_v30, %v5877_v27  ;;  %v6011_v34 = vrot.slane %v6010_v26, 4  ;;  %v5537_v27 = vadd.f32 %v5536_v62, %v5474_v7  ;;  %v5476_v30 = vmul.f32 %v12052_v17, %v12052_v17  ;;  %v14788_v7 = vld [vmem:[#allocation34_spill] sm:$0xff] }
 0xa25   :  { %v12450_v54 = vadd.f32 %v12135_v23, %v5158_v4  ;;  %v5406_v3 = vadd.f32 %v5405_v47, %v12052_v17  ;;  %v5477_v62 = vmul.f32 %v14786_v1, %v14786_v1  ;;  %v5163_v23 = vadd.f32 %v12205_v53, %v4994_v60  ;;  %v14844_v17 = vld [vmem:[#allocation15_spill] sm:$0xff] }
 0xa26   :  { %v5880_v0 = vrot.slane %v5879_v44, 2  ;;  %v6012_v37 = vadd.f32 %v6011_v34, %v6010_v26  ;;  %v5538_v36 = vadd.f32 %v5537_v27, %v5475_v19  ;;  %v12459_v26 = vadd.f32 %v12173_v51, %v5161_v12  ;;  %v5180_v51 = vpop.f32.mrf.mxu0  ;;  %v14790_v27 = vld [vmem:[#allocation5_spill] sm:$0xff] }
 0xa27   :  { %14784 = vst [vmem:[#allocation138_spill] sm:$0xff] %v12450_v54  ;;  %v5002_v22 = vadd.f32 %v12300_v6, %v14788_v7  ;;  %v5407_v5 = vadd.f32 %v5406_v3, %v14786_v1  ;;  %v12468_v19 = vadd.f32 %v12213_v2, %v5163_v23  ;;  %v5166_v47 = vadd.f32 %v12243_v40, %v4997_v46  ;;  %v14792_v3 = vld [vmem:[#allocation164_spill] sm:$0xff] }
 0xa28   :  { %v5881_v20 = vadd.f32 %v5880_v0, %v5879_v44  ;;  %v6013_v32 = vrot.slane %v6012_v37, 2  ;;  %14787 = vst [vmem:[#allocation120_spill] sm:$0xff] %v12459_v26  ;;  %v5539_v4 = vadd.f32 %v5538_v36, %v5476_v30  ;;  %v5478_v44 = vmul.f32 %v12450_v54, %v12450_v54  ;;  %v14840_v1 = vld [vmem:[#allocation16_spill] sm:$0xff] }
 0xa29   :  { %14789 = vst [vmem:[#allocation28_spill] sm:$0xff] %v12468_v19  ;;  %v5408_v0 = vadd.f32 %v5407_v5, %v12450_v54  ;;  %v5004_v6 = vadd.f32 %v12338_v58, %v14790_v27  ;;  %v12477_v30 = vadd.f32 %v12251_v63, %v5166_v47  ;;  %v5168_v55 = vadd.f32 %v12281_v56, %v4999_v16  ;;  %v14794_v16 = vld [vmem:[#allocation78_spill] sm:$0xff]  ;;  %v14839_v54 = vld [vmem:[#allocation48_spill] sm:$0xff] }
 0xa2a   :  { %v5882_v9 = vrot.slane %v5881_v20, 1  ;;  %v6014_v34 = vadd.f32 %v6013_v32, %v6012_v37  ;;  %v5540_v12 = vadd.f32 %v5539_v4, %v5477_v62  ;;  %v5479_v37 = vmul.f32 %v12459_v26, %v12459_v26  ;;  %v5349_v62 = vpop.f32.mrf.mxu1 }
 0xa2b   :  { %14791 = vst [vmem:[#allocation21_spill] sm:$0xff] %v12477_v30  ;;  %v5409_v2 = vadd.f32 %v5408_v0, %v12459_v26  ;;  %v5480_v58 = vmul.f32 %v12468_v19, %v12468_v19  ;;  %v5171_v36 = vadd.f32 %v12319_v48, %v5002_v22  ;;  %v12490_v23 = vadd.f32 %v12289_v29, %v5168_v55  ;;  %v14838_v26 = vld [vmem:[#allocation97_spill] sm:$0xff] }
 0xa2c   :  { %v5883_v53 = vadd.f32 %v5882_v9, %v5881_v20  ;;  %v6015_v60 = vrot.slane %v6014_v34, 1  ;;  %v5007_v20 = vadd.f32 %v12376_v15, %v14792_v3  ;;  %v5541_v32 = vadd.f32 %v5540_v12, %v5478_v44  ;;  %v14796_v44 = vld [vmem:[#allocation80_spill] sm:$0xff] }
 0xa2d   :  { %v5410_v63 = vadd.f32 %v5409_v2, %v12468_v19  ;;  %14793 = vst [vmem:[#allocation55_spill] sm:$0xff] %v12490_v23  ;;  %v5009_v5 = vadd.f32 %v12414_v49, %v14794_v16  ;;  %v5481_v9 = vmul.f32 %v12477_v30, %v12477_v30  ;;  %v12500_v22 = vadd.f32 %v12327_v21, %v5171_v36  ;;  %v14837_v19 = vld [vmem:[#allocation91_spill] sm:$0xff] }
 0xa2e   :  { %v6016_v40 = vadd.f32 %v6015_v60, %v6014_v34  ;;  %v12481_v46 = vmul.f32 0.001953125, %v5883_v53  ;;  %v5542_v15 = vadd.f32 %v5541_v32, %v5479_v37  ;;  %v5013_v34 = vpop.f32.mrf.mxu3  ;;  %v5173_v29 = vadd.f32 %v12359_v43, %v5004_v6  ;;  %v14798_v37 = vld [vmem:[#allocation62_spill] sm:$0xff]  ;;  %v5182_v6 = vpop.f32.mrf.mxu0 }
 0xa2f   :  { %v5411_v48 = vadd.f32 %v5410_v63, %v12477_v30  ;;  %14795 = vst [vmem:[#allocation43_spill] sm:$0xff] %v12500_v22  ;;  %v5012_v47 = vadd.f32 %v5011_v24, %v14796_v44  ;;  %v5176_v53 = vadd.f32 %v12397_v38, %v5007_v20  ;;  %v5482_v60 = vmul.f32 %v12490_v23, %v12490_v23  ;;  %v14836_v30 = vld [vmem:[#allocation47_spill] sm:$0xff] }
 0xa30   :  { %v6018_v7 = vmul.f32 0.001953125, %v6016_v40  ;;  %v6019_v56 = vmul.f32 %v12481_v46, %v12481_v46  ;;  %v5543_v0 = vadd.f32 %v5542_v15, %v5480_v58  ;;  %v12509_v27 = vadd.f32 %v12367_v52, %v5173_v29 }
 0xa31   :  { %v5412_v49 = vadd.f32 %v5411_v48, %v12490_v23  ;;  %v5014_v21 = vadd.f32 %v5013_v34, %v14798_v37  ;;  %v5178_v43 = vadd.f32 %v12434_v10, %v5009_v5  ;;  %v5483_v38 = vmul.f32 %v12500_v22, %v12500_v22 }
 0xa32   :  { %v6020_v4 = vsub.f32 %v6018_v7, %v6019_v56  ;;  %14797 = vst [vmem:[#allocation145_spill] sm:$0xff] %v12509_v27  ;;  %v5544_v2 = vadd.f32 %v5543_v0, %v5481_v9  ;;  %v12517_v55 = vadd.f32 %v12405_v8, %v5176_v53  ;;  %v5181_v40 = vadd.f32 %v5180_v51, %v5012_v47  ;;  %v5351_v58 = vpop.f32.mrf.mxu1 }
 0xa33   :  { %v5413_v24 = vadd.f32 %v5412_v49, %v12500_v22  ;;  %v5484_v20 = vmul.f32 %v12509_v27, %v12509_v27  ;;  %v12523_v32 = vadd.f32 %v12442_v61, %v5178_v43  ;;  %v5183_v10 = vadd.f32 %v5182_v6, %v5014_v21  ;;  %v14835_v22 = vld [vmem:[#allocation92_spill] sm:$0xff] }
 0xa34   :  { %v6021_v12 = vadd.f32 1e-05, %v6020_v4  ;;  %14799 = vst [vmem:[#allocation127_spill] sm:$0xff] %v12517_v55  ;;  %v5545_v3 = vadd.f32 %v5544_v2, %v5482_v60  ;;  %v5485_v8 = vmul.f32 %v12517_v55, %v12517_v55  ;;  %v12528_v7 = vadd.f32 %v5349_v62, %v5181_v40  ;;  %v5813_v40 = vld [vmem:[%s13531_s8] sm:$0x1] }
 0xa35   :  { %v5414_v52 = vadd.f32 %v5413_v24, %v12509_v27  ;;  %14800 = vst [vmem:[#allocation165_spill] sm:$0xff] %v12523_v32  ;;  %v5486_v5 = vmul.f32 %v12523_v32, %v12523_v32  ;;  %v12533_v15 = vadd.f32 %v5351_v58, %v5183_v10  ;;  %v14834_v27 = vld [vmem:[#allocation122_spill] sm:$0xff] }
 0xa36   :  { %7139 = vrsqrt.f32 %v6021_v12  ;;  %v5546_v36 = vadd.f32 %v5545_v3, %v5483_v38  ;;  %14801 = vst [vmem:[#allocation12_spill] sm:$0xff] %v12528_v7  ;;  %v5487_v48 = vmul.f32 %v12528_v7, %v12528_v7  ;;  %vm6028_vm4 = vweird.f32 %v6021_v12 }
 0xa37   :  { %v5415_v63 = vadd.f32 %v5414_v52, %v12517_v55  ;;  %v5488_v4 = vmul.f32 %v12533_v15, %v12533_v15  ;;  %v14833_v55 = vld [vmem:[#allocation46_spill] sm:$0xff] }
 0xa38   :  { %v5547_v56 = vadd.f32 %v5546_v36, %v5484_v20 }
 0xa39   :  { %v5416_v16 = vadd.f32 %v5415_v63, %v12523_v32  ;;  %v14832_v32 = vld [vmem:[#allocation137_spill] sm:$0xff] }
 0xa3a   :  { %v5548_v9 = vadd.f32 %v5547_v56, %v5485_v8 }
 0xa3b   :  { %v5417_v34 = vadd.f32 %v5416_v16, %v12528_v7  ;;  %v14829_v7 = vld [vmem:[#allocation7_spill] sm:$0xff] }
 0xa3c   :  { %v7140_v51 = vpop.eup %7139  ;;  %v5549_v29 = vadd.f32 %v5548_v9, %v5486_v5 }
 0xa3d   :  { %v6023_v61 = vmul.f32 %v7140_v51, %v6021_v12  ;;  %v5418_v62 = vadd.f32 %v5417_v34, %v12533_v15  ;;  %vm6029_vm3 = vweird.f32 %v7140_v51 }
 0xa3e   :  { %v5550_v47 = vadd.f32 %v5549_v29, %v5487_v48  ;;  %vm6030_vm5 = vmor %vm6028_vm4, %vm6029_vm3 }
 0xa3f   :  { %v6024_v44 = vmul.f32 %v7140_v51, %v6023_v61  ;;  %v5419_v0 = vrot.slane %v5418_v62, 4 }
 0xa40   :  { %v5551_v53 = vadd.f32 %v5550_v47, %v5488_v4 }
 0xa41   :  { %v6025_v49 = vmul.f32 0.5, %v6024_v44  ;;  %v5420_v60 = vadd.f32 %v5419_v0, %v5418_v62 }
 0xa42   :  { %v5552_v37 = vrot.slane %v5551_v53, 4 }
 0xa43   :  { %v6026_v21 = vsub.f32 1.5, %v6025_v49  ;;  %v5421_v2 = vrot.slane %v5420_v60, 2  ;;  %v14805_v49 = vld [vmem:[#allocation27_spill] sm:$0xff] }
 0xa44   :  { %v5553_v43 = vadd.f32 %v5552_v37, %v5551_v53  ;;  %v14804_v53 = vld [vmem:[#allocation166_spill] sm:$0xff]  ;;  %v14806_v37 = vld [vmem:[#allocation83_spill] sm:$0xff] }
 0xa45   :  { %v6027_v6 = vmul.f32 %v7140_v51, %v6026_v21  ;;  %v5422_v24 = vadd.f32 %v5421_v2, %v5420_v60  ;;  %v14807_v2 = vld [vmem:[#allocation169_spill] sm:$0xff] }
 0xa46   :  { %v5554_v38 = vrot.slane %v5553_v43, 2 }
 0xa47   :  { %v6031_v3 = vsel %vm6030_vm5, %v7140_v51, %v6027_v6  ;;  %v5423_v20 = vrot.slane %v5422_v24, 1  ;;  %v5814_v51 = vld [vmem:[%s13532_s9] sm:$0x1]  ;;  %v14808_v6 = vld [vmem:[#allocation128_spill] sm:$0xff] }
 0xa48   :  { %v6032_v52 = vmul.f32 %v6031_v3, %v5813_v40  ;;  %v5555_v10 = vadd.f32 %v5554_v38, %v5553_v43  ;;  %v14809_v40 = vld [vmem:[#allocation64_spill] sm:$0xff] }
 0xa49   :  { %v5424_v36 = vadd.f32 %v5423_v20, %v5422_v24 }
 0xa4a   :  { %v12544_v58 = vperm.slane %v6032_v52, 0  ;;  %v5556_v63 = vrot.slane %v5555_v10, 1  ;;  %v6033_v61 = vmul.f32 %v6032_v52, %v12481_v46  ;;  %v14810_v52 = vld [vmem:[#allocation88_spill] sm:$0xff] }
 0xa4b   :  { %v12548_v12 = vmul.f32 0.001953125, %v5424_v36 }
 0xa4c   :  { %v6231_v8 = vmul.f32 %v12544_v58, %v12419_v13  ;;  %v5557_v56 = vadd.f32 %v5556_v63, %v5555_v10  ;;  %v6034_v34 = vsub.f32 %v5814_v51, %v6033_v61  ;;  %v12563_v46 = vmul.f32 %v12544_v58, %v14804_v53  ;;  %v14811_v10 = vld [vmem:[#allocation171_spill] sm:$0xff]  ;;  %v14815_v51 = vld [vmem:[#allocation174_spill] sm:$0xff] }
 0xa4d   :  { %v5560_v5 = vmul.f32 %v12548_v12, %v12548_v12  ;;  %v12567_v60 = vmul.f32 %v12544_v58, %v14805_v49  ;;  %v12571_v21 = vmul.f32 %v12544_v58, %v14806_v37  ;;  %v12575_v43 = vmul.f32 %v12544_v58, %v14807_v2  ;;  %v14812_v63 = vld [vmem:[#allocation135_spill] sm:$0xff]  ;;  %v14819_v49 = vld [vmem:[#allocation60_spill] sm:$0xff] }
 0xa4e   :  { %v5559_v16 = vmul.f32 0.001953125, %v5557_v56  ;;  %v12556_v29 = vperm.slane %v6034_v34, 0  ;;  %v12579_v24 = vmul.f32 %v12544_v58, %v14808_v6  ;;  %v12583_v3 = vmul.f32 %v12544_v58, %v14809_v40  ;;  %v14813_v56 = vld [vmem:[#allocation66_spill] sm:$0xff]  ;;  %v14816_v34 = vld [vmem:[#allocation141_spill] sm:$0xff]  ;;  %v14820_v2 = vld [vmem:[#allocation100_spill] sm:$0xff] }
 0xa4f   :  { %v12587_v20 = vmul.f32 %v12544_v58, %v14810_v52  ;;  %v12591_v36 = vmul.f32 %v12544_v58, %v14811_v10  ;;  %v12623_v37 = vmul.f32 %v12544_v58, %v14819_v49  ;;  %v12627_v6 = vmul.f32 %v12544_v58, %v14820_v2  ;;  %v14823_v52 = vld [vmem:[#allocation30_spill] sm:$0xff]  ;;  %v14827_v2 = vld [vmem:[#allocation124_spill] sm:$0xff] }
 0xa50   :  { %v5561_v9 = vsub.f32 %v5559_v16, %v5560_v5  ;;  %14802 = vst [vmem:[#allocation56_spill] sm:$0xff] %v12556_v29  ;;  %v12559_v13 = vadd.f32 %v12556_v29, %v6231_v8  ;;  %v12595_v8 = vmul.f32 %v12544_v58, %v14812_v63  ;;  %v12599_v16 = vmul.f32 %v12544_v58, %v14813_v56  ;;  %v14814_v5 = vld [vmem:[#allocation93_spill] sm:$0xff]  ;;  %v14824_v63 = vld [vmem:[#allocation103_spill] sm:$0xff] }
 0xa51   :  { %v12603_v61 = vmul.f32 %v12544_v58, %v14814_v5  ;;  %v12636_v10 = vmul.f32 %v12544_v58, %v14823_v52  ;;  %v12640_v56 = vmul.f32 %v12544_v58, %v14824_v63  ;;  %v12644_v5 = vmul.f32 %v12544_v58, %v11664_v28  ;;  %v14828_v28 = vld [vmem:[#allocation74_spill] sm:$0xff] }
 0xa52   :  { %v5562_v48 = vadd.f32 1e-05, %v5561_v9  ;;  %14803 = vst [vmem:[#allocation99_spill] sm:$0xff] %v12559_v13  ;;  %v12607_v9 = vmul.f32 %v12544_v58, %v14815_v51  ;;  %v12661_v52 = vmul.f32 %v12544_v58, %v14827_v2  ;;  %v12665_v63 = vmul.f32 %v12544_v58, %v14828_v28  ;;  %v14850_v13 = vld [vmem:[#allocation150_spill] sm:$0xff] }
 0xa53   :  { %v12669_v40 = vmul.f32 %v12544_v58, %v14829_v7  ;;  %v12681_v2 = vmul.f32 %v12544_v58, %v14832_v32  ;;  %v12685_v28 = vmul.f32 %v12544_v58, %v14833_v55  ;;  %v12689_v7 = vmul.f32 %v12544_v58, %v14834_v27 }
 0xa54   :  { %7141 = vrsqrt.f32 %v5562_v48  ;;  %vm5569_vm6 = vweird.f32 %v5562_v48  ;;  %v12701_v32 = vmul.f32 %v12544_v58, %v14837_v19  ;;  %v12705_v55 = vmul.f32 %v12544_v58, %v14838_v26 }
 0xa55   :  { %v12709_v27 = vmul.f32 %v12544_v58, %v14839_v54  ;;  %v12729_v54 = vmul.f32 %v12544_v58, %v14844_v17 }
 0xa57   :  { %14845 = vst [vmem:[#allocation168_spill] sm:$0xff] %v12729_v54  ;;  %v14854_v54 = vld [vmem:[#allocation117_spill] sm:$0xff] }
 0xa5a   :  { %v7142_v62 = vpop.eup %7141 }
 0xa5b   :  { %v5564_v4 = vmul.f32 %v7142_v62, %v5562_v48  ;;  %vm5570_vm7 = vweird.f32 %v7142_v62  ;;  %v5354_v48 = vld [vmem:[%s13533_s5] sm:$0x1] }
 0xa5c   :  { %vm12630_vm8 = vmor %vm5569_vm6, %vm5570_vm7 }
 0xa5d   :  { %v5565_v44 = vmul.f32 %v7142_v62, %v5564_v4  ;;  %v12611_v4 = vmul.f32 %v12544_v58, %v14816_v34  ;;  %v14825_v34 = vld [vmem:[#allocation156_spill] sm:$0xff] }
 0xa5f   :  { %v5566_v47 = vmul.f32 0.5, %v5565_v44  ;;  %v14817_v44 = vld [vmem:[#allocation68_spill] sm:$0xff] }
 0xa61   :  { %v5567_v0 = vsub.f32 1.5, %v5566_v47  ;;  %v12615_v47 = vmul.f32 %v12544_v58, %v14817_v44  ;;  %v12653_v44 = vmul.f32 %v12544_v58, %v14825_v34  ;;  %v14831_v34 = vld [vmem:[#allocation81_spill] sm:$0xff] }
 0xa63   :  { %v5568_v38 = vmul.f32 %v7142_v62, %v5567_v0  ;;  %v14818_v0 = vld [vmem:[#allocation98_spill] sm:$0xff] }
 0xa64   :  { %v12619_v53 = vmul.f32 %v12544_v58, %v14818_v0  ;;  %v14826_v0 = vld [vmem:[#allocation72_spill] sm:$0xff] }
 0xa65   :  { %v5572_v51 = vsel %vm12630_vm8, %v7142_v62, %v5568_v38  ;;  %v12657_v49 = vmul.f32 %v12544_v58, %v14826_v0  ;;  %v14830_v62 = vld [vmem:[#allocation82_spill] sm:$0xff]  ;;  %v12677_v0 = vmul.f32 %v12544_v58, %v14831_v34  ;;  %v12697_v34 = vmul.f32 %v12544_v58, %v14836_v30 }
 0xa66   :  { %v12673_v38 = vmul.f32 %v12544_v58, %v14830_v62  ;;  %v12693_v62 = vmul.f32 %v12544_v58, %v14835_v22  ;;  %v5573_v23 = vmul.f32 %v5572_v51, %v5354_v48  ;;  %v12713_v22 = vmul.f32 %v12544_v58, %v14840_v1  ;;  %v14841_v48 = vld [vmem:[#allocation50_spill] sm:$0xff]  ;;  %v14842_v51 = vld [vmem:[#allocation49_spill] sm:$0xff] }
 0xa67   :  { %v12717_v30 = vmul.f32 %v12544_v58, %v11885_v25  ;;  %v12721_v19 = vmul.f32 %v12544_v58, %v14841_v48  ;;  %v12725_v26 = vmul.f32 %v12544_v58, %v14842_v51  ;;  %v12733_v1 = vmul.f32 %v12544_v58, %v14846_v57 }
 0xa68   :  { %v12737_v25 = vmul.f32 %v12544_v58, %v14848_v14  ;;  %v12741_v48 = vmul.f32 %v12544_v58, %v14850_v13  ;;  %v12745_v51 = vmul.f32 %v12544_v58, %v11952_v42  ;;  %v12753_v57 = vmul.f32 %v12544_v58, %v14854_v54  ;;  %v14855_v14 = vld [vmem:[#allocation33_spill] sm:$0xff]  ;;  %v14856_v13 = vld [vmem:[#allocation40_spill] sm:$0xff] }
 0xa69   :  { %14843 = vst [vmem:[#allocation23_spill] sm:$0xff] %v12725_v26  ;;  %v14852_v26 = vld [vmem:[#allocation52_spill] sm:$0xff]  ;;  %v12766_v42 = vmul.f32 %v12544_v58, %v12003_v39  ;;  %v12777_v54 = vmul.f32 %v12544_v58, %v12039_v11  ;;  %v12797_v11 = vmul.f32 %v12544_v58, %v12175_v31 }
 0xa6a   :  { %14847 = vst [vmem:[#allocation134_spill] sm:$0xff] %v12733_v1  ;;  %v12749_v17 = vmul.f32 %v12544_v58, %v14852_v26  ;;  %v5574_v1 = vmul.f32 %v5573_v23, %v12548_v12  ;;  %v14858_v26 = vld [vmem:[#allocation53_spill] sm:$0xff]  ;;  %v5355_v12 = vld [vmem:[%s13534_s6] sm:$0x1] }
 0xa6b   :  { %14849 = vst [vmem:[#allocation57_spill] sm:$0xff] %v12737_v25  ;;  %v12758_v25 = vmul.f32 %v12544_v58, %v14855_v14  ;;  %v14860_v14 = vld [vmem:[#allocation132_spill] sm:$0xff] }
 0xa6c   :  { %14851 = vst [vmem:[#allocation13_spill] sm:$0xff] %v12741_v48  ;;  %v12762_v48 = vmul.f32 %v12544_v58, %v14856_v13  ;;  %v12781_v13 = vmul.f32 %v12544_v58, %v14860_v14  ;;  %v12801_v14 = vmul.f32 %v12544_v58, %v12203_v41  ;;  %v12821_v41 = vmul.f32 %v12544_v58, %v12357_v35 }
 0xa6d   :  { %14853 = vst [vmem:[#allocation3_spill] sm:$0xff] %v12749_v17  ;;  %v12770_v17 = vmul.f32 %v12544_v58, %v14858_v26  ;;  %v12789_v26 = vmul.f32 %v12544_v58, %v12113_v50  ;;  %v12809_v50 = vmul.f32 %v12544_v58, %v12267_v59  ;;  %v12829_v59 = vadd.f32 %v12556_v29, %v12563_v46 }
 0xa6e   :  { %14857 = vst [vmem:[#allocation25_spill] sm:$0xff] %v12762_v48  ;;  %v14861_v48 = vld [vmem:[#allocation161_spill] sm:$0xff]  ;;  %v12841_v35 = vadd.f32 %v12556_v29, %v12575_v43  ;;  %v12851_v46 = vadd.f32 %v12556_v29, %v12583_v3  ;;  %v12863_v43 = vadd.f32 %v12556_v29, %v12595_v8  ;;  %v12875_v3 = vadd.f32 %v12556_v29, %v12607_v9 }
 0xa6f   :  { %14859 = vst [vmem:[#allocation143_spill] sm:$0xff] %v12770_v17  ;;  %v12785_v39 = vmul.f32 %v12544_v58, %v14861_v48  ;;  %v12793_v17 = vmul.f32 %v12544_v58, %v12143_v45  ;;  %v12805_v48 = vmul.f32 %v12544_v58, %v12235_v33  ;;  %v12813_v45 = vmul.f32 %v12544_v58, %v12297_v18 }
 0xa70   :  { %14863 = vst [vmem:[#allocation45_spill] sm:$0xff] %v12797_v11  ;;  %v5575_v11 = vsub.f32 %v5355_v12, %v5574_v1  ;;  %v12833_v18 = vadd.f32 %v12556_v29, %v12567_v60  ;;  %v12847_v1 = vperm.slane %v5573_v23, 0  ;;  %v12855_v60 = vadd.f32 %v12556_v29, %v12587_v20 }
 0xa71   :  { %14862 = vst [vmem:[#allocation140_spill] sm:$0xff] %v12793_v17  ;;  %v14866_v17 = vld [vmem:[#allocation11_spill] sm:$0xff]  ;;  %v12867_v23 = vadd.f32 %v12556_v29, %v12599_v16  ;;  %v12885_v8 = vadd.f32 %v12556_v29, %v12615_v47  ;;  %v12889_v16 = vadd.f32 %v12556_v29, %v12619_v53  ;;  %v12897_v9 = vadd.f32 %v12556_v29, %v12627_v6 }
 0xa72   :  { %14864 = vst [vmem:[#allocation24_spill] sm:$0xff] %v12801_v14  ;;  %v12817_v31 = vmul.f32 %v12544_v58, %v14866_v17  ;;  %v14869_v14 = vld [vmem:[#allocation42_spill] sm:$0xff]  ;;  %v12837_v17 = vadd.f32 %v12556_v29, %v12571_v21  ;;  %v12859_v21 = vadd.f32 %v12556_v29, %v12591_v36  ;;  %v12877_v20 = vperm.slane %v5575_v11, 0  ;;  %v14871_v11 = vld [vmem:[#allocation23_spill] sm:$0xff] }
 0xa73   :  { %14865 = vst [vmem:[#allocation148_spill] sm:$0xff] %v12813_v45  ;;  %v12825_v33 = vmul.f32 %v12544_v58, %v14869_v14  ;;  %v12845_v58 = vadd.f32 %v12556_v29, %v12579_v24  ;;  %v12871_v24 = vadd.f32 %v12556_v29, %v12603_v61  ;;  %v12881_v36 = vadd.f32 %v12556_v29, %v12611_v4  ;;  %v14872_v14 = vld [vmem:[#allocation168_spill] sm:$0xff] }
 0xa74   :  { %14867 = vst [vmem:[#allocation14_spill] sm:$0xff] %v12817_v31  ;;  %v12893_v61 = vadd.f32 %v12556_v29, %v12623_v37  ;;  %v12901_v4 = vadd.f32 %v12556_v29, %v12636_v10  ;;  %v12905_v47 = vadd.f32 %v12556_v29, %v12640_v56  ;;  %v6099_v53 = vmul.f32 %v12847_v1, %v12533_v15  ;;  %v14880_v31 = vld [vmem:[#allocation3_spill] sm:$0xff] }
 0xa75   :  { %14868 = vst [vmem:[#allocation151_spill] sm:$0xff] %v12821_v41  ;;  %v12911_v12 = vadd.f32 %v12556_v29, %v12644_v5  ;;  %v12915_v37 = vadd.f32 %v12556_v29, %v12653_v44  ;;  %v12919_v6 = vadd.f32 %v12556_v29, %v12657_v49  ;;  %v12923_v10 = vadd.f32 %v12556_v29, %v12661_v52  ;;  %v14877_v41 = vld [vmem:[#allocation13_spill] sm:$0xff] }
 0xa76   :  { %14870 = vst [vmem:[#allocation58_spill] sm:$0xff] %v12825_v33  ;;  %v12927_v56 = vadd.f32 %v12556_v29, %v12665_v63  ;;  %v12931_v15 = vadd.f32 %v12556_v29, %v12669_v40  ;;  %v12935_v5 = vadd.f32 %v12556_v29, %v12673_v38  ;;  %v12938_v44 = vadd.f32 %v12877_v20, %v6099_v53  ;;  %v14873_v53 = vld [vmem:[#allocation134_spill] sm:$0xff]  ;;  %v14875_v33 = vld [vmem:[#allocation57_spill] sm:$0xff] }
 0xa77   :  { %v12942_v49 = vadd.f32 %v12556_v29, %v12677_v0  ;;  %v12946_v52 = vadd.f32 %v12556_v29, %v12681_v2  ;;  %v12950_v63 = vadd.f32 %v12556_v29, %v12685_v28  ;;  %v12954_v40 = vadd.f32 %v12556_v29, %v12689_v7  ;;  %v14884_v45 = vld [vmem:[#allocation25_spill] sm:$0xff] }
 0xa78   :  { %v12958_v38 = vadd.f32 %v12556_v29, %v12693_v62  ;;  %v12962_v0 = vadd.f32 %v12556_v29, %v12697_v34  ;;  %v12966_v2 = vadd.f32 %v12556_v29, %v12701_v32  ;;  %v12970_v28 = vadd.f32 %v12556_v29, %v12705_v55 }
 0xa79   :  { %v12974_v7 = vadd.f32 %v12556_v29, %v12709_v27  ;;  %v12978_v62 = vadd.f32 %v12556_v29, %v12713_v22  ;;  %v12982_v34 = vadd.f32 %v12556_v29, %v12717_v30  ;;  %v12986_v32 = vadd.f32 %v12556_v29, %v12721_v19 }
 0xa7a   :  { %v12990_v55 = vadd.f32 %v12556_v29, %v14871_v11  ;;  %v12994_v27 = vadd.f32 %v12556_v29, %v14872_v14  ;;  %v12998_v22 = vadd.f32 %v12556_v29, %v14873_v53  ;;  %v13002_v30 = vadd.f32 %v12556_v29, %v14875_v33 }
 0xa7b   :  { %v13006_v19 = vadd.f32 %v12556_v29, %v14877_v41  ;;  %v13010_v11 = vadd.f32 %v12556_v29, %v12745_v51  ;;  %v13014_v14 = vadd.f32 %v12556_v29, %v14880_v31  ;;  %v13018_v53 = vadd.f32 %v12556_v29, %v12753_v57 }
 0xa7c   :  { %14874 = vst [vmem:[#allocation8_spill] sm:$0xff] %v12998_v22  ;;  %v13022_v33 = vadd.f32 %v12556_v29, %v12758_v25  ;;  %v13026_v41 = vadd.f32 %v12556_v29, %v14884_v45  ;;  %v13030_v51 = vadd.f32 %v12556_v29, %v12766_v42  ;;  %v13038_v57 = vadd.f32 %v12556_v29, %v12777_v54  ;;  %v14892_v45 = vld [vmem:[#allocation167_spill] sm:$0xff] }
 0xa7d   :  { %14876 = vst [vmem:[#allocation37_spill] sm:$0xff] %v13002_v30  ;;  %v13048_v42 = vadd.f32 %v12556_v29, %v12781_v13  ;;  %v13056_v54 = vadd.f32 %v12556_v29, %v12789_v26  ;;  %v14910_v30 = vld [vmem:[#allocation31_spill] sm:$0xff] }
 0xa7e   :  { %14878 = vst [vmem:[#allocation173_spill] sm:$0xff] %v13006_v19  ;;  %v14912_v22 = vld [vmem:[#allocation139_spill] sm:$0xff] }
 0xa7f   :  { %14879 = vst [vmem:[#allocation175_spill] sm:$0xff] %v13010_v11  ;;  %v14887_v11 = vld [vmem:[#allocation143_spill] sm:$0xff] }
 0xa80   :  { %14881 = vst [vmem:[#allocation86_spill] sm:$0xff] %v13014_v14  ;;  %v13034_v31 = vadd.f32 %v12556_v29, %v14887_v11  ;;  %v13052_v11 = vadd.f32 %v12556_v29, %v12785_v39 }
 0xa81   :  { %14882 = vst [vmem:[#allocation61_spill] sm:$0xff] %v13018_v53  ;;  %v14890_v53 = vld [vmem:[#allocation118_spill] sm:$0xff] }
 0xa82   :  { %14883 = vst [vmem:[#allocation26_spill] sm:$0xff] %v13022_v33  ;;  %v6036_v25 = vmul.f32 %v12847_v1, %v14890_v53  ;;  %v14891_v33 = vld [vmem:[#allocation121_spill] sm:$0xff] }
 0xa83   :  { %14885 = vst [vmem:[#allocation6_spill] sm:$0xff] %v13026_v41  ;;  %v6037_v14 = vmul.f32 %v12847_v1, %v14891_v33  ;;  %v6038_v41 = vmul.f32 %v12847_v1, %v14892_v45 }
 0xa84   :  { %14886 = vst [vmem:[#allocation59_spill] sm:$0xff] %v13030_v51  ;;  %v6103_v45 = vadd.f32 %v12877_v20, %v6036_v25 }
 0xa85   :  { %14888 = vst [vmem:[#allocation129_spill] sm:$0xff] %v13034_v31  ;;  %v14897_v31 = vld [vmem:[#allocation85_spill] sm:$0xff]  ;;  %v6104_v51 = vadd.f32 %v12877_v20, %v6037_v14  ;;  %v6105_v13 = vadd.f32 %v12877_v20, %v6038_v41  ;;  %v13082_v14 = vadd.f32 %v12556_v29, %v12805_v48  ;;  %v14906_v41 = vld [vmem:[#allocation170_spill] sm:$0xff] }
 0xa86   :  { %14889 = vst [vmem:[#allocation63_spill] sm:$0xff] %v13038_v57  ;;  %v14896_v57 = vld [vmem:[#allocation126_spill] sm:$0xff]  ;;  %v6040_v33 = vmul.f32 %v12847_v1, %v14897_v31  ;;  %v14903_v31 = vld [vmem:[#allocation24_spill] sm:$0xff] }
 0xa87   :  { %14893 = vst [vmem:[#allocation159_spill] sm:$0xff] %v13048_v42  ;;  %v6039_v53 = vmul.f32 %v12847_v1, %v14896_v57  ;;  %v14898_v42 = vld [vmem:[#allocation140_spill] sm:$0xff]  ;;  %v13078_v25 = vadd.f32 %v12556_v29, %v14903_v31 }
 0xa88   :  { %14894 = vst [vmem:[#allocation155_spill] sm:$0xff] %v13052_v11  ;;  %v13067_v39 = vadd.f32 %v12556_v29, %v14898_v42  ;;  %v14900_v11 = vld [vmem:[#allocation45_spill] sm:$0xff]  ;;  %v6042_v42 = vmul.f32 %v12847_v1, %v14906_v41  ;;  %v6300_v41 = vadd.f32 %v12833_v18, %v6104_v51 }
 0xa89   :  { %14895 = vst [vmem:[#allocation157_spill] sm:$0xff] %v13056_v54  ;;  %v13071_v26 = vadd.f32 %v12556_v29, %v14900_v11  ;;  %v14902_v54 = vld [vmem:[#allocation29_spill] sm:$0xff]  ;;  %v6106_v19 = vadd.f32 %v12877_v20, %v6039_v53  ;;  %v13089_v11 = vadd.f32 %v12556_v29, %v12809_v50  ;;  %v6045_v50 = vmul.f32 %v12847_v1, %v14910_v30 }
 0xa8a   :  { %14899 = vst [vmem:[#allocation96_spill] sm:$0xff] %v13067_v39  ;;  %v6041_v57 = vmul.f32 %v12847_v1, %v14902_v54  ;;  %v6107_v39 = vadd.f32 %v12877_v20, %v6040_v33  ;;  %v14908_v54 = vld [vmem:[#allocation133_spill] sm:$0xff]  ;;  %v6109_v48 = vadd.f32 %v12877_v20, %v6042_v42  ;;  %v6301_v33 = vadd.f32 %v12837_v17, %v6105_v13  ;;  %v14913_v42 = vld [vmem:[#allocation95_spill] sm:$0xff] }
 0xa8b   :  { %14901 = vst [vmem:[#allocation65_spill] sm:$0xff] %v13071_v26  ;;  %v6043_v53 = vmul.f32 %v12847_v1, %v14908_v54  ;;  %v14909_v26 = vld [vmem:[#allocation90_spill] sm:$0xff]  ;;  %v6112_v51 = vadd.f32 %v12877_v20, %v6045_v50  ;;  %v14914_v13 = vld [vmem:[#allocation99_spill] sm:$0xff] }
 0xa8c   :  { %14904 = vst [vmem:[#allocation4_spill] sm:$0xff] %v13078_v25  ;;  %v6044_v31 = vmul.f32 %v12847_v1, %v14909_v26  ;;  %v6108_v25 = vadd.f32 %v12877_v20, %v6041_v57  ;;  %v6302_v26 = vadd.f32 %v12841_v35, %v6106_v19  ;;  %v6047_v57 = vmul.f32 %v12847_v1, %v14912_v22 }
 0xa8d   :  { %14905 = vst [vmem:[#allocation101_spill] sm:$0xff] %v13082_v14  ;;  %v6299_v14 = vadd.f32 %v12829_v59, %v6103_v45  ;;  %v6110_v54 = vadd.f32 %v12877_v20, %v6043_v53  ;;  %v6048_v59 = vmul.f32 %v12847_v1, %v14913_v42  ;;  %v6303_v17 = vadd.f32 %v12845_v58, %v6107_v39  ;;  %v14915_v42 = vld [vmem:[#allocation32_spill] sm:$0xff] }
 0xa8e   :  { %14907 = vst [vmem:[#allocation67_spill] sm:$0xff] %v13089_v11  ;;  %v14911_v11 = vld [vmem:[#allocation172_spill] sm:$0xff]  ;;  %v6111_v18 = vadd.f32 %v12877_v20, %v6044_v31  ;;  %v6304_v45 = vadd.f32 %v12851_v46, %v6108_v25  ;;  %v6305_v35 = vadd.f32 %v12855_v60, %v6109_v48  ;;  %v6364_v19 = vmax.f32 %v6300_v41, 0.0  ;;  %v14917_v60 = vld [vmem:[#allocation146_spill] sm:$0xff] }
 0xa8f   :  { %v6046_v29 = vmul.f32 %v12847_v1, %v14911_v11  ;;  %v13117_v11 = vadd.f32 %v14914_v13, %v12938_v44  ;;  %v6363_v22 = vmax.f32 %v6299_v14, 0.0  ;;  %v6365_v53 = vmax.f32 %v6301_v33, 0.0  ;;  %v14918_v33 = vld [vmem:[#allocation177_spill] sm:$0xff] }
 0xa90   :  { %v6049_v31 = vmul.f32 %v12847_v1, %v14915_v42  ;;  %v6114_v58 = vadd.f32 %v12877_v20, %v6047_v57  ;;  %v6306_v39 = vadd.f32 %v12859_v21, %v6110_v54  ;;  %v6366_v50 = vmax.f32 %v6302_v26, 0.0  ;;  %6428 = vst [vmem:[%s13535_s10 + $0x8] sm:$0xff] %v6364_v19  ;;  %v14921_v19 = vld [vmem:[#allocation153_spill] sm:$0xff] }
 0xa91   :  { %v6113_v30 = vadd.f32 %v12877_v20, %v6046_v29  ;;  %v14916_v29 = vld [vmem:[#allocation176_spill] sm:$0xff]  ;;  %v6115_v25 = vadd.f32 %v12877_v20, %v6048_v59  ;;  %v6307_v44 = vadd.f32 %v12863_v43, %v6111_v18  ;;  %v6367_v13 = vmax.f32 %v6303_v17, 0.0  ;;  %6427 = vst [vmem:[%s13535_s10] sm:$0xff] %v6363_v22  ;;  %v14919_v59 = vld [vmem:[#allocation149_spill] sm:$0xff] }
 0xa92   :  { %v6050_v46 = vmul.f32 %v12847_v1, %v14916_v29  ;;  %v6051_v14 = vmul.f32 %v12847_v1, %v14917_v60  ;;  %v6116_v48 = vadd.f32 %v12877_v20, %v6049_v31  ;;  %v6308_v21 = vadd.f32 %v12867_v23, %v6112_v51  ;;  %6429 = vst [vmem:[%s13535_s10 + $0x10] sm:$0xff] %v6365_v53  ;;  %v14924_v60 = vld [vmem:[#allocation44_spill] sm:$0xff] }
 0xa93   :  { %v6368_v41 = vmax.f32 %v6304_v45, 0.0  ;;  %v6052_v43 = vmul.f32 %v12847_v1, %v14918_v33  ;;  %v6309_v26 = vadd.f32 %v12871_v24, %v6113_v30  ;;  %v6369_v57 = vmax.f32 %v6305_v35, 0.0  ;;  %6430 = vst [vmem:[%s13535_s10 + $0x18] sm:$0xff] %v6366_v50  ;;  %v14920_v45 = vld [vmem:[#allocation69_spill] sm:$0xff] }
 0xa94   :  { %v6117_v54 = vadd.f32 %v12877_v20, %v6050_v46  ;;  %v6053_v23 = vmul.f32 %v12847_v1, %v14919_v59  ;;  %v6118_v18 = vadd.f32 %v12877_v20, %v6051_v14  ;;  %v6310_v17 = vadd.f32 %v12875_v3, %v6114_v58  ;;  %6431 = vst [vmem:[%s13535_s10 + $0x20] sm:$0xff] %v6367_v13  ;;  %v14922_v58 = vld [vmem:[#allocation105_spill] sm:$0xff]  ;;  %v14923_v46 = vld [vmem:[#allocation116_spill] sm:$0xff] }
 0xa95   :  { %v6370_v51 = vmax.f32 %v6306_v39, 0.0  ;;  %v6054_v24 = vmul.f32 %v12847_v1, %v14920_v45  ;;  %v6119_v30 = vadd.f32 %v12877_v20, %v6052_v43  ;;  %v6311_v35 = vadd.f32 %v12881_v36, %v6115_v25  ;;  %6432 = vst [vmem:[%s13535_s10 + $0x28] sm:$0xff] %v6368_v41  ;;  %v14925_v41 = vld [vmem:[#allocation77_spill] sm:$0xff] }
 0xa96   :  { %v6371_v22 = vmax.f32 %v6307_v44, 0.0  ;;  %v6055_v3 = vmul.f32 %v12847_v1, %v14921_v19  ;;  %v6120_v53 = vadd.f32 %v12877_v20, %v6053_v23  ;;  %v6312_v42 = vadd.f32 %v12885_v8, %v6116_v48  ;;  %6433 = vst [vmem:[%s13535_s10 + $0x30] sm:$0xff] %v6369_v57  ;;  %v14929_v19 = vld [vmem:[#allocation119_spill] sm:$0xff] }
 0xa97   :  { %v6372_v31 = vmax.f32 %v6308_v21, 0.0  ;;  %v6056_v36 = vmul.f32 %v12847_v1, %v14922_v58  ;;  %v6121_v39 = vadd.f32 %v12877_v20, %v6054_v24  ;;  %v6313_v50 = vadd.f32 %v12889_v16, %v6117_v54  ;;  %6434 = vst [vmem:[%s13535_s10 + $0x38] sm:$0xff] %v6370_v51  ;;  %v14928_v24 = vld [vmem:[#allocation79_spill] sm:$0xff] }
 0xa98   :  { %v6373_v29 = vmax.f32 %v6309_v26, 0.0  ;;  %v6057_v8 = vmul.f32 %v12847_v1, %v14923_v46  ;;  %v6122_v25 = vadd.f32 %v12877_v20, %v6055_v3  ;;  %v6314_v44 = vadd.f32 %v12893_v61, %v6118_v18  ;;  %6435 = vst [vmem:[%s13535_s10 + $0x40] sm:$0xff] %v6371_v22  ;;  %v14926_v26 = vld [vmem:[#allocation76_spill] sm:$0xff]  ;;  %v14927_v18 = vld [vmem:[#allocation131_spill] sm:$0xff] }
 0xa99   :  { %v6374_v13 = vmax.f32 %v6310_v17, 0.0  ;;  %v6058_v16 = vmul.f32 %v12847_v1, %v14924_v60  ;;  %v6123_v14 = vadd.f32 %v12877_v20, %v6056_v36  ;;  %v6315_v48 = vadd.f32 %v12897_v9, %v6119_v30  ;;  %6436 = vst [vmem:[%s13535_s10 + $0x48] sm:$0xff] %v6372_v31  ;;  %v14930_v31 = vld [vmem:[#allocation87_spill] sm:$0xff] }
 0xa9a   :  { %v6375_v21 = vmax.f32 %v6311_v35, 0.0  ;;  %v6059_v61 = vmul.f32 %v12847_v1, %v14925_v41  ;;  %v6124_v33 = vadd.f32 %v12877_v20, %v6057_v8  ;;  %v6316_v43 = vadd.f32 %v12901_v4, %v6120_v53  ;;  %6437 = vst [vmem:[%s13535_s10 + $0x50] sm:$0xff] %v6373_v29  ;;  %v14934_v41 = vld [vmem:[#allocation89_spill] sm:$0xff] }
 0xa9b   :  { %v6376_v54 = vmax.f32 %v6312_v42, 0.0  ;;  %v6060_v9 = vmul.f32 %v12847_v1, %v14926_v26  ;;  %v6125_v57 = vadd.f32 %v12877_v20, %v6058_v16  ;;  %v6317_v59 = vadd.f32 %v12905_v47, %v6121_v39  ;;  %6438 = vst [vmem:[%s13535_s10 + $0x58] sm:$0xff] %v6374_v13  ;;  %v14933_v16 = vld [vmem:[#allocation9_spill] sm:$0xff] }
 0xa9c   :  { %v6377_v23 = vmax.f32 %v6313_v50, 0.0  ;;  %v6061_v4 = vmul.f32 %v12847_v1, %v14927_v18  ;;  %v6126_v17 = vadd.f32 %v12877_v20, %v6059_v61  ;;  %v6318_v51 = vadd.f32 %v12911_v12, %v6122_v25  ;;  %6439 = vst [vmem:[%s13535_s10 + $0x60] sm:$0xff] %v6375_v21  ;;  %v14931_v50 = vld [vmem:[#allocation84_spill] sm:$0xff] }
 0xa9d   :  { %v6378_v45 = vmax.f32 %v6314_v44, 0.0  ;;  %v6062_v47 = vmul.f32 %v12847_v1, %v14928_v24  ;;  %v6127_v30 = vadd.f32 %v12877_v20, %v6060_v9  ;;  %v6319_v35 = vadd.f32 %v12915_v37, %v6123_v14  ;;  %6440 = vst [vmem:[%s13535_s10 + $0x68] sm:$0xff] %v6376_v54  ;;  %v14932_v25 = vld [vmem:[#allocation144_spill] sm:$0xff] }
 0xa9e   :  { %v6379_v22 = vmax.f32 %v6315_v48, 0.0  ;;  %v6063_v12 = vmul.f32 %v12847_v1, %v14929_v19  ;;  %v6128_v3 = vadd.f32 %v12877_v20, %v6061_v4  ;;  %v6320_v53 = vadd.f32 %v12919_v6, %v6124_v33  ;;  %6441 = vst [vmem:[%s13535_s10 + $0x70] sm:$0xff] %v6377_v23  ;;  %v14935_v54 = vld [vmem:[#allocation152_spill] sm:$0xff]  ;;  %v14939_v19 = vld [vmem:[#allocation102_spill] sm:$0xff] }
 0xa9f   :  { %v6380_v42 = vmax.f32 %v6316_v43, 0.0  ;;  %v6064_v37 = vmul.f32 %v12847_v1, %v14930_v31  ;;  %v6129_v58 = vadd.f32 %v12877_v20, %v6062_v47  ;;  %v6321_v36 = vadd.f32 %v12923_v10, %v6125_v57  ;;  %6442 = vst [vmem:[%s13535_s10 + $0x78] sm:$0xff] %v6378_v45  ;;  %v14938_v47 = vld [vmem:[#allocation35_spill] sm:$0xff] }
 0xaa0   :  { %v6381_v39 = vmax.f32 %v6317_v59, 0.0  ;;  %v6065_v6 = vmul.f32 %v12847_v1, %v14931_v50  ;;  %v6130_v29 = vadd.f32 %v12877_v20, %v6063_v12  ;;  %v6322_v46 = vadd.f32 %v12927_v56, %v6126_v17  ;;  %6443 = vst [vmem:[%s13535_s10 + $0x80] sm:$0xff] %v6379_v22  ;;  %v14936_v59 = vld [vmem:[#allocation10_spill] sm:$0xff] }
 0xaa1   :  { %v6382_v8 = vmax.f32 %v6318_v51, 0.0  ;;  %v6066_v10 = vmul.f32 %v12847_v1, %v14932_v25  ;;  %v6131_v44 = vadd.f32 %v12877_v20, %v6064_v37  ;;  %v6323_v13 = vadd.f32 %v12931_v15, %v6127_v30  ;;  %6444 = vst [vmem:[%s13535_s10 + $0x88] sm:$0xff] %v6380_v42  ;;  %v14937_v17 = vld [vmem:[#allocation94_spill] sm:$0xff] }
 0xaa2   :  { %v6383_v60 = vmax.f32 %v6319_v35, 0.0  ;;  %v6067_v56 = vmul.f32 %v12847_v1, %v14933_v16  ;;  %v6132_v14 = vadd.f32 %v12877_v20, %v6065_v6  ;;  %v6324_v48 = vadd.f32 %v12935_v5, %v6128_v3  ;;  %6445 = vst [vmem:[%s13535_s10 + $0x90] sm:$0xff] %v6381_v39  ;;  %v14940_v42 = vld [vmem:[#allocation142_spill] sm:$0xff]  ;;  %v14944_v16 = vld [vmem:[#allocation111_spill] sm:$0xff] }
 0xaa3   :  { %v6384_v21 = vmax.f32 %v6320_v53, 0.0  ;;  %v6068_v15 = vmul.f32 %v12847_v1, %v14934_v41  ;;  %v6133_v61 = vadd.f32 %v12877_v20, %v6066_v10  ;;  %v6325_v33 = vadd.f32 %v12942_v49, %v6129_v58  ;;  %6446 = vst [vmem:[%s13535_s10 + $0x98] sm:$0xff] %v6382_v8  ;;  %v14943_v10 = vld [vmem:[#allocation51_spill] sm:$0xff] }
 0xaa4   :  { %v6385_v43 = vmax.f32 %v6321_v36, 0.0  ;;  %v6069_v5 = vmul.f32 %v12847_v1, %v14935_v54  ;;  %v6134_v26 = vadd.f32 %v12877_v20, %v6067_v56  ;;  %v6326_v9 = vadd.f32 %v12946_v52, %v6130_v29  ;;  %6447 = vst [vmem:[%s13535_s10 + $0xa0] sm:$0xff] %v6383_v60  ;;  %v14941_v36 = vld [vmem:[#allocation36_spill] sm:$0xff]  ;;  %v14942_v29 = vld [vmem:[#allocation147_spill] sm:$0xff] }
 0xaa5   :  { %v6386_v57 = vmax.f32 %v6322_v46, 0.0  ;;  %v6070_v49 = vmul.f32 %v12847_v1, %v14936_v59  ;;  %v6135_v23 = vadd.f32 %v12877_v20, %v6068_v15  ;;  %v6327_v18 = vadd.f32 %v12950_v63, %v6131_v44  ;;  %6448 = vst [vmem:[%s13535_s10 + $0xa8] sm:$0xff] %v6384_v21  ;;  %v14945_v21 = vld [vmem:[#allocation106_spill] sm:$0xff] }
 0xaa6   :  { %v6387_v4 = vmax.f32 %v6323_v13, 0.0  ;;  %v6071_v52 = vmul.f32 %v12847_v1, %v14937_v17  ;;  %v6136_v51 = vadd.f32 %v12877_v20, %v6069_v5  ;;  %v6328_v45 = vadd.f32 %v12954_v40, %v6132_v14  ;;  %6449 = vst [vmem:[%s13535_s10 + $0xb0] sm:$0xff] %v6385_v43 }
 0xaa7   :  { %v6388_v24 = vmax.f32 %v6324_v48, 0.0  ;;  %v6072_v63 = vmul.f32 %v12847_v1, %v14938_v47  ;;  %v6137_v30 = vadd.f32 %v12877_v20, %v6070_v49  ;;  %v6329_v35 = vadd.f32 %v12958_v38, %v6133_v61  ;;  %6450 = vst [vmem:[%s13535_s10 + $0xb8] sm:$0xff] %v6386_v57  ;;  %v14948_v49 = vld [vmem:[#allocation108_spill] sm:$0xff] }
 0xaa8   :  { %v6389_v22 = vmax.f32 %v6325_v33, 0.0  ;;  %v6073_v40 = vmul.f32 %v12847_v1, %v14939_v19  ;;  %v6138_v12 = vadd.f32 %v12877_v20, %v6071_v52  ;;  %v6330_v3 = vadd.f32 %v12962_v0, %v6134_v26  ;;  %6451 = vst [vmem:[%s13535_s10 + $0xc0] sm:$0xff] %v6387_v4  ;;  %v14946_v33 = vld [vmem:[#allocation154_spill] sm:$0xff]  ;;  %v14947_v26 = vld [vmem:[#allocation39_spill] sm:$0xff] }
 0xaa9   :  { %v6390_v53 = vmax.f32 %v6326_v9, 0.0  ;;  %v6074_v38 = vmul.f32 %v12847_v1, %v14940_v42  ;;  %v6139_v31 = vadd.f32 %v12877_v20, %v6072_v63  ;;  %v6331_v37 = vadd.f32 %v12966_v2, %v6135_v23  ;;  %6452 = vst [vmem:[%s13535_s10 + $0xc8] sm:$0xff] %v6388_v24  ;;  %v14950_v52 = vld [vmem:[#allocation110_spill] sm:$0xff]  ;;  %v14952_v63 = vld [vmem:[#allocation125_spill] sm:$0xff]  ;;  %v14955_v42 = vld [vmem:[#allocation175_spill] sm:$0xff] }
 0xaaa   :  { %v6391_v58 = vmax.f32 %v6327_v18, 0.0  ;;  %v6075_v0 = vmul.f32 %v12847_v1, %v14941_v36  ;;  %v6140_v39 = vadd.f32 %v12877_v20, %v6073_v40  ;;  %v6332_v50 = vadd.f32 %v12970_v28, %v6136_v51  ;;  %6453 = vst [vmem:[%s13535_s10 + $0xd0] sm:$0xff] %v6389_v22  ;;  %v14949_v18 = vld [vmem:[#allocation8_spill] sm:$0xff]  ;;  %v14953_v22 = vld [vmem:[#allocation173_spill] sm:$0xff] }
 0xaab   :  { %v6392_v6 = vmax.f32 %v6328_v45, 0.0  ;;  %v6076_v2 = vmul.f32 %v12847_v1, %v14942_v29  ;;  %v6141_v46 = vadd.f32 %v12877_v20, %v6074_v38  ;;  %v6333_v8 = vadd.f32 %v12974_v7, %v6137_v30  ;;  %6454 = vst [vmem:[%s13535_s10 + $0xd8] sm:$0xff] %v6390_v53  ;;  %v14951_v45 = vld [vmem:[#allocation37_spill] sm:$0xff] }
 0xaac   :  { %v6393_v25 = vmax.f32 %v6329_v35, 0.0  ;;  %v6077_v28 = vmul.f32 %v12847_v1, %v14943_v10  ;;  %v6142_v44 = vadd.f32 %v12877_v20, %v6075_v0  ;;  %v6334_v13 = vadd.f32 %v12978_v62, %v6138_v12  ;;  %6455 = vst [vmem:[%s13535_s10 + $0xe0] sm:$0xff] %v6391_v58  ;;  %v14954_v12 = vld [vmem:[#allocation19_spill] sm:$0xff]  ;;  %v14957_v0 = vld [vmem:[#allocation86_spill] sm:$0xff] }
 0xaad   :  { %v6394_v60 = vmax.f32 %v6330_v3, 0.0  ;;  %v6078_v7 = vmul.f32 %v12847_v1, %v14944_v16  ;;  %v6143_v56 = vadd.f32 %v12877_v20, %v6076_v2  ;;  %v6335_v14 = vadd.f32 %v12982_v34, %v6139_v31  ;;  %6456 = vst [vmem:[%s13535_s10 + $0xe8] sm:$0xff] %v6392_v6  ;;  %v14958_v6 = vld [vmem:[#allocation41_spill] sm:$0xff]  ;;  %v14960_v10 = vld [vmem:[#allocation115_spill] sm:$0xff] }
 0xaae   :  { %v6395_v48 = vmax.f32 %v6331_v37, 0.0  ;;  %v6079_v62 = vmul.f32 %v12847_v1, %v14945_v21  ;;  %v6144_v41 = vadd.f32 %v12877_v20, %v6077_v28  ;;  %v6336_v15 = vadd.f32 %v12986_v32, %v6140_v39  ;;  %6457 = vst [vmem:[%s13535_s10 + $0xf0] sm:$0xff] %v6393_v25  ;;  %v14956_v37 = vld [vmem:[#allocation113_spill] sm:$0xff] }
 0xaaf   :  { %v6396_v61 = vmax.f32 %v6332_v50, 0.0  ;;  %v6080_v34 = vmul.f32 %v12847_v1, %v14946_v33  ;;  %v6145_v43 = vadd.f32 %v12877_v20, %v6078_v7  ;;  %v6337_v54 = vadd.f32 %v12990_v55, %v6141_v46  ;;  %6458 = vst [vmem:[%s13535_s10 + $0xf8] sm:$0xff] %v6394_v60  ;;  %v14959_v46 = vld [vmem:[#allocation61_spill] sm:$0xff]  ;;  %v14962_v7 = vld [vmem:[#allocation138_spill] sm:$0xff]  ;;  %v14965_v33 = vld [vmem:[#allocation59_spill] sm:$0xff] }
 0xab0   :  { %v6397_v5 = vmax.f32 %v6333_v8, 0.0  ;;  %v6081_v32 = vmul.f32 %v12847_v1, %v14947_v26  ;;  %v6146_v9 = vadd.f32 %v12877_v20, %v6079_v62  ;;  %v6338_v57 = vadd.f32 %v12994_v27, %v6142_v44  ;;  %6459 = vst [vmem:[%s13535_s10 + $0x100] sm:$0xff] %v6395_v48  ;;  %v14963_v48 = vld [vmem:[#allocation6_spill] sm:$0xff] }
 0xab1   :  { %v6398_v59 = vmax.f32 %v6334_v13, 0.0  ;;  %v6082_v55 = vmul.f32 %v12847_v1, %v14948_v49  ;;  %v6147_v23 = vadd.f32 %v12877_v20, %v6080_v34  ;;  %v6339_v4 = vadd.f32 %v14949_v18, %v6143_v56  ;;  %6460 = vst [vmem:[%s13535_s10 + $0x108] sm:$0xff] %v6396_v61  ;;  %v14961_v13 = vld [vmem:[#allocation26_spill] sm:$0xff] }
 0xab2   :  { %v6399_v17 = vmax.f32 %v6335_v14, 0.0  ;;  %v6083_v27 = vmul.f32 %v12847_v1, %v14950_v52  ;;  %v6148_v51 = vadd.f32 %v12877_v20, %v6081_v32  ;;  %v6340_v24 = vadd.f32 %v14951_v45, %v6144_v41  ;;  %6461 = vst [vmem:[%s13535_s10 + $0x110] sm:$0xff] %v6397_v5  ;;  %v14964_v41 = vld [vmem:[#allocation120_spill] sm:$0xff]  ;;  %v14967_v32 = vld [vmem:[#allocation129_spill] sm:$0xff] }
 0xab3   :  { %v6400_v47 = vmax.f32 %v6336_v15, 0.0  ;;  %v6084_v30 = vmul.f32 %v12847_v1, %v14952_v63  ;;  %v6149_v35 = vadd.f32 %v12877_v20, %v6082_v55  ;;  %v6341_v19 = vadd.f32 %v14953_v22, %v6145_v43  ;;  %6462 = vst [vmem:[%s13535_s10 + $0x118] sm:$0xff] %v6398_v59  ;;  %v14968_v59 = vld [vmem:[#allocation21_spill] sm:$0xff] }
 0xab4   :  { %v6401_v40 = vmax.f32 %v6337_v54, 0.0  ;;  %v6085_v3 = vmul.f32 %v12847_v1, %v14954_v12  ;;  %v6150_v53 = vadd.f32 %v12877_v20, %v6083_v27  ;;  %v6342_v38 = vadd.f32 %v14955_v42, %v6146_v9  ;;  %6463 = vst [vmem:[%s13535_s10 + $0x120] sm:$0xff] %v6399_v17  ;;  %v14966_v54 = vld [vmem:[#allocation28_spill] sm:$0xff]  ;;  %v14970_v17 = vld [vmem:[#allocation55_spill] sm:$0xff] }
 0xab5   :  { %v6402_v31 = vmax.f32 %v6338_v57, 0.0  ;;  %v6086_v58 = vmul.f32 %v12847_v1, %v14956_v37  ;;  %v6151_v36 = vadd.f32 %v12877_v20, %v6084_v30  ;;  %v6343_v39 = vadd.f32 %v14957_v0, %v6147_v23  ;;  %6464 = vst [vmem:[%s13535_s10 + $0x128] sm:$0xff] %v6400_v47  ;;  %v14969_v23 = vld [vmem:[#allocation63_spill] sm:$0xff] }
 0xab6   :  { %v6403_v50 = vmax.f32 %v6339_v4, 0.0  ;;  %v6087_v29 = vmul.f32 %v12847_v1, %v14958_v6  ;;  %v6152_v2 = vadd.f32 %v12877_v20, %v6085_v3  ;;  %v6344_v8 = vadd.f32 %v14959_v46, %v6148_v51  ;;  %6465 = vst [vmem:[%s13535_s10 + $0x130] sm:$0xff] %v6401_v40  ;;  %v14971_v51 = vld [vmem:[#allocation159_spill] sm:$0xff]  ;;  %v14974_v40 = vld [vmem:[#allocation145_spill] sm:$0xff] }
 0xab7   :  { %v6404_v25 = vmax.f32 %v6340_v24, 0.0  ;;  %v6088_v28 = vmul.f32 %v12847_v1, %v14960_v10  ;;  %v6153_v44 = vadd.f32 %v12877_v20, %v6086_v58  ;;  %v6345_v60 = vadd.f32 %v14961_v13, %v6149_v35  ;;  %6466 = vst [vmem:[%s13535_s10 + $0x138] sm:$0xff] %v6402_v31  ;;  %v14972_v47 = vld [vmem:[#allocation43_spill] sm:$0xff] }
 0xab8   :  { %v6405_v16 = vmax.f32 %v6341_v19, 0.0  ;;  %v6089_v56 = vmul.f32 %v12847_v1, %v14962_v7  ;;  %v6154_v14 = vadd.f32 %v12877_v20, %v6087_v29  ;;  %v6346_v21 = vadd.f32 %v14963_v48, %v6150_v53  ;;  %6467 = vst [vmem:[%s13535_s10 + $0x140] sm:$0xff] %v6403_v50  ;;  %v14973_v35 = vld [vmem:[#allocation155_spill] sm:$0xff]  ;;  %v14975_v53 = vld [vmem:[#allocation157_spill] sm:$0xff]  ;;  %v14983_v7 = vld [vmem:[#allocation56_spill] sm:$0xff] }
 0xab9   :  { %v6406_v62 = vmax.f32 %v6342_v38, 0.0  ;;  %v6090_v15 = vmul.f32 %v12847_v1, %v14964_v41  ;;  %v6155_v61 = vadd.f32 %v12877_v20, %v6088_v28  ;;  %v6347_v34 = vadd.f32 %v14965_v33, %v6151_v36  ;;  %6468 = vst [vmem:[%s13535_s10 + $0x148] sm:$0xff] %v6404_v25  ;;  %v14976_v31 = vld [vmem:[#allocation127_spill] sm:$0xff]  ;;  %v14977_v36 = vld [vmem:[#allocation96_spill] sm:$0xff]  ;;  %v14978_v50 = vld [vmem:[#allocation165_spill] sm:$0xff] }
 0xaba   :  { %v6407_v43 = vmax.f32 %v6343_v39, 0.0  ;;  %v6091_v5 = vmul.f32 %v12847_v1, %v14966_v54  ;;  %v6156_v26 = vadd.f32 %v12877_v20, %v6089_v56  ;;  %v6348_v9 = vadd.f32 %v14967_v32, %v6152_v2  ;;  %6469 = vst [vmem:[%s13535_s10 + $0x150] sm:$0xff] %v6405_v16  ;;  %v14979_v2 = vld [vmem:[#allocation65_spill] sm:$0xff]  ;;  %v14980_v25 = vld [vmem:[#allocation12_spill] sm:$0xff]  ;;  %v14988_v32 = vld [vmem:[#allocation58_spill] sm:$0xff] }
 0xabb   :  { %v6408_v57 = vmax.f32 %v6344_v8, 0.0  ;;  %v6092_v49 = vmul.f32 %v12847_v1, %v14968_v59  ;;  %v6157_v55 = vadd.f32 %v12877_v20, %v6090_v15  ;;  %v6349_v18 = vadd.f32 %v14969_v23, %v6153_v44  ;;  %6470 = vst [vmem:[%s13535_s10 + $0x158] sm:$0xff] %v6406_v62  ;;  %v14981_v44 = vld [vmem:[#allocation4_spill] sm:$0xff]  ;;  %v14984_v48 = vld [vmem:[#allocation101_spill] sm:$0xff] }
 0xabc   :  { %v6409_v4 = vmax.f32 %v6345_v60, 0.0  ;;  %v6093_v52 = vmul.f32 %v12847_v1, %v14970_v17  ;;  %v6158_v27 = vadd.f32 %v12877_v20, %v6091_v5  ;;  %v6350_v45 = vadd.f32 %v14971_v51, %v6154_v14  ;;  %6471 = vst [vmem:[%s13535_s10 + $0x160] sm:$0xff] %v6407_v43  ;;  %v14982_v16 = vld [vmem:[#allocation148_spill] sm:$0xff]  ;;  %v14987_v43 = vld [vmem:[#allocation151_spill] sm:$0xff] }
 0xabd   :  { %v6410_v24 = vmax.f32 %v6346_v21, 0.0  ;;  %v6094_v63 = vmul.f32 %v12847_v1, %v14972_v47  ;;  %v6159_v30 = vadd.f32 %v12877_v20, %v6092_v49  ;;  %v6351_v22 = vadd.f32 %v14973_v35, %v6155_v61  ;;  %6472 = vst [vmem:[%s13535_s10 + $0x168] sm:$0xff] %v6408_v57  ;;  %v14986_v61 = vld [vmem:[#allocation67_spill] sm:$0xff] }
 0xabe   :  { %v6411_v19 = vmax.f32 %v6347_v34, 0.0  ;;  %v6095_v12 = vmul.f32 %v12847_v1, %v14974_v40  ;;  %v6160_v3 = vadd.f32 %v12877_v20, %v6093_v52  ;;  %v6352_v42 = vadd.f32 %v14975_v53, %v6156_v26  ;;  %6473 = vst [vmem:[%s13535_s10 + $0x170] sm:$0xff] %v6409_v4 }
 0xabf   :  { %v6412_v38 = vmax.f32 %v6348_v9, 0.0  ;;  %v6096_v37 = vmul.f32 %v12847_v1, %v14976_v31  ;;  %v6161_v58 = vadd.f32 %v12877_v20, %v6094_v63  ;;  %v6353_v0 = vadd.f32 %v14977_v36, %v6157_v55  ;;  %6474 = vst [vmem:[%s13535_s10 + $0x178] sm:$0xff] %v6410_v24 }
 0xac0   :  { %v6413_v39 = vmax.f32 %v6349_v18, 0.0  ;;  %v6097_v6 = vmul.f32 %v12847_v1, %v14978_v50  ;;  %v6162_v29 = vadd.f32 %v12877_v20, %v6095_v12  ;;  %v6354_v46 = vadd.f32 %v14979_v2, %v6158_v27  ;;  %6475 = vst [vmem:[%s13535_s10 + $0x180] sm:$0xff] %v6411_v19 }
 0xac1   :  { %v6414_v8 = vmax.f32 %v6350_v45, 0.0  ;;  %v6098_v10 = vmul.f32 %v12847_v1, %v14980_v25  ;;  %v6163_v28 = vadd.f32 %v12877_v20, %v6096_v37  ;;  %v6355_v13 = vadd.f32 %v14981_v44, %v6159_v30  ;;  %6476 = vst [vmem:[%s13535_s10 + $0x188] sm:$0xff] %v6412_v38  ;;  %v14985_v1 = vld [vmem:[#allocation14_spill] sm:$0xff] }
 0xac2   :  { %v6415_v60 = vmax.f32 %v6351_v22, 0.0  ;;  %v6294_v56 = vadd.f32 %v14983_v7, %v14982_v16  ;;  %v6164_v14 = vadd.f32 %v12877_v20, %v6097_v6  ;;  %v6356_v21 = vadd.f32 %v14984_v48, %v6160_v3  ;;  %6477 = vst [vmem:[%s13535_s10 + $0x190] sm:$0xff] %v6413_v39 }
 0xac3   :  { %v6416_v62 = vmax.f32 %v6352_v42, 0.0  ;;  %v6295_v41 = vadd.f32 %v14983_v7, %v14985_v1  ;;  %v6165_v15 = vadd.f32 %v12877_v20, %v6098_v10  ;;  %v6357_v33 = vadd.f32 %v14986_v61, %v6161_v58  ;;  %6478 = vst [vmem:[%s13535_s10 + $0x198] sm:$0xff] %v6414_v8 }
 0xac4   :  { %v6417_v34 = vmax.f32 %v6353_v0, 0.0  ;;  %v6296_v54 = vadd.f32 %v14983_v7, %v14987_v43  ;;  %v6358_v5 = vadd.f32 %v6294_v56, %v6162_v29  ;;  %v6418_v26 = vmax.f32 %v6354_v46, 0.0  ;;  %6479 = vst [vmem:[%s13535_s10 + $0x1a0] sm:$0xff] %v6415_v60 }
 0xac5   :  { %v6297_v9 = vadd.f32 %v14983_v7, %v14988_v32  ;;  %v6359_v20 = vadd.f32 %v6295_v41, %v6163_v28  ;;  %v6419_v57 = vmax.f32 %v6355_v13, 0.0  ;;  %v6420_v49 = vmax.f32 %v6356_v21, 0.0  ;;  %6480 = vst [vmem:[%s13535_s10 + $0x1a8] sm:$0xff] %v6416_v62 }
 0xac6   :  { %v6360_v59 = vadd.f32 %v6296_v54, %v6164_v14  ;;  %v6421_v23 = vmax.f32 %v6357_v33, 0.0  ;;  %6481 = vst [vmem:[%s13535_s10 + $0x1b0] sm:$0xff] %v6417_v34  ;;  %v6422_v18 = vmax.f32 %v6358_v5, 0.0  ;;  %v6426_v27 = vmax.f32 %v13117_v11, 0.0 }
 0xac7   :  { %v6361_v55 = vadd.f32 %v6297_v9, %v6165_v15  ;;  %6482 = vst [vmem:[%s13535_s10 + $0x1b8] sm:$0xff] %v6418_v26  ;;  %v6423_v4 = vmax.f32 %v6359_v20, 0.0 }
 0xac8   :  { %6483 = vst [vmem:[%s13535_s10 + $0x1c0] sm:$0xff] %v6419_v57  ;;  %v6424_v17 = vmax.f32 %v6360_v59, 0.0 }
 0xac9   :  { %6484 = vst [vmem:[%s13535_s10 + $0x1c8] sm:$0xff] %v6420_v49  ;;  %v6425_v52 = vmax.f32 %v6361_v55, 0.0 }
 0xaca   :  { %6485 = vst [vmem:[%s13535_s10 + $0x1d0] sm:$0xff] %v6421_v23 }
 0xacb   :  { %6486 = vst [vmem:[%s13535_s10 + $0x1d8] sm:$0xff] %v6422_v18 }
 0xacc   :  { %6487 = vst [vmem:[%s13535_s10 + $0x1e0] sm:$0xff] %v6423_v4 }
 0xacd   :  { %6488 = vst [vmem:[%s13535_s10 + $0x1e8] sm:$0xff] %v6424_v17 }
 0xace   :  { %6489 = vst [vmem:[%s13535_s10 + $0x1f0] sm:$0xff] %v6425_v52 }
 0xacf   :  { %6490 = vst [vmem:[%s13535_s10 + $0x1f8] sm:$0xff] %v6426_v27 }

</bundles_post_ra>
